<compile_context>
chip_gen: v6e
topology: v6e:2x2x1
jax: 0.10.0
libtpu: 0.0.40
codegen_flags: <defaults>
</compile_context>

<pallas_src>
import jax
import jax.numpy as jnp
import numpy as np
from jax.experimental import pallas as pl
from jax.experimental.pallas import tpu as pltpu


# ---------------------------------------------------------------------------
# Fused per-layer Pallas kernel.
#
# Input  x_ref : (1, Cin, LP_in)        bf16  -- zero-padded, spatially flat.
# Output o_ref : (1, 4, Cout, L_out)    bf16/f32 -- phase-major, spatially
#                flat; phase p = 2a+b holds output pixels (2i+a, 2j+b).
#                Columns [H*Wp, L_out) and the 2 wrap columns of each row are
#                garbage and MUST be cropped by the wrapper.
# ---------------------------------------------------------------------------
def _upproj_layer_kernel(H, W, Cin, Cout, L_out):
    Wp = W + 2                 # row stride of the flattened padded input
    L = H * Wp                 # valid flat length of one phase's output grid
    X1OFF = Wp + 1             # interior start inside the x1pad scratch

    def off(rh, rw):           # (row, col) tap offset -> flat lane offset
        return rh * Wp + rw

    def kernel(x_ref, w5_ref, w2_ref, bn_ref, cm_ref, o_ref, x1pad_ref):
        x = x_ref[0]                                     # (Cin, LP_in) bf16

        # Stacked 9-tap operand, shared by all 4 phases and both 5x5 branches.
        P = jnp.concatenate(
            [x[:, off(rh, rw):off(rh, rw) + L_out]
             for rh in range(3) for rw in range(3)], axis=0)   # (9*Cin, L_out)

        s5 = bn_ref[:8 * Cout, 0:1]                      # (8*Cout, 1) f32
        b5 = bn_ref[:8 * Cout, 1:2]
        s3 = bn_ref[8 * Cout:, 0:1]                      # (Cout, 1) f32
        b3 = bn_ref[8 * Cout:, 1:2]
        cmask = cm_ref[...]                              # (1, L_out) f32

        # Both 5x5 branches, all 4 phases: ONE MXU contraction, BN fused once.
        y5 = jnp.dot(w5_ref[...], P, preferred_element_type=jnp.float32)
        y5 = y5 * s5 + b5                                # (8*Cout, L_out)

        # Upper branch (rows [0, 4*Cout)): ReLU + wrap/tail-column mask,
        # embedded in the zero-bordered per-phase scratch (pad=1 of the 3x3).
        x1 = (jnp.maximum(y5[:4 * Cout], 0.0) * cmask).astype(jnp.bfloat16)
        X1LEN = x1pad_ref.shape[-1]
        zhead = jnp.zeros((Cout, X1OFF), jnp.bfloat16)
        ztail = jnp.zeros((Cout, X1LEN - X1OFF - L_out), jnp.bfloat16)
        for p in range(4):
            x1pad_ref[p, :, :X1OFF] = zhead
            x1pad_ref[p, :, X1OFF:X1OFF + L_out] = x1[p * Cout:(p + 1) * Cout]
            x1pad_ref[p, :, X1OFF + L_out:] = ztail

        # 3x3 conv on the (virtual) full-resolution x1: one contraction for
        # all 4 output phases (phase-major along lanes).  The 16 distinct
        # (source-phase, tap) slices are loaded once and reused.
        pieces = {}

        def piece(a, b, dh, dw):
            pa = (a + dh - 1) % 2
            rh = (a + dh - 1 - pa) // 2 + 1
            pb = (b + dw - 1) % 2
            rw = (b + dw - 1 - pb) // 2 + 1
            key = (2 * pa + pb, rh, rw)
            if key not in pieces:
                o3 = off(rh, rw)
                pieces[key] = x1pad_ref[2 * pa + pb, :, o3:o3 + L_out]
            return pieces[key]

        Q = jnp.concatenate(
            [jnp.concatenate([piece(a, b, dh, dw)
                              for a in range(2) for b in range(2)], axis=1)
             for dh in range(3) for dw in range(3)], axis=0)  # (9*Cout, 4*L_out)

        y3 = jnp.dot(w2_ref[...], Q, preferred_element_type=jnp.float32)
        y3 = y3 * s3 + b3                                # (Cout, 4*L_out)

        # Residual add (bottom 5x5 branch, not ReLU'd) + ReLU, lane-dense
        # full-width stores (L_out is a multiple of 128).
        for p in range(4):
            res = (y3[:, p * L_out:(p + 1) * L_out]
                   + y5[(4 + p) * Cout:(5 + p) * Cout])
            o_ref[0, p] = jnp.maximum(res, 0.0).astype(o_ref.dtype)

    return kernel


# ---------------------------------------------------------------------------
# Weight packing (wrapper-side, pure JAX).
# ---------------------------------------------------------------------------
def _pack_conv5_phase_major(w):
    """(5,5,Cin,Cout) -> (4*Cout, 9*Cin) bf16; row p*Cout+c = phase p=2a+b,
    channel c; tap slot t=3rh+rw.  Invalid taps for a phase get zero weight."""
    _, _, cin, cout = w.shape
    wb = w.astype(jnp.bfloat16)
    out = jnp.zeros((4, cout, 9 * cin), jnp.bfloat16)
    for a in range(2):
        for b in range(2):
            for rh in range(3):
                for rw in range(3):
                    kh, kw = 2 * rh - a, 2 * rw - b
                    if 0 <= kh < 5 and 0 <= kw < 5:
                        t = 3 * rh + rw
                        out = out.at[2 * a + b, :,
                                     t * cin:(t + 1) * cin].set(wb[kh, kw].T)
    return out.reshape(4 * cout, 9 * cin)


def _pack_conv3(w):
    """(3,3,C,C) -> (C, 9*C) bf16, tap slot s = 3*dh + dw."""
    wb = w.astype(jnp.bfloat16)
    return jnp.concatenate(
        [wb[dh, dw].T for dh in range(3) for dw in range(3)], axis=1)


# ---------------------------------------------------------------------------
# Per-layer wrapper: pad/flatten input, call the fused kernel, pixel-shuffle.
# ---------------------------------------------------------------------------
def upproj_module(x, p, out_dtype=jnp.bfloat16):
    """x: (N, Cin, H, W) -> (N, Cout, 2H, 2W) in out_dtype."""
    N, Cin, H, W = x.shape
    Cout = p['w1'].shape[-1]
    Wp = W + 2
    L = H * Wp
    L_out = ((L + 127) // 128) * 128         # lane-dense output length
    LP_in = L_out + 3 * Wp                   # flat padded-input length

    xp = jnp.pad(x, ((0, 0), (0, 0), (1, 2), (1, 1)))
    xp = xp.reshape(N, Cin, (H + 3) * Wp)
    xp = jnp.pad(xp, ((0, 0), (0, 0), (0, LP_in - (H + 3) * Wp)))
    xp = xp.astype(jnp.bfloat16)

    # Stacked 5x5 weights: rows [0,4Cout) = upper branch (w1) phases 0..3,
    # rows [4Cout,8Cout) = bottom branch (wb) phases 0..3.
    w5 = jnp.concatenate([_pack_conv5_phase_major(p['w1']),
                          _pack_conv5_phase_major(p['wb'])], axis=0)
    w2 = _pack_conv3(p['w2'])

    # Merged BN operand: (9*Cout, 2) = [scale, shift] per output row.
    s_all = jnp.concatenate(
        [jnp.tile(p['s1'], 4), jnp.tile(p['sb'], 4), p['s2']])
    h_all = jnp.concatenate(
        [jnp.tile(p['b1'], 4), jnp.tile(p['bb'], 4), p['b2']])
    bn = jnp.stack([s_all, h_all], axis=1).astype(jnp.float32)

    idx = jnp.arange(L_out, dtype=jnp.int32)
    cmask = (((idx % Wp) < W) & (idx < L)).astype(jnp.float32).reshape(1, L_out)

    kernel = _upproj_layer_kernel(H, W, Cin, Cout, L_out)
    out = pl.pallas_call(
        kernel,
        out_shape=jax.ShapeDtypeStruct((N, 4, Cout, L_out), out_dtype),
        grid=(N,),
        in_specs=[
            pl.BlockSpec((1, Cin, LP_in), lambda n: (n, 0, 0)),
            pl.BlockSpec((8 * Cout, 9 * Cin), lambda n: (0, 0)),
            pl.BlockSpec((Cout, 9 * Cout), lambda n: (0, 0)),
            pl.BlockSpec((9 * Cout, 2), lambda n: (0, 0)),
            pl.BlockSpec((1, L_out), lambda n: (0, 0)),
        ],
        out_specs=pl.BlockSpec((1, 4, Cout, L_out), lambda n: (n, 0, 0, 0)),
        scratch_shapes=[pltpu.VMEM((4, Cout, L_out + 3 * Wp), jnp.bfloat16)],
        compiler_params=pltpu.CompilerParams(
            dimension_semantics=("parallel",),
            vmem_limit_bytes=64 * 1024 * 1024),
    )(xp, w5, w2, bn, cmask)

    # (N, 4, Cout, L_out) -> (N, Cout, 2H, 2W): crop the lane padding, split
    # phases, drop the 2 flat-offset wrap columns, pixel-shuffle phases back.
    y = out[..., :L].reshape(N, 2, 2, Cout, H, Wp)[..., :W]
    y = jnp.transpose(y, (0, 3, 4, 1, 5, 2)).reshape(N, Cout, 2 * H, 2 * W)
    return y


def upproj_forward(x_nchw, params):
    x = x_nchw
    n_layers = len(params)
    for i, p in enumerate(params):
        dt = jnp.float32 if i == n_layers - 1 else jnp.bfloat16
        x = upproj_module(x, p, out_dtype=dt)
    return x


# ---------------------------------------------------------------------------
# Deterministic parameter construction (synthetic, no checkpoint).
# ---------------------------------------------------------------------------
def make_upproj_params(key, in_channels):
    layers = []
    c = in_channels
    for _ in range(4):
        cin, cout = c, c // 2
        key, sub = jax.random.split(key)
        ks = jax.random.split(sub, 15)

        def bn_affine(k4, ch):
            kg, kb, km, kv = k4
            gamma = 1.0 + 0.1 * jax.random.normal(kg, (ch,), jnp.float32)
            beta = 0.1 * jax.random.normal(kb, (ch,), jnp.float32)
            mean = 0.1 * jax.random.normal(km, (ch,), jnp.float32)
            var = 1.0 + 0.1 * jnp.abs(jax.random.normal(kv, (ch,), jnp.float32))
            scale = gamma * jax.lax.rsqrt(var + 1e-5)
            shift = beta - mean * scale
            return scale, shift

        w1 = 0.1 * jax.random.normal(ks[0], (5, 5, cin, cout), jnp.float32)
        s1, b1 = bn_affine(ks[1:5], cout)
        w2 = 0.1 * jax.random.normal(ks[5], (3, 3, cout, cout), jnp.float32)
        s2, b2 = bn_affine(ks[6:10], cout)
        wb = 0.1 * jax.random.normal(ks[10], (5, 5, cin, cout), jnp.float32)
        sb, bb = bn_affine(ks[11:15], cout)
        layers.append(dict(w1=w1, s1=s1, b1=b1, w2=w2, s2=s2, b2=b2,
                           wb=wb, sb=sb, bb=bb))
        c = cout
    return layers


# ---------------------------------------------------------------------------
# Pure-JAX reference (structurally independent; same bf16 operand rounding).
# ---------------------------------------------------------------------------
def unpool_nhwc(x):  # (N, H, W, C) -> (N, 2H, 2W, C), zeros except [2i, 2j]
    N, H, W, C = x.shape
    y = jnp.zeros((N, H, 2, W, 2, C), x.dtype)
    y = y.at[:, :, 0, :, 0, :].set(x)
    return y.reshape(N, 2 * H, 2 * W, C)


def _ref_conv(x, w):
    return jax.lax.conv_general_dilated(
        x.astype(jnp.bfloat16), w.astype(jnp.bfloat16), (1, 1), 'VALID',
        dimension_numbers=('NHWC', 'HWIO', 'NHWC'),
        preferred_element_type=jnp.float32)


def ref_upproj_forward(x_nchw, params):
    x = jnp.transpose(x_nchw, (0, 2, 3, 1))
    for p in params:
        x = unpool_nhwc(x)
        xp5 = jnp.pad(x, ((0, 0), (2, 2), (2, 2), (0, 0)))
        x1 = jnp.maximum(_ref_conv(xp5, p['w1']) * p['s1'] + p['b1'], 0.0)
        x1 = jnp.pad(x1, ((0, 0), (1, 1), (1, 1), (0, 0)))
        x1 = _ref_conv(x1, p['w2']) * p['s2'] + p['b2']
        x2 = _ref_conv(xp5, p['wb']) * p['sb'] + p['bb']
        x = jnp.maximum(x1 + x2, 0.0)
    return jnp.transpose(x, (0, 3, 1, 2))


if __name__ == "__main__":
    key = jax.random.PRNGKey(0)
    kx, kp = jax.random.split(key)

    # NCHW input, matching the PyTorch module convention.
    N, C, Hs, Ws = 2, 16, 4, 4          # 4 layers halve channels: 16 -> 1
    x = jax.random.normal(kx, (N, C, Hs, Ws), jnp.float32)
    params = make_upproj_params(kp, C)

    fwd = jax.jit(upproj_forward)
    out = jax.block_until_ready(fwd(x, params))

    assert out.shape == (N, C // 16, Hs * 16, Ws * 16), out.shape
    ref = ref_upproj_forward(x, params)
    np.testing.assert_allclose(np.asarray(out), np.asarray(ref),
                               rtol=1e-2, atol=1e-2)
    print("KERNEL_OK")
</pallas_src>

<mosaic_0001>
module attributes {stable_mosaic.version = 11 : i64} {
  func.func @kernel(%arg0: i32, %arg1: memref<1x16x146xbf16, #tpu.memory_space<vmem>>, %arg2: memref<64x144xbf16, #tpu.memory_space<vmem>>, %arg3: memref<8x72xbf16, #tpu.memory_space<vmem>>, %arg4: memref<72x2xf32, #tpu.memory_space<vmem>>, %arg5: memref<1x128xf32, #tpu.memory_space<vmem>>, %arg6: memref<1x4x8x128xbf16, #tpu.memory_space<vmem>>, %arg7: memref<4x8x146xbf16, #tpu.memory_space<vmem>>) attributes {dimension_semantics = [#tpu.dimension_semantics<parallel>], iteration_bounds = array<i64: 2>, scalar_prefetch = 0 : i64, scratch_operands = 1 : i64, tpu.core_type = #tpu.core_type<tc>, window_params = [{transform_indices = @transform_0, window_bounds = array<i64: 1, 16, 146>}, {pipeline_mode = #tpu.pipeline_mode<synchronous>, transform_indices = @transform_1, window_bounds = array<i64: 64, 144>}, {pipeline_mode = #tpu.pipeline_mode<synchronous>, transform_indices = @transform_2, window_bounds = array<i64: 8, 72>}, {pipeline_mode = #tpu.pipeline_mode<synchronous>, transform_indices = @transform_3, window_bounds = array<i64: 72, 2>}, {pipeline_mode = #tpu.pipeline_mode<synchronous>, transform_indices = @transform_4, window_bounds = array<i64: 1, 128>}, {transform_indices = @transform_5, window_bounds = array<i64: 1, 4, 8, 128>}]} {
    %c0 = arith.constant 0 : index
    %c0_0 = arith.constant 0 : index
    %c0_1 = arith.constant 0 : index
    %0 = vector.load %arg1[%c0, %c0_0, %c0_1] : memref<1x16x146xbf16, #tpu.memory_space<vmem>>, vector<1x16x146xbf16>
    %1 = vector.shape_cast %0 : vector<1x16x146xbf16> to vector<16x146xbf16>
    %2 = vector.extract_strided_slice %1 {offsets = [0, 0], sizes = [16, 128], strides = [1, 1]} : vector<16x146xbf16> to vector<16x128xbf16>
    %3 = vector.extract_strided_slice %1 {offsets = [0, 1], sizes = [16, 128], strides = [1, 1]} : vector<16x146xbf16> to vector<16x128xbf16>
    %4 = vector.extract_strided_slice %1 {offsets = [0, 2], sizes = [16, 128], strides = [1, 1]} : vector<16x146xbf16> to vector<16x128xbf16>
    %5 = vector.extract_strided_slice %1 {offsets = [0, 6], sizes = [16, 128], strides = [1, 1]} : vector<16x146xbf16> to vector<16x128xbf16>
    %6 = vector.extract_strided_slice %1 {offsets = [0, 7], sizes = [16, 128], strides = [1, 1]} : vector<16x146xbf16> to vector<16x128xbf16>
    %7 = vector.extract_strided_slice %1 {offsets = [0, 8], sizes = [16, 128], strides = [1, 1]} : vector<16x146xbf16> to vector<16x128xbf16>
    %8 = vector.extract_strided_slice %1 {offsets = [0, 12], sizes = [16, 128], strides = [1, 1]} : vector<16x146xbf16> to vector<16x128xbf16>
    %9 = vector.extract_strided_slice %1 {offsets = [0, 13], sizes = [16, 128], strides = [1, 1]} : vector<16x146xbf16> to vector<16x128xbf16>
    %10 = vector.extract_strided_slice %1 {offsets = [0, 14], sizes = [16, 128], strides = [1, 1]} : vector<16x146xbf16> to vector<16x128xbf16>
    %11 = tpu.concatenate %2, %3, %4, %5, %6, %7, %8, %9, %10 in 0 : vector<16x128xbf16>, vector<16x128xbf16>, vector<16x128xbf16>, vector<16x128xbf16>, vector<16x128xbf16>, vector<16x128xbf16>, vector<16x128xbf16>, vector<16x128xbf16>, vector<16x128xbf16> -> vector<144x128xbf16>
    %c0_2 = arith.constant 0 : index
    %c0_3 = arith.constant 0 : index
    %12 = vector.load %arg4[%c0_2, %c0_3] : memref<72x2xf32, #tpu.memory_space<vmem>>, vector<64x1xf32>
    %c0_4 = arith.constant 0 : index
    %c1 = arith.constant 1 : index
    %13 = vector.load %arg4[%c0_4, %c1] : memref<72x2xf32, #tpu.memory_space<vmem>>, vector<64x1xf32>
    %c64 = arith.constant 64 : index
    %c0_5 = arith.constant 0 : index
    %14 = vector.load %arg4[%c64, %c0_5] : memref<72x2xf32, #tpu.memory_space<vmem>>, vector<8x1xf32>
    %c64_6 = arith.constant 64 : index
    %c1_7 = arith.constant 1 : index
    %15 = vector.load %arg4[%c64_6, %c1_7] : memref<72x2xf32, #tpu.memory_space<vmem>>, vector<8x1xf32>
    %c0_8 = arith.constant 0 : index
    %c0_9 = arith.constant 0 : index
    %16 = vector.load %arg5[%c0_8, %c0_9] : memref<1x128xf32, #tpu.memory_space<vmem>>, vector<1x128xf32>
    %c0_10 = arith.constant 0 : index
    %c0_11 = arith.constant 0 : index
    %17 = vector.load %arg2[%c0_10, %c0_11] : memref<64x144xbf16, #tpu.memory_space<vmem>>, vector<64x144xbf16>
    %cst = arith.constant dense<0.000000e+00> : vector<64x128xf32>
    %18 = tpu.matmul %17, %11, %cst {dimension_numbers = #tpu.dot_dimension_numbers<[1], [0], [0], [1], [0, 0, 1, 1], [], []>} : vector<64x144xbf16>, vector<144x128xbf16>, vector<64x128xf32> -> vector<64x128xf32>
    %19 = vector.broadcast %12 : vector<64x1xf32> to vector<64x128xf32>
    %20 = arith.mulf %18, %19 : vector<64x128xf32>
    %21 = vector.broadcast %13 : vector<64x1xf32> to vector<64x128xf32>
    %22 = arith.addf %20, %21 : vector<64x128xf32>
    %23 = vector.extract_strided_slice %22 {offsets = [0, 0], sizes = [32, 128], strides = [1, 1]} : vector<64x128xf32> to vector<32x128xf32>
    %cst_12 = arith.constant 0.000000e+00 : f32
    %24 = vector.broadcast %cst_12 : f32 to vector<32x128xf32>
    %25 = arith.maximumf %23, %24 : vector<32x128xf32>
    %26 = vector.broadcast %16 : vector<1x128xf32> to vector<32x128xf32>
    %27 = arith.mulf %25, %26 : vector<32x128xf32>
    %28 = arith.truncf %27 : vector<32x128xf32> to vector<32x128xbf16>
    %cst_13 = arith.constant 0.000000e+00 : bf16
    %29 = vector.broadcast %cst_13 : bf16 to vector<8x7xbf16>
    %cst_14 = arith.constant 0.000000e+00 : bf16
    %30 = vector.broadcast %cst_14 : bf16 to vector<8x11xbf16>
    %c0_15 = arith.constant 0 : index
    %c0_16 = arith.constant 0 : index
    %c0_17 = arith.constant 0 : index
    %31 = vector.load %arg7[%c0_15, %c0_16, %c0_17] : memref<4x8x146xbf16, #tpu.memory_space<vmem>>, vector<1x8x7xbf16>
    %32 = vector.shape_cast %31 : vector<1x8x7xbf16> to vector<8x7xbf16>
    %33 = vector.shape_cast %29 : vector<8x7xbf16> to vector<1x8x7xbf16>
    tpu.vector_store %arg7[%c0_15, %c0_16, %c0_17], %33 {strides = array<i32>} : memref<4x8x146xbf16, #tpu.memory_space<vmem>>, vector<1x8x7xbf16>,
    %34 = vector.extract_strided_slice %28 {offsets = [0, 0], sizes = [8, 128], strides = [1, 1]} : vector<32x128xbf16> to vector<8x128xbf16>
    %c0_18 = arith.constant 0 : index
    %c0_19 = arith.constant 0 : index
    %c7 = arith.constant 7 : index
    %35 = vector.load %arg7[%c0_18, %c0_19, %c7] : memref<4x8x146xbf16, #tpu.memory_space<vmem>>, vector<1x8x128xbf16>
    %36 = vector.shape_cast %35 : vector<1x8x128xbf16> to vector<8x128xbf16>
    %37 = vector.shape_cast %34 : vector<8x128xbf16> to vector<1x8x128xbf16>
    tpu.vector_store %arg7[%c0_18, %c0_19, %c7], %37 {strides = array<i32>} : memref<4x8x146xbf16, #tpu.memory_space<vmem>>, vector<1x8x128xbf16>,
    %c0_20 = arith.constant 0 : index
    %c0_21 = arith.constant 0 : index
    %c135 = arith.constant 135 : index
    %38 = vector.load %arg7[%c0_20, %c0_21, %c135] : memref<4x8x146xbf16, #tpu.memory_space<vmem>>, vector<1x8x11xbf16>
    %39 = vector.shape_cast %38 : vector<1x8x11xbf16> to vector<8x11xbf16>
    %40 = vector.shape_cast %30 : vector<8x11xbf16> to vector<1x8x11xbf16>
    tpu.vector_store %arg7[%c0_20, %c0_21, %c135], %40 {strides = array<i32>} : memref<4x8x146xbf16, #tpu.memory_space<vmem>>, vector<1x8x11xbf16>,
    %c1_22 = arith.constant 1 : index
    %c0_23 = arith.constant 0 : index
    %c0_24 = arith.constant 0 : index
    %41 = vector.load %arg7[%c1_22, %c0_23, %c0_24] : memref<4x8x146xbf16, #tpu.memory_space<vmem>>, vector<1x8x7xbf16>
    %42 = vector.shape_cast %41 : vector<1x8x7xbf16> to vector<8x7xbf16>
    %43 = vector.shape_cast %29 : vector<8x7xbf16> to vector<1x8x7xbf16>
    tpu.vector_store %arg7[%c1_22, %c0_23, %c0_24], %43 {strides = array<i32>} : memref<4x8x146xbf16, #tpu.memory_space<vmem>>, vector<1x8x7xbf16>,
    %44 = vector.extract_strided_slice %28 {offsets = [8, 0], sizes = [8, 128], strides = [1, 1]} : vector<32x128xbf16> to vector<8x128xbf16>
    %c1_25 = arith.constant 1 : index
    %c0_26 = arith.constant 0 : index
    %c7_27 = arith.constant 7 : index
    %45 = vector.load %arg7[%c1_25, %c0_26, %c7_27] : memref<4x8x146xbf16, #tpu.memory_space<vmem>>, vector<1x8x128xbf16>
    %46 = vector.shape_cast %45 : vector<1x8x128xbf16> to vector<8x128xbf16>
    %47 = vector.shape_cast %44 : vector<8x128xbf16> to vector<1x8x128xbf16>
    tpu.vector_store %arg7[%c1_25, %c0_26, %c7_27], %47 {strides = array<i32>} : memref<4x8x146xbf16, #tpu.memory_space<vmem>>, vector<1x8x128xbf16>,
    %c1_28 = arith.constant 1 : index
    %c0_29 = arith.constant 0 : index
    %c135_30 = arith.constant 135 : index
    %48 = vector.load %arg7[%c1_28, %c0_29, %c135_30] : memref<4x8x146xbf16, #tpu.memory_space<vmem>>, vector<1x8x11xbf16>
    %49 = vector.shape_cast %48 : vector<1x8x11xbf16> to vector<8x11xbf16>
    %50 = vector.shape_cast %30 : vector<8x11xbf16> to vector<1x8x11xbf16>
    tpu.vector_store %arg7[%c1_28, %c0_29, %c135_30], %50 {strides = array<i32>} : memref<4x8x146xbf16, #tpu.memory_space<vmem>>, vector<1x8x11xbf16>,
    %c2 = arith.constant 2 : index
    %c0_31 = arith.constant 0 : index
    %c0_32 = arith.constant 0 : index
    %51 = vector.load %arg7[%c2, %c0_31, %c0_32] : memref<4x8x146xbf16, #tpu.memory_space<vmem>>, vector<1x8x7xbf16>
    %52 = vector.shape_cast %51 : vector<1x8x7xbf16> to vector<8x7xbf16>
    %53 = vector.shape_cast %29 : vector<8x7xbf16> to vector<1x8x7xbf16>
    tpu.vector_store %arg7[%c2, %c0_31, %c0_32], %53 {strides = array<i32>} : memref<4x8x146xbf16, #tpu.memory_space<vmem>>, vector<1x8x7xbf16>,
    %54 = vector.extract_strided_slice %28 {offsets = [16, 0], sizes = [8, 128], strides = [1, 1]} : vector<32x128xbf16> to vector<8x128xbf16>
    %c2_33 = arith.constant 2 : index
    %c0_34 = arith.constant 0 : index
    %c7_35 = arith.constant 7 : index
    %55 = vector.load %arg7[%c2_33, %c0_34, %c7_35] : memref<4x8x146xbf16, #tpu.memory_space<vmem>>, vector<1x8x128xbf16>
    %56 = vector.shape_cast %55 : vector<1x8x128xbf16> to vector<8x128xbf16>
    %57 = vector.shape_cast %54 : vector<8x128xbf16> to vector<1x8x128xbf16>
    tpu.vector_store %arg7[%c2_33, %c0_34, %c7_35], %57 {strides = array<i32>} : memref<4x8x146xbf16, #tpu.memory_space<vmem>>, vector<1x8x128xbf16>,
    %c2_36 = arith.constant 2 : index
    %c0_37 = arith.constant 0 : index
    %c135_38 = arith.constant 135 : index
    %58 = vector.load %arg7[%c2_36, %c0_37, %c135_38] : memref<4x8x146xbf16, #tpu.memory_space<vmem>>, vector<1x8x11xbf16>
    %59 = vector.shape_cast %58 : vector<1x8x11xbf16> to vector<8x11xbf16>
    %60 = vector.shape_cast %30 : vector<8x11xbf16> to vector<1x8x11xbf16>
    tpu.vector_store %arg7[%c2_36, %c0_37, %c135_38], %60 {strides = array<i32>} : memref<4x8x146xbf16, #tpu.memory_space<vmem>>, vector<1x8x11xbf16>,
    %c3 = arith.constant 3 : index
    %c0_39 = arith.constant 0 : index
    %c0_40 = arith.constant 0 : index
    %61 = vector.load %arg7[%c3, %c0_39, %c0_40] : memref<4x8x146xbf16, #tpu.memory_space<vmem>>, vector<1x8x7xbf16>
    %62 = vector.shape_cast %61 : vector<1x8x7xbf16> to vector<8x7xbf16>
    %63 = vector.shape_cast %29 : vector<8x7xbf16> to vector<1x8x7xbf16>
    tpu.vector_store %arg7[%c3, %c0_39, %c0_40], %63 {strides = array<i32>} : memref<4x8x146xbf16, #tpu.memory_space<vmem>>, vector<1x8x7xbf16>,
    %64 = vector.extract_strided_slice %28 {offsets = [24, 0], sizes = [8, 128], strides = [1, 1]} : vector<32x128xbf16> to vector<8x128xbf16>
    %c3_41 = arith.constant 3 : index
    %c0_42 = arith.constant 0 : index
    %c7_43 = arith.constant 7 : index
    %65 = vector.load %arg7[%c3_41, %c0_42, %c7_43] : memref<4x8x146xbf16, #tpu.memory_space<vmem>>, vector<1x8x128xbf16>
    %66 = vector.shape_cast %65 : vector<1x8x128xbf16> to vector<8x128xbf16>
    %67 = vector.shape_cast %64 : vector<8x128xbf16> to vector<1x8x128xbf16>
    tpu.vector_store %arg7[%c3_41, %c0_42, %c7_43], %67 {strides = array<i32>} : memref<4x8x146xbf16, #tpu.memory_space<vmem>>, vector<1x8x128xbf16>,
    %c3_44 = arith.constant 3 : index
    %c0_45 = arith.constant 0 : index
    %c135_46 = arith.constant 135 : index
    %68 = vector.load %arg7[%c3_44, %c0_45, %c135_46] : memref<4x8x146xbf16, #tpu.memory_space<vmem>>, vector<1x8x11xbf16>
    %69 = vector.shape_cast %68 : vector<1x8x11xbf16> to vector<8x11xbf16>
    %70 = vector.shape_cast %30 : vector<8x11xbf16> to vector<1x8x11xbf16>
    tpu.vector_store %arg7[%c3_44, %c0_45, %c135_46], %70 {strides = array<i32>} : memref<4x8x146xbf16, #tpu.memory_space<vmem>>, vector<1x8x11xbf16>,
    %c3_47 = arith.constant 3 : index
    %c0_48 = arith.constant 0 : index
    %c0_49 = arith.constant 0 : index
    %71 = vector.load %arg7[%c3_47, %c0_48, %c0_49] : memref<4x8x146xbf16, #tpu.memory_space<vmem>>, vector<1x8x128xbf16>
    %72 = vector.shape_cast %71 : vector<1x8x128xbf16> to vector<8x128xbf16>
    %c2_50 = arith.constant 2 : index
    %c0_51 = arith.constant 0 : index
    %c1_52 = arith.constant 1 : index
    %73 = vector.load %arg7[%c2_50, %c0_51, %c1_52] : memref<4x8x146xbf16, #tpu.memory_space<vmem>>, vector<1x8x128xbf16>
    %74 = vector.shape_cast %73 : vector<1x8x128xbf16> to vector<8x128xbf16>
    %c1_53 = arith.constant 1 : index
    %c0_54 = arith.constant 0 : index
    %c6 = arith.constant 6 : index
    %75 = vector.load %arg7[%c1_53, %c0_54, %c6] : memref<4x8x146xbf16, #tpu.memory_space<vmem>>, vector<1x8x128xbf16>
    %76 = vector.shape_cast %75 : vector<1x8x128xbf16> to vector<8x128xbf16>
    %c0_55 = arith.constant 0 : index
    %c0_56 = arith.constant 0 : index
    %c7_57 = arith.constant 7 : index
    %77 = vector.load %arg7[%c0_55, %c0_56, %c7_57] : memref<4x8x146xbf16, #tpu.memory_space<vmem>>, vector<1x8x128xbf16>
    %78 = vector.shape_cast %77 : vector<1x8x128xbf16> to vector<8x128xbf16>
    %79 = tpu.concatenate %72, %74, %76, %78 in 1 : vector<8x128xbf16>, vector<8x128xbf16>, vector<8x128xbf16>, vector<8x128xbf16> -> vector<8x512xbf16>
    %c3_58 = arith.constant 3 : index
    %c0_59 = arith.constant 0 : index
    %c1_60 = arith.constant 1 : index
    %80 = vector.load %arg7[%c3_58, %c0_59, %c1_60] : memref<4x8x146xbf16, #tpu.memory_space<vmem>>, vector<1x8x128xbf16>
    %81 = vector.shape_cast %80 : vector<1x8x128xbf16> to vector<8x128xbf16>
    %c1_61 = arith.constant 1 : index
    %c0_62 = arith.constant 0 : index
    %c7_63 = arith.constant 7 : index
    %82 = vector.load %arg7[%c1_61, %c0_62, %c7_63] : memref<4x8x146xbf16, #tpu.memory_space<vmem>>, vector<1x8x128xbf16>
    %83 = vector.shape_cast %82 : vector<1x8x128xbf16> to vector<8x128xbf16>
    %84 = tpu.concatenate %74, %81, %78, %83 in 1 : vector<8x128xbf16>, vector<8x128xbf16>, vector<8x128xbf16>, vector<8x128xbf16> -> vector<8x512xbf16>
    %c2_64 = arith.constant 2 : index
    %c0_65 = arith.constant 0 : index
    %c2_66 = arith.constant 2 : index
    %85 = vector.load %arg7[%c2_64, %c0_65, %c2_66] : memref<4x8x146xbf16, #tpu.memory_space<vmem>>, vector<1x8x128xbf16>
    %86 = vector.shape_cast %85 : vector<1x8x128xbf16> to vector<8x128xbf16>
    %c0_67 = arith.constant 0 : index
    %c0_68 = arith.constant 0 : index
    %c8 = arith.constant 8 : index
    %87 = vector.load %arg7[%c0_67, %c0_68, %c8] : memref<4x8x146xbf16, #tpu.memory_space<vmem>>, vector<1x8x128xbf16>
    %88 = vector.shape_cast %87 : vector<1x8x128xbf16> to vector<8x128xbf16>
    %89 = tpu.concatenate %81, %86, %83, %88 in 1 : vector<8x128xbf16>, vector<8x128xbf16>, vector<8x128xbf16>, vector<8x128xbf16> -> vector<8x512xbf16>
    %c3_69 = arith.constant 3 : index
    %c0_70 = arith.constant 0 : index
    %c6_71 = arith.constant 6 : index
    %90 = vector.load %arg7[%c3_69, %c0_70, %c6_71] : memref<4x8x146xbf16, #tpu.memory_space<vmem>>, vector<1x8x128xbf16>
    %91 = vector.shape_cast %90 : vector<1x8x128xbf16> to vector<8x128xbf16>
    %c2_72 = arith.constant 2 : index
    %c0_73 = arith.constant 0 : index
    %c7_74 = arith.constant 7 : index
    %92 = vector.load %arg7[%c2_72, %c0_73, %c7_74] : memref<4x8x146xbf16, #tpu.memory_space<vmem>>, vector<1x8x128xbf16>
    %93 = vector.shape_cast %92 : vector<1x8x128xbf16> to vector<8x128xbf16>
    %94 = tpu.concatenate %76, %78, %91, %93 in 1 : vector<8x128xbf16>, vector<8x128xbf16>, vector<8x128xbf16>, vector<8x128xbf16> -> vector<8x512xbf16>
    %c3_75 = arith.constant 3 : index
    %c0_76 = arith.constant 0 : index
    %c7_77 = arith.constant 7 : index
    %95 = vector.load %arg7[%c3_75, %c0_76, %c7_77] : memref<4x8x146xbf16, #tpu.memory_space<vmem>>, vector<1x8x128xbf16>
    %96 = vector.shape_cast %95 : vector<1x8x128xbf16> to vector<8x128xbf16>
    %97 = tpu.concatenate %78, %83, %93, %96 in 1 : vector<8x128xbf16>, vector<8x128xbf16>, vector<8x128xbf16>, vector<8x128xbf16> -> vector<8x512xbf16>
    %c2_78 = arith.constant 2 : index
    %c0_79 = arith.constant 0 : index
    %c8_80 = arith.constant 8 : index
    %98 = vector.load %arg7[%c2_78, %c0_79, %c8_80] : memref<4x8x146xbf16, #tpu.memory_space<vmem>>, vector<1x8x128xbf16>
    %99 = vector.shape_cast %98 : vector<1x8x128xbf16> to vector<8x128xbf16>
    %100 = tpu.concatenate %83, %88, %96, %99 in 1 : vector<8x128xbf16>, vector<8x128xbf16>, vector<8x128xbf16>, vector<8x128xbf16> -> vector<8x512xbf16>
    %c1_81 = arith.constant 1 : index
    %c0_82 = arith.constant 0 : index
    %c12 = arith.constant 12 : index
    %101 = vector.load %arg7[%c1_81, %c0_82, %c12] : memref<4x8x146xbf16, #tpu.memory_space<vmem>>, vector<1x8x128xbf16>
    %102 = vector.shape_cast %101 : vector<1x8x128xbf16> to vector<8x128xbf16>
    %c0_83 = arith.constant 0 : index
    %c0_84 = arith.constant 0 : index
    %c13 = arith.constant 13 : index
    %103 = vector.load %arg7[%c0_83, %c0_84, %c13] : memref<4x8x146xbf16, #tpu.memory_space<vmem>>, vector<1x8x128xbf16>
    %104 = vector.shape_cast %103 : vector<1x8x128xbf16> to vector<8x128xbf16>
    %105 = tpu.concatenate %91, %93, %102, %104 in 1 : vector<8x128xbf16>, vector<8x128xbf16>, vector<8x128xbf16>, vector<8x128xbf16> -> vector<8x512xbf16>
    %c1_85 = arith.constant 1 : index
    %c0_86 = arith.constant 0 : index
    %c13_87 = arith.constant 13 : index
    %106 = vector.load %arg7[%c1_85, %c0_86, %c13_87] : memref<4x8x146xbf16, #tpu.memory_space<vmem>>, vector<1x8x128xbf16>
    %107 = vector.shape_cast %106 : vector<1x8x128xbf16> to vector<8x128xbf16>
    %108 = tpu.concatenate %93, %96, %104, %107 in 1 : vector<8x128xbf16>, vector<8x128xbf16>, vector<8x128xbf16>, vector<8x128xbf16> -> vector<8x512xbf16>
    %c0_88 = arith.constant 0 : index
    %c0_89 = arith.constant 0 : index
    %c14 = arith.constant 14 : index
    %109 = vector.load %arg7[%c0_88, %c0_89, %c14] : memref<4x8x146xbf16, #tpu.memory_space<vmem>>, vector<1x8x128xbf16>
    %110 = vector.shape_cast %109 : vector<1x8x128xbf16> to vector<8x128xbf16>
    %111 = tpu.concatenate %96, %99, %107, %110 in 1 : vector<8x128xbf16>, vector<8x128xbf16>, vector<8x128xbf16>, vector<8x128xbf16> -> vector<8x512xbf16>
    %112 = tpu.concatenate %79, %84, %89, %94, %97, %100, %105, %108, %111 in 0 : vector<8x512xbf16>, vector<8x512xbf16>, vector<8x512xbf16>, vector<8x512xbf16>, vector<8x512xbf16>, vector<8x512xbf16>, vector<8x512xbf16>, vector<8x512xbf16>, vector<8x512xbf16> -> vector<72x512xbf16>
    %c0_90 = arith.constant 0 : index
    %c0_91 = arith.constant 0 : index
    %113 = vector.load %arg3[%c0_90, %c0_91] : memref<8x72xbf16, #tpu.memory_space<vmem>>, vector<8x72xbf16>
    %cst_92 = arith.constant dense<0.000000e+00> : vector<8x512xf32>
    %114 = tpu.matmul %113, %112, %cst_92 {dimension_numbers = #tpu.dot_dimension_numbers<[1], [0], [0], [1], [0, 0, 1, 1], [], []>} : vector<8x72xbf16>, vector<72x512xbf16>, vector<8x512xf32> -> vector<8x512xf32>
    %115 = vector.broadcast %14 : vector<8x1xf32> to vector<8x512xf32>
    %116 = arith.mulf %114, %115 : vector<8x512xf32>
    %117 = vector.broadcast %15 : vector<8x1xf32> to vector<8x512xf32>
    %118 = arith.addf %116, %117 : vector<8x512xf32>
    %119 = vector.extract_strided_slice %118 {offsets = [0, 0], sizes = [8, 128], strides = [1, 1]} : vector<8x512xf32> to vector<8x128xf32>
    %120 = vector.extract_strided_slice %22 {offsets = [32, 0], sizes = [8, 128], strides = [1, 1]} : vector<64x128xf32> to vector<8x128xf32>
    %121 = arith.addf %119, %120 : vector<8x128xf32>
    %cst_93 = arith.constant 0.000000e+00 : f32
    %122 = vector.broadcast %cst_93 : f32 to vector<8x128xf32>
    %123 = arith.maximumf %121, %122 : vector<8x128xf32>
    %124 = arith.truncf %123 : vector<8x128xf32> to vector<8x128xbf16>
    %c0_94 = arith.constant 0 : index
    %c0_95 = arith.constant 0 : index
    %c0_96 = arith.constant 0 : index
    %c0_97 = arith.constant 0 : index
    %125 = vector.load %arg6[%c0_94, %c0_95, %c0_96, %c0_97] : memref<1x4x8x128xbf16, #tpu.memory_space<vmem>>, vector<1x1x8x128xbf16>
    %126 = vector.shape_cast %125 : vector<1x1x8x128xbf16> to vector<8x128xbf16>
    %127 = vector.shape_cast %124 : vector<8x128xbf16> to vector<1x1x8x128xbf16>
    tpu.vector_store %arg6[%c0_94, %c0_95, %c0_96, %c0_97], %127 {strides = array<i32>} : memref<1x4x8x128xbf16, #tpu.memory_space<vmem>>, vector<1x1x8x128xbf16>,
    %128 = vector.extract_strided_slice %118 {offsets = [0, 128], sizes = [8, 128], strides = [1, 1]} : vector<8x512xf32> to vector<8x128xf32>
    %129 = vector.extract_strided_slice %22 {offsets = [40, 0], sizes = [8, 128], strides = [1, 1]} : vector<64x128xf32> to vector<8x128xf32>
    %130 = arith.addf %128, %129 : vector<8x128xf32>
    %cst_98 = arith.constant 0.000000e+00 : f32
    %131 = vector.broadcast %cst_98 : f32 to vector<8x128xf32>
    %132 = arith.maximumf %130, %131 : vector<8x128xf32>
    %133 = arith.truncf %132 : vector<8x128xf32> to vector<8x128xbf16>
    %c0_99 = arith.constant 0 : index
    %c1_100 = arith.constant 1 : index
    %c0_101 = arith.constant 0 : index
    %c0_102 = arith.constant 0 : index
    %134 = vector.load %arg6[%c0_99, %c1_100, %c0_101, %c0_102] : memref<1x4x8x128xbf16, #tpu.memory_space<vmem>>, vector<1x1x8x128xbf16>
    %135 = vector.shape_cast %134 : vector<1x1x8x128xbf16> to vector<8x128xbf16>
    %136 = vector.shape_cast %133 : vector<8x128xbf16> to vector<1x1x8x128xbf16>
    tpu.vector_store %arg6[%c0_99, %c1_100, %c0_101, %c0_102], %136 {strides = array<i32>} : memref<1x4x8x128xbf16, #tpu.memory_space<vmem>>, vector<1x1x8x128xbf16>,
    %137 = vector.extract_strided_slice %118 {offsets = [0, 256], sizes = [8, 128], strides = [1, 1]} : vector<8x512xf32> to vector<8x128xf32>
    %138 = vector.extract_strided_slice %22 {offsets = [48, 0], sizes = [8, 128], strides = [1, 1]} : vector<64x128xf32> to vector<8x128xf32>
    %139 = arith.addf %137, %138 : vector<8x128xf32>
    %cst_103 = arith.constant 0.000000e+00 : f32
    %140 = vector.broadcast %cst_103 : f32 to vector<8x128xf32>
    %141 = arith.maximumf %139, %140 : vector<8x128xf32>
    %142 = arith.truncf %141 : vector<8x128xf32> to vector<8x128xbf16>
    %c0_104 = arith.constant 0 : index
    %c2_105 = arith.constant 2 : index
    %c0_106 = arith.constant 0 : index
    %c0_107 = arith.constant 0 : index
    %143 = vector.load %arg6[%c0_104, %c2_105, %c0_106, %c0_107] : memref<1x4x8x128xbf16, #tpu.memory_space<vmem>>, vector<1x1x8x128xbf16>
    %144 = vector.shape_cast %143 : vector<1x1x8x128xbf16> to vector<8x128xbf16>
    %145 = vector.shape_cast %142 : vector<8x128xbf16> to vector<1x1x8x128xbf16>
    tpu.vector_store %arg6[%c0_104, %c2_105, %c0_106, %c0_107], %145 {strides = array<i32>} : memref<1x4x8x128xbf16, #tpu.memory_space<vmem>>, vector<1x1x8x128xbf16>,
    %146 = vector.extract_strided_slice %118 {offsets = [0, 384], sizes = [8, 128], strides = [1, 1]} : vector<8x512xf32> to vector<8x128xf32>
    %147 = vector.extract_strided_slice %22 {offsets = [56, 0], sizes = [8, 128], strides = [1, 1]} : vector<64x128xf32> to vector<8x128xf32>
    %148 = arith.addf %146, %147 : vector<8x128xf32>
    %cst_108 = arith.constant 0.000000e+00 : f32
    %149 = vector.broadcast %cst_108 : f32 to vector<8x128xf32>
    %150 = arith.maximumf %148, %149 : vector<8x128xf32>
    %151 = arith.truncf %150 : vector<8x128xf32> to vector<8x128xbf16>
    %c0_109 = arith.constant 0 : index
    %c3_110 = arith.constant 3 : index
    %c0_111 = arith.constant 0 : index
    %c0_112 = arith.constant 0 : index
    %152 = vector.load %arg6[%c0_109, %c3_110, %c0_111, %c0_112] : memref<1x4x8x128xbf16, #tpu.memory_space<vmem>>, vector<1x1x8x128xbf16>
    %153 = vector.shape_cast %152 : vector<1x1x8x128xbf16> to vector<8x128xbf16>
    %154 = vector.shape_cast %151 : vector<8x128xbf16> to vector<1x1x8x128xbf16>
    tpu.vector_store %arg6[%c0_109, %c3_110, %c0_111, %c0_112], %154 {strides = array<i32>} : memref<1x4x8x128xbf16, #tpu.memory_space<vmem>>, vector<1x1x8x128xbf16>,
    return
  }
  func.func @transform_0(%arg0: i32) -> (i32, i32, i32) {
    %c0_i32 = arith.constant 0 : i32
    %c0_i32_0 = arith.constant 0 : i32
    %c0_i32_1 = arith.constant 0 : i32
    return %arg0, %c0_i32, %c0_i32_0 : i32, i32, i32
  }
  func.func @transform_1(%arg0: i32) -> (i32, i32) {
    %c0_i32 = arith.constant 0 : i32
    %c0_i32_0 = arith.constant 0 : i32
    %c0_i32_1 = arith.constant 0 : i32
    return %c0_i32, %c0_i32_0 : i32, i32
  }
  func.func @transform_2(%arg0: i32) -> (i32, i32) {
    %c0_i32 = arith.constant 0 : i32
    %c0_i32_0 = arith.constant 0 : i32
    %c0_i32_1 = arith.constant 0 : i32
    return %c0_i32, %c0_i32_0 : i32, i32
  }
  func.func @transform_3(%arg0: i32) -> (i32, i32) {
    %c0_i32 = arith.constant 0 : i32
    %c0_i32_0 = arith.constant 0 : i32
    %c0_i32_1 = arith.constant 0 : i32
    return %c0_i32, %c0_i32_0 : i32, i32
  }
  func.func @transform_4(%arg0: i32) -> (i32, i32) {
    %c0_i32 = arith.constant 0 : i32
    %c0_i32_0 = arith.constant 0 : i32
    %c0_i32_1 = arith.constant 0 : i32
    return %c0_i32, %c0_i32_0 : i32, i32
  }
  func.func @transform_5(%arg0: i32) -> (i32, i32, i32, i32) {
    %c0_i32 = arith.constant 0 : i32
    %c0_i32_0 = arith.constant 0 : i32
    %c0_i32_1 = arith.constant 0 : i32
    %c0_i32_2 = arith.constant 0 : i32
    return %arg0, %c0_i32, %c0_i32_0, %c0_i32_1 : i32, i32, i32, i32
  }
}

module attributes {stable_mosaic.version = 11 : i64} {
  func.func @kernel(%arg0: i32, %arg1: memref<1x8x158xbf16, #tpu.memory_space<vmem>>, %arg2: memref<32x72xbf16, #tpu.memory_space<vmem>>, %arg3: memref<4x36xbf16, #tpu.memory_space<vmem>>, %arg4: memref<36x2xf32, #tpu.memory_space<vmem>>, %arg5: memref<1x128xf32, #tpu.memory_space<vmem>>, %arg6: memref<1x4x4x128xbf16, #tpu.memory_space<vmem>>, %arg7: memref<4x4x158xbf16, #tpu.memory_space<vmem>>) attributes {dimension_semantics = [#tpu.dimension_semantics<parallel>], iteration_bounds = array<i64: 2>, scalar_prefetch = 0 : i64, scratch_operands = 1 : i64, tpu.core_type = #tpu.core_type<tc>, window_params = [{transform_indices = @transform_0, window_bounds = array<i64: 1, 8, 158>}, {pipeline_mode = #tpu.pipeline_mode<synchronous>, transform_indices = @transform_1, window_bounds = array<i64: 32, 72>}, {pipeline_mode = #tpu.pipeline_mode<synchronous>, transform_indices = @transform_2, window_bounds = array<i64: 4, 36>}, {pipeline_mode = #tpu.pipeline_mode<synchronous>, transform_indices = @transform_3, window_bounds = array<i64: 36, 2>}, {pipeline_mode = #tpu.pipeline_mode<synchronous>, transform_indices = @transform_4, window_bounds = array<i64: 1, 128>}, {transform_indices = @transform_5, window_bounds = array<i64: 1, 4, 4, 128>}]} {
    %c0 = arith.constant 0 : index
    %c0_0 = arith.constant 0 : index
    %c0_1 = arith.constant 0 : index
    %0 = vector.load %arg1[%c0, %c0_0, %c0_1] : memref<1x8x158xbf16, #tpu.memory_space<vmem>>, vector<1x8x158xbf16>
    %1 = vector.shape_cast %0 : vector<1x8x158xbf16> to vector<8x158xbf16>
    %2 = vector.extract_strided_slice %1 {offsets = [0, 0], sizes = [8, 128], strides = [1, 1]} : vector<8x158xbf16> to vector<8x128xbf16>
    %3 = vector.extract_strided_slice %1 {offsets = [0, 1], sizes = [8, 128], strides = [1, 1]} : vector<8x158xbf16> to vector<8x128xbf16>
    %4 = vector.extract_strided_slice %1 {offsets = [0, 2], sizes = [8, 128], strides = [1, 1]} : vector<8x158xbf16> to vector<8x128xbf16>
    %5 = vector.extract_strided_slice %1 {offsets = [0, 10], sizes = [8, 128], strides = [1, 1]} : vector<8x158xbf16> to vector<8x128xbf16>
    %6 = vector.extract_strided_slice %1 {offsets = [0, 11], sizes = [8, 128], strides = [1, 1]} : vector<8x158xbf16> to vector<8x128xbf16>
    %7 = vector.extract_strided_slice %1 {offsets = [0, 12], sizes = [8, 128], strides = [1, 1]} : vector<8x158xbf16> to vector<8x128xbf16>
    %8 = vector.extract_strided_slice %1 {offsets = [0, 20], sizes = [8, 128], strides = [1, 1]} : vector<8x158xbf16> to vector<8x128xbf16>
    %9 = vector.extract_strided_slice %1 {offsets = [0, 21], sizes = [8, 128], strides = [1, 1]} : vector<8x158xbf16> to vector<8x128xbf16>
    %10 = vector.extract_strided_slice %1 {offsets = [0, 22], sizes = [8, 128], strides = [1, 1]} : vector<8x158xbf16> to vector<8x128xbf16>
    %11 = tpu.concatenate %2, %3, %4, %5, %6, %7, %8, %9, %10 in 0 : vector<8x128xbf16>, vector<8x128xbf16>, vector<8x128xbf16>, vector<8x128xbf16>, vector<8x128xbf16>, vector<8x128xbf16>, vector<8x128xbf16>, vector<8x128xbf16>, vector<8x128xbf16> -> vector<72x128xbf16>
    %c0_2 = arith.constant 0 : index
    %c0_3 = arith.constant 0 : index
    %12 = vector.load %arg4[%c0_2, %c0_3] : memref<36x2xf32, #tpu.memory_space<vmem>>, vector<32x1xf32>
    %c0_4 = arith.constant 0 : index
    %c1 = arith.constant 1 : index
    %13 = vector.load %arg4[%c0_4, %c1] : memref<36x2xf32, #tpu.memory_space<vmem>>, vector<32x1xf32>
    %c32 = arith.constant 32 : index
    %c0_5 = arith.constant 0 : index
    %14 = vector.load %arg4[%c32, %c0_5] : memref<36x2xf32, #tpu.memory_space<vmem>>, vector<4x1xf32>
    %c32_6 = arith.constant 32 : index
    %c1_7 = arith.constant 1 : index
    %15 = vector.load %arg4[%c32_6, %c1_7] : memref<36x2xf32, #tpu.memory_space<vmem>>, vector<4x1xf32>
    %c0_8 = arith.constant 0 : index
    %c0_9 = arith.constant 0 : index
    %16 = vector.load %arg5[%c0_8, %c0_9] : memref<1x128xf32, #tpu.memory_space<vmem>>, vector<1x128xf32>
    %c0_10 = arith.constant 0 : index
    %c0_11 = arith.constant 0 : index
    %17 = vector.load %arg2[%c0_10, %c0_11] : memref<32x72xbf16, #tpu.memory_space<vmem>>, vector<32x72xbf16>
    %cst = arith.constant dense<0.000000e+00> : vector<32x128xf32>
    %18 = tpu.matmul %17, %11, %cst {dimension_numbers = #tpu.dot_dimension_numbers<[1], [0], [0], [1], [0, 0, 1, 1], [], []>} : vector<32x72xbf16>, vector<72x128xbf16>, vector<32x128xf32> -> vector<32x128xf32>
    %19 = vector.broadcast %12 : vector<32x1xf32> to vector<32x128xf32>
    %20 = arith.mulf %18, %19 : vector<32x128xf32>
    %21 = vector.broadcast %13 : vector<32x1xf32> to vector<32x128xf32>
    %22 = arith.addf %20, %21 : vector<32x128xf32>
    %23 = vector.extract_strided_slice %22 {offsets = [0, 0], sizes = [16, 128], strides = [1, 1]} : vector<32x128xf32> to vector<16x128xf32>
    %cst_12 = arith.constant 0.000000e+00 : f32
    %24 = vector.broadcast %cst_12 : f32 to vector<16x128xf32>
    %25 = arith.maximumf %23, %24 : vector<16x128xf32>
    %26 = vector.broadcast %16 : vector<1x128xf32> to vector<16x128xf32>
    %27 = arith.mulf %25, %26 : vector<16x128xf32>
    %28 = arith.truncf %27 : vector<16x128xf32> to vector<16x128xbf16>
    %cst_13 = arith.constant 0.000000e+00 : bf16
    %29 = vector.broadcast %cst_13 : bf16 to vector<4x11xbf16>
    %cst_14 = arith.constant 0.000000e+00 : bf16
    %30 = vector.broadcast %cst_14 : bf16 to vector<4x19xbf16>
    %c0_15 = arith.constant 0 : index
    %c0_16 = arith.constant 0 : index
    %c0_17 = arith.constant 0 : index
    %31 = vector.load %arg7[%c0_15, %c0_16, %c0_17] : memref<4x4x158xbf16, #tpu.memory_space<vmem>>, vector<1x4x11xbf16>
    %32 = vector.shape_cast %31 : vector<1x4x11xbf16> to vector<4x11xbf16>
    %33 = vector.shape_cast %29 : vector<4x11xbf16> to vector<1x4x11xbf16>
    tpu.vector_store %arg7[%c0_15, %c0_16, %c0_17], %33 {strides = array<i32>} : memref<4x4x158xbf16, #tpu.memory_space<vmem>>, vector<1x4x11xbf16>,
    %34 = vector.extract_strided_slice %28 {offsets = [0, 0], sizes = [4, 128], strides = [1, 1]} : vector<16x128xbf16> to vector<4x128xbf16>
    %c0_18 = arith.constant 0 : index
    %c0_19 = arith.constant 0 : index
    %c11 = arith.constant 11 : index
    %35 = vector.load %arg7[%c0_18, %c0_19, %c11] : memref<4x4x158xbf16, #tpu.memory_space<vmem>>, vector<1x4x128xbf16>
    %36 = vector.shape_cast %35 : vector<1x4x128xbf16> to vector<4x128xbf16>
    %37 = vector.shape_cast %34 : vector<4x128xbf16> to vector<1x4x128xbf16>
    tpu.vector_store %arg7[%c0_18, %c0_19, %c11], %37 {strides = array<i32>} : memref<4x4x158xbf16, #tpu.memory_space<vmem>>, vector<1x4x128xbf16>,
    %c0_20 = arith.constant 0 : index
    %c0_21 = arith.constant 0 : index
    %c139 = arith.constant 139 : index
    %38 = vector.load %arg7[%c0_20, %c0_21, %c139] : memref<4x4x158xbf16, #tpu.memory_space<vmem>>, vector<1x4x19xbf16>
    %39 = vector.shape_cast %38 : vector<1x4x19xbf16> to vector<4x19xbf16>
    %40 = vector.shape_cast %30 : vector<4x19xbf16> to vector<1x4x19xbf16>
    tpu.vector_store %arg7[%c0_20, %c0_21, %c139], %40 {strides = array<i32>} : memref<4x4x158xbf16, #tpu.memory_space<vmem>>, vector<1x4x19xbf16>,
    %c1_22 = arith.constant 1 : index
    %c0_23 = arith.constant 0 : index
    %c0_24 = arith.constant 0 : index
    %41 = vector.load %arg7[%c1_22, %c0_23, %c0_24] : memref<4x4x158xbf16, #tpu.memory_space<vmem>>, vector<1x4x11xbf16>
    %42 = vector.shape_cast %41 : vector<1x4x11xbf16> to vector<4x11xbf16>
    %43 = vector.shape_cast %29 : vector<4x11xbf16> to vector<1x4x11xbf16>
    tpu.vector_store %arg7[%c1_22, %c0_23, %c0_24], %43 {strides = array<i32>} : memref<4x4x158xbf16, #tpu.memory_space<vmem>>, vector<1x4x11xbf16>,
    %44 = vector.extract_strided_slice %28 {offsets = [4, 0], sizes = [4, 128], strides = [1, 1]} : vector<16x128xbf16> to vector<4x128xbf16>
    %c1_25 = arith.constant 1 : index
    %c0_26 = arith.constant 0 : index
    %c11_27 = arith.constant 11 : index
    %45 = vector.load %arg7[%c1_25, %c0_26, %c11_27] : memref<4x4x158xbf16, #tpu.memory_space<vmem>>, vector<1x4x128xbf16>
    %46 = vector.shape_cast %45 : vector<1x4x128xbf16> to vector<4x128xbf16>
    %47 = vector.shape_cast %44 : vector<4x128xbf16> to vector<1x4x128xbf16>
    tpu.vector_store %arg7[%c1_25, %c0_26, %c11_27], %47 {strides = array<i32>} : memref<4x4x158xbf16, #tpu.memory_space<vmem>>, vector<1x4x128xbf16>,
    %c1_28 = arith.constant 1 : index
    %c0_29 = arith.constant 0 : index
    %c139_30 = arith.constant 139 : index
    %48 = vector.load %arg7[%c1_28, %c0_29, %c139_30] : memref<4x4x158xbf16, #tpu.memory_space<vmem>>, vector<1x4x19xbf16>
    %49 = vector.shape_cast %48 : vector<1x4x19xbf16> to vector<4x19xbf16>
    %50 = vector.shape_cast %30 : vector<4x19xbf16> to vector<1x4x19xbf16>
    tpu.vector_store %arg7[%c1_28, %c0_29, %c139_30], %50 {strides = array<i32>} : memref<4x4x158xbf16, #tpu.memory_space<vmem>>, vector<1x4x19xbf16>,
    %c2 = arith.constant 2 : index
    %c0_31 = arith.constant 0 : index
    %c0_32 = arith.constant 0 : index
    %51 = vector.load %arg7[%c2, %c0_31, %c0_32] : memref<4x4x158xbf16, #tpu.memory_space<vmem>>, vector<1x4x11xbf16>
    %52 = vector.shape_cast %51 : vector<1x4x11xbf16> to vector<4x11xbf16>
    %53 = vector.shape_cast %29 : vector<4x11xbf16> to vector<1x4x11xbf16>
    tpu.vector_store %arg7[%c2, %c0_31, %c0_32], %53 {strides = array<i32>} : memref<4x4x158xbf16, #tpu.memory_space<vmem>>, vector<1x4x11xbf16>,
    %54 = vector.extract_strided_slice %28 {offsets = [8, 0], sizes = [4, 128], strides = [1, 1]} : vector<16x128xbf16> to vector<4x128xbf16>
    %c2_33 = arith.constant 2 : index
    %c0_34 = arith.constant 0 : index
    %c11_35 = arith.constant 11 : index
    %55 = vector.load %arg7[%c2_33, %c0_34, %c11_35] : memref<4x4x158xbf16, #tpu.memory_space<vmem>>, vector<1x4x128xbf16>
    %56 = vector.shape_cast %55 : vector<1x4x128xbf16> to vector<4x128xbf16>
    %57 = vector.shape_cast %54 : vector<4x128xbf16> to vector<1x4x128xbf16>
    tpu.vector_store %arg7[%c2_33, %c0_34, %c11_35], %57 {strides = array<i32>} : memref<4x4x158xbf16, #tpu.memory_space<vmem>>, vector<1x4x128xbf16>,
    %c2_36 = arith.constant 2 : index
    %c0_37 = arith.constant 0 : index
    %c139_38 = arith.constant 139 : index
    %58 = vector.load %arg7[%c2_36, %c0_37, %c139_38] : memref<4x4x158xbf16, #tpu.memory_space<vmem>>, vector<1x4x19xbf16>
    %59 = vector.shape_cast %58 : vector<1x4x19xbf16> to vector<4x19xbf16>
    %60 = vector.shape_cast %30 : vector<4x19xbf16> to vector<1x4x19xbf16>
    tpu.vector_store %arg7[%c2_36, %c0_37, %c139_38], %60 {strides = array<i32>} : memref<4x4x158xbf16, #tpu.memory_space<vmem>>, vector<1x4x19xbf16>,
    %c3 = arith.constant 3 : index
    %c0_39 = arith.constant 0 : index
    %c0_40 = arith.constant 0 : index
    %61 = vector.load %arg7[%c3, %c0_39, %c0_40] : memref<4x4x158xbf16, #tpu.memory_space<vmem>>, vector<1x4x11xbf16>
    %62 = vector.shape_cast %61 : vector<1x4x11xbf16> to vector<4x11xbf16>
    %63 = vector.shape_cast %29 : vector<4x11xbf16> to vector<1x4x11xbf16>
    tpu.vector_store %arg7[%c3, %c0_39, %c0_40], %63 {strides = array<i32>} : memref<4x4x158xbf16, #tpu.memory_space<vmem>>, vector<1x4x11xbf16>,
    %64 = vector.extract_strided_slice %28 {offsets = [12, 0], sizes = [4, 128], strides = [1, 1]} : vector<16x128xbf16> to vector<4x128xbf16>
    %c3_41 = arith.constant 3 : index
    %c0_42 = arith.constant 0 : index
    %c11_43 = arith.constant 11 : index
    %65 = vector.load %arg7[%c3_41, %c0_42, %c11_43] : memref<4x4x158xbf16, #tpu.memory_space<vmem>>, vector<1x4x128xbf16>
    %66 = vector.shape_cast %65 : vector<1x4x128xbf16> to vector<4x128xbf16>
    %67 = vector.shape_cast %64 : vector<4x128xbf16> to vector<1x4x128xbf16>
    tpu.vector_store %arg7[%c3_41, %c0_42, %c11_43], %67 {strides = array<i32>} : memref<4x4x158xbf16, #tpu.memory_space<vmem>>, vector<1x4x128xbf16>,
    %c3_44 = arith.constant 3 : index
    %c0_45 = arith.constant 0 : index
    %c139_46 = arith.constant 139 : index
    %68 = vector.load %arg7[%c3_44, %c0_45, %c139_46] : memref<4x4x158xbf16, #tpu.memory_space<vmem>>, vector<1x4x19xbf16>
    %69 = vector.shape_cast %68 : vector<1x4x19xbf16> to vector<4x19xbf16>
    %70 = vector.shape_cast %30 : vector<4x19xbf16> to vector<1x4x19xbf16>
    tpu.vector_store %arg7[%c3_44, %c0_45, %c139_46], %70 {strides = array<i32>} : memref<4x4x158xbf16, #tpu.memory_space<vmem>>, vector<1x4x19xbf16>,
    %c3_47 = arith.constant 3 : index
    %c0_48 = arith.constant 0 : index
    %c0_49 = arith.constant 0 : index
    %71 = vector.load %arg7[%c3_47, %c0_48, %c0_49] : memref<4x4x158xbf16, #tpu.memory_space<vmem>>, vector<1x4x128xbf16>
    %72 = vector.shape_cast %71 : vector<1x4x128xbf16> to vector<4x128xbf16>
    %c2_50 = arith.constant 2 : index
    %c0_51 = arith.constant 0 : index
    %c1_52 = arith.constant 1 : index
    %73 = vector.load %arg7[%c2_50, %c0_51, %c1_52] : memref<4x4x158xbf16, #tpu.memory_space<vmem>>, vector<1x4x128xbf16>
    %74 = vector.shape_cast %73 : vector<1x4x128xbf16> to vector<4x128xbf16>
    %c1_53 = arith.constant 1 : index
    %c0_54 = arith.constant 0 : index
    %c10 = arith.constant 10 : index
    %75 = vector.load %arg7[%c1_53, %c0_54, %c10] : memref<4x4x158xbf16, #tpu.memory_space<vmem>>, vector<1x4x128xbf16>
    %76 = vector.shape_cast %75 : vector<1x4x128xbf16> to vector<4x128xbf16>
    %c0_55 = arith.constant 0 : index
    %c0_56 = arith.constant 0 : index
    %c11_57 = arith.constant 11 : index
    %77 = vector.load %arg7[%c0_55, %c0_56, %c11_57] : memref<4x4x158xbf16, #tpu.memory_space<vmem>>, vector<1x4x128xbf16>
    %78 = vector.shape_cast %77 : vector<1x4x128xbf16> to vector<4x128xbf16>
    %79 = tpu.concatenate %72, %74, %76, %78 in 1 : vector<4x128xbf16>, vector<4x128xbf16>, vector<4x128xbf16>, vector<4x128xbf16> -> vector<4x512xbf16>
    %c3_58 = arith.constant 3 : index
    %c0_59 = arith.constant 0 : index
    %c1_60 = arith.constant 1 : index
    %80 = vector.load %arg7[%c3_58, %c0_59, %c1_60] : memref<4x4x158xbf16, #tpu.memory_space<vmem>>, vector<1x4x128xbf16>
    %81 = vector.shape_cast %80 : vector<1x4x128xbf16> to vector<4x128xbf16>
    %c1_61 = arith.constant 1 : index
    %c0_62 = arith.constant 0 : index
    %c11_63 = arith.constant 11 : index
    %82 = vector.load %arg7[%c1_61, %c0_62, %c11_63] : memref<4x4x158xbf16, #tpu.memory_space<vmem>>, vector<1x4x128xbf16>
    %83 = vector.shape_cast %82 : vector<1x4x128xbf16> to vector<4x128xbf16>
    %84 = tpu.concatenate %74, %81, %78, %83 in 1 : vector<4x128xbf16>, vector<4x128xbf16>, vector<4x128xbf16>, vector<4x128xbf16> -> vector<4x512xbf16>
    %c2_64 = arith.constant 2 : index
    %c0_65 = arith.constant 0 : index
    %c2_66 = arith.constant 2 : index
    %85 = vector.load %arg7[%c2_64, %c0_65, %c2_66] : memref<4x4x158xbf16, #tpu.memory_space<vmem>>, vector<1x4x128xbf16>
    %86 = vector.shape_cast %85 : vector<1x4x128xbf16> to vector<4x128xbf16>
    %c0_67 = arith.constant 0 : index
    %c0_68 = arith.constant 0 : index
    %c12 = arith.constant 12 : index
    %87 = vector.load %arg7[%c0_67, %c0_68, %c12] : memref<4x4x158xbf16, #tpu.memory_space<vmem>>, vector<1x4x128xbf16>
    %88 = vector.shape_cast %87 : vector<1x4x128xbf16> to vector<4x128xbf16>
    %89 = tpu.concatenate %81, %86, %83, %88 in 1 : vector<4x128xbf16>, vector<4x128xbf16>, vector<4x128xbf16>, vector<4x128xbf16> -> vector<4x512xbf16>
    %c3_69 = arith.constant 3 : index
    %c0_70 = arith.constant 0 : index
    %c10_71 = arith.constant 10 : index
    %90 = vector.load %arg7[%c3_69, %c0_70, %c10_71] : memref<4x4x158xbf16, #tpu.memory_space<vmem>>, vector<1x4x128xbf16>
    %91 = vector.shape_cast %90 : vector<1x4x128xbf16> to vector<4x128xbf16>
    %c2_72 = arith.constant 2 : index
    %c0_73 = arith.constant 0 : index
    %c11_74 = arith.constant 11 : index
    %92 = vector.load %arg7[%c2_72, %c0_73, %c11_74] : memref<4x4x158xbf16, #tpu.memory_space<vmem>>, vector<1x4x128xbf16>
    %93 = vector.shape_cast %92 : vector<1x4x128xbf16> to vector<4x128xbf16>
    %94 = tpu.concatenate %76, %78, %91, %93 in 1 : vector<4x128xbf16>, vector<4x128xbf16>, vector<4x128xbf16>, vector<4x128xbf16> -> vector<4x512xbf16>
    %c3_75 = arith.constant 3 : index
    %c0_76 = arith.constant 0 : index
    %c11_77 = arith.constant 11 : index
    %95 = vector.load %arg7[%c3_75, %c0_76, %c11_77] : memref<4x4x158xbf16, #tpu.memory_space<vmem>>, vector<1x4x128xbf16>
    %96 = vector.shape_cast %95 : vector<1x4x128xbf16> to vector<4x128xbf16>
    %97 = tpu.concatenate %78, %83, %93, %96 in 1 : vector<4x128xbf16>, vector<4x128xbf16>, vector<4x128xbf16>, vector<4x128xbf16> -> vector<4x512xbf16>
    %c2_78 = arith.constant 2 : index
    %c0_79 = arith.constant 0 : index
    %c12_80 = arith.constant 12 : index
    %98 = vector.load %arg7[%c2_78, %c0_79, %c12_80] : memref<4x4x158xbf16, #tpu.memory_space<vmem>>, vector<1x4x128xbf16>
    %99 = vector.shape_cast %98 : vector<1x4x128xbf16> to vector<4x128xbf16>
    %100 = tpu.concatenate %83, %88, %96, %99 in 1 : vector<4x128xbf16>, vector<4x128xbf16>, vector<4x128xbf16>, vector<4x128xbf16> -> vector<4x512xbf16>
    %c1_81 = arith.constant 1 : index
    %c0_82 = arith.constant 0 : index
    %c20 = arith.constant 20 : index
    %101 = vector.load %arg7[%c1_81, %c0_82, %c20] : memref<4x4x158xbf16, #tpu.memory_space<vmem>>, vector<1x4x128xbf16>
    %102 = vector.shape_cast %101 : vector<1x4x128xbf16> to vector<4x128xbf16>
    %c0_83 = arith.constant 0 : index
    %c0_84 = arith.constant 0 : index
    %c21 = arith.constant 21 : index
    %103 = vector.load %arg7[%c0_83, %c0_84, %c21] : memref<4x4x158xbf16, #tpu.memory_space<vmem>>, vector<1x4x128xbf16>
    %104 = vector.shape_cast %103 : vector<1x4x128xbf16> to vector<4x128xbf16>
    %105 = tpu.concatenate %91, %93, %102, %104 in 1 : vector<4x128xbf16>, vector<4x128xbf16>, vector<4x128xbf16>, vector<4x128xbf16> -> vector<4x512xbf16>
    %c1_85 = arith.constant 1 : index
    %c0_86 = arith.constant 0 : index
    %c21_87 = arith.constant 21 : index
    %106 = vector.load %arg7[%c1_85, %c0_86, %c21_87] : memref<4x4x158xbf16, #tpu.memory_space<vmem>>, vector<1x4x128xbf16>
    %107 = vector.shape_cast %106 : vector<1x4x128xbf16> to vector<4x128xbf16>
    %108 = tpu.concatenate %93, %96, %104, %107 in 1 : vector<4x128xbf16>, vector<4x128xbf16>, vector<4x128xbf16>, vector<4x128xbf16> -> vector<4x512xbf16>
    %c0_88 = arith.constant 0 : index
    %c0_89 = arith.constant 0 : index
    %c22 = arith.constant 22 : index
    %109 = vector.load %arg7[%c0_88, %c0_89, %c22] : memref<4x4x158xbf16, #tpu.memory_space<vmem>>, vector<1x4x128xbf16>
    %110 = vector.shape_cast %109 : vector<1x4x128xbf16> to vector<4x128xbf16>
    %111 = tpu.concatenate %96, %99, %107, %110 in 1 : vector<4x128xbf16>, vector<4x128xbf16>, vector<4x128xbf16>, vector<4x128xbf16> -> vector<4x512xbf16>
    %112 = tpu.concatenate %79, %84, %89, %94, %97, %100, %105, %108, %111 in 0 : vector<4x512xbf16>, vector<4x512xbf16>, vector<4x512xbf16>, vector<4x512xbf16>, vector<4x512xbf16>, vector<4x512xbf16>, vector<4x512xbf16>, vector<4x512xbf16>, vector<4x512xbf16> -> vector<36x512xbf16>
    %c0_90 = arith.constant 0 : index
    %c0_91 = arith.constant 0 : index
    %113 = vector.load %arg3[%c0_90, %c0_91] : memref<4x36xbf16, #tpu.memory_space<vmem>>, vector<4x36xbf16>
    %cst_92 = arith.constant dense<0.000000e+00> : vector<4x512xf32>
    %114 = tpu.matmul %113, %112, %cst_92 {dimension_numbers = #tpu.dot_dimension_numbers<[1], [0], [0], [1], [0, 0, 1, 1], [], []>} : vector<4x36xbf16>, vector<36x512xbf16>, vector<4x512xf32> -> vector<4x512xf32>
    %115 = vector.broadcast %14 : vector<4x1xf32> to vector<4x512xf32>
    %116 = arith.mulf %114, %115 : vector<4x512xf32>
    %117 = vector.broadcast %15 : vector<4x1xf32> to vector<4x512xf32>
    %118 = arith.addf %116, %117 : vector<4x512xf32>
    %119 = vector.extract_strided_slice %118 {offsets = [0, 0], sizes = [4, 128], strides = [1, 1]} : vector<4x512xf32> to vector<4x128xf32>
    %120 = vector.extract_strided_slice %22 {offsets = [16, 0], sizes = [4, 128], strides = [1, 1]} : vector<32x128xf32> to vector<4x128xf32>
    %121 = arith.addf %119, %120 : vector<4x128xf32>
    %cst_93 = arith.constant 0.000000e+00 : f32
    %122 = vector.broadcast %cst_93 : f32 to vector<4x128xf32>
    %123 = arith.maximumf %121, %122 : vector<4x128xf32>
    %124 = arith.truncf %123 : vector<4x128xf32> to vector<4x128xbf16>
    %c0_94 = arith.constant 0 : index
    %c0_95 = arith.constant 0 : index
    %c0_96 = arith.constant 0 : index
    %c0_97 = arith.constant 0 : index
    %125 = vector.load %arg6[%c0_94, %c0_95, %c0_96, %c0_97] : memref<1x4x4x128xbf16, #tpu.memory_space<vmem>>, vector<1x1x4x128xbf16>
    %126 = vector.shape_cast %125 : vector<1x1x4x128xbf16> to vector<4x128xbf16>
    %127 = vector.shape_cast %124 : vector<4x128xbf16> to vector<1x1x4x128xbf16>
    tpu.vector_store %arg6[%c0_94, %c0_95, %c0_96, %c0_97], %127 {strides = array<i32>} : memref<1x4x4x128xbf16, #tpu.memory_space<vmem>>, vector<1x1x4x128xbf16>,
    %128 = vector.extract_strided_slice %118 {offsets = [0, 128], sizes = [4, 128], strides = [1, 1]} : vector<4x512xf32> to vector<4x128xf32>
    %129 = vector.extract_strided_slice %22 {offsets = [20, 0], sizes = [4, 128], strides = [1, 1]} : vector<32x128xf32> to vector<4x128xf32>
    %130 = arith.addf %128, %129 : vector<4x128xf32>
    %cst_98 = arith.constant 0.000000e+00 : f32
    %131 = vector.broadcast %cst_98 : f32 to vector<4x128xf32>
    %132 = arith.maximumf %130, %131 : vector<4x128xf32>
    %133 = arith.truncf %132 : vector<4x128xf32> to vector<4x128xbf16>
    %c0_99 = arith.constant 0 : index
    %c1_100 = arith.constant 1 : index
    %c0_101 = arith.constant 0 : index
    %c0_102 = arith.constant 0 : index
    %134 = vector.load %arg6[%c0_99, %c1_100, %c0_101, %c0_102] : memref<1x4x4x128xbf16, #tpu.memory_space<vmem>>, vector<1x1x4x128xbf16>
    %135 = vector.shape_cast %134 : vector<1x1x4x128xbf16> to vector<4x128xbf16>
    %136 = vector.shape_cast %133 : vector<4x128xbf16> to vector<1x1x4x128xbf16>
    tpu.vector_store %arg6[%c0_99, %c1_100, %c0_101, %c0_102], %136 {strides = array<i32>} : memref<1x4x4x128xbf16, #tpu.memory_space<vmem>>, vector<1x1x4x128xbf16>,
    %137 = vector.extract_strided_slice %118 {offsets = [0, 256], sizes = [4, 128], strides = [1, 1]} : vector<4x512xf32> to vector<4x128xf32>
    %138 = vector.extract_strided_slice %22 {offsets = [24, 0], sizes = [4, 128], strides = [1, 1]} : vector<32x128xf32> to vector<4x128xf32>
    %139 = arith.addf %137, %138 : vector<4x128xf32>
    %cst_103 = arith.constant 0.000000e+00 : f32
    %140 = vector.broadcast %cst_103 : f32 to vector<4x128xf32>
    %141 = arith.maximumf %139, %140 : vector<4x128xf32>
    %142 = arith.truncf %141 : vector<4x128xf32> to vector<4x128xbf16>
    %c0_104 = arith.constant 0 : index
    %c2_105 = arith.constant 2 : index
    %c0_106 = arith.constant 0 : index
    %c0_107 = arith.constant 0 : index
    %143 = vector.load %arg6[%c0_104, %c2_105, %c0_106, %c0_107] : memref<1x4x4x128xbf16, #tpu.memory_space<vmem>>, vector<1x1x4x128xbf16>
    %144 = vector.shape_cast %143 : vector<1x1x4x128xbf16> to vector<4x128xbf16>
    %145 = vector.shape_cast %142 : vector<4x128xbf16> to vector<1x1x4x128xbf16>
    tpu.vector_store %arg6[%c0_104, %c2_105, %c0_106, %c0_107], %145 {strides = array<i32>} : memref<1x4x4x128xbf16, #tpu.memory_space<vmem>>, vector<1x1x4x128xbf16>,
    %146 = vector.extract_strided_slice %118 {offsets = [0, 384], sizes = [4, 128], strides = [1, 1]} : vector<4x512xf32> to vector<4x128xf32>
    %147 = vector.extract_strided_slice %22 {offsets = [28, 0], sizes = [4, 128], strides = [1, 1]} : vector<32x128xf32> to vector<4x128xf32>
    %148 = arith.addf %146, %147 : vector<4x128xf32>
    %cst_108 = arith.constant 0.000000e+00 : f32
    %149 = vector.broadcast %cst_108 : f32 to vector<4x128xf32>
    %150 = arith.maximumf %148, %149 : vector<4x128xf32>
    %151 = arith.truncf %150 : vector<4x128xf32> to vector<4x128xbf16>
    %c0_109 = arith.constant 0 : index
    %c3_110 = arith.constant 3 : index
    %c0_111 = arith.constant 0 : index
    %c0_112 = arith.constant 0 : index
    %152 = vector.load %arg6[%c0_109, %c3_110, %c0_111, %c0_112] : memref<1x4x4x128xbf16, #tpu.memory_space<vmem>>, vector<1x1x4x128xbf16>
    %153 = vector.shape_cast %152 : vector<1x1x4x128xbf16> to vector<4x128xbf16>
    %154 = vector.shape_cast %151 : vector<4x128xbf16> to vector<1x1x4x128xbf16>
    tpu.vector_store %arg6[%c0_109, %c3_110, %c0_111, %c0_112], %154 {strides = array<i32>} : memref<1x4x4x128xbf16, #tpu.memory_space<vmem>>, vector<1x1x4x128xbf16>,
    return
  }
  func.func @transform_0(%arg0: i32) -> (i32, i32, i32) {
    %c0_i32 = arith.constant 0 : i32
    %c0_i32_0 = arith.constant 0 : i32
    %c0_i32_1 = arith.constant 0 : i32
    return %arg0, %c0_i32, %c0_i32_0 : i32, i32, i32
  }
  func.func @transform_1(%arg0: i32) -> (i32, i32) {
    %c0_i32 = arith.constant 0 : i32
    %c0_i32_0 = arith.constant 0 : i32
    %c0_i32_1 = arith.constant 0 : i32
    return %c0_i32, %c0_i32_0 : i32, i32
  }
  func.func @transform_2(%arg0: i32) -> (i32, i32) {
    %c0_i32 = arith.constant 0 : i32
    %c0_i32_0 = arith.constant 0 : i32
    %c0_i32_1 = arith.constant 0 : i32
    return %c0_i32, %c0_i32_0 : i32, i32
  }
  func.func @transform_3(%arg0: i32) -> (i32, i32) {
    %c0_i32 = arith.constant 0 : i32
    %c0_i32_0 = arith.constant 0 : i32
    %c0_i32_1 = arith.constant 0 : i32
    return %c0_i32, %c0_i32_0 : i32, i32
  }
  func.func @transform_4(%arg0: i32) -> (i32, i32) {
    %c0_i32 = arith.constant 0 : i32
    %c0_i32_0 = arith.constant 0 : i32
    %c0_i32_1 = arith.constant 0 : i32
    return %c0_i32, %c0_i32_0 : i32, i32
  }
  func.func @transform_5(%arg0: i32) -> (i32, i32, i32, i32) {
    %c0_i32 = arith.constant 0 : i32
    %c0_i32_0 = arith.constant 0 : i32
    %c0_i32_1 = arith.constant 0 : i32
    %c0_i32_2 = arith.constant 0 : i32
    return %arg0, %c0_i32, %c0_i32_0, %c0_i32_1 : i32, i32, i32, i32
  }
}

module attributes {stable_mosaic.version = 11 : i64} {
  func.func @kernel(%arg0: i32, %arg1: memref<1x4x438xbf16, #tpu.memory_space<vmem>>, %arg2: memref<16x36xbf16, #tpu.memory_space<vmem>>, %arg3: memref<2x18xbf16, #tpu.memory_space<vmem>>, %arg4: memref<18x2xf32, #tpu.memory_space<vmem>>, %arg5: memref<1x384xf32, #tpu.memory_space<vmem>>, %arg6: memref<1x4x2x384xbf16, #tpu.memory_space<vmem>>, %arg7: memref<4x2x438xbf16, #tpu.memory_space<vmem>>) attributes {dimension_semantics = [#tpu.dimension_semantics<parallel>], iteration_bounds = array<i64: 2>, scalar_prefetch = 0 : i64, scratch_operands = 1 : i64, tpu.core_type = #tpu.core_type<tc>, window_params = [{transform_indices = @transform_0, window_bounds = array<i64: 1, 4, 438>}, {pipeline_mode = #tpu.pipeline_mode<synchronous>, transform_indices = @transform_1, window_bounds = array<i64: 16, 36>}, {pipeline_mode = #tpu.pipeline_mode<synchronous>, transform_indices = @transform_2, window_bounds = array<i64: 2, 18>}, {pipeline_mode = #tpu.pipeline_mode<synchronous>, transform_indices = @transform_3, window_bounds = array<i64: 18, 2>}, {pipeline_mode = #tpu.pipeline_mode<synchronous>, transform_indices = @transform_4, window_bounds = array<i64: 1, 384>}, {transform_indices = @transform_5, window_bounds = array<i64: 1, 4, 2, 384>}]} {
    %c0 = arith.constant 0 : index
    %c0_0 = arith.constant 0 : index
    %c0_1 = arith.constant 0 : index
    %0 = vector.load %arg1[%c0, %c0_0, %c0_1] : memref<1x4x438xbf16, #tpu.memory_space<vmem>>, vector<1x4x438xbf16>
    %1 = vector.shape_cast %0 : vector<1x4x438xbf16> to vector<4x438xbf16>
    %2 = vector.extract_strided_slice %1 {offsets = [0, 0], sizes = [4, 384], strides = [1, 1]} : vector<4x438xbf16> to vector<4x384xbf16>
    %3 = vector.extract_strided_slice %1 {offsets = [0, 1], sizes = [4, 384], strides = [1, 1]} : vector<4x438xbf16> to vector<4x384xbf16>
    %4 = vector.extract_strided_slice %1 {offsets = [0, 2], sizes = [4, 384], strides = [1, 1]} : vector<4x438xbf16> to vector<4x384xbf16>
    %5 = vector.extract_strided_slice %1 {offsets = [0, 18], sizes = [4, 384], strides = [1, 1]} : vector<4x438xbf16> to vector<4x384xbf16>
    %6 = vector.extract_strided_slice %1 {offsets = [0, 19], sizes = [4, 384], strides = [1, 1]} : vector<4x438xbf16> to vector<4x384xbf16>
    %7 = vector.extract_strided_slice %1 {offsets = [0, 20], sizes = [4, 384], strides = [1, 1]} : vector<4x438xbf16> to vector<4x384xbf16>
    %8 = vector.extract_strided_slice %1 {offsets = [0, 36], sizes = [4, 384], strides = [1, 1]} : vector<4x438xbf16> to vector<4x384xbf16>
    %9 = vector.extract_strided_slice %1 {offsets = [0, 37], sizes = [4, 384], strides = [1, 1]} : vector<4x438xbf16> to vector<4x384xbf16>
    %10 = vector.extract_strided_slice %1 {offsets = [0, 38], sizes = [4, 384], strides = [1, 1]} : vector<4x438xbf16> to vector<4x384xbf16>
    %11 = tpu.concatenate %2, %3, %4, %5, %6, %7, %8, %9, %10 in 0 : vector<4x384xbf16>, vector<4x384xbf16>, vector<4x384xbf16>, vector<4x384xbf16>, vector<4x384xbf16>, vector<4x384xbf16>, vector<4x384xbf16>, vector<4x384xbf16>, vector<4x384xbf16> -> vector<36x384xbf16>
    %c0_2 = arith.constant 0 : index
    %c0_3 = arith.constant 0 : index
    %12 = vector.load %arg4[%c0_2, %c0_3] : memref<18x2xf32, #tpu.memory_space<vmem>>, vector<16x1xf32>
    %c0_4 = arith.constant 0 : index
    %c1 = arith.constant 1 : index
    %13 = vector.load %arg4[%c0_4, %c1] : memref<18x2xf32, #tpu.memory_space<vmem>>, vector<16x1xf32>
    %c16 = arith.constant 16 : index
    %c0_5 = arith.constant 0 : index
    %14 = vector.load %arg4[%c16, %c0_5] : memref<18x2xf32, #tpu.memory_space<vmem>>, vector<2x1xf32>
    %c16_6 = arith.constant 16 : index
    %c1_7 = arith.constant 1 : index
    %15 = vector.load %arg4[%c16_6, %c1_7] : memref<18x2xf32, #tpu.memory_space<vmem>>, vector<2x1xf32>
    %c0_8 = arith.constant 0 : index
    %c0_9 = arith.constant 0 : index
    %16 = vector.load %arg5[%c0_8, %c0_9] : memref<1x384xf32, #tpu.memory_space<vmem>>, vector<1x384xf32>
    %c0_10 = arith.constant 0 : index
    %c0_11 = arith.constant 0 : index
    %17 = vector.load %arg2[%c0_10, %c0_11] : memref<16x36xbf16, #tpu.memory_space<vmem>>, vector<16x36xbf16>
    %cst = arith.constant dense<0.000000e+00> : vector<16x384xf32>
    %18 = tpu.matmul %17, %11, %cst {dimension_numbers = #tpu.dot_dimension_numbers<[1], [0], [0], [1], [0, 0, 1, 1], [], []>} : vector<16x36xbf16>, vector<36x384xbf16>, vector<16x384xf32> -> vector<16x384xf32>
    %19 = vector.broadcast %12 : vector<16x1xf32> to vector<16x384xf32>
    %20 = arith.mulf %18, %19 : vector<16x384xf32>
    %21 = vector.broadcast %13 : vector<16x1xf32> to vector<16x384xf32>
    %22 = arith.addf %20, %21 : vector<16x384xf32>
    %23 = vector.extract_strided_slice %22 {offsets = [0, 0], sizes = [8, 384], strides = [1, 1]} : vector<16x384xf32> to vector<8x384xf32>
    %cst_12 = arith.constant 0.000000e+00 : f32
    %24 = vector.broadcast %cst_12 : f32 to vector<8x384xf32>
    %25 = arith.maximumf %23, %24 : vector<8x384xf32>
    %26 = vector.broadcast %16 : vector<1x384xf32> to vector<8x384xf32>
    %27 = arith.mulf %25, %26 : vector<8x384xf32>
    %28 = arith.truncf %27 : vector<8x384xf32> to vector<8x384xbf16>
    %cst_13 = arith.constant 0.000000e+00 : bf16
    %29 = vector.broadcast %cst_13 : bf16 to vector<2x19xbf16>
    %cst_14 = arith.constant 0.000000e+00 : bf16
    %30 = vector.broadcast %cst_14 : bf16 to vector<2x35xbf16>
    %c0_15 = arith.constant 0 : index
    %c0_16 = arith.constant 0 : index
    %c0_17 = arith.constant 0 : index
    %31 = vector.load %arg7[%c0_15, %c0_16, %c0_17] : memref<4x2x438xbf16, #tpu.memory_space<vmem>>, vector<1x2x19xbf16>
    %32 = vector.shape_cast %31 : vector<1x2x19xbf16> to vector<2x19xbf16>
    %33 = vector.shape_cast %29 : vector<2x19xbf16> to vector<1x2x19xbf16>
    tpu.vector_store %arg7[%c0_15, %c0_16, %c0_17], %33 {strides = array<i32>} : memref<4x2x438xbf16, #tpu.memory_space<vmem>>, vector<1x2x19xbf16>,
    %34 = vector.extract_strided_slice %28 {offsets = [0, 0], sizes = [2, 384], strides = [1, 1]} : vector<8x384xbf16> to vector<2x384xbf16>
    %c0_18 = arith.constant 0 : index
    %c0_19 = arith.constant 0 : index
    %c19 = arith.constant 19 : index
    %35 = vector.load %arg7[%c0_18, %c0_19, %c19] : memref<4x2x438xbf16, #tpu.memory_space<vmem>>, vector<1x2x384xbf16>
    %36 = vector.shape_cast %35 : vector<1x2x384xbf16> to vector<2x384xbf16>
    %37 = vector.shape_cast %34 : vector<2x384xbf16> to vector<1x2x384xbf16>
    tpu.vector_store %arg7[%c0_18, %c0_19, %c19], %37 {strides = array<i32>} : memref<4x2x438xbf16, #tpu.memory_space<vmem>>, vector<1x2x384xbf16>,
    %c0_20 = arith.constant 0 : index
    %c0_21 = arith.constant 0 : index
    %c403 = arith.constant 403 : index
    %38 = vector.load %arg7[%c0_20, %c0_21, %c403] : memref<4x2x438xbf16, #tpu.memory_space<vmem>>, vector<1x2x35xbf16>
    %39 = vector.shape_cast %38 : vector<1x2x35xbf16> to vector<2x35xbf16>
    %40 = vector.shape_cast %30 : vector<2x35xbf16> to vector<1x2x35xbf16>
    tpu.vector_store %arg7[%c0_20, %c0_21, %c403], %40 {strides = array<i32>} : memref<4x2x438xbf16, #tpu.memory_space<vmem>>, vector<1x2x35xbf16>,
    %c1_22 = arith.constant 1 : index
    %c0_23 = arith.constant 0 : index
    %c0_24 = arith.constant 0 : index
    %41 = vector.load %arg7[%c1_22, %c0_23, %c0_24] : memref<4x2x438xbf16, #tpu.memory_space<vmem>>, vector<1x2x19xbf16>
    %42 = vector.shape_cast %41 : vector<1x2x19xbf16> to vector<2x19xbf16>
    %43 = vector.shape_cast %29 : vector<2x19xbf16> to vector<1x2x19xbf16>
    tpu.vector_store %arg7[%c1_22, %c0_23, %c0_24], %43 {strides = array<i32>} : memref<4x2x438xbf16, #tpu.memory_space<vmem>>, vector<1x2x19xbf16>,
    %44 = vector.extract_strided_slice %28 {offsets = [2, 0], sizes = [2, 384], strides = [1, 1]} : vector<8x384xbf16> to vector<2x384xbf16>
    %c1_25 = arith.constant 1 : index
    %c0_26 = arith.constant 0 : index
    %c19_27 = arith.constant 19 : index
    %45 = vector.load %arg7[%c1_25, %c0_26, %c19_27] : memref<4x2x438xbf16, #tpu.memory_space<vmem>>, vector<1x2x384xbf16>
    %46 = vector.shape_cast %45 : vector<1x2x384xbf16> to vector<2x384xbf16>
    %47 = vector.shape_cast %44 : vector<2x384xbf16> to vector<1x2x384xbf16>
    tpu.vector_store %arg7[%c1_25, %c0_26, %c19_27], %47 {strides = array<i32>} : memref<4x2x438xbf16, #tpu.memory_space<vmem>>, vector<1x2x384xbf16>,
    %c1_28 = arith.constant 1 : index
    %c0_29 = arith.constant 0 : index
    %c403_30 = arith.constant 403 : index
    %48 = vector.load %arg7[%c1_28, %c0_29, %c403_30] : memref<4x2x438xbf16, #tpu.memory_space<vmem>>, vector<1x2x35xbf16>
    %49 = vector.shape_cast %48 : vector<1x2x35xbf16> to vector<2x35xbf16>
    %50 = vector.shape_cast %30 : vector<2x35xbf16> to vector<1x2x35xbf16>
    tpu.vector_store %arg7[%c1_28, %c0_29, %c403_30], %50 {strides = array<i32>} : memref<4x2x438xbf16, #tpu.memory_space<vmem>>, vector<1x2x35xbf16>,
    %c2 = arith.constant 2 : index
    %c0_31 = arith.constant 0 : index
    %c0_32 = arith.constant 0 : index
    %51 = vector.load %arg7[%c2, %c0_31, %c0_32] : memref<4x2x438xbf16, #tpu.memory_space<vmem>>, vector<1x2x19xbf16>
    %52 = vector.shape_cast %51 : vector<1x2x19xbf16> to vector<2x19xbf16>
    %53 = vector.shape_cast %29 : vector<2x19xbf16> to vector<1x2x19xbf16>
    tpu.vector_store %arg7[%c2, %c0_31, %c0_32], %53 {strides = array<i32>} : memref<4x2x438xbf16, #tpu.memory_space<vmem>>, vector<1x2x19xbf16>,
    %54 = vector.extract_strided_slice %28 {offsets = [4, 0], sizes = [2, 384], strides = [1, 1]} : vector<8x384xbf16> to vector<2x384xbf16>
    %c2_33 = arith.constant 2 : index
    %c0_34 = arith.constant 0 : index
    %c19_35 = arith.constant 19 : index
    %55 = vector.load %arg7[%c2_33, %c0_34, %c19_35] : memref<4x2x438xbf16, #tpu.memory_space<vmem>>, vector<1x2x384xbf16>
    %56 = vector.shape_cast %55 : vector<1x2x384xbf16> to vector<2x384xbf16>
    %57 = vector.shape_cast %54 : vector<2x384xbf16> to vector<1x2x384xbf16>
    tpu.vector_store %arg7[%c2_33, %c0_34, %c19_35], %57 {strides = array<i32>} : memref<4x2x438xbf16, #tpu.memory_space<vmem>>, vector<1x2x384xbf16>,
    %c2_36 = arith.constant 2 : index
    %c0_37 = arith.constant 0 : index
    %c403_38 = arith.constant 403 : index
    %58 = vector.load %arg7[%c2_36, %c0_37, %c403_38] : memref<4x2x438xbf16, #tpu.memory_space<vmem>>, vector<1x2x35xbf16>
    %59 = vector.shape_cast %58 : vector<1x2x35xbf16> to vector<2x35xbf16>
    %60 = vector.shape_cast %30 : vector<2x35xbf16> to vector<1x2x35xbf16>
    tpu.vector_store %arg7[%c2_36, %c0_37, %c403_38], %60 {strides = array<i32>} : memref<4x2x438xbf16, #tpu.memory_space<vmem>>, vector<1x2x35xbf16>,
    %c3 = arith.constant 3 : index
    %c0_39 = arith.constant 0 : index
    %c0_40 = arith.constant 0 : index
    %61 = vector.load %arg7[%c3, %c0_39, %c0_40] : memref<4x2x438xbf16, #tpu.memory_space<vmem>>, vector<1x2x19xbf16>
    %62 = vector.shape_cast %61 : vector<1x2x19xbf16> to vector<2x19xbf16>
    %63 = vector.shape_cast %29 : vector<2x19xbf16> to vector<1x2x19xbf16>
    tpu.vector_store %arg7[%c3, %c0_39, %c0_40], %63 {strides = array<i32>} : memref<4x2x438xbf16, #tpu.memory_space<vmem>>, vector<1x2x19xbf16>,
    %64 = vector.extract_strided_slice %28 {offsets = [6, 0], sizes = [2, 384], strides = [1, 1]} : vector<8x384xbf16> to vector<2x384xbf16>
    %c3_41 = arith.constant 3 : index
    %c0_42 = arith.constant 0 : index
    %c19_43 = arith.constant 19 : index
    %65 = vector.load %arg7[%c3_41, %c0_42, %c19_43] : memref<4x2x438xbf16, #tpu.memory_space<vmem>>, vector<1x2x384xbf16>
    %66 = vector.shape_cast %65 : vector<1x2x384xbf16> to vector<2x384xbf16>
    %67 = vector.shape_cast %64 : vector<2x384xbf16> to vector<1x2x384xbf16>
    tpu.vector_store %arg7[%c3_41, %c0_42, %c19_43], %67 {strides = array<i32>} : memref<4x2x438xbf16, #tpu.memory_space<vmem>>, vector<1x2x384xbf16>,
    %c3_44 = arith.constant 3 : index
    %c0_45 = arith.constant 0 : index
    %c403_46 = arith.constant 403 : index
    %68 = vector.load %arg7[%c3_44, %c0_45, %c403_46] : memref<4x2x438xbf16, #tpu.memory_space<vmem>>, vector<1x2x35xbf16>
    %69 = vector.shape_cast %68 : vector<1x2x35xbf16> to vector<2x35xbf16>
    %70 = vector.shape_cast %30 : vector<2x35xbf16> to vector<1x2x35xbf16>
    tpu.vector_store %arg7[%c3_44, %c0_45, %c403_46], %70 {strides = array<i32>} : memref<4x2x438xbf16, #tpu.memory_space<vmem>>, vector<1x2x35xbf16>,
    %c3_47 = arith.constant 3 : index
    %c0_48 = arith.constant 0 : index
    %c0_49 = arith.constant 0 : index
    %71 = vector.load %arg7[%c3_47, %c0_48, %c0_49] : memref<4x2x438xbf16, #tpu.memory_space<vmem>>, vector<1x2x384xbf16>
    %72 = vector.shape_cast %71 : vector<1x2x384xbf16> to vector<2x384xbf16>
    %c2_50 = arith.constant 2 : index
    %c0_51 = arith.constant 0 : index
    %c1_52 = arith.constant 1 : index
    %73 = vector.load %arg7[%c2_50, %c0_51, %c1_52] : memref<4x2x438xbf16, #tpu.memory_space<vmem>>, vector<1x2x384xbf16>
    %74 = vector.shape_cast %73 : vector<1x2x384xbf16> to vector<2x384xbf16>
    %c1_53 = arith.constant 1 : index
    %c0_54 = arith.constant 0 : index
    %c18 = arith.constant 18 : index
    %75 = vector.load %arg7[%c1_53, %c0_54, %c18] : memref<4x2x438xbf16, #tpu.memory_space<vmem>>, vector<1x2x384xbf16>
    %76 = vector.shape_cast %75 : vector<1x2x384xbf16> to vector<2x384xbf16>
    %c0_55 = arith.constant 0 : index
    %c0_56 = arith.constant 0 : index
    %c19_57 = arith.constant 19 : index
    %77 = vector.load %arg7[%c0_55, %c0_56, %c19_57] : memref<4x2x438xbf16, #tpu.memory_space<vmem>>, vector<1x2x384xbf16>
    %78 = vector.shape_cast %77 : vector<1x2x384xbf16> to vector<2x384xbf16>
    %79 = tpu.concatenate %72, %74, %76, %78 in 1 : vector<2x384xbf16>, vector<2x384xbf16>, vector<2x384xbf16>, vector<2x384xbf16> -> vector<2x1536xbf16>
    %c3_58 = arith.constant 3 : index
    %c0_59 = arith.constant 0 : index
    %c1_60 = arith.constant 1 : index
    %80 = vector.load %arg7[%c3_58, %c0_59, %c1_60] : memref<4x2x438xbf16, #tpu.memory_space<vmem>>, vector<1x2x384xbf16>
    %81 = vector.shape_cast %80 : vector<1x2x384xbf16> to vector<2x384xbf16>
    %c1_61 = arith.constant 1 : index
    %c0_62 = arith.constant 0 : index
    %c19_63 = arith.constant 19 : index
    %82 = vector.load %arg7[%c1_61, %c0_62, %c19_63] : memref<4x2x438xbf16, #tpu.memory_space<vmem>>, vector<1x2x384xbf16>
    %83 = vector.shape_cast %82 : vector<1x2x384xbf16> to vector<2x384xbf16>
    %84 = tpu.concatenate %74, %81, %78, %83 in 1 : vector<2x384xbf16>, vector<2x384xbf16>, vector<2x384xbf16>, vector<2x384xbf16> -> vector<2x1536xbf16>
    %c2_64 = arith.constant 2 : index
    %c0_65 = arith.constant 0 : index
    %c2_66 = arith.constant 2 : index
    %85 = vector.load %arg7[%c2_64, %c0_65, %c2_66] : memref<4x2x438xbf16, #tpu.memory_space<vmem>>, vector<1x2x384xbf16>
    %86 = vector.shape_cast %85 : vector<1x2x384xbf16> to vector<2x384xbf16>
    %c0_67 = arith.constant 0 : index
    %c0_68 = arith.constant 0 : index
    %c20 = arith.constant 20 : index
    %87 = vector.load %arg7[%c0_67, %c0_68, %c20] : memref<4x2x438xbf16, #tpu.memory_space<vmem>>, vector<1x2x384xbf16>
    %88 = vector.shape_cast %87 : vector<1x2x384xbf16> to vector<2x384xbf16>
    %89 = tpu.concatenate %81, %86, %83, %88 in 1 : vector<2x384xbf16>, vector<2x384xbf16>, vector<2x384xbf16>, vector<2x384xbf16> -> vector<2x1536xbf16>
    %c3_69 = arith.constant 3 : index
    %c0_70 = arith.constant 0 : index
    %c18_71 = arith.constant 18 : index
    %90 = vector.load %arg7[%c3_69, %c0_70, %c18_71] : memref<4x2x438xbf16, #tpu.memory_space<vmem>>, vector<1x2x384xbf16>
    %91 = vector.shape_cast %90 : vector<1x2x384xbf16> to vector<2x384xbf16>
    %c2_72 = arith.constant 2 : index
    %c0_73 = arith.constant 0 : index
    %c19_74 = arith.constant 19 : index
    %92 = vector.load %arg7[%c2_72, %c0_73, %c19_74] : memref<4x2x438xbf16, #tpu.memory_space<vmem>>, vector<1x2x384xbf16>
    %93 = vector.shape_cast %92 : vector<1x2x384xbf16> to vector<2x384xbf16>
    %94 = tpu.concatenate %76, %78, %91, %93 in 1 : vector<2x384xbf16>, vector<2x384xbf16>, vector<2x384xbf16>, vector<2x384xbf16> -> vector<2x1536xbf16>
    %c3_75 = arith.constant 3 : index
    %c0_76 = arith.constant 0 : index
    %c19_77 = arith.constant 19 : index
    %95 = vector.load %arg7[%c3_75, %c0_76, %c19_77] : memref<4x2x438xbf16, #tpu.memory_space<vmem>>, vector<1x2x384xbf16>
    %96 = vector.shape_cast %95 : vector<1x2x384xbf16> to vector<2x384xbf16>
    %97 = tpu.concatenate %78, %83, %93, %96 in 1 : vector<2x384xbf16>, vector<2x384xbf16>, vector<2x384xbf16>, vector<2x384xbf16> -> vector<2x1536xbf16>
    %c2_78 = arith.constant 2 : index
    %c0_79 = arith.constant 0 : index
    %c20_80 = arith.constant 20 : index
    %98 = vector.load %arg7[%c2_78, %c0_79, %c20_80] : memref<4x2x438xbf16, #tpu.memory_space<vmem>>, vector<1x2x384xbf16>
    %99 = vector.shape_cast %98 : vector<1x2x384xbf16> to vector<2x384xbf16>
    %100 = tpu.concatenate %83, %88, %96, %99 in 1 : vector<2x384xbf16>, vector<2x384xbf16>, vector<2x384xbf16>, vector<2x384xbf16> -> vector<2x1536xbf16>
    %c1_81 = arith.constant 1 : index
    %c0_82 = arith.constant 0 : index
    %c36 = arith.constant 36 : index
    %101 = vector.load %arg7[%c1_81, %c0_82, %c36] : memref<4x2x438xbf16, #tpu.memory_space<vmem>>, vector<1x2x384xbf16>
    %102 = vector.shape_cast %101 : vector<1x2x384xbf16> to vector<2x384xbf16>
    %c0_83 = arith.constant 0 : index
    %c0_84 = arith.constant 0 : index
    %c37 = arith.constant 37 : index
    %103 = vector.load %arg7[%c0_83, %c0_84, %c37] : memref<4x2x438xbf16, #tpu.memory_space<vmem>>, vector<1x2x384xbf16>
    %104 = vector.shape_cast %103 : vector<1x2x384xbf16> to vector<2x384xbf16>
    %105 = tpu.concatenate %91, %93, %102, %104 in 1 : vector<2x384xbf16>, vector<2x384xbf16>, vector<2x384xbf16>, vector<2x384xbf16> -> vector<2x1536xbf16>
    %c1_85 = arith.constant 1 : index
    %c0_86 = arith.constant 0 : index
    %c37_87 = arith.constant 37 : index
    %106 = vector.load %arg7[%c1_85, %c0_86, %c37_87] : memref<4x2x438xbf16, #tpu.memory_space<vmem>>, vector<1x2x384xbf16>
    %107 = vector.shape_cast %106 : vector<1x2x384xbf16> to vector<2x384xbf16>
    %108 = tpu.concatenate %93, %96, %104, %107 in 1 : vector<2x384xbf16>, vector<2x384xbf16>, vector<2x384xbf16>, vector<2x384xbf16> -> vector<2x1536xbf16>
    %c0_88 = arith.constant 0 : index
    %c0_89 = arith.constant 0 : index
    %c38 = arith.constant 38 : index
    %109 = vector.load %arg7[%c0_88, %c0_89, %c38] : memref<4x2x438xbf16, #tpu.memory_space<vmem>>, vector<1x2x384xbf16>
    %110 = vector.shape_cast %109 : vector<1x2x384xbf16> to vector<2x384xbf16>
    %111 = tpu.concatenate %96, %99, %107, %110 in 1 : vector<2x384xbf16>, vector<2x384xbf16>, vector<2x384xbf16>, vector<2x384xbf16> -> vector<2x1536xbf16>
    %112 = tpu.concatenate %79, %84, %89, %94, %97, %100, %105, %108, %111 in 0 : vector<2x1536xbf16>, vector<2x1536xbf16>, vector<2x1536xbf16>, vector<2x1536xbf16>, vector<2x1536xbf16>, vector<2x1536xbf16>, vector<2x1536xbf16>, vector<2x1536xbf16>, vector<2x1536xbf16> -> vector<18x1536xbf16>
    %c0_90 = arith.constant 0 : index
    %c0_91 = arith.constant 0 : index
    %113 = vector.load %arg3[%c0_90, %c0_91] : memref<2x18xbf16, #tpu.memory_space<vmem>>, vector<2x18xbf16>
    %cst_92 = arith.constant dense<0.000000e+00> : vector<2x1536xf32>
    %114 = tpu.matmul %113, %112, %cst_92 {dimension_numbers = #tpu.dot_dimension_numbers<[1], [0], [0], [1], [0, 0, 1, 1], [], []>} : vector<2x18xbf16>, vector<18x1536xbf16>, vector<2x1536xf32> -> vector<2x1536xf32>
    %115 = vector.broadcast %14 : vector<2x1xf32> to vector<2x1536xf32>
    %116 = arith.mulf %114, %115 : vector<2x1536xf32>
    %117 = vector.broadcast %15 : vector<2x1xf32> to vector<2x1536xf32>
    %118 = arith.addf %116, %117 : vector<2x1536xf32>
    %119 = vector.extract_strided_slice %118 {offsets = [0, 0], sizes = [2, 384], strides = [1, 1]} : vector<2x1536xf32> to vector<2x384xf32>
    %120 = vector.extract_strided_slice %22 {offsets = [8, 0], sizes = [2, 384], strides = [1, 1]} : vector<16x384xf32> to vector<2x384xf32>
    %121 = arith.addf %119, %120 : vector<2x384xf32>
    %cst_93 = arith.constant 0.000000e+00 : f32
    %122 = vector.broadcast %cst_93 : f32 to vector<2x384xf32>
    %123 = arith.maximumf %121, %122 : vector<2x384xf32>
    %124 = arith.truncf %123 : vector<2x384xf32> to vector<2x384xbf16>
    %c0_94 = arith.constant 0 : index
    %c0_95 = arith.constant 0 : index
    %c0_96 = arith.constant 0 : index
    %c0_97 = arith.constant 0 : index
    %125 = vector.load %arg6[%c0_94, %c0_95, %c0_96, %c0_97] : memref<1x4x2x384xbf16, #tpu.memory_space<vmem>>, vector<1x1x2x384xbf16>
    %126 = vector.shape_cast %125 : vector<1x1x2x384xbf16> to vector<2x384xbf16>
    %127 = vector.shape_cast %124 : vector<2x384xbf16> to vector<1x1x2x384xbf16>
    tpu.vector_store %arg6[%c0_94, %c0_95, %c0_96, %c0_97], %127 {strides = array<i32>} : memref<1x4x2x384xbf16, #tpu.memory_space<vmem>>, vector<1x1x2x384xbf16>,
    %128 = vector.extract_strided_slice %118 {offsets = [0, 384], sizes = [2, 384], strides = [1, 1]} : vector<2x1536xf32> to vector<2x384xf32>
    %129 = vector.extract_strided_slice %22 {offsets = [10, 0], sizes = [2, 384], strides = [1, 1]} : vector<16x384xf32> to vector<2x384xf32>
    %130 = arith.addf %128, %129 : vector<2x384xf32>
    %cst_98 = arith.constant 0.000000e+00 : f32
    %131 = vector.broadcast %cst_98 : f32 to vector<2x384xf32>
    %132 = arith.maximumf %130, %131 : vector<2x384xf32>
    %133 = arith.truncf %132 : vector<2x384xf32> to vector<2x384xbf16>
    %c0_99 = arith.constant 0 : index
    %c1_100 = arith.constant 1 : index
    %c0_101 = arith.constant 0 : index
    %c0_102 = arith.constant 0 : index
    %134 = vector.load %arg6[%c0_99, %c1_100, %c0_101, %c0_102] : memref<1x4x2x384xbf16, #tpu.memory_space<vmem>>, vector<1x1x2x384xbf16>
    %135 = vector.shape_cast %134 : vector<1x1x2x384xbf16> to vector<2x384xbf16>
    %136 = vector.shape_cast %133 : vector<2x384xbf16> to vector<1x1x2x384xbf16>
    tpu.vector_store %arg6[%c0_99, %c1_100, %c0_101, %c0_102], %136 {strides = array<i32>} : memref<1x4x2x384xbf16, #tpu.memory_space<vmem>>, vector<1x1x2x384xbf16>,
    %137 = vector.extract_strided_slice %118 {offsets = [0, 768], sizes = [2, 384], strides = [1, 1]} : vector<2x1536xf32> to vector<2x384xf32>
    %138 = vector.extract_strided_slice %22 {offsets = [12, 0], sizes = [2, 384], strides = [1, 1]} : vector<16x384xf32> to vector<2x384xf32>
    %139 = arith.addf %137, %138 : vector<2x384xf32>
    %cst_103 = arith.constant 0.000000e+00 : f32
    %140 = vector.broadcast %cst_103 : f32 to vector<2x384xf32>
    %141 = arith.maximumf %139, %140 : vector<2x384xf32>
    %142 = arith.truncf %141 : vector<2x384xf32> to vector<2x384xbf16>
    %c0_104 = arith.constant 0 : index
    %c2_105 = arith.constant 2 : index
    %c0_106 = arith.constant 0 : index
    %c0_107 = arith.constant 0 : index
    %143 = vector.load %arg6[%c0_104, %c2_105, %c0_106, %c0_107] : memref<1x4x2x384xbf16, #tpu.memory_space<vmem>>, vector<1x1x2x384xbf16>
    %144 = vector.shape_cast %143 : vector<1x1x2x384xbf16> to vector<2x384xbf16>
    %145 = vector.shape_cast %142 : vector<2x384xbf16> to vector<1x1x2x384xbf16>
    tpu.vector_store %arg6[%c0_104, %c2_105, %c0_106, %c0_107], %145 {strides = array<i32>} : memref<1x4x2x384xbf16, #tpu.memory_space<vmem>>, vector<1x1x2x384xbf16>,
    %146 = vector.extract_strided_slice %118 {offsets = [0, 1152], sizes = [2, 384], strides = [1, 1]} : vector<2x1536xf32> to vector<2x384xf32>
    %147 = vector.extract_strided_slice %22 {offsets = [14, 0], sizes = [2, 384], strides = [1, 1]} : vector<16x384xf32> to vector<2x384xf32>
    %148 = arith.addf %146, %147 : vector<2x384xf32>
    %cst_108 = arith.constant 0.000000e+00 : f32
    %149 = vector.broadcast %cst_108 : f32 to vector<2x384xf32>
    %150 = arith.maximumf %148, %149 : vector<2x384xf32>
    %151 = arith.truncf %150 : vector<2x384xf32> to vector<2x384xbf16>
    %c0_109 = arith.constant 0 : index
    %c3_110 = arith.constant 3 : index
    %c0_111 = arith.constant 0 : index
    %c0_112 = arith.constant 0 : index
    %152 = vector.load %arg6[%c0_109, %c3_110, %c0_111, %c0_112] : memref<1x4x2x384xbf16, #tpu.memory_space<vmem>>, vector<1x1x2x384xbf16>
    %153 = vector.shape_cast %152 : vector<1x1x2x384xbf16> to vector<2x384xbf16>
    %154 = vector.shape_cast %151 : vector<2x384xbf16> to vector<1x1x2x384xbf16>
    tpu.vector_store %arg6[%c0_109, %c3_110, %c0_111, %c0_112], %154 {strides = array<i32>} : memref<1x4x2x384xbf16, #tpu.memory_space<vmem>>, vector<1x1x2x384xbf16>,
    return
  }
  func.func @transform_0(%arg0: i32) -> (i32, i32, i32) {
    %c0_i32 = arith.constant 0 : i32
    %c0_i32_0 = arith.constant 0 : i32
    %c0_i32_1 = arith.constant 0 : i32
    return %arg0, %c0_i32, %c0_i32_0 : i32, i32, i32
  }
  func.func @transform_1(%arg0: i32) -> (i32, i32) {
    %c0_i32 = arith.constant 0 : i32
    %c0_i32_0 = arith.constant 0 : i32
    %c0_i32_1 = arith.constant 0 : i32
    return %c0_i32, %c0_i32_0 : i32, i32
  }
  func.func @transform_2(%arg0: i32) -> (i32, i32) {
    %c0_i32 = arith.constant 0 : i32
    %c0_i32_0 = arith.constant 0 : i32
    %c0_i32_1 = arith.constant 0 : i32
    return %c0_i32, %c0_i32_0 : i32, i32
  }
  func.func @transform_3(%arg0: i32) -> (i32, i32) {
    %c0_i32 = arith.constant 0 : i32
    %c0_i32_0 = arith.constant 0 : i32
    %c0_i32_1 = arith.constant 0 : i32
    return %c0_i32, %c0_i32_0 : i32, i32
  }
  func.func @transform_4(%arg0: i32) -> (i32, i32) {
    %c0_i32 = arith.constant 0 : i32
    %c0_i32_0 = arith.constant 0 : i32
    %c0_i32_1 = arith.constant 0 : i32
    return %c0_i32, %c0_i32_0 : i32, i32
  }
  func.func @transform_5(%arg0: i32) -> (i32, i32, i32, i32) {
    %c0_i32 = arith.constant 0 : i32
    %c0_i32_0 = arith.constant 0 : i32
    %c0_i32_1 = arith.constant 0 : i32
    %c0_i32_2 = arith.constant 0 : i32
    return %arg0, %c0_i32, %c0_i32_0, %c0_i32_1 : i32, i32, i32, i32
  }
}

module attributes {stable_mosaic.version = 11 : i64} {
  func.func @kernel(%arg0: i32, %arg1: memref<1x2x1254xbf16, #tpu.memory_space<vmem>>, %arg2: memref<8x18xbf16, #tpu.memory_space<vmem>>, %arg3: memref<1x9xbf16, #tpu.memory_space<vmem>>, %arg4: memref<9x2xf32, #tpu.memory_space<vmem>>, %arg5: memref<1x1152xf32, #tpu.memory_space<vmem>>, %arg6: memref<1x4x1x1152xf32, #tpu.memory_space<vmem>>, %arg7: memref<4x1x1254xbf16, #tpu.memory_space<vmem>>) attributes {dimension_semantics = [#tpu.dimension_semantics<parallel>], iteration_bounds = array<i64: 2>, scalar_prefetch = 0 : i64, scratch_operands = 1 : i64, tpu.core_type = #tpu.core_type<tc>, window_params = [{transform_indices = @transform_0, window_bounds = array<i64: 1, 2, 1254>}, {pipeline_mode = #tpu.pipeline_mode<synchronous>, transform_indices = @transform_1, window_bounds = array<i64: 8, 18>}, {pipeline_mode = #tpu.pipeline_mode<synchronous>, transform_indices = @transform_2, window_bounds = array<i64: 1, 9>}, {pipeline_mode = #tpu.pipeline_mode<synchronous>, transform_indices = @transform_3, window_bounds = array<i64: 9, 2>}, {pipeline_mode = #tpu.pipeline_mode<synchronous>, transform_indices = @transform_4, window_bounds = array<i64: 1, 1152>}, {transform_indices = @transform_5, window_bounds = array<i64: 1, 4, 1, 1152>}]} {
    %c0 = arith.constant 0 : index
    %c0_0 = arith.constant 0 : index
    %c0_1 = arith.constant 0 : index
    %0 = vector.load %arg1[%c0, %c0_0, %c0_1] : memref<1x2x1254xbf16, #tpu.memory_space<vmem>>, vector<1x2x1254xbf16>
    %1 = vector.shape_cast %0 : vector<1x2x1254xbf16> to vector<2x1254xbf16>
    %2 = vector.extract_strided_slice %1 {offsets = [0, 0], sizes = [2, 1152], strides = [1, 1]} : vector<2x1254xbf16> to vector<2x1152xbf16>
    %3 = vector.extract_strided_slice %1 {offsets = [0, 1], sizes = [2, 1152], strides = [1, 1]} : vector<2x1254xbf16> to vector<2x1152xbf16>
    %4 = vector.extract_strided_slice %1 {offsets = [0, 2], sizes = [2, 1152], strides = [1, 1]} : vector<2x1254xbf16> to vector<2x1152xbf16>
    %5 = vector.extract_strided_slice %1 {offsets = [0, 34], sizes = [2, 1152], strides = [1, 1]} : vector<2x1254xbf16> to vector<2x1152xbf16>
    %6 = vector.extract_strided_slice %1 {offsets = [0, 35], sizes = [2, 1152], strides = [1, 1]} : vector<2x1254xbf16> to vector<2x1152xbf16>
    %7 = vector.extract_strided_slice %1 {offsets = [0, 36], sizes = [2, 1152], strides = [1, 1]} : vector<2x1254xbf16> to vector<2x1152xbf16>
    %8 = vector.extract_strided_slice %1 {offsets = [0, 68], sizes = [2, 1152], strides = [1, 1]} : vector<2x1254xbf16> to vector<2x1152xbf16>
    %9 = vector.extract_strided_slice %1 {offsets = [0, 69], sizes = [2, 1152], strides = [1, 1]} : vector<2x1254xbf16> to vector<2x1152xbf16>
    %10 = vector.extract_strided_slice %1 {offsets = [0, 70], sizes = [2, 1152], strides = [1, 1]} : vector<2x1254xbf16> to vector<2x1152xbf16>
    %11 = tpu.concatenate %2, %3, %4, %5, %6, %7, %8, %9, %10 in 0 : vector<2x1152xbf16>, vector<2x1152xbf16>, vector<2x1152xbf16>, vector<2x1152xbf16>, vector<2x1152xbf16>, vector<2x1152xbf16>, vector<2x1152xbf16>, vector<2x1152xbf16>, vector<2x1152xbf16> -> vector<18x1152xbf16>
    %c0_2 = arith.constant 0 : index
    %c0_3 = arith.constant 0 : index
    %12 = vector.load %arg4[%c0_2, %c0_3] : memref<9x2xf32, #tpu.memory_space<vmem>>, vector<8x1xf32>
    %c0_4 = arith.constant 0 : index
    %c1 = arith.constant 1 : index
    %13 = vector.load %arg4[%c0_4, %c1] : memref<9x2xf32, #tpu.memory_space<vmem>>, vector<8x1xf32>
    %c8 = arith.constant 8 : index
    %c0_5 = arith.constant 0 : index
    %14 = vector.load %arg4[%c8, %c0_5] : memref<9x2xf32, #tpu.memory_space<vmem>>, vector<1x1xf32>
    %c8_6 = arith.constant 8 : index
    %c1_7 = arith.constant 1 : index
    %15 = vector.load %arg4[%c8_6, %c1_7] : memref<9x2xf32, #tpu.memory_space<vmem>>, vector<1x1xf32>
    %c0_8 = arith.constant 0 : index
    %c0_9 = arith.constant 0 : index
    %16 = vector.load %arg5[%c0_8, %c0_9] : memref<1x1152xf32, #tpu.memory_space<vmem>>, vector<1x1152xf32>
    %c0_10 = arith.constant 0 : index
    %c0_11 = arith.constant 0 : index
    %17 = vector.load %arg2[%c0_10, %c0_11] : memref<8x18xbf16, #tpu.memory_space<vmem>>, vector<8x18xbf16>
    %cst = arith.constant dense<0.000000e+00> : vector<8x1152xf32>
    %18 = tpu.matmul %17, %11, %cst {dimension_numbers = #tpu.dot_dimension_numbers<[1], [0], [0], [1], [0, 0, 1, 1], [], []>} : vector<8x18xbf16>, vector<18x1152xbf16>, vector<8x1152xf32> -> vector<8x1152xf32>
    %19 = vector.broadcast %12 : vector<8x1xf32> to vector<8x1152xf32>
    %20 = arith.mulf %18, %19 : vector<8x1152xf32>
    %21 = vector.broadcast %13 : vector<8x1xf32> to vector<8x1152xf32>
    %22 = arith.addf %20, %21 : vector<8x1152xf32>
    %23 = vector.extract_strided_slice %22 {offsets = [0, 0], sizes = [4, 1152], strides = [1, 1]} : vector<8x1152xf32> to vector<4x1152xf32>
    %cst_12 = arith.constant 0.000000e+00 : f32
    %24 = vector.broadcast %cst_12 : f32 to vector<4x1152xf32>
    %25 = arith.maximumf %23, %24 : vector<4x1152xf32>
    %26 = vector.broadcast %16 : vector<1x1152xf32> to vector<4x1152xf32>
    %27 = arith.mulf %25, %26 : vector<4x1152xf32>
    %28 = arith.truncf %27 : vector<4x1152xf32> to vector<4x1152xbf16>
    %cst_13 = arith.constant 0.000000e+00 : bf16
    %29 = vector.broadcast %cst_13 : bf16 to vector<1x35xbf16>
    %cst_14 = arith.constant 0.000000e+00 : bf16
    %30 = vector.broadcast %cst_14 : bf16 to vector<1x67xbf16>
    %c0_15 = arith.constant 0 : index
    %c0_16 = arith.constant 0 : index
    %c0_17 = arith.constant 0 : index
    %31 = vector.load %arg7[%c0_15, %c0_16, %c0_17] : memref<4x1x1254xbf16, #tpu.memory_space<vmem>>, vector<1x1x35xbf16>
    %32 = vector.shape_cast %31 : vector<1x1x35xbf16> to vector<1x35xbf16>
    %33 = vector.shape_cast %29 : vector<1x35xbf16> to vector<1x1x35xbf16>
    tpu.vector_store %arg7[%c0_15, %c0_16, %c0_17], %33 {strides = array<i32>} : memref<4x1x1254xbf16, #tpu.memory_space<vmem>>, vector<1x1x35xbf16>,
    %34 = vector.extract_strided_slice %28 {offsets = [0, 0], sizes = [1, 1152], strides = [1, 1]} : vector<4x1152xbf16> to vector<1x1152xbf16>
    %c0_18 = arith.constant 0 : index
    %c0_19 = arith.constant 0 : index
    %c35 = arith.constant 35 : index
    %35 = vector.load %arg7[%c0_18, %c0_19, %c35] : memref<4x1x1254xbf16, #tpu.memory_space<vmem>>, vector<1x1x1152xbf16>
    %36 = vector.shape_cast %35 : vector<1x1x1152xbf16> to vector<1x1152xbf16>
    %37 = vector.shape_cast %34 : vector<1x1152xbf16> to vector<1x1x1152xbf16>
    tpu.vector_store %arg7[%c0_18, %c0_19, %c35], %37 {strides = array<i32>} : memref<4x1x1254xbf16, #tpu.memory_space<vmem>>, vector<1x1x1152xbf16>,
    %c0_20 = arith.constant 0 : index
    %c0_21 = arith.constant 0 : index
    %c1187 = arith.constant 1187 : index
    %38 = vector.load %arg7[%c0_20, %c0_21, %c1187] : memref<4x1x1254xbf16, #tpu.memory_space<vmem>>, vector<1x1x67xbf16>
    %39 = vector.shape_cast %38 : vector<1x1x67xbf16> to vector<1x67xbf16>
    %40 = vector.shape_cast %30 : vector<1x67xbf16> to vector<1x1x67xbf16>
    tpu.vector_store %arg7[%c0_20, %c0_21, %c1187], %40 {strides = array<i32>} : memref<4x1x1254xbf16, #tpu.memory_space<vmem>>, vector<1x1x67xbf16>,
    %c1_22 = arith.constant 1 : index
    %c0_23 = arith.constant 0 : index
    %c0_24 = arith.constant 0 : index
    %41 = vector.load %arg7[%c1_22, %c0_23, %c0_24] : memref<4x1x1254xbf16, #tpu.memory_space<vmem>>, vector<1x1x35xbf16>
    %42 = vector.shape_cast %41 : vector<1x1x35xbf16> to vector<1x35xbf16>
    %43 = vector.shape_cast %29 : vector<1x35xbf16> to vector<1x1x35xbf16>
    tpu.vector_store %arg7[%c1_22, %c0_23, %c0_24], %43 {strides = array<i32>} : memref<4x1x1254xbf16, #tpu.memory_space<vmem>>, vector<1x1x35xbf16>,
    %44 = vector.extract_strided_slice %28 {offsets = [1, 0], sizes = [1, 1152], strides = [1, 1]} : vector<4x1152xbf16> to vector<1x1152xbf16>
    %c1_25 = arith.constant 1 : index
    %c0_26 = arith.constant 0 : index
    %c35_27 = arith.constant 35 : index
    %45 = vector.load %arg7[%c1_25, %c0_26, %c35_27] : memref<4x1x1254xbf16, #tpu.memory_space<vmem>>, vector<1x1x1152xbf16>
    %46 = vector.shape_cast %45 : vector<1x1x1152xbf16> to vector<1x1152xbf16>
    %47 = vector.shape_cast %44 : vector<1x1152xbf16> to vector<1x1x1152xbf16>
    tpu.vector_store %arg7[%c1_25, %c0_26, %c35_27], %47 {strides = array<i32>} : memref<4x1x1254xbf16, #tpu.memory_space<vmem>>, vector<1x1x1152xbf16>,
    %c1_28 = arith.constant 1 : index
    %c0_29 = arith.constant 0 : index
    %c1187_30 = arith.constant 1187 : index
    %48 = vector.load %arg7[%c1_28, %c0_29, %c1187_30] : memref<4x1x1254xbf16, #tpu.memory_space<vmem>>, vector<1x1x67xbf16>
    %49 = vector.shape_cast %48 : vector<1x1x67xbf16> to vector<1x67xbf16>
    %50 = vector.shape_cast %30 : vector<1x67xbf16> to vector<1x1x67xbf16>
    tpu.vector_store %arg7[%c1_28, %c0_29, %c1187_30], %50 {strides = array<i32>} : memref<4x1x1254xbf16, #tpu.memory_space<vmem>>, vector<1x1x67xbf16>,
    %c2 = arith.constant 2 : index
    %c0_31 = arith.constant 0 : index
    %c0_32 = arith.constant 0 : index
    %51 = vector.load %arg7[%c2, %c0_31, %c0_32] : memref<4x1x1254xbf16, #tpu.memory_space<vmem>>, vector<1x1x35xbf16>
    %52 = vector.shape_cast %51 : vector<1x1x35xbf16> to vector<1x35xbf16>
    %53 = vector.shape_cast %29 : vector<1x35xbf16> to vector<1x1x35xbf16>
    tpu.vector_store %arg7[%c2, %c0_31, %c0_32], %53 {strides = array<i32>} : memref<4x1x1254xbf16, #tpu.memory_space<vmem>>, vector<1x1x35xbf16>,
    %54 = vector.extract_strided_slice %28 {offsets = [2, 0], sizes = [1, 1152], strides = [1, 1]} : vector<4x1152xbf16> to vector<1x1152xbf16>
    %c2_33 = arith.constant 2 : index
    %c0_34 = arith.constant 0 : index
    %c35_35 = arith.constant 35 : index
    %55 = vector.load %arg7[%c2_33, %c0_34, %c35_35] : memref<4x1x1254xbf16, #tpu.memory_space<vmem>>, vector<1x1x1152xbf16>
    %56 = vector.shape_cast %55 : vector<1x1x1152xbf16> to vector<1x1152xbf16>
    %57 = vector.shape_cast %54 : vector<1x1152xbf16> to vector<1x1x1152xbf16>
    tpu.vector_store %arg7[%c2_33, %c0_34, %c35_35], %57 {strides = array<i32>} : memref<4x1x1254xbf16, #tpu.memory_space<vmem>>, vector<1x1x1152xbf16>,
    %c2_36 = arith.constant 2 : index
    %c0_37 = arith.constant 0 : index
    %c1187_38 = arith.constant 1187 : index
    %58 = vector.load %arg7[%c2_36, %c0_37, %c1187_38] : memref<4x1x1254xbf16, #tpu.memory_space<vmem>>, vector<1x1x67xbf16>
    %59 = vector.shape_cast %58 : vector<1x1x67xbf16> to vector<1x67xbf16>
    %60 = vector.shape_cast %30 : vector<1x67xbf16> to vector<1x1x67xbf16>
    tpu.vector_store %arg7[%c2_36, %c0_37, %c1187_38], %60 {strides = array<i32>} : memref<4x1x1254xbf16, #tpu.memory_space<vmem>>, vector<1x1x67xbf16>,
    %c3 = arith.constant 3 : index
    %c0_39 = arith.constant 0 : index
    %c0_40 = arith.constant 0 : index
    %61 = vector.load %arg7[%c3, %c0_39, %c0_40] : memref<4x1x1254xbf16, #tpu.memory_space<vmem>>, vector<1x1x35xbf16>
    %62 = vector.shape_cast %61 : vector<1x1x35xbf16> to vector<1x35xbf16>
    %63 = vector.shape_cast %29 : vector<1x35xbf16> to vector<1x1x35xbf16>
    tpu.vector_store %arg7[%c3, %c0_39, %c0_40], %63 {strides = array<i32>} : memref<4x1x1254xbf16, #tpu.memory_space<vmem>>, vector<1x1x35xbf16>,
    %64 = vector.extract_strided_slice %28 {offsets = [3, 0], sizes = [1, 1152], strides = [1, 1]} : vector<4x1152xbf16> to vector<1x1152xbf16>
    %c3_41 = arith.constant 3 : index
    %c0_42 = arith.constant 0 : index
    %c35_43 = arith.constant 35 : index
    %65 = vector.load %arg7[%c3_41, %c0_42, %c35_43] : memref<4x1x1254xbf16, #tpu.memory_space<vmem>>, vector<1x1x1152xbf16>
    %66 = vector.shape_cast %65 : vector<1x1x1152xbf16> to vector<1x1152xbf16>
    %67 = vector.shape_cast %64 : vector<1x1152xbf16> to vector<1x1x1152xbf16>
    tpu.vector_store %arg7[%c3_41, %c0_42, %c35_43], %67 {strides = array<i32>} : memref<4x1x1254xbf16, #tpu.memory_space<vmem>>, vector<1x1x1152xbf16>,
    %c3_44 = arith.constant 3 : index
    %c0_45 = arith.constant 0 : index
    %c1187_46 = arith.constant 1187 : index
    %68 = vector.load %arg7[%c3_44, %c0_45, %c1187_46] : memref<4x1x1254xbf16, #tpu.memory_space<vmem>>, vector<1x1x67xbf16>
    %69 = vector.shape_cast %68 : vector<1x1x67xbf16> to vector<1x67xbf16>
    %70 = vector.shape_cast %30 : vector<1x67xbf16> to vector<1x1x67xbf16>
    tpu.vector_store %arg7[%c3_44, %c0_45, %c1187_46], %70 {strides = array<i32>} : memref<4x1x1254xbf16, #tpu.memory_space<vmem>>, vector<1x1x67xbf16>,
    %c3_47 = arith.constant 3 : index
    %c0_48 = arith.constant 0 : index
    %c0_49 = arith.constant 0 : index
    %71 = vector.load %arg7[%c3_47, %c0_48, %c0_49] : memref<4x1x1254xbf16, #tpu.memory_space<vmem>>, vector<1x1x1152xbf16>
    %72 = vector.shape_cast %71 : vector<1x1x1152xbf16> to vector<1x1152xbf16>
    %c2_50 = arith.constant 2 : index
    %c0_51 = arith.constant 0 : index
    %c1_52 = arith.constant 1 : index
    %73 = vector.load %arg7[%c2_50, %c0_51, %c1_52] : memref<4x1x1254xbf16, #tpu.memory_space<vmem>>, vector<1x1x1152xbf16>
    %74 = vector.shape_cast %73 : vector<1x1x1152xbf16> to vector<1x1152xbf16>
    %c1_53 = arith.constant 1 : index
    %c0_54 = arith.constant 0 : index
    %c34 = arith.constant 34 : index
    %75 = vector.load %arg7[%c1_53, %c0_54, %c34] : memref<4x1x1254xbf16, #tpu.memory_space<vmem>>, vector<1x1x1152xbf16>
    %76 = vector.shape_cast %75 : vector<1x1x1152xbf16> to vector<1x1152xbf16>
    %c0_55 = arith.constant 0 : index
    %c0_56 = arith.constant 0 : index
    %c35_57 = arith.constant 35 : index
    %77 = vector.load %arg7[%c0_55, %c0_56, %c35_57] : memref<4x1x1254xbf16, #tpu.memory_space<vmem>>, vector<1x1x1152xbf16>
    %78 = vector.shape_cast %77 : vector<1x1x1152xbf16> to vector<1x1152xbf16>
    %79 = tpu.concatenate %72, %74, %76, %78 in 1 : vector<1x1152xbf16>, vector<1x1152xbf16>, vector<1x1152xbf16>, vector<1x1152xbf16> -> vector<1x4608xbf16>
    %c3_58 = arith.constant 3 : index
    %c0_59 = arith.constant 0 : index
    %c1_60 = arith.constant 1 : index
    %80 = vector.load %arg7[%c3_58, %c0_59, %c1_60] : memref<4x1x1254xbf16, #tpu.memory_space<vmem>>, vector<1x1x1152xbf16>
    %81 = vector.shape_cast %80 : vector<1x1x1152xbf16> to vector<1x1152xbf16>
    %c1_61 = arith.constant 1 : index
    %c0_62 = arith.constant 0 : index
    %c35_63 = arith.constant 35 : index
    %82 = vector.load %arg7[%c1_61, %c0_62, %c35_63] : memref<4x1x1254xbf16, #tpu.memory_space<vmem>>, vector<1x1x1152xbf16>
    %83 = vector.shape_cast %82 : vector<1x1x1152xbf16> to vector<1x1152xbf16>
    %84 = tpu.concatenate %74, %81, %78, %83 in 1 : vector<1x1152xbf16>, vector<1x1152xbf16>, vector<1x1152xbf16>, vector<1x1152xbf16> -> vector<1x4608xbf16>
    %c2_64 = arith.constant 2 : index
    %c0_65 = arith.constant 0 : index
    %c2_66 = arith.constant 2 : index
    %85 = vector.load %arg7[%c2_64, %c0_65, %c2_66] : memref<4x1x1254xbf16, #tpu.memory_space<vmem>>, vector<1x1x1152xbf16>
    %86 = vector.shape_cast %85 : vector<1x1x1152xbf16> to vector<1x1152xbf16>
    %c0_67 = arith.constant 0 : index
    %c0_68 = arith.constant 0 : index
    %c36 = arith.constant 36 : index
    %87 = vector.load %arg7[%c0_67, %c0_68, %c36] : memref<4x1x1254xbf16, #tpu.memory_space<vmem>>, vector<1x1x1152xbf16>
    %88 = vector.shape_cast %87 : vector<1x1x1152xbf16> to vector<1x1152xbf16>
    %89 = tpu.concatenate %81, %86, %83, %88 in 1 : vector<1x1152xbf16>, vector<1x1152xbf16>, vector<1x1152xbf16>, vector<1x1152xbf16> -> vector<1x4608xbf16>
    %c3_69 = arith.constant 3 : index
    %c0_70 = arith.constant 0 : index
    %c34_71 = arith.constant 34 : index
    %90 = vector.load %arg7[%c3_69, %c0_70, %c34_71] : memref<4x1x1254xbf16, #tpu.memory_space<vmem>>, vector<1x1x1152xbf16>
    %91 = vector.shape_cast %90 : vector<1x1x1152xbf16> to vector<1x1152xbf16>
    %c2_72 = arith.constant 2 : index
    %c0_73 = arith.constant 0 : index
    %c35_74 = arith.constant 35 : index
    %92 = vector.load %arg7[%c2_72, %c0_73, %c35_74] : memref<4x1x1254xbf16, #tpu.memory_space<vmem>>, vector<1x1x1152xbf16>
    %93 = vector.shape_cast %92 : vector<1x1x1152xbf16> to vector<1x1152xbf16>
    %94 = tpu.concatenate %76, %78, %91, %93 in 1 : vector<1x1152xbf16>, vector<1x1152xbf16>, vector<1x1152xbf16>, vector<1x1152xbf16> -> vector<1x4608xbf16>
    %c3_75 = arith.constant 3 : index
    %c0_76 = arith.constant 0 : index
    %c35_77 = arith.constant 35 : index
    %95 = vector.load %arg7[%c3_75, %c0_76, %c35_77] : memref<4x1x1254xbf16, #tpu.memory_space<vmem>>, vector<1x1x1152xbf16>
    %96 = vector.shape_cast %95 : vector<1x1x1152xbf16> to vector<1x1152xbf16>
    %97 = tpu.concatenate %78, %83, %93, %96 in 1 : vector<1x1152xbf16>, vector<1x1152xbf16>, vector<1x1152xbf16>, vector<1x1152xbf16> -> vector<1x4608xbf16>
    %c2_78 = arith.constant 2 : index
    %c0_79 = arith.constant 0 : index
    %c36_80 = arith.constant 36 : index
    %98 = vector.load %arg7[%c2_78, %c0_79, %c36_80] : memref<4x1x1254xbf16, #tpu.memory_space<vmem>>, vector<1x1x1152xbf16>
    %99 = vector.shape_cast %98 : vector<1x1x1152xbf16> to vector<1x1152xbf16>
    %100 = tpu.concatenate %83, %88, %96, %99 in 1 : vector<1x1152xbf16>, vector<1x1152xbf16>, vector<1x1152xbf16>, vector<1x1152xbf16> -> vector<1x4608xbf16>
    %c1_81 = arith.constant 1 : index
    %c0_82 = arith.constant 0 : index
    %c68 = arith.constant 68 : index
    %101 = vector.load %arg7[%c1_81, %c0_82, %c68] : memref<4x1x1254xbf16, #tpu.memory_space<vmem>>, vector<1x1x1152xbf16>
    %102 = vector.shape_cast %101 : vector<1x1x1152xbf16> to vector<1x1152xbf16>
    %c0_83 = arith.constant 0 : index
    %c0_84 = arith.constant 0 : index
    %c69 = arith.constant 69 : index
    %103 = vector.load %arg7[%c0_83, %c0_84, %c69] : memref<4x1x1254xbf16, #tpu.memory_space<vmem>>, vector<1x1x1152xbf16>
    %104 = vector.shape_cast %103 : vector<1x1x1152xbf16> to vector<1x1152xbf16>
    %105 = tpu.concatenate %91, %93, %102, %104 in 1 : vector<1x1152xbf16>, vector<1x1152xbf16>, vector<1x1152xbf16>, vector<1x1152xbf16> -> vector<1x4608xbf16>
    %c1_85 = arith.constant 1 : index
    %c0_86 = arith.constant 0 : index
    %c69_87 = arith.constant 69 : index
    %106 = vector.load %arg7[%c1_85, %c0_86, %c69_87] : memref<4x1x1254xbf16, #tpu.memory_space<vmem>>, vector<1x1x1152xbf16>
    %107 = vector.shape_cast %106 : vector<1x1x1152xbf16> to vector<1x1152xbf16>
    %108 = tpu.concatenate %93, %96, %104, %107 in 1 : vector<1x1152xbf16>, vector<1x1152xbf16>, vector<1x1152xbf16>, vector<1x1152xbf16> -> vector<1x4608xbf16>
    %c0_88 = arith.constant 0 : index
    %c0_89 = arith.constant 0 : index
    %c70 = arith.constant 70 : index
    %109 = vector.load %arg7[%c0_88, %c0_89, %c70] : memref<4x1x1254xbf16, #tpu.memory_space<vmem>>, vector<1x1x1152xbf16>
    %110 = vector.shape_cast %109 : vector<1x1x1152xbf16> to vector<1x1152xbf16>
    %111 = tpu.concatenate %96, %99, %107, %110 in 1 : vector<1x1152xbf16>, vector<1x1152xbf16>, vector<1x1152xbf16>, vector<1x1152xbf16> -> vector<1x4608xbf16>
    %112 = tpu.concatenate %79, %84, %89, %94, %97, %100, %105, %108, %111 in 0 : vector<1x4608xbf16>, vector<1x4608xbf16>, vector<1x4608xbf16>, vector<1x4608xbf16>, vector<1x4608xbf16>, vector<1x4608xbf16>, vector<1x4608xbf16>, vector<1x4608xbf16>, vector<1x4608xbf16> -> vector<9x4608xbf16>
    %c0_90 = arith.constant 0 : index
    %c0_91 = arith.constant 0 : index
    %113 = vector.load %arg3[%c0_90, %c0_91] : memref<1x9xbf16, #tpu.memory_space<vmem>>, vector<1x9xbf16>
    %cst_92 = arith.constant dense<0.000000e+00> : vector<1x4608xf32>
    %114 = tpu.matmul %113, %112, %cst_92 {dimension_numbers = #tpu.dot_dimension_numbers<[1], [0], [0], [1], [0, 0, 1, 1], [], []>} : vector<1x9xbf16>, vector<9x4608xbf16>, vector<1x4608xf32> -> vector<1x4608xf32>
    %115 = vector.broadcast %14 : vector<1x1xf32> to vector<1x4608xf32>
    %116 = arith.mulf %114, %115 : vector<1x4608xf32>
    %117 = vector.broadcast %15 : vector<1x1xf32> to vector<1x4608xf32>
    %118 = arith.addf %116, %117 : vector<1x4608xf32>
    %119 = vector.extract_strided_slice %118 {offsets = [0, 0], sizes = [1, 1152], strides = [1, 1]} : vector<1x4608xf32> to vector<1x1152xf32>
    %120 = vector.extract_strided_slice %22 {offsets = [4, 0], sizes = [1, 1152], strides = [1, 1]} : vector<8x1152xf32> to vector<1x1152xf32>
    %121 = arith.addf %119, %120 : vector<1x1152xf32>
    %cst_93 = arith.constant 0.000000e+00 : f32
    %122 = vector.broadcast %cst_93 : f32 to vector<1x1152xf32>
    %123 = arith.maximumf %121, %122 : vector<1x1152xf32>
    %c0_94 = arith.constant 0 : index
    %c0_95 = arith.constant 0 : index
    %c0_96 = arith.constant 0 : index
    %c0_97 = arith.constant 0 : index
    %124 = vector.load %arg6[%c0_94, %c0_95, %c0_96, %c0_97] : memref<1x4x1x1152xf32, #tpu.memory_space<vmem>>, vector<1x1x1x1152xf32>
    %125 = vector.shape_cast %124 : vector<1x1x1x1152xf32> to vector<1x1152xf32>
    %126 = vector.shape_cast %123 : vector<1x1152xf32> to vector<1x1x1x1152xf32>
    tpu.vector_store %arg6[%c0_94, %c0_95, %c0_96, %c0_97], %126 {strides = array<i32>} : memref<1x4x1x1152xf32, #tpu.memory_space<vmem>>, vector<1x1x1x1152xf32>,
    %127 = vector.extract_strided_slice %118 {offsets = [0, 1152], sizes = [1, 1152], strides = [1, 1]} : vector<1x4608xf32> to vector<1x1152xf32>
    %128 = vector.extract_strided_slice %22 {offsets = [5, 0], sizes = [1, 1152], strides = [1, 1]} : vector<8x1152xf32> to vector<1x1152xf32>
    %129 = arith.addf %127, %128 : vector<1x1152xf32>
    %cst_98 = arith.constant 0.000000e+00 : f32
    %130 = vector.broadcast %cst_98 : f32 to vector<1x1152xf32>
    %131 = arith.maximumf %129, %130 : vector<1x1152xf32>
    %c0_99 = arith.constant 0 : index
    %c1_100 = arith.constant 1 : index
    %c0_101 = arith.constant 0 : index
    %c0_102 = arith.constant 0 : index
    %132 = vector.load %arg6[%c0_99, %c1_100, %c0_101, %c0_102] : memref<1x4x1x1152xf32, #tpu.memory_space<vmem>>, vector<1x1x1x1152xf32>
    %133 = vector.shape_cast %132 : vector<1x1x1x1152xf32> to vector<1x1152xf32>
    %134 = vector.shape_cast %131 : vector<1x1152xf32> to vector<1x1x1x1152xf32>
    tpu.vector_store %arg6[%c0_99, %c1_100, %c0_101, %c0_102], %134 {strides = array<i32>} : memref<1x4x1x1152xf32, #tpu.memory_space<vmem>>, vector<1x1x1x1152xf32>,
    %135 = vector.extract_strided_slice %118 {offsets = [0, 2304], sizes = [1, 1152], strides = [1, 1]} : vector<1x4608xf32> to vector<1x1152xf32>
    %136 = vector.extract_strided_slice %22 {offsets = [6, 0], sizes = [1, 1152], strides = [1, 1]} : vector<8x1152xf32> to vector<1x1152xf32>
    %137 = arith.addf %135, %136 : vector<1x1152xf32>
    %cst_103 = arith.constant 0.000000e+00 : f32
    %138 = vector.broadcast %cst_103 : f32 to vector<1x1152xf32>
    %139 = arith.maximumf %137, %138 : vector<1x1152xf32>
    %c0_104 = arith.constant 0 : index
    %c2_105 = arith.constant 2 : index
    %c0_106 = arith.constant 0 : index
    %c0_107 = arith.constant 0 : index
    %140 = vector.load %arg6[%c0_104, %c2_105, %c0_106, %c0_107] : memref<1x4x1x1152xf32, #tpu.memory_space<vmem>>, vector<1x1x1x1152xf32>
    %141 = vector.shape_cast %140 : vector<1x1x1x1152xf32> to vector<1x1152xf32>
    %142 = vector.shape_cast %139 : vector<1x1152xf32> to vector<1x1x1x1152xf32>
    tpu.vector_store %arg6[%c0_104, %c2_105, %c0_106, %c0_107], %142 {strides = array<i32>} : memref<1x4x1x1152xf32, #tpu.memory_space<vmem>>, vector<1x1x1x1152xf32>,
    %143 = vector.extract_strided_slice %118 {offsets = [0, 3456], sizes = [1, 1152], strides = [1, 1]} : vector<1x4608xf32> to vector<1x1152xf32>
    %144 = vector.extract_strided_slice %22 {offsets = [7, 0], sizes = [1, 1152], strides = [1, 1]} : vector<8x1152xf32> to vector<1x1152xf32>
    %145 = arith.addf %143, %144 : vector<1x1152xf32>
    %cst_108 = arith.constant 0.000000e+00 : f32
    %146 = vector.broadcast %cst_108 : f32 to vector<1x1152xf32>
    %147 = arith.maximumf %145, %146 : vector<1x1152xf32>
    %c0_109 = arith.constant 0 : index
    %c3_110 = arith.constant 3 : index
    %c0_111 = arith.constant 0 : index
    %c0_112 = arith.constant 0 : index
    %148 = vector.load %arg6[%c0_109, %c3_110, %c0_111, %c0_112] : memref<1x4x1x1152xf32, #tpu.memory_space<vmem>>, vector<1x1x1x1152xf32>
    %149 = vector.shape_cast %148 : vector<1x1x1x1152xf32> to vector<1x1152xf32>
    %150 = vector.shape_cast %147 : vector<1x1152xf32> to vector<1x1x1x1152xf32>
    tpu.vector_store %arg6[%c0_109, %c3_110, %c0_111, %c0_112], %150 {strides = array<i32>} : memref<1x4x1x1152xf32, #tpu.memory_space<vmem>>, vector<1x1x1x1152xf32>,
    return
  }
  func.func @transform_0(%arg0: i32) -> (i32, i32, i32) {
    %c0_i32 = arith.constant 0 : i32
    %c0_i32_0 = arith.constant 0 : i32
    %c0_i32_1 = arith.constant 0 : i32
    return %arg0, %c0_i32, %c0_i32_0 : i32, i32, i32
  }
  func.func @transform_1(%arg0: i32) -> (i32, i32) {
    %c0_i32 = arith.constant 0 : i32
    %c0_i32_0 = arith.constant 0 : i32
    %c0_i32_1 = arith.constant 0 : i32
    return %c0_i32, %c0_i32_0 : i32, i32
  }
  func.func @transform_2(%arg0: i32) -> (i32, i32) {
    %c0_i32 = arith.constant 0 : i32
    %c0_i32_0 = arith.constant 0 : i32
    %c0_i32_1 = arith.constant 0 : i32
    return %c0_i32, %c0_i32_0 : i32, i32
  }
  func.func @transform_3(%arg0: i32) -> (i32, i32) {
    %c0_i32 = arith.constant 0 : i32
    %c0_i32_0 = arith.constant 0 : i32
    %c0_i32_1 = arith.constant 0 : i32
    return %c0_i32, %c0_i32_0 : i32, i32
  }
  func.func @transform_4(%arg0: i32) -> (i32, i32) {
    %c0_i32 = arith.constant 0 : i32
    %c0_i32_0 = arith.constant 0 : i32
    %c0_i32_1 = arith.constant 0 : i32
    return %c0_i32, %c0_i32_0 : i32, i32
  }
  func.func @transform_5(%arg0: i32) -> (i32, i32, i32, i32) {
    %c0_i32 = arith.constant 0 : i32
    %c0_i32_0 = arith.constant 0 : i32
    %c0_i32_1 = arith.constant 0 : i32
    %c0_i32_2 = arith.constant 0 : i32
    return %arg0, %c0_i32, %c0_i32_0, %c0_i32_1 : i32, i32, i32, i32
  }
}

</mosaic_0001>

<bundles_post_ra>
// kernel: tile.93
= control target key start
LH: loop header
LB: loop body
LE: loop exit
PB: predicated region body
PF: predicated region fallthrough
CT: control target
= control target key end

     0   :  { %2 = vsyncpa [#allocation1], 0  ;;  %s42_s6 = smov [#allocation0]   ;;  %s59_s0 = inlined_call_operand.hbm [shape: f32[8], index: 0, kind: input, shape index: {}]   ;;  %s60_s1 = inlined_call_operand.vmem [shape: f32[4,8], index: 1, kind: output, shape index: {}]  }
   0x1   :  { %s9_s7 = sshll.u32 %s42_s6, 4  ;;  %s10_s7 = int_to_ptr.vmem [resolvable:$true] %s9_s7 }
   0x2   :  { %s28_s8 = scalar_lea.vmem %s10_s7, 16  ;;  %s32_s9 = scalar_lea.vmem %s10_s7, 32 }
   0x3   :  { %p29_p0 = scmp.ne.s32.totalorder %s10_s7, %s28_s8  ;;  %p33_p1 = scmp.lt.s32.totalorder %s10_s7, %s10_s7 }
   0x4   :  { %p34_p2 = scmp.lt.s32.totalorder %s32_s9, %s28_s8 }
   0x6   :  { %p35_p3 = por %p34_p2, %p33_p1 }
   0x8   :  { %p36_p4 = pnand %p35_p3, %p29_p0 }
   0xa   :  { %39 = shalt.err (!%p36_p4)
}
   0xb   :  { %12 = dma.hbm_to_vmem [thread:$0]  %s59_s0, 16, %s10_s7, [#allocation1]  }
   0xc   :  { %40 = dma.done.wait [#allocation1], 16  }
   0xd   :  { %41 = vsyncadd [#allocation1], 4294967280  ;;  %v16_v0 = vld [vmem:[#allocation0] ss:$0 sm:$0xff] }
   0xe   :  { %17 = vst [vmem:[%s60_s1] sm:$0xf] %v16_v0 }
   0xf   :  { %18 = vsyncpa [#allocation1], 1 }

// kernel: tile.94
= control target key start
LH: loop header
LB: loop body
LE: loop exit
PB: predicated region body
PF: predicated region fallthrough
CT: control target
= control target key end

     0   :  { %vm8_vm0 = vcmask 64512   ;;  %s40_s8 = smov 8   ;;  %s41_s9 = smov 16   ;;  %vm14_vm1 = vcmask 261312   ;;  %vm20_vm2 = vcmask 195712   ;;  %vm26_vm3 = vcmask 130112   ;;  %s58_s0 = inlined_call_operand.vmem [shape: f32[4,8], index: 0, kind: input, shape index: {}]   ;;  %s59_s1 = inlined_call_operand.vmem [shape: f32[32], index: 1, kind: output, shape index: {}]  }
   0x1   :  { %v5_v0 = vld [vmem:[%s58_s0] sm:$0xf]  ;;  %s39_s0 = smov 24  }
   0x2   :  { %6 = vst [vmem:[#allocation1] sm:$0xf] %v5_v0 }
   0x9   :  { %v11_v1 = vld [vmem:[#allocation1 + $0x3] sm:$0x1]   ;;  %v23_v2 = vld [vmem:[#allocation1 + $0x1] sm:$0x1]   ;;  %v7_v3 = vld [vmem:[#allocation1] sm:$0x1]  }
   0xa   :  { %12 = vrot.lane.b32.xlu0 %v11_v1, %s39_s0  ;;  %24 = vrot.lane.b32.xlu1 %v23_v2, %s40_s8  ;;  %v17_v4 = vld [vmem:[#allocation1 + $0x2] sm:$0x1]   ;;  %9 = vst.msk [vmem:[#allocation0] sm:$0x1] %vm8_vm0, %v7_v3  }
   0xe   :  { %18 = vrot.lane.b32.xlu0 %v17_v4, %s41_s9 }
  0x7c   :  { %v13_v5 = vpop.permute.xlu0 %12   ;;  %v25_v6 = vpop.permute.xlu1 %24  }
  0x7d   :  { %15 = vst.msk [vmem:[#allocation0] sm:$0x1] %vm14_vm1, %v13_v5  }
  0x80   :  { %v19_v7 = vpop.permute.xlu0 %18  }
  0x81   :  { %21 = vst.msk [vmem:[#allocation0] sm:$0x1] %vm20_vm2, %v19_v7  }
  0x82   :  { %27 = vst.msk [vmem:[#allocation0] sm:$0x1] %vm26_vm3, %v25_v6  }
  0x89   :  { %v32_v8 = vld [vmem:[#allocation0] sm:$0x1] }
  0x8a   :  { %35 = vst [vmem:[%s59_s1] sm:$0x1] %v32_v8 }

// kernel: tile.113
= control target key start
LH: loop header
LB: loop body
LE: loop exit
PB: predicated region body
PF: predicated region fallthrough
CT: control target
= control target key end

     0   :  { %2 = vsyncpa [#allocation1], 0  ;;  %s42_s6 = smov [#allocation0]   ;;  %s59_s0 = inlined_call_operand.hbm [shape: f32[4], index: 0, kind: input, shape index: {}]   ;;  %s60_s1 = inlined_call_operand.vmem [shape: f32[4,4], index: 1, kind: output, shape index: {}]  }
   0x1   :  { %s9_s7 = sshll.u32 %s42_s6, 4  ;;  %s10_s7 = int_to_ptr.vmem [resolvable:$true] %s9_s7 }
   0x2   :  { %s28_s8 = scalar_lea.vmem %s10_s7, 16  ;;  %s32_s9 = scalar_lea.vmem %s10_s7, 32 }
   0x3   :  { %p29_p0 = scmp.ne.s32.totalorder %s10_s7, %s28_s8  ;;  %p33_p1 = scmp.lt.s32.totalorder %s10_s7, %s10_s7 }
   0x4   :  { %p34_p2 = scmp.lt.s32.totalorder %s32_s9, %s28_s8 }
   0x6   :  { %p35_p3 = por %p34_p2, %p33_p1 }
   0x8   :  { %p36_p4 = pnand %p35_p3, %p29_p0 }
   0xa   :  { %39 = shalt.err (!%p36_p4)
}
   0xb   :  { %12 = dma.hbm_to_vmem [thread:$0]  %s59_s0, 16, %s10_s7, [#allocation1]  }
   0xc   :  { %40 = dma.done.wait [#allocation1], 16  }
   0xd   :  { %41 = vsyncadd [#allocation1], 4294967280  ;;  %v16_v0 = vld [vmem:[#allocation0] ss:$0 sm:$0xff] }
   0xe   :  { %17 = vst [vmem:[%s60_s1] sm:$0xf] %v16_v0 }
   0xf   :  { %18 = vsyncpa [#allocation1], 1 }

// kernel: tile.114
= control target key start
LH: loop header
LB: loop body
LE: loop exit
PB: predicated region body
PF: predicated region fallthrough
CT: control target
= control target key end

     0   :  { %vm8_vm0 = vcmask 31744   ;;  %s40_s8 = smov 4   ;;  %s41_s9 = smov 8   ;;  %vm14_vm1 = vcmask 130144   ;;  %vm20_vm2 = vcmask 97344   ;;  %vm26_vm3 = vcmask 64544   ;;  %s58_s0 = inlined_call_operand.vmem [shape: f32[4,4], index: 0, kind: input, shape index: {}]   ;;  %s59_s1 = inlined_call_operand.vmem [shape: f32[16], index: 1, kind: output, shape index: {}]  }
   0x1   :  { %v5_v0 = vld [vmem:[%s58_s0] sm:$0xf]  ;;  %s39_s0 = smov 12  }
   0x2   :  { %6 = vst [vmem:[#allocation1] sm:$0xf] %v5_v0 }
   0x9   :  { %v11_v1 = vld [vmem:[#allocation1 + $0x3] sm:$0x1]   ;;  %v23_v2 = vld [vmem:[#allocation1 + $0x1] sm:$0x1]   ;;  %v7_v3 = vld [vmem:[#allocation1] sm:$0x1]  }
   0xa   :  { %12 = vrot.lane.b32.xlu0 %v11_v1, %s39_s0  ;;  %24 = vrot.lane.b32.xlu1 %v23_v2, %s40_s8  ;;  %v17_v4 = vld [vmem:[#allocation1 + $0x2] sm:$0x1]   ;;  %9 = vst.msk [vmem:[#allocation0] sm:$0x1] %vm8_vm0, %v7_v3  }
   0xe   :  { %18 = vrot.lane.b32.xlu0 %v17_v4, %s41_s9 }
  0x7c   :  { %v13_v5 = vpop.permute.xlu0 %12   ;;  %v25_v6 = vpop.permute.xlu1 %24  }
  0x7d   :  { %15 = vst.msk [vmem:[#allocation0] sm:$0x1] %vm14_vm1, %v13_v5  }
  0x80   :  { %v19_v7 = vpop.permute.xlu0 %18  }
  0x81   :  { %21 = vst.msk [vmem:[#allocation0] sm:$0x1] %vm20_vm2, %v19_v7  }
  0x82   :  { %27 = vst.msk [vmem:[#allocation0] sm:$0x1] %vm26_vm3, %v25_v6  }
  0x89   :  { %v32_v8 = vld [vmem:[#allocation0] sm:$0x1] }
  0x8a   :  { %35 = vst [vmem:[%s59_s1] sm:$0x1] %v32_v8 }

// kernel: tile.133
= control target key start
LH: loop header
LB: loop body
LE: loop exit
PB: predicated region body
PF: predicated region fallthrough
CT: control target
= control target key end

     0   :  { %2 = vsyncpa [#allocation1], 0  ;;  %s42_s6 = smov [#allocation0]   ;;  %s59_s0 = inlined_call_operand.hbm [shape: f32[2], index: 0, kind: input, shape index: {}]   ;;  %s60_s1 = inlined_call_operand.vmem [shape: f32[4,2], index: 1, kind: output, shape index: {}]  }
   0x1   :  { %s9_s7 = sshll.u32 %s42_s6, 4  ;;  %s10_s7 = int_to_ptr.vmem [resolvable:$true] %s9_s7 }
   0x2   :  { %s28_s8 = scalar_lea.vmem %s10_s7, 16  ;;  %s32_s9 = scalar_lea.vmem %s10_s7, 32 }
   0x3   :  { %p29_p0 = scmp.ne.s32.totalorder %s10_s7, %s28_s8  ;;  %p33_p1 = scmp.lt.s32.totalorder %s10_s7, %s10_s7 }
   0x4   :  { %p34_p2 = scmp.lt.s32.totalorder %s32_s9, %s28_s8 }
   0x6   :  { %p35_p3 = por %p34_p2, %p33_p1 }
   0x8   :  { %p36_p4 = pnand %p35_p3, %p29_p0 }
   0xa   :  { %39 = shalt.err (!%p36_p4)
}
   0xb   :  { %12 = dma.hbm_to_vmem [thread:$0]  %s59_s0, 16, %s10_s7, [#allocation1]  }
   0xc   :  { %40 = dma.done.wait [#allocation1], 16  }
   0xd   :  { %41 = vsyncadd [#allocation1], 4294967280  ;;  %v16_v0 = vld [vmem:[#allocation0] ss:$0 sm:$0xff] }
   0xe   :  { %17 = vst [vmem:[%s60_s1] sm:$0xf] %v16_v0 }
   0xf   :  { %18 = vsyncpa [#allocation1], 1 }

// kernel: tile.134
= control target key start
LH: loop header
LB: loop body
LE: loop exit
PB: predicated region body
PF: predicated region fallthrough
CT: control target
= control target key end

     0   :  { %vm8_vm0 = vcmask 15360   ;;  %s40_s8 = smov 2   ;;  %s41_s9 = smov 4   ;;  %vm14_vm1 = vcmask 64560   ;;  %vm20_vm2 = vcmask 48160   ;;  %vm26_vm3 = vcmask 31760   ;;  %s58_s0 = inlined_call_operand.vmem [shape: f32[4,2], index: 0, kind: input, shape index: {}]   ;;  %s59_s1 = inlined_call_operand.vmem [shape: f32[8], index: 1, kind: output, shape index: {}]  }
   0x1   :  { %v5_v0 = vld [vmem:[%s58_s0] sm:$0xf]  ;;  %s39_s0 = smov 6  }
   0x2   :  { %6 = vst [vmem:[#allocation1] sm:$0xf] %v5_v0 }
   0x9   :  { %v11_v1 = vld [vmem:[#allocation1 + $0x3] sm:$0x1]   ;;  %v23_v2 = vld [vmem:[#allocation1 + $0x1] sm:$0x1]   ;;  %v7_v3 = vld [vmem:[#allocation1] sm:$0x1]  }
   0xa   :  { %12 = vrot.lane.b32.xlu0 %v11_v1, %s39_s0  ;;  %24 = vrot.lane.b32.xlu1 %v23_v2, %s40_s8  ;;  %v17_v4 = vld [vmem:[#allocation1 + $0x2] sm:$0x1]   ;;  %9 = vst.msk [vmem:[#allocation0] sm:$0x1] %vm8_vm0, %v7_v3  }
   0xe   :  { %18 = vrot.lane.b32.xlu0 %v17_v4, %s41_s9 }
  0x7c   :  { %v13_v5 = vpop.permute.xlu0 %12   ;;  %v25_v6 = vpop.permute.xlu1 %24  }
  0x7d   :  { %15 = vst.msk [vmem:[#allocation0] sm:$0x1] %vm14_vm1, %v13_v5  }
  0x80   :  { %v19_v7 = vpop.permute.xlu0 %18  }
  0x81   :  { %21 = vst.msk [vmem:[#allocation0] sm:$0x1] %vm20_vm2, %v19_v7  }
  0x82   :  { %27 = vst.msk [vmem:[#allocation0] sm:$0x1] %vm26_vm3, %v25_v6  }
  0x89   :  { %v32_v8 = vld [vmem:[#allocation0] sm:$0x1] }
  0x8a   :  { %35 = vst [vmem:[%s59_s1] sm:$0x1] %v32_v8 }

// kernel: upproj_forward.4
= control target key start
LH: loop header
LB: loop body
LE: loop exit
PB: predicated region body
PF: predicated region fallthrough
CT: control target
= control target key end

     0   :  { %s1098_s18 = smov 0   ;;  %s1366_s0 = inlined_call_operand.vmem [shape: bf16[2,16,146], index: 0, kind: input, shape index: {}]   ;;  %s1367_s1 = inlined_call_operand.vmem [shape: bf16[64,144], index: 1, kind: input, shape index: {}]   ;;  %s1368_s2 = inlined_call_operand.vmem [shape: bf16[8,72], index: 2, kind: input, shape index: {}]   ;;  %s1369_s3 = inlined_call_operand.vmem [shape: f32[72,2], index: 3, kind: input, shape index: {}]   ;;  %s1370_s4 = inlined_call_operand.vmem [shape: f32[1,128], index: 4, kind: input, shape index: {}]   ;;  %s1371_s5 = inlined_call_operand.vmem [shape: bf16[2,4,8,128], index: 5, kind: output, shape index: {}]  }
   0x1 LB: > { %s935_s19 = sadd.s32 4294967295, %s1055_s18   ;;  %p939_p0 = scmp.ge.s32.totalorder %s1055_s18, 1  ;;  %s1055_s18 = sphi %s1098_s18, %s15_s18  }
   0x2   : > { %p187_p1 = scmp.lt.s32.totalorder %s1055_s18, 3 }
   0x4   : > { %p188_p2 = pnand %p939_p0, %p187_p1 }
   0x5   : > { %p215_p3 = scmp.lt.s32.totalorder (!%p188_p2), %s935_s19, 1  ;;  %s1058_s24 = smov (!%p188_p2), 116  }
   0x6   : > { %191 = sbr.rel (%p188_p2) target bundleno = 908 (0x38c), region = 40  ;;  %s1059_s25 = smov (!%p188_p2), 115  }
   0x7   : > { %s1060_s26 = smov (!%p188_p2), 120   ;;  %s1061_s27 = smov (!%p188_p2), 121  }
   0x8   : > { %s1062_s28 = smov (!%p188_p2), 122   ;;  %s1063_s29 = smov (!%p188_p2), 126  }
   0x9   : > { %s1064_s30 = smov (!%p188_p2), 127   ;;  %s1065_s8 = smov (!%p188_p2), 114  }
   0xa   : > { %s1067_s11 = smov (!%p188_p2), 7  }
   0xb   : > { %v1057_v0 = vmov 0   ;;  %s1375_s19 = smov (!%p215_p3, %s935_s19), 1  ;;  %v1031_v3 = vld [vmem:[%s1367_s1 + $0x4] ss:$8 sps:$4 sm:$0xff]   ;;  %vm347_vm0 = vcmask 130048   ;;  %v296_v4 = vld [vmem:[%s1369_s3 + $0x18] sm:$0xff] }
   0xc   : > { %360 = vmatprep.subr.bf16.mxu0 %v1057_v0  ;;  %1017 = vset.pattern.permute.xlu1 %v1057_v0  ;;  %s980_s20 = sshll.u32 %s1375_s19, 4  ;;  %v295_v5 = vld [vmem:[%s1369_s3 + $0x10] sm:$0xff]  ;;  %v1066_v6 = vmov 1   ;;  %v293_v7 = vld [vmem:[%s1369_s3] sm:$0xff]  ;;  %v294_v8 = vld [vmem:[%s1369_s3 + $0x8] sm:$0xff]  ;;  %vm283_vm1 = vcmask 941056  }
   0xd   : > { %1016 = vset.pattern.permute.xlu0 %v1057_v0  ;;  %794 = vmatprep.mubr.bf16.mxu1 %v1057_v0  ;;  %s219_s23 = scalar_lea.vmem %s1366_s0, %s980_s20  ;;  %vm276_vm2 = vcmask 949248   ;;  %vm269_vm3 = vcmask 982016   ;;  %vm262_vm4 = vcmask 990208   ;;  %vm255_vm5 = vcmask 998400   ;;  %v1029_v33 = vld [vmem:[%s1367_s1] ss:$8 sps:$4 sm:$0xff]  }
   0xe   : > { %v1118_v1 = vld [vmem:[%s219_s23] ss:$8 sps:$4 sm:$0xff]   ;;  %v1028_v2 = vld [vmem:[%s219_s23 + $0x4] ss:$8 sps:$4 sm:$0xff]   ;;  %954 = vmatprep.mubr.msk.bf16.mxu0 %vm347_vm0, %v1031_v3  ;;  %vm248_vm6 = vcmask 1031168   ;;  %vm241_vm7 = vcmask 1039360  }
   0xf   : > { %272 = vrot.lane.b32.xlu1 %v1118_v1, %s1058_s24  ;;  %279 = vrot.lane.b32.xlu0 %v1118_v1, %s1059_s25  ;;  %vm290_vm8 = vcmask 932864   ;;  %v1032_v34 = vld [vmem:[%s1367_s1 + $0x14] ss:$8 sps:$4 sm:$0xff]   ;;  %v1034_v35 = vld [vmem:[%s1367_s1 + $0x10] ss:$8 sps:$4 sm:$0xff]   ;;  %vm529_vm9 = vcmask 52224  }
  0x10   : > { %558 = vst.msk [vmem:[#allocation2 + $0x10] sm:$0xf] %vm529_vm9, %v1057_v0  ;;  %530 = vst.msk [vmem:[#allocation2] sm:$0xf] %vm529_vm9, %v1057_v0  ;;  %v958_v60 = vld [vmem:[%s1370_s4] ss:$0 sm:$0xff] }
  0x11   : > { %547 = vst.msk [vmem:[#allocation2 + $0x8] sm:$0xf] %vm529_vm9, %v1057_v0  ;;  %570 = vst.msk [vmem:[#allocation2 + $0x18] sm:$0xf] %vm529_vm9, %v1057_v0  ;;  %vm540_vm10 = vcmask 1043512   ;;  %vm541_vm11 = vcmask 56324  }
  0x12   : > { %vm537_vm12 = vcmask 56320   ;;  %vm1200_vm13 = vmor %vm541_vm11, %vm540_vm10  ;;  %vm544_vm14 = vcmask 142392   ;;  %vm692_vm15 = vcmask 1043456  }
  0x13   : > { %274 = vrot.lane.b32.xlu1 %v1028_v2, %s1058_s24  ;;  %281 = vrot.lane.b32.xlu0 %v1028_v2, %s1059_s25 }
  0x17   : > { %267 = vrot.lane.b32.xlu1 %v1028_v2, %s1060_s26  ;;  %265 = vrot.lane.b32.xlu0 %v1118_v1, %s1060_s26 }
  0x1b   : > { %260 = vrot.lane.b32.xlu1 %v1028_v2, %s1061_s27  ;;  %258 = vrot.lane.b32.xlu0 %v1118_v1, %s1061_s27 }
  0x1f   : > { %253 = vrot.lane.b32.xlu1 %v1028_v2, %s1062_s28  ;;  %251 = vrot.lane.b32.xlu0 %v1118_v1, %s1062_s28 }
  0x23   : > { %246 = vrot.lane.b32.xlu1 %v1028_v2, %s1063_s29  ;;  %244 = vrot.lane.b32.xlu0 %v1118_v1, %s1063_s29 }
  0x27   : > { %239 = vrot.lane.b32.xlu1 %v1028_v2, %s1064_s30  ;;  %237 = vrot.lane.b32.xlu0 %v1118_v1, %s1064_s30 }
  0x2b   : > { %288 = vrot.lane.b32.xlu1 %v1028_v2, %s1065_s8  ;;  %286 = vrot.lane.b32.xlu0 %v1118_v1, %s1065_s8 }
  0x2f   : > { %442 = vperm.xlu1 %1017, %v296_v4   ;;  %437 = vperm.xlu0 %1016, %v295_v5  }
  0x33   : > { %1018 = vset.pattern.permute.xlu1 %v1066_v6  ;;  %1019 = vset.pattern.permute.xlu0 %v1066_v6 }
  0x34   : > { %482 = vperm.xlu1 %1018, %v295_v5   ;;  %486 = vperm.xlu0 %1019, %v296_v4  }
  0x38   : > { %1020 = vset.pattern.permute.xlu1 %v1057_v0  ;;  %474 = vperm.xlu0 %1019, %v293_v7  }
  0x39   : > { %427 = vperm.xlu1 %1020, %v293_v7  }
  0x3c   : > { %1022 = vset.pattern.permute.xlu0 %v1057_v0 }
  0x3d   : > { %432 = vperm.xlu1 %1020, %v294_v8  }
  0x41   : > { %1021 = vset.pattern.permute.xlu1 %v1066_v6 }
  0x42   : > { %478 = vperm.xlu1 %1021, %v294_v8  }
  0x46   : > { %1023 = vset.pattern.permute.xlu1 %v1057_v0 }
  0x81   : > { %v273_v9 = vpop.permute.xlu1 %272  ;;  %v280_v10 = vpop.permute.xlu0 %279 }
  0x85   : > { %v275_v11 = vpop.permute.xlu1 %274  ;;  %v282_v12 = vpop.permute.xlu0 %281 }
  0x86   : > { %v284_v13 = vsel %vm283_vm1, %v280_v10, %v282_v12  ;;  %v277_v16 = vsel %vm276_vm2, %v273_v9, %v275_v11 }
  0x87   : > { %361 = vmatpush1.bf16.msra.mxu0 %v284_v13 }
  0x88   : > { %362 = vmatprep.subr.bf16.mxu0 %v1057_v0 }
  0x89   : > { %v268_v14 = vpop.permute.xlu1 %267  ;;  %v266_v15 = vpop.permute.xlu0 %265 }
  0x8a   : > { %v270_v17 = vsel %vm269_vm3, %v266_v15, %v268_v14 }
  0x8b   : > { %363 = vmatpush1.bf16.msra.mxu0 %v277_v16 }
  0x8c   : > { %364 = vmatprep.subr.bf16.mxu0 %v1057_v0 }
  0x8d   : > { %v261_v18 = vpop.permute.xlu1 %260  ;;  %v259_v19 = vpop.permute.xlu0 %258 }
  0x8e   : > { %v263_v20 = vsel %vm262_vm4, %v259_v19, %v261_v18 }
  0x8f   : > { %365 = vmatpush1.bf16.msra.mxu0 %v270_v17 }
  0x90   : > { %366 = vmatprep.subr.bf16.mxu0 %v1057_v0 }
  0x91   : > { %v254_v21 = vpop.permute.xlu1 %253  ;;  %v252_v22 = vpop.permute.xlu0 %251 }
  0x92   : > { %v256_v23 = vsel %vm255_vm5, %v252_v22, %v254_v21 }
  0x93   : > { %367 = vmatpush1.bf16.msra.mxu0 %v263_v20 }
  0x94   : > { %368 = vmatprep.subr.bf16.mxu0 %v1057_v0 }
  0x95   : > { %v247_v24 = vpop.permute.xlu1 %246  ;;  %v245_v25 = vpop.permute.xlu0 %244 }
  0x96   : > { %v249_v26 = vsel %vm248_vm6, %v245_v25, %v247_v24 }
  0x97   : > { %369 = vmatpush1.bf16.msra.mxu0 %v256_v23 }
  0x98   : > { %370 = vmatprep.subr.bf16.mxu0 %v1057_v0 }
  0x99   : > { %v240_v27 = vpop.permute.xlu1 %239  ;;  %v238_v28 = vpop.permute.xlu0 %237 }
  0x9a   : > { %v242_v29 = vsel %vm241_vm7, %v238_v28, %v240_v27 }
  0x9b   : > { %371 = vmatpush1.bf16.msra.mxu0 %v249_v26 }
  0x9c   : > { %372 = vmatprep.subr.bf16.mxu0 %v1057_v0 }
  0x9d   : > { %v289_v30 = vpop.permute.xlu1 %288  ;;  %v287_v31 = vpop.permute.xlu0 %286 }
  0x9e   : > { %v291_v32 = vsel %vm290_vm8, %v287_v31, %v289_v30 }
  0x9f   : > { %373 = vmatpush1.bf16.msra.mxu0 %v242_v29 }
  0xa0   : > { %374 = vmatprep.subr.bf16.mxu0 %v1057_v0 }
  0xa3   : > { %375 = vmatpush1.bf16.msra.mxu0 %v1118_v1 }
  0xa4   : > { %390 = vmatprep.subr.bf16.mxu0 %v1057_v0 }
  0xa7   : > { %391 = vmatpush2.bf16.msra.mxu0 %v291_v32 }
  0xaa   : > { %393 = vmatmul.mubr.bf16.vlgmr.msra.gmra.mxu0 %v1029_v33  ;;  %v443_v36 = vpop.permute.xlu1 %442  ;;  %v438_v38 = vpop.permute.xlu0 %437 }
  0xab   : > { %955 = vmatprep.mubr.msk.bf16.mxu0 %vm347_vm0, %v1032_v34 }
  0xaf   : > { %v483_v37 = vpop.permute.xlu1 %482  ;;  %v487_v40 = vpop.permute.xlu0 %486 }
  0xb2   : > { %401 = vmatmul.mubr.bf16.gmra.mxu0 %v1034_v35 }
  0xb3   : > { %v475_v46 = vpop.permute.xlu0 %474 }
  0xb4   : > { %v428_v39 = vpop.permute.xlu1 %427 }
  0xb8   : > { %v433_v43 = vpop.permute.xlu1 %432 }
  0xbd   : > { %v479_v52 = vpop.permute.xlu1 %478 }
 0x16a   : > { %v394_v41 = vpop.f32.mrf.mxu0 }
 0x16b   : > { %v465_v45 = vmul.f32 %v428_v39, %v394_v41  ;;  %v1048_v39 = vld [vmem:[%s1367_s1 + $0x30] ss:$8 sps:$4 sm:$0xff]   ;;  %v297_v41 = vld [vmem:[%s1369_s3 + $0x20] sm:$0xff] }
 0x16c   : > { %v396_v42 = vpop.f32.mrf.mxu0 }
 0x16d   : > { %v505_v49 = vadd.f32 %v475_v46, %v465_v45  ;;  %v299_v42 = vld [vmem:[%s1369_s3 + $0x30] sm:$0xff] }
 0x16e   : > { %v397_v44 = vpop.f32.mrf.mxu0 }
 0x16f   : > { %v466_v50 = vmul.f32 %v433_v43, %v397_v44  ;;  %v513_v56 = vmax.f32 %v505_v49, 0.0  ;;  %v300_v43 = vld [vmem:[%s1369_s3 + $0x38] sm:$0xff]  ;;  %v301_v44 = vld [vmem:[%s1369_s3 + $0x40] sm:$0xff] }
 0x170   : > { %v399_v47 = vpop.f32.mrf.mxu0 }
 0x171   : > { %v506_v57 = vadd.f32 %v479_v52, %v466_v50  ;;  %v523_v1 = vmul.f32 %v958_v60, %v513_v56 }
 0x172   : > { %v402_v48 = vpop.f32.mrf.mxu0 }
 0x173   : > { %v467_v51 = vmul.f32 %v438_v38, %v402_v48  ;;  %v514_v2 = vmax.f32 %v506_v57, 0.0  ;;  %v982_v7 = vpack.c.bf16 %v523_v1, %v523_v1  ;;  %v1046_v38 = vld [vmem:[%s1367_s1 + $0x34] ss:$8 sps:$4 sm:$0xff]  }
 0x174   : > { %v404_v53 = vpop.f32.mrf.mxu0 }
 0x175   : > { %v507_v54 = vadd.f32 %v483_v37, %v467_v51  ;;  %v524_v8 = vmul.f32 %v958_v60, %v514_v2  ;;  %v1045_v37 = vld [vmem:[%s1367_s1 + $0x20] ss:$8 sps:$4 sm:$0xff]  }
 0x176   : > { %v405_v55 = vpop.f32.mrf.mxu0 }
 0x177   : > { %v515_v58 = vmax.f32 %v507_v54, 0.0  ;;  %v468_v59 = vmul.f32 %v443_v36, %v405_v55  ;;  %v983_v10 = vpack.c.bf16 %v524_v8, %v524_v8  ;;  %v1043_v36 = vld [vmem:[%s1367_s1 + $0x24] ss:$8 sps:$4 sm:$0xff]  }
 0x178   : > { %v407_v61 = vpop.f32.mrf.mxu0  ;;  %956 = vmatprep.mubr.msk.bf16.mxu0 %vm347_vm0, %v1043_v36 }
 0x179   : > { %v508_v62 = vadd.f32 %v487_v40, %v468_v59  ;;  %v525_v63 = vmul.f32 %v958_v60, %v515_v58  ;;  %409 = vmatmul.mubr.bf16.gmra.mxu0 %v1045_v37  ;;  %v298_v40 = vld [vmem:[%s1369_s3 + $0x28] sm:$0xff] }
 0x17a   : > { %957 = vmatprep.mubr.msk.bf16.mxu0 %vm347_vm0, %v1046_v38  ;;  %vm747_vm0 = vcmask 588800  }
 0x17b   : > { %v516_v3 = vmax.f32 %v508_v62, 0.0  ;;  %v984_v4 = vpack.c.bf16 %v525_v63, %v525_v63 }
 0x17d   : > { %562 = vrot.lane.b32.xlu0 %v984_v4, %s1067_s11  ;;  %v526_v5 = vmul.f32 %v958_v60, %v516_v3 }
 0x17f   : > { %v985_v9 = vpack.c.bf16 %v526_v5, %v526_v5 }
 0x181   : > { %573 = vrot.lane.b32.xlu1 %v985_v9, %s1067_s11  ;;  %534 = vrot.lane.b32.xlu0 %v982_v7, %s1067_s11 }
 0x182   : > { %417 = vmatmul.mubr.bf16.gmra.mxu0 %v1048_v39  ;;  %v746_v39 = vld [vmem:[%s1368_s2] sm:$0xf] }
 0x185   : > { %550 = vrot.lane.b32.xlu1 %v983_v10, %s1067_s11 }
 0x1ef   : > { %v563_v11 = vpop.permute.xlu0 %562 }
 0x1f0   : > { %v564_v13 = vrot.slane %v563_v11, 4 }
 0x1f2   : > { %v565_v14 = vsel %vm537_vm12, %v564_v13, %v563_v11 }
 0x1f3   : > { %567 = vst.msk [vmem:[#allocation2 + $0x10] sm:$0xff] %vm1200_vm13, %v565_v14  ;;  %v574_v15 = vpop.permute.xlu1 %573  ;;  %v535_v16 = vpop.permute.xlu0 %534 }
 0x1f4   : > { %568 = vst.msk [vmem:[#allocation2 + $0x14] sm:$0xf] %vm544_vm14, %v1057_v0  ;;  %v575_v17 = vrot.slane %v574_v15, 4  ;;  %v536_v18 = vrot.slane %v535_v16, 4 }
 0x1f6   : > { %v576_v19 = vsel %vm537_vm12, %v575_v17, %v574_v15  ;;  %v538_v20 = vsel %vm537_vm12, %v536_v18, %v535_v16 }
 0x1f7   : > { %578 = vst.msk [vmem:[#allocation2 + $0x18] sm:$0xff] %vm1200_vm13, %v576_v19  ;;  %543 = vst.msk [vmem:[#allocation2] sm:$0xff] %vm1200_vm13, %v538_v20  ;;  %v551_v21 = vpop.permute.xlu1 %550 }
 0x1f8   : > { %579 = vst.msk [vmem:[#allocation2 + $0x1c] sm:$0xf] %vm544_vm14, %v1057_v0  ;;  %545 = vst.msk [vmem:[#allocation2 + $0x4] sm:$0xf] %vm544_vm14, %v1057_v0  ;;  %v552_v22 = vrot.slane %v551_v21, 4 }
 0x1fa   : > { %v553_v23 = vsel %vm537_vm12, %v552_v22, %v551_v21 }
 0x1fb   : > { %555 = vst.msk [vmem:[#allocation2 + $0x8] sm:$0xff] %vm1200_vm13, %v553_v23  ;;  %v581_v30 = vld [vmem:[#allocation2 + $0x10] sm:$0xff] }
 0x1fc   : > { %556 = vst.msk [vmem:[#allocation2 + $0xc] sm:$0xf] %vm544_vm14, %v1057_v0  ;;  %v964_v31 = vcombine.high %v581_v30, %v581_v30  ;;  %v963_v32 = vcombine.low %v581_v30, %v581_v30 }
 0x1fe   : > { %v580_v36 = vld [vmem:[#allocation2 + $0x18] sm:$0xf] }
 0x1ff   : > { %v583_v24 = vld [vmem:[#allocation2] sm:$0xff]  ;;  %v614_v33 = vld [vmem:[#allocation2 + $0x18] sm:$0xff] }
 0x200   : > { %v968_v25 = vcombine.high %v583_v24, %v583_v24  ;;  %v967_v26 = vcombine.low %v583_v24, %v583_v24  ;;  %v970_v34 = vcombine.high %v614_v33, %v614_v33  ;;  %v969_v35 = vcombine.low %v614_v33, %v614_v33 }
 0x202   : > { %637 = vrot.lane.b32.xlu1 %v968_v25, %s1060_s26  ;;  %635 = vrot.lane.b32.xlu0 %v967_v26, %s1060_s26 }
 0x203   : > { %v582_v27 = vld [vmem:[#allocation2 + $0x8] sm:$0xff] }
 0x204   : > { %v966_v28 = vcombine.high %v582_v27, %v582_v27  ;;  %v965_v29 = vcombine.low %v582_v27, %v582_v27 }
 0x206   : > { %611 = vrot.lane.b32.xlu1 %v968_v25, %s1061_s27  ;;  %609 = vrot.lane.b32.xlu0 %v967_v26, %s1061_s27 }
 0x20a   : > { %627 = vrot.lane.b32.xlu1 %v966_v28, %s1061_s27  ;;  %625 = vrot.lane.b32.xlu0 %v965_v29, %s1061_s27 }
 0x20e   : > { %601 = vrot.lane.b32.xlu1 %v966_v28, %s1062_s28  ;;  %599 = vrot.lane.b32.xlu0 %v965_v29, %s1062_s28 }
 0x212   : > { %657 = vrot.lane.b32.xlu1 %v964_v31, %s1060_s26  ;;  %655 = vrot.lane.b32.xlu0 %v963_v32, %s1060_s26  ;;  %s224_s26 = scalar_lea.vmem %s1371_s5, %s980_s20 }
 0x216   : > { %647 = vrot.lane.b32.xlu1 %v964_v31, %s1061_s27  ;;  %645 = vrot.lane.b32.xlu0 %v963_v32, %s1061_s27 }
 0x21a   : > { %632 = vrot.lane.b32.xlu1 %v964_v31, %s1063_s29  ;;  %630 = vrot.lane.b32.xlu0 %v963_v32, %s1063_s29 }
 0x21e   : > { %591 = vrot.lane.b32.xlu1 %v964_v31, %s1064_s30  ;;  %589 = vrot.lane.b32.xlu0 %v963_v32, %s1064_s30 }
 0x222   : > { %652 = vrot.lane.b32.xlu1 %v970_v34, %s1061_s27  ;;  %650 = vrot.lane.b32.xlu0 %v969_v35, %s1061_s27 }
 0x226   : > { %642 = vrot.lane.b32.xlu1 %v970_v34, %s1062_s28  ;;  %640 = vrot.lane.b32.xlu0 %v969_v35, %s1062_s28 }
 0x22a   : > { %672 = vrot.lane.b32.xlu1 %v966_v28, %s1059_s25  ;;  %670 = vrot.lane.b32.xlu0 %v965_v29, %s1059_s25 }
 0x22e   : > { %622 = vrot.lane.b32.xlu1 %v970_v34, %s1064_s30  ;;  %620 = vrot.lane.b32.xlu0 %v969_v35, %s1064_s30 }
 0x232   : > { %677 = vrot.lane.b32.xlu1 %v968_v25, %s1065_s8  ;;  %675 = vrot.lane.b32.xlu0 %v967_v26, %s1065_s8 }
 0x236   : > { %667 = vrot.lane.b32.xlu1 %v968_v25, %s1059_s25  ;;  %665 = vrot.lane.b32.xlu0 %v967_v26, %s1059_s25 }
 0x23a   : > { %662 = vrot.lane.b32.xlu1 %v966_v28, %s1058_s24  ;;  %660 = vrot.lane.b32.xlu0 %v965_v29, %s1058_s24 }
 0x23e   : > { %452 = vperm.xlu1 %1023, %v298_v40   ;;  %447 = vperm.xlu0 %1022, %v297_v41  }
 0x242   : > { %457 = vperm.xlu1 %1023, %v299_v42   ;;  %462 = vperm.xlu0 %1022, %v300_v43  }
 0x246   : > { %846 = vperm.xlu1 %1023, %v301_v44   ;;  %1024 = vset.pattern.permute.xlu0 %v1066_v6 }
 0x247   : > { %490 = vperm.xlu0 %1024, %v297_v41  }
 0x24a   : > { %1025 = vset.pattern.permute.xlu1 %v1066_v6 }
 0x24b   : > { %494 = vperm.xlu1 %1025, %v298_v40   ;;  %502 = vperm.xlu0 %1024, %v300_v43  }
 0x24f   : > { %498 = vperm.xlu1 %1025, %v299_v42  }
 0x253   : > { %854 = vperm.xlu1 %1025, %v301_v44  }
 0x274   : > { %v638_v45 = vpop.permute.xlu1 %637  ;;  %v636_v46 = vpop.permute.xlu0 %635 }
 0x275   : > { %v1297_v2 = vsel %vm269_vm3, %v636_v46, %v638_v45 }
 0x276   : > { %v687_v11 = vrot.slane %v1297_v2, 4 }
 0x278   : > { %v612_v47 = vpop.permute.xlu1 %611  ;;  %v610_v48 = vpop.permute.xlu0 %609 }
 0x279   : > { %v1313_v13 = vsel %vm262_vm4, %v610_v48, %v612_v47 }
 0x27a   : > { %v682_v20 = vrot.slane %v1313_v13, 4 }
 0x27c   : > { %v628_v49 = vpop.permute.xlu1 %627  ;;  %v626_v50 = vpop.permute.xlu0 %625 }
 0x27d   : > { %v1303_v5 = vsel %vm262_vm4, %v626_v50, %v628_v49 }
 0x27e   : > { %v683_v14 = vrot.slane %v1303_v5, 4  ;;  %v725_v16 = vsel %vm692_vm15, %v1303_v5, %v687_v11 }
 0x280   : > { %v602_v51 = vpop.permute.xlu1 %601  ;;  %v600_v52 = vpop.permute.xlu0 %599  ;;  %v707_v22 = vsel %vm692_vm15, %v1313_v13, %v683_v14 }
 0x281   : > { %v603_v21 = vsel %vm255_vm5, %v600_v52, %v602_v51 }
 0x282   : > { %v684_v25 = vrot.slane %v603_v21, 4 }
 0x284   : > { %v658_v53 = vpop.permute.xlu1 %657  ;;  %v656_v54 = vpop.permute.xlu0 %655 }
 0x285   : > { %v1286_v55 = vsel %vm269_vm3, %v656_v54, %v658_v53 }
 0x286   : > { %971 = vmatprep.subr.msk.bf16.mxu1 %vm692_vm15, %v1286_v55  ;;  %v689_v49 = vrot.slane %v1286_v55, 4  ;;  %v703_v55 = vsel %vm692_vm15, %v603_v21, %v682_v20 }
 0x288   : > { %v648_v6 = vpop.permute.xlu1 %647  ;;  %v646_v56 = vpop.permute.xlu0 %645 }
 0x289   : > { %v1291_v63 = vsel %vm262_vm4, %v646_v56, %v648_v6  ;;  %v410_v6 = vpop.f32.mrf.mxu0 }
 0x28a   : > { %v686_v7 = vrot.slane %v1291_v63, 4 }
 0x28b   : > { %v412_v56 = vpop.f32.mrf.mxu0 }
 0x28c   : > { %v633_v57 = vpop.permute.xlu1 %632  ;;  %v631_v58 = vpop.permute.xlu0 %630 }
 0x28d   : > { %v634_v17 = vsel %vm248_vm6, %v631_v58, %v633_v57  ;;  %v413_v57 = vpop.f32.mrf.mxu0 }
 0x28e   : > { %v714_v24 = vsel %vm692_vm15, %v634_v17, %v682_v20 }
 0x28f   : > { %v415_v58 = vpop.f32.mrf.mxu0 }
 0x290   : > { %v592_v59 = vpop.permute.xlu1 %591  ;;  %v590_v60 = vpop.permute.xlu0 %589 }
 0x291   : > { %v593_v23 = vsel %vm241_vm7, %v590_v60, %v592_v59  ;;  %v418_v59 = vpop.f32.mrf.mxu0 }
 0x292   : > { %v680_v29 = vrot.slane %v593_v23, 4 }
 0x293   : > { %v420_v60 = vpop.f32.mrf.mxu0 }
 0x294   : > { %v653_v61 = vpop.permute.xlu1 %652  ;;  %v651_v62 = vpop.permute.xlu0 %650  ;;  %v695_v37 = vsel %vm692_vm15, %v580_v36, %v680_v29 }
 0x295   : > { %v1294_v1 = vsel %vm262_vm4, %v651_v62, %v653_v61  ;;  %v421_v61 = vpop.f32.mrf.mxu0 }
 0x296   : > { %v688_v3 = vrot.slane %v1294_v1, 4  ;;  %v751_v4 = vsel %vm692_vm15, %v1294_v1, 0  ;;  %v733_v52 = vsel %vm692_vm15, %v1294_v1, %v689_v49 }
 0x297   : > { %769 = vmatpush1.bf16.msra.mxu1 %v751_v4  ;;  %v423_v62 = vpop.f32.mrf.mxu0 }
 0x298   : > { %v643_v8 = vpop.permute.xlu1 %642  ;;  %v641_v9 = vpop.permute.xlu0 %640  ;;  %v729_v10 = vsel %vm692_vm15, %v1291_v63, %v688_v3 }
 0x299   : > { %v1310_v12 = vsel %vm255_vm5, %v641_v9, %v643_v8  ;;  %770 = vmatprep.subr.bf16.mxu1 %v729_v10 }
 0x29a   : > { %v736_v15 = vsel %vm692_vm15, %v1310_v12, %v686_v7  ;;  %v685_v53 = vrot.slane %v1310_v12, 4 }
 0x29b   : > { %771 = vmatpush1.bf16.msra.mxu1 %v736_v15 }
 0x29c   : > { %v673_v18 = vpop.permute.xlu1 %672  ;;  %772 = vmatprep.subr.bf16.mxu1 %v725_v16  ;;  %v671_v19 = vpop.permute.xlu0 %670  ;;  %v718_v54 = vsel %vm692_vm15, %v1303_v5, %v685_v53 }
 0x29d   : > { %v674_v35 = vsel %vm283_vm1, %v671_v19, %v673_v18 }
 0x29e   : > { %v691_v40 = vrot.slane %v674_v35, 4  ;;  %v757_v44 = vsel %vm692_vm15, %v674_v35, 0 }
 0x29f   : > { %773 = vmatpush1.bf16.msra.mxu1 %v707_v22 }
 0x2a0   : > { %v623_v26 = vpop.permute.xlu1 %622  ;;  %774 = vmatprep.subr.bf16.mxu1 %v714_v24  ;;  %v621_v27 = vpop.permute.xlu0 %620 }
 0x2a1   : > { %v624_v28 = vsel %vm241_vm7, %v621_v27, %v623_v26 }
 0x2a2   : > { %v681_v30 = vrot.slane %v624_v28, 4  ;;  %v711_v31 = vsel %vm692_vm15, %v624_v28, %v684_v25 }
 0x2a3   : > { %775 = vmatpush1.bf16.msra.mxu1 %v711_v31 }
 0x2a4   : > { %v678_v32 = vpop.permute.xlu1 %677  ;;  %v676_v33 = vpop.permute.xlu0 %675  ;;  %v699_v34 = vsel %vm692_vm15, %v593_v23, %v681_v30 }
 0x2a5   : > { %776 = vmatprep.subr.bf16.mxu1 %v699_v34  ;;  %v679_v38 = vsel %vm290_vm8, %v676_v33, %v678_v32 }
 0x2a7   : > { %777 = vmatpush1.bf16.msra.mxu1 %v695_v37 }
 0x2a8   : > { %v668_v41 = vpop.permute.xlu1 %667  ;;  %973 = vmatprep.subr.msk.bf16.mxu1 %vm692_vm15, %v679_v38  ;;  %v666_v42 = vpop.permute.xlu0 %665 }
 0x2a9   : > { %v669_v43 = vsel %vm283_vm1, %v666_v42, %v668_v41 }
 0x2aa   : > { %972 = vmatmul.mubr.msk.bf16.vlgmr.msra.gmra.mxu1 %vm747_vm0, %v746_v39  ;;  %v744_v45 = vsel %vm692_vm15, %v669_v43, %v691_v40  ;;  %v690_v46 = vrot.slane %v669_v43, 4 }
 0x2ab   : > { %810 = vmatpush1.bf16.msra.mxu1 %v757_v44  ;;  %835 = vmatprep.mubr.bf16.mxu1 %v1057_v0  ;;  %v722_v0 = vsel %vm692_vm15, %v1297_v2, %v686_v7 }
 0x2ac   : > { %v663_v47 = vpop.permute.xlu1 %662  ;;  %811 = vmatprep.subr.bf16.mxu1 %v744_v45  ;;  %v661_v48 = vpop.permute.xlu0 %660 }
 0x2ad   : > { %v664_v50 = vsel %vm276_vm2, %v661_v48, %v663_v47 }
 0x2ae   : > { %v740_v51 = vsel %vm692_vm15, %v664_v50, %v690_v46 }
 0x2af   : > { %812 = vmatpush1.bf16.msra.mxu1 %v740_v51 }
 0x2b0   : > { %813 = vmatprep.subr.bf16.mxu1 %v733_v52 }
 0x2b3   : > { %814 = vmatpush1.bf16.msra.mxu1 %v729_v10 }
 0x2b4   : > { %815 = vmatprep.subr.bf16.mxu1 %v722_v0 }
 0x2b7   : > { %816 = vmatpush1.bf16.msra.mxu1 %v718_v54 }
 0x2b8   : > { %817 = vmatprep.subr.bf16.mxu1 %v707_v22 }
 0x2b9   : > { %v453_v63 = vpop.permute.xlu1 %452  ;;  %v448_v3 = vpop.permute.xlu0 %447 }
 0x2ba   : > { %v469_v8 = vmul.f32 %v448_v3, %v410_v6  ;;  %v470_v10 = vmul.f32 %v453_v63, %v413_v57 }
 0x2bb   : > { %818 = vmatpush1.bf16.msra.mxu1 %v703_v55 }
 0x2bd   : > { %v458_v1 = vpop.permute.xlu1 %457  ;;  %v463_v5 = vpop.permute.xlu0 %462 }
 0x2be   : > { %974 = vmatmul.mubr.msk.bf16.vlgmr.msra.gmra.mxu1 %vm747_vm0, %v746_v39  ;;  %v471_v27 = vmul.f32 %v458_v1, %v418_v59  ;;  %v472_v29 = vmul.f32 %v463_v5, %v421_v61 }
 0x2c1   : > { %v847_v2 = vpop.permute.xlu1 %846 }
 0x2c2   : > { %v491_v9 = vpop.permute.xlu0 %490 }
 0x2c3   : > { %v509_v14 = vadd.f32 %v491_v9, %v469_v8 }
 0x2c6   : > { %v495_v4 = vpop.permute.xlu1 %494  ;;  %v503_v31 = vpop.permute.xlu0 %502 }
 0x2c7   : > { %v510_v16 = vadd.f32 %v495_v4, %v470_v10  ;;  %v512_v37 = vadd.f32 %v503_v31, %v472_v29 }
 0x2ca   : > { %v499_v7 = vpop.permute.xlu1 %498 }
 0x2cb   : > { %v511_v33 = vadd.f32 %v499_v7, %v471_v27 }
 0x2ce   : > { %v855_v12 = vpop.permute.xlu1 %854 }
 0x36a   : > { %v796_v11 = vpop.f32.mrf.mxu1 }
 0x36b   : > { %v849_v13 = vmul.f32 %v847_v2, %v796_v11 }
 0x36c   : > { %v798_v15 = vpop.f32.mrf.mxu1 }
 0x36d   : > { %v850_v17 = vmul.f32 %v847_v2, %v798_v15  ;;  %v857_v18 = vadd.f32 %v855_v12, %v849_v13 }
 0x36e   : > { %v800_v19 = vpop.f32.mrf.mxu1 }
 0x36f   : > { %v858_v20 = vadd.f32 %v855_v12, %v850_v17  ;;  %v861_v21 = vadd.f32 %v857_v18, %v509_v14 }
 0x370   : > { %v801_v22 = vpop.f32.mrf.mxu1 }
 0x371   : > { %v865_v23 = vadd.f32 %v858_v20, %v510_v16  ;;  %v862_v24 = vmax.f32 %v861_v21, 0.0 }
 0x373   : > { %v866_v25 = vmax.f32 %v865_v23, 0.0 }
 0x375   : > { %v989_v26 = vpack.c.bf16 %v866_v25, %v862_v24 }
 0x377   : > { %990 = vst [vmem:[%s224_s26] sm:$0xff] %v989_v26  }
 0x37e   : > { %v837_v28 = vpop.f32.mrf.mxu1 }
 0x37f   : > { %v851_v30 = vmul.f32 %v847_v2, %v837_v28 }
 0x380   : > { %v839_v32 = vpop.f32.mrf.mxu1 }
 0x381   : > { %v859_v34 = vadd.f32 %v855_v12, %v851_v30  ;;  %v852_v35 = vmul.f32 %v847_v2, %v839_v32 }
 0x382   : > { %v841_v36 = vpop.f32.mrf.mxu1 }
 0x383   : > { %v870_v38 = vadd.f32 %v859_v34, %v511_v33  ;;  %v860_v39 = vadd.f32 %v855_v12, %v852_v35 }
 0x384   : > { %v842_v40 = vpop.f32.mrf.mxu1 }
 0x385   : > { %v875_v41 = vadd.f32 %v860_v39, %v512_v37  ;;  %v871_v42 = vmax.f32 %v870_v38, 0.0 }
 0x387   : > { %v876_v43 = vmax.f32 %v875_v41, 0.0 }
 0x389   : > { %v994_v44 = vpack.c.bf16 %v876_v43, %v871_v42 }
 0x38b   : > { %996 = vst [vmem:[%s224_s26 + $0x8] sm:$0xff] %v994_v44  }
 0x38c PF: > { %s15_s18 = sadd.s32 1, %s1055_s18  }
 0x38d   : > { %p12_p4 = scmp.ge.s32.totalorder %s15_s18, 4  }
 0x38f   :  { %14 = sbr.rel (!%p12_p4) target bundleno = 1 (0x1), region = 76 }

// kernel: upproj_forward.5
= control target key start
LH: loop header
LB: loop body
LE: loop exit
PB: predicated region body
PF: predicated region fallthrough
CT: control target
= control target key end

     0   :  { %s1023_s18 = smov 0   ;;  %s1261_s0 = inlined_call_operand.vmem [shape: bf16[2,8,158], index: 0, kind: input, shape index: {}]   ;;  %s1262_s1 = inlined_call_operand.vmem [shape: bf16[32,72], index: 1, kind: input, shape index: {}]   ;;  %s1263_s2 = inlined_call_operand.vmem [shape: bf16[4,36], index: 2, kind: input, shape index: {}]   ;;  %s1264_s3 = inlined_call_operand.vmem [shape: f32[36,2], index: 3, kind: input, shape index: {}]   ;;  %s1265_s4 = inlined_call_operand.vmem [shape: f32[1,128], index: 4, kind: input, shape index: {}]   ;;  %s1266_s5 = inlined_call_operand.vmem [shape: bf16[2,4,4,128], index: 5, kind: output, shape index: {}]  }
   0x1 LB: > { %s885_s19 = sadd.s32 4294967295, %s979_s18   ;;  %p889_p0 = scmp.ge.s32.totalorder %s979_s18, 1  ;;  %s979_s18 = sphi %s1023_s18, %s15_s18  }
   0x2   : > { %p187_p1 = scmp.lt.s32.totalorder %s979_s18, 3 }
   0x4   : > { %p188_p2 = pnand %p889_p0, %p187_p1 }
   0x5   : > { %p215_p3 = scmp.lt.s32.totalorder (!%p188_p2), %s885_s19, 1  ;;  %s981_s24 = smov (!%p188_p2), 108  }
   0x6   : > { %191 = sbr.rel (%p188_p2) target bundleno = 895 (0x37f), region = 40  ;;  %s982_s25 = smov (!%p188_p2), 106  }
   0x7   : > { %s983_s26 = smov (!%p188_p2), 107   ;;  %s984_s27 = smov (!%p188_p2), 117  }
   0x8   : > { %s985_s28 = smov (!%p188_p2), 116   ;;  %s986_s6 = smov (!%p188_p2), 126  }
   0x9   : > { %s988_s7 = smov (!%p188_p2), 118   ;;  %s989_s8 = smov (!%p188_p2), 127  }
   0xa   : > { %s992_s17 = smov (!%p188_p2), 11  }
   0xb   : > { %s1270_s19 = smov (!%p215_p3, %s885_s19), 1  ;;  %v971_v3 = vld [vmem:[%s1262_s1] sm:$0xff]   ;;  %vm317_vm0 = vcmask 588800   ;;  %v987_v4 = vmov 0   ;;  %v298_v5 = vld [vmem:[%s1264_s3 + $0x8] sm:$0xff]  ;;  %v990_v7 = vmov 1   ;;  %v437_v48 = vlaneseq }
   0xc   : > { %s915_s20 = sshll.u32 %s1270_s19, 3  ;;  %934 = vmatprep.mubr.msk.bf16.mxu0 %vm317_vm0, %v971_v3  ;;  %960 = vset.pattern.permute.xlu1 %v987_v4  ;;  %v297_v6 = vld [vmem:[%s1264_s3] sm:$0xff]  ;;  %vm278_vm1 = vcmask 867328   ;;  %vm280_vm2 = vcmask 1043456   ;;  %vm266_vm3 = vcmask 883712   ;;  %vm272_vm4 = vcmask 875520  }
   0xd   : > { %s219_s23 = scalar_lea.vmem %s1261_s0, %s915_s20  ;;  %959 = vset.pattern.permute.xlu0 %v987_v4  ;;  %738 = vmatprep.mubr.bf16.mxu1 %v987_v4  ;;  %vm254_vm5 = vcmask 957440   ;;  %vm260_vm6 = vcmask 949248   ;;  %vm242_vm7 = vcmask 1031168   ;;  %vm248_vm8 = vcmask 965632   ;;  %v972_v37 = vld [vmem:[%s1262_s1 + $0x8] sm:$0xff]  }
   0xe   : > { %v1039_v0 = vld [vmem:[%s219_s23] sm:$0xff]  ;;  %vm236_vm9 = vcmask 1039360   ;;  %vm431_vm10 = vcmask 82944   ;;  %v991_v46 = vmov 1983009808   ;;  %v438_v55 = vshrl.u32 %v437_v48, 7 }
   0xf   : > { %v894_v1 = vcombine.low %v1039_v0, %v1039_v0  ;;  %v895_v2 = vcombine.high %v1039_v0, %v1039_v0  ;;  %464 = vst.msk [vmem:[#allocation2 + $0x8] sm:$0x3] %vm431_vm10, %v987_v4  ;;  %432 = vst.msk [vmem:[#allocation2] sm:$0x3] %vm431_vm10, %v987_v4  ;;  %v435_v47 = vunpack.c.l.s4 %v991_v46  ;;  %v900_v56 = vld [vmem:[%s1265_s4] ss:$0 sm:$0xff] }
  0x10   : > { %454 = vst.msk [vmem:[#allocation2 + $0x4] sm:$0x3] %vm431_vm10, %v987_v4  ;;  %481 = vst.msk [vmem:[#allocation2 + $0xc] sm:$0x3] %vm431_vm10, %v987_v4  ;;  %vm447_vm11 = vcmask 1041496   ;;  %vm448_vm12 = vcmask 84994  }
  0x11   : > { %262 = vrot.lane.b32.xlu1 %v894_v1, %s981_s24  ;;  %274 = vrot.lane.b32.xlu0 %v894_v1, %s982_s25  ;;  %v436_v54 = vunpack.c.0.s8 %v435_v47  ;;  %vm444_vm13 = vcmask 89088   ;;  %vm1108_vm14 = vmor %vm448_vm12, %vm447_vm11  ;;  %vm451_vm15 = vcmask 238680  }
  0x13   : > { %v439_v60 = vsub.s32 %v436_v54, %v438_v55 }
  0x15   : > { %264 = vrot.lane.b32.xlu1 %v895_v2, %s981_s24  ;;  %276 = vrot.lane.b32.xlu0 %v895_v2, %s982_s25 }
  0x19   : > { %270 = vrot.lane.b32.xlu1 %v895_v2, %s983_s26  ;;  %268 = vrot.lane.b32.xlu0 %v894_v1, %s983_s26 }
  0x1d   : > { %252 = vrot.lane.b32.xlu1 %v895_v2, %s984_s27  ;;  %250 = vrot.lane.b32.xlu0 %v894_v1, %s984_s27 }
  0x21   : > { %258 = vrot.lane.b32.xlu1 %v895_v2, %s985_s28  ;;  %256 = vrot.lane.b32.xlu0 %v894_v1, %s985_s28 }
  0x25   : > { %240 = vrot.lane.b32.xlu1 %v895_v2, %s986_s6  ;;  %238 = vrot.lane.b32.xlu0 %v894_v1, %s986_s6 }
  0x29   : > { %246 = vrot.lane.b32.xlu1 %v895_v2, %s988_s7  ;;  %244 = vrot.lane.b32.xlu0 %v894_v1, %s988_s7 }
  0x2d   : > { %234 = vrot.lane.b32.xlu1 %v895_v2, %s989_s8  ;;  %232 = vrot.lane.b32.xlu0 %v894_v1, %s989_s8 }
  0x31   : > { %383 = vperm.xlu1 %960, %v298_v5   ;;  %378 = vperm.xlu0 %959, %v297_v6  }
  0x35   : > { %961 = vset.pattern.permute.xlu1 %v990_v7  ;;  %962 = vset.pattern.permute.xlu0 %v990_v7 }
  0x36   : > { %401 = vperm.xlu1 %961, %v297_v6   ;;  %405 = vperm.xlu0 %962, %v298_v5  }
  0x3a   : > { %963 = vset.pattern.permute.xlu0 %v987_v4  ;;  %964 = vset.pattern.permute.xlu1 %v987_v4 }
  0x83   : > { %v263_v8 = vpop.permute.xlu1 %262  ;;  %v275_v9 = vpop.permute.xlu0 %274 }
  0x87   : > { %v265_v10 = vpop.permute.xlu1 %264  ;;  %v277_v11 = vpop.permute.xlu0 %276 }
  0x88   : > { %v279_v12 = vsel %vm278_vm1, %v275_v9, %v277_v11  ;;  %v267_v16 = vsel %vm266_vm3, %v263_v8, %v265_v10 }
  0x89   : > { %938 = vmatprep.subr.msk.bf16.mxu0 %vm280_vm2, %v279_v12  ;;  %v325_v13 = vsel %vm280_vm2, %v279_v12, 0 }
  0x8a   : > { %925 = vmatpush3.bf16.msra.mxu0 %v325_v13 }
  0x8b   : > { %v271_v14 = vpop.permute.xlu1 %270  ;;  %v269_v15 = vpop.permute.xlu0 %268 }
  0x8c   : > { %v273_v17 = vsel %vm272_vm4, %v269_v15, %v271_v14 }
  0x8d   : > { %v295_v18 = vsel %vm280_vm2, %v267_v16, %v273_v17 }
  0x8e   : > { %926 = vmatprep.subr.bf16.mxu0 %v295_v18 }
  0x8f   : > { %v253_v19 = vpop.permute.xlu1 %252  ;;  %927 = vmatpush3.bf16.msra.mxu0 %v295_v18  ;;  %v251_v20 = vpop.permute.xlu0 %250 }
  0x90   : > { %v255_v23 = vsel %vm254_vm5, %v251_v20, %v253_v19 }
  0x93   : > { %v259_v21 = vpop.permute.xlu1 %258  ;;  %v257_v22 = vpop.permute.xlu0 %256 }
  0x94   : > { %v261_v24 = vsel %vm260_vm6, %v257_v22, %v259_v21 }
  0x95   : > { %v291_v25 = vsel %vm280_vm2, %v255_v23, %v261_v24 }
  0x96   : > { %928 = vmatprep.subr.bf16.mxu0 %v291_v25 }
  0x97   : > { %v241_v26 = vpop.permute.xlu1 %240  ;;  %929 = vmatpush3.bf16.msra.mxu0 %v291_v25  ;;  %v239_v27 = vpop.permute.xlu0 %238 }
  0x98   : > { %v243_v30 = vsel %vm242_vm7, %v239_v27, %v241_v26  ;;  %v299_v26 = vld [vmem:[%s1264_s3 + $0x10] sm:$0xff]  ;;  %v300_v27 = vld [vmem:[%s1264_s3 + $0x18] sm:$0xff] }
  0x9b   : > { %v247_v28 = vpop.permute.xlu1 %246  ;;  %v245_v29 = vpop.permute.xlu0 %244 }
  0x9c   : > { %v249_v31 = vsel %vm248_vm8, %v245_v29, %v247_v28  ;;  %v301_v28 = vld [vmem:[%s1264_s3 + $0x20] sm:$0xf] }
  0x9d   : > { %v287_v32 = vsel %vm280_vm2, %v243_v30, %v249_v31 }
  0x9e   : > { %930 = vmatprep.subr.bf16.mxu0 %v287_v32 }
  0x9f   : > { %v235_v33 = vpop.permute.xlu1 %234  ;;  %931 = vmatpush3.bf16.msra.mxu0 %v287_v32  ;;  %v233_v34 = vpop.permute.xlu0 %232 }
  0xa0   : > { %v237_v35 = vsel %vm236_vm9, %v233_v34, %v235_v33 }
  0xa1   : > { %v283_v36 = vsel %vm280_vm2, %v1039_v0, %v237_v35 }
  0xa2   : > { %932 = vmatprep.subr.bf16.mxu0 %v283_v36 }
  0xa3   : > { %933 = vmatpush3.bf16.msra.mxu0 %v283_v36 }
  0xa6   : > { %935 = vmatmul.mubr.msk.bf16.vlgmr.msra.gmra.mxu0 %vm317_vm0, %v972_v37  ;;  %vm628_vm0 = vcmask 1041408  }
  0xac   : > { %v384_v38 = vpop.permute.xlu1 %383  ;;  %v379_v40 = vpop.permute.xlu0 %378 }
  0xb1   : > { %v402_v42 = vpop.permute.xlu1 %401  ;;  %v406_v50 = vpop.permute.xlu0 %405 }
 0x166   : > { %v1101_v39 = vpop.f32.mrf.mxu0 }
 0x168   : > { %v361_v41 = vpop.f32.mrf.mxu0 }
 0x169   : > { %v396_v43 = vmul.f32 %v379_v40, %v361_v41 }
 0x16a   : > { %v1103_v44 = vpop.f32.mrf.mxu0 }
 0x16b   : > { %v416_v45 = vadd.f32 %v402_v42, %v396_v43 }
 0x16c   : > { %v364_v49 = vpop.f32.mrf.mxu0 }
 0x16d   : > { %v397_v51 = vmul.f32 %v384_v38, %v364_v49  ;;  %v420_v52 = vmax.f32 %v416_v45, 0.0 }
 0x16f   : > { %v417_v53 = vadd.f32 %v406_v50, %v397_v51  ;;  %v428_v58 = vmul.f32 %v900_v56, %v420_v52 }
 0x171   : > { %v421_v57 = vmax.f32 %v417_v53, 0.0 }
 0x173   : > { %v429_v59 = vmul.f32 %v900_v56, %v421_v57 }
 0x175   : > { %v430_v61 = vpack.c.bf16 %v429_v59, %v428_v58  ;;  %v901_v62 = vpack.c.bf16 %v429_v59, %v429_v59 }
 0x177   : > { %v472_v63 = vrot.slane %v901_v62, %v439_v60  ;;  %v440_v0 = vrot.slane %v430_v61, %v439_v60 }
 0x179   : > { %473 = vrot.lane.b32.xlu0 %v472_v63, %s992_s17  ;;  %441 = vrot.lane.b32.xlu1 %v440_v0, %s992_s17  ;;  %v455_v1 = vcombine.high %v440_v0, %v440_v0  ;;  %v482_v2 = vcombine.high %v472_v63, %v472_v63 }
 0x17d   : > { %456 = vrot.lane.b32.xlu1 %v455_v1, %s992_s17 }
 0x181   : > { %483 = vrot.lane.b32.xlu1 %v482_v2, %s992_s17 }
 0x1eb   : > { %v474_v3 = vpop.permute.xlu0 %473  ;;  %v442_v5 = vpop.permute.xlu1 %441 }
 0x1ec   : > { %v475_v8 = vrot.slane %v474_v3, 6  ;;  %v443_v9 = vrot.slane %v442_v5, 6 }
 0x1ee   : > { %v476_v10 = vsel %vm444_vm13, %v475_v8, %v474_v3  ;;  %v445_v11 = vsel %vm444_vm13, %v443_v9, %v442_v5 }
 0x1ef   : > { %478 = vst.msk [vmem:[#allocation2 + $0x8] sm:$0xf] %vm1108_vm14, %v476_v10  ;;  %450 = vst.msk [vmem:[#allocation2] sm:$0xf] %vm1108_vm14, %v445_v11  ;;  %v457_v12 = vpop.permute.xlu1 %456 }
 0x1f0   : > { %479 = vst.msk [vmem:[#allocation2 + $0xa] sm:$0x3] %vm451_vm15, %v987_v4  ;;  %452 = vst.msk [vmem:[#allocation2 + $0x2] sm:$0x3] %vm451_vm15, %v987_v4  ;;  %v458_v13 = vrot.slane %v457_v12, 6 }
 0x1f2   : > { %v459_v14 = vsel %vm444_vm13, %v458_v13, %v457_v12 }
 0x1f3   : > { %461 = vst.msk [vmem:[#allocation2 + $0x4] sm:$0xf] %vm1108_vm14, %v459_v14  ;;  %v484_v15 = vpop.permute.xlu1 %483 }
 0x1f4   : > { %462 = vst.msk [vmem:[#allocation2 + $0x6] sm:$0x3] %vm451_vm15, %v987_v4  ;;  %v485_v16 = vrot.slane %v484_v15, 6 }
 0x1f6   : > { %v486_v17 = vsel %vm444_vm13, %v485_v16, %v484_v15 }
 0x1f7   : > { %488 = vst.msk [vmem:[#allocation2 + $0xc] sm:$0xf] %vm1108_vm14, %v486_v17  ;;  %v904_v18 = vld.sshfl [vmem:[#allocation2] sm:$0x33 pattern:$0x76325410] }
 0x1f8   : > { %489 = vst.msk [vmem:[#allocation2 + $0xe] sm:$0x3] %vm451_vm15, %v987_v4  ;;  %561 = vrot.lane.b32.xlu0 %v904_v18, %s985_s28  ;;  %v530_v19 = vcombine.high %v904_v18, %v904_v18  ;;  %v902_v20 = vld.sshfl [vmem:[#allocation2 + $0x8] sm:$0x33 pattern:$0x76325410] }
 0x1f9   : > { %v502_v21 = vcombine.high %v902_v20, %v902_v20 }
 0x1fa   : > { %563 = vrot.lane.b32.xlu1 %v530_v19, %s985_s28 }
 0x1fb   : > { %v903_v22 = vld.sshfl [vmem:[#allocation2 + $0x4] sm:$0x33 pattern:$0x76325410] }
 0x1fc   : > { %571 = vrot.lane.b32.xlu0 %v902_v20, %s984_s27  ;;  %v516_v23 = vcombine.high %v903_v22, %v903_v22 }
 0x1fe   : > { %573 = vrot.lane.b32.xlu1 %v502_v21, %s984_s27 }
 0x1ff   : > { %v905_v24 = vld.sshfl [vmem:[#allocation2 + $0xc] sm:$0x33 pattern:$0x76325410] }
 0x200   : > { %581 = vrot.lane.b32.xlu0 %v902_v20, %s985_s28  ;;  %v545_v25 = vcombine.high %v905_v24, %v905_v24 }
 0x202   : > { %583 = vrot.lane.b32.xlu1 %v502_v21, %s985_s28 }
 0x204   : > { %531 = vrot.lane.b32.xlu0 %v904_v18, %s984_s27 }
 0x206   : > { %533 = vrot.lane.b32.xlu1 %v530_v19, %s984_s27 }
 0x208   : > { %503 = vrot.lane.b32.xlu0 %v902_v20, %s989_s8 }
 0x20a   : > { %505 = vrot.lane.b32.xlu1 %v502_v21, %s989_s8 }
 0x20c   : > { %556 = vrot.lane.b32.xlu0 %v902_v20, %s986_s6 }
 0x20e   : > { %558 = vrot.lane.b32.xlu1 %v502_v21, %s986_s6  ;;  %s224_s6 = scalar_lea.vmem %s1266_s5, %s915_s20 }
 0x210   : > { %591 = vrot.lane.b32.xlu0 %v904_v18, %s983_s26 }
 0x212   : > { %593 = vrot.lane.b32.xlu1 %v530_v19, %s983_s26 }
 0x214   : > { %601 = vrot.lane.b32.xlu0 %v904_v18, %s982_s25 }
 0x216   : > { %603 = vrot.lane.b32.xlu1 %v530_v19, %s982_s25 }
 0x218   : > { %551 = vrot.lane.b32.xlu0 %v903_v22, %s984_s27 }
 0x21a   : > { %553 = vrot.lane.b32.xlu1 %v516_v23, %s984_s27 }
 0x21c   : > { %576 = vrot.lane.b32.xlu0 %v905_v24, %s984_s27 }
 0x21e   : > { %578 = vrot.lane.b32.xlu1 %v545_v25, %s984_s27 }
 0x220   : > { %566 = vrot.lane.b32.xlu0 %v905_v24, %s988_s7 }
 0x222   : > { %568 = vrot.lane.b32.xlu1 %v545_v25, %s988_s7 }
 0x224   : > { %546 = vrot.lane.b32.xlu0 %v905_v24, %s989_s8 }
 0x226   : > { %548 = vrot.lane.b32.xlu1 %v545_v25, %s989_s8 }
 0x228   : > { %517 = vrot.lane.b32.xlu0 %v903_v22, %s988_s7 }
 0x22a   : > { %519 = vrot.lane.b32.xlu1 %v516_v23, %s988_s7 }
 0x22c   : > { %596 = vrot.lane.b32.xlu0 %v903_v22, %s983_s26 }
 0x22e   : > { %598 = vrot.lane.b32.xlu1 %v516_v23, %s983_s26 }
 0x230   : > { %586 = vrot.lane.b32.xlu0 %v903_v22, %s981_s24 }
 0x232   : > { %588 = vrot.lane.b32.xlu1 %v516_v23, %s981_s24 }
 0x234   : > { %388 = vperm.xlu0 %963, %v299_v26  }
 0x236   : > { %393 = vperm.xlu1 %964, %v300_v27  }
 0x238   : > { %966 = vset.pattern.permute.xlu0 %v990_v7 }
 0x239   : > { %413 = vperm.xlu0 %966, %v300_v27  }
 0x23a   : > { %965 = vset.pattern.permute.xlu1 %v990_v7 }
 0x23b   : > { %409 = vperm.xlu1 %965, %v299_v26   ;;  %v490_v26 = vld [vmem:[#allocation2 + $0xc] sm:$0x3] }
 0x23f   : > { %967 = vset.pattern.permute.xlu1 %v987_v4 }
 0x240   : > { %790 = vperm.xlu1 %967, %v301_v28  }
 0x244   : > { %968 = vset.pattern.permute.xlu1 %v990_v7 }
 0x245   : > { %798 = vperm.xlu1 %968, %v301_v28  }
 0x26a   : > { %v562_v29 = vpop.permute.xlu0 %561 }
 0x26c   : > { %v564_v30 = vpop.permute.xlu1 %563 }
 0x26d   : > { %v1181_v48 = vsel %vm260_vm6, %v562_v29, %v564_v30 }
 0x26e   : > { %v572_v31 = vpop.permute.xlu0 %571  ;;  %v618_v51 = vrot.slane %v1181_v48, 6 }
 0x270   : > { %v574_v32 = vpop.permute.xlu1 %573 }
 0x271   : > { %v1188_v52 = vsel %vm254_vm5, %v572_v31, %v574_v32 }
 0x272   : > { %v582_v33 = vpop.permute.xlu0 %581  ;;  %v622_v56 = vrot.slane %v1188_v52, 4  ;;  %v617_v6 = vrot.slane %v1188_v52, 2 }
 0x274   : > { %v584_v34 = vpop.permute.xlu1 %583 }
 0x275   : > { %v1176_v35 = vsel %vm260_vm6, %v582_v33, %v584_v34  ;;  %vm649_vm6 = vcmask 1045504  }
 0x276   : > { %v532_v36 = vpop.permute.xlu0 %531  ;;  %906 = vmatprep.subr.msk.bf16.mxu1 %vm628_vm0, %v1176_v35  ;;  %v620_v23 = vrot.slane %v1176_v35, 6 }
 0x278   : > { %v534_v37 = vpop.permute.xlu1 %533 }
 0x279   : > { %v535_v2 = vsel %vm254_vm5, %v532_v36, %v534_v37 }
 0x27a   : > { %v504_v38 = vpop.permute.xlu0 %503  ;;  %v615_v20 = vrot.slane %v535_v2, 2 }
 0x27c   : > { %v506_v40 = vpop.permute.xlu1 %505 }
 0x27d   : > { %v507_v8 = vsel %vm236_vm9, %v504_v38, %v506_v40  ;;  %v690_v40 = vld [vmem:[%s1263_s2] sm:$0x3] }
 0x27e   : > { %v557_v41 = vpop.permute.xlu0 %556  ;;  %v606_v15 = vrot.slane %v507_v8, 6 }
 0x280   : > { %v559_v7 = vpop.permute.xlu1 %558  ;;  %v631_v31 = vsel %vm628_vm0, %v490_v26, %v606_v15 }
 0x281   : > { %v560_v10 = vsel %vm242_vm7, %v557_v41, %v559_v7 }
 0x282   : > { %v592_v42 = vpop.permute.xlu0 %591  ;;  %v611_v18 = vrot.slane %v560_v10, 4 }
 0x284   : > { %v594_v43 = vpop.permute.xlu1 %593 }
 0x285   : > { %v595_v27 = vsel %vm272_vm4, %v592_v42, %v594_v43 }
 0x286   : > { %v602_v45 = vpop.permute.xlu0 %601  ;;  %v624_v36 = vrot.slane %v595_v27, 4 }
 0x288   : > { %v604_v46 = vpop.permute.xlu1 %603 }
 0x289   : > { %v605_v37 = vsel %vm278_vm1, %v602_v45, %v604_v46 }
 0x28a   : > { %v552_v47 = vpop.permute.xlu0 %551 }
 0x28c   : > { %v554_v49 = vpop.permute.xlu1 %553 }
 0x28d   : > { %v1184_v50 = vsel %vm254_vm5, %v552_v47, %v554_v49  ;;  %v613_v49 = vrot.slane %v1181_v48, 4 }
 0x28e   : > { %v577_v53 = vpop.permute.xlu0 %576  ;;  %v664_v54 = vsel %vm628_vm0, %v1184_v50, %v618_v51  ;;  %v609_v61 = vrot.slane %v1184_v50, 6  ;;  %v608_v51 = vrot.slane %v535_v2, 6 }
 0x28f   : > { %v674_v62 = vsel %vm280_vm2, %v664_v54, %v622_v56 }
 0x290   : > { %v579_v55 = vpop.permute.xlu1 %578  ;;  %v640_v9 = vsel %vm628_vm0, %v535_v2, %v609_v61 }
 0x291   : > { %v1194_v57 = vsel %vm254_vm5, %v577_v53, %v579_v55  ;;  %vm691_vm5 = vcmask 293888   ;;  %v626_v55 = vrot.slane %v595_v27, 2 }
 0x292   : > { %v625_v58 = vrot.slane %v1194_v57, 2  ;;  %v567_v59 = vpop.permute.xlu0 %566  ;;  %v695_v60 = vsel %vm628_vm0, %v1194_v57, 0  ;;  %v670_v33 = vsel %vm628_vm0, %v1194_v57, %v620_v23  ;;  %v619_v7 = vrot.slane %v1194_v57, 6 }
 0x293   : > { %717 = vmatpush1.bf16.msra.mxu1 %v695_v60  ;;  %v678_v42 = vsel %vm280_vm2, %v670_v33, %v624_v36 }
 0x294   : > { %v569_v63 = vpop.permute.xlu1 %568  ;;  %v682_v0 = vsel %vm649_vm6, %v674_v62, %v625_v58  ;;  %v667_v57 = vsel %vm628_vm0, %v1188_v52, %v619_v7  ;;  %v648_v58 = vsel %vm280_vm2, %v640_v9, %v613_v49 }
 0x295   : > { %v1203_v1 = vsel %vm248_vm8, %v567_v59, %v569_v63  ;;  %718 = vmatprep.subr.bf16.mxu1 %v682_v0  ;;  %v612_v59 = vrot.slane %v1184_v50, 4  ;;  %v660_v61 = vsel %vm649_vm6, %v648_v58, %v617_v6 }
 0x296   : > { %v621_v3 = vrot.slane %v1203_v1, 4  ;;  %v547_v5 = vpop.permute.xlu0 %546  ;;  %v616_v62 = vrot.slane %v1203_v1, 2 }
 0x298   : > { %v549_v11 = vpop.permute.xlu1 %548  ;;  %v672_v12 = vsel %vm280_vm2, %v640_v9, %v621_v3 }
 0x299   : > { %v550_v13 = vsel %vm236_vm9, %v547_v5, %v549_v11  ;;  %v679_v14 = vsel %vm649_vm6, %v672_v12, %v617_v6 }
 0x29a   : > { %v607_v16 = vrot.slane %v550_v13, 6  ;;  %v518_v17 = vpop.permute.xlu0 %517  ;;  %719 = vmatpush1.bf16.msra.mxu1 %v679_v14  ;;  %v610_v19 = vrot.slane %v550_v13, 4 }
 0x29c   : > { %v520_v21 = vpop.permute.xlu1 %519  ;;  %v634_v22 = vsel %vm628_vm0, %v507_v8, %v607_v16  ;;  %v642_v32 = vsel %vm280_vm2, %v631_v31, %v610_v19 }
 0x29d   : > { %v521_v24 = vsel %vm248_vm8, %v518_v17, %v520_v21  ;;  %v644_v25 = vsel %vm280_vm2, %v634_v22, %v611_v18 }
 0x29e   : > { %v614_v28 = vrot.slane %v521_v24, 2  ;;  %v597_v29 = vpop.permute.xlu0 %596  ;;  %v654_v30 = vsel %vm649_vm6, %v644_v25, %v615_v20  ;;  %v637_v56 = vsel %vm628_vm0, %v521_v24, %v608_v51 }
 0x29f   : > { %720 = vmatprep.subr.bf16.mxu1 %v654_v30 }
 0x2a0   : > { %v599_v34 = vpop.permute.xlu1 %598  ;;  %v651_v35 = vsel %vm649_vm6, %v642_v32, %v614_v28 }
 0x2a1   : > { %v600_v38 = vsel %vm272_vm4, %v597_v29, %v599_v34  ;;  %721 = vmatpush1.bf16.msra.mxu1 %v651_v35 }
 0x2a2   : > { %v627_v41 = vrot.slane %v600_v38, 2  ;;  %908 = vmatprep.subr.msk.bf16.mxu1 %vm628_vm0, %v605_v37  ;;  %v701_v43 = vsel %vm628_vm0, %v600_v38, 0  ;;  %v587_v47 = vpop.permute.xlu0 %586 }
 0x2a4   : > { %907 = vmatmul.mubr.msk.bf16.vlgmr.msra.gmra.mxu1 %vm691_vm5, %v690_v40  ;;  %v589_v45 = vpop.permute.xlu1 %588  ;;  %v688_v46 = vsel %vm649_vm6, %v678_v42, %v627_v41 }
 0x2a5   : > { %v590_v53 = vsel %vm266_vm3, %v587_v47, %v589_v45  ;;  %758 = vmatpush1.bf16.msra.mxu1 %v701_v43  ;;  %779 = vmatprep.mubr.bf16.mxu1 %v987_v4  ;;  %v646_v4 = vsel %vm280_vm2, %v637_v56, %v612_v59 }
 0x2a6   : > { %v623_v54 = vrot.slane %v590_v53, 4  ;;  %759 = vmatprep.subr.bf16.mxu1 %v688_v46  ;;  %v657_v63 = vsel %vm649_vm6, %v646_v4, %v616_v62 }
 0x2a8   : > { %v676_v48 = vsel %vm280_vm2, %v667_v57, %v623_v54 }
 0x2a9   : > { %v685_v60 = vsel %vm649_vm6, %v676_v48, %v626_v55 }
 0x2aa   : > { %760 = vmatpush1.bf16.msra.mxu1 %v685_v60 }
 0x2ab   : > { %761 = vmatprep.subr.bf16.mxu1 %v660_v61 }
 0x2ae   : > { %762 = vmatpush1.bf16.msra.mxu1 %v657_v63 }
 0x2af   : > { %v389_v2 = vpop.permute.xlu0 %388 }
 0x2b0   : > { %v398_v3 = vmul.f32 %v1101_v39, %v389_v2 }
 0x2b1   : > { %909 = vmatmul.mubr.msk.bf16.vlgmr.msra.gmra.mxu1 %vm691_vm5, %v690_v40  ;;  %v394_v52 = vpop.permute.xlu1 %393 }
 0x2b2   : > { %v399_v20 = vmul.f32 %v1103_v44, %v394_v52 }
 0x2b4   : > { %v414_v21 = vpop.permute.xlu0 %413 }
 0x2b5   : > { %v419_v24 = vadd.f32 %v414_v21, %v399_v20 }
 0x2b6   : > { %v410_v0 = vpop.permute.xlu1 %409 }
 0x2b7   : > { %v418_v6 = vadd.f32 %v410_v0, %v398_v3  ;;  %v823_v30 = vrot.slane %v419_v24, 4 }
 0x2b9   : > { %v810_v13 = vrot.slane %v418_v6, 4 }
 0x2bb   : > { %v791_v50 = vpop.permute.xlu1 %790 }
 0x2c0   : > { %v799_v8 = vpop.permute.xlu1 %798 }
 0x364   : > { %v740_v5 = vpop.f32.mrf.mxu1 }
 0x365   : > { %v793_v9 = vmul.f32 %v791_v50, %v740_v5 }
 0x366   : > { %v742_v10 = vpop.f32.mrf.mxu1 }
 0x367   : > { %v794_v11 = vmul.f32 %v791_v50, %v742_v10  ;;  %v801_v1 = vadd.f32 %v799_v8, %v793_v9 }
 0x368   : > { %v744_v12 = vpop.f32.mrf.mxu1 }
 0x369   : > { %v802_v14 = vadd.f32 %v799_v8, %v794_v11  ;;  %v805_v15 = vadd.f32 %v801_v1, %v418_v6 }
 0x36a   : > { %v745_v16 = vpop.f32.mrf.mxu1 }
 0x36b   : > { %v806_v17 = vmax.f32 %v805_v15, 0.0  ;;  %v812_v18 = vadd.f32 %v810_v13, %v802_v14 }
 0x36d   : > { %v807_v39 = vpack.c.bf16 %v806_v17, %v806_v17  ;;  %v813_v19 = vmax.f32 %v812_v18, 0.0 }
 0x36f   : > { %808 = vst [vmem:[%s224_s6] sm:$0x3] %v807_v39  ;;  %v814_v22 = vpack.c.bf16 %v813_v19, %v813_v19 }
 0x371   : > { %910 = vst [vmem:[%s224_s6 + $0x2] sm:$0x3] %v814_v22  ;;  %v781_v23 = vpop.f32.mrf.mxu1 }
 0x372   : > { %v795_v25 = vmul.f32 %v791_v50, %v781_v23 }
 0x373   : > { %v783_v26 = vpop.f32.mrf.mxu1 }
 0x374   : > { %v803_v27 = vadd.f32 %v799_v8, %v795_v25  ;;  %v796_v28 = vmul.f32 %v791_v50, %v783_v26 }
 0x375   : > { %v785_v29 = vpop.f32.mrf.mxu1 }
 0x376   : > { %v817_v31 = vadd.f32 %v803_v27, %v419_v24  ;;  %v804_v32 = vadd.f32 %v799_v8, %v796_v28 }
 0x377   : > { %v786_v33 = vpop.f32.mrf.mxu1 }
 0x378   : > { %v818_v34 = vmax.f32 %v817_v31, 0.0  ;;  %v825_v35 = vadd.f32 %v823_v30, %v804_v32 }
 0x37a   : > { %v819_v36 = vpack.c.bf16 %v818_v34, %v818_v34  ;;  %v826_v37 = vmax.f32 %v825_v35, 0.0 }
 0x37c   : > { %911 = vst [vmem:[%s224_s6 + $0x4] sm:$0x3] %v819_v36  ;;  %v827_v44 = vpack.c.bf16 %v826_v37, %v826_v37 }
 0x37e   : > { %912 = vst [vmem:[%s224_s6 + $0x6] sm:$0x3] %v827_v44 }
 0x37f PF: > { %s15_s18 = sadd.s32 1, %s979_s18  }
 0x380   : > { %p12_p4 = scmp.ge.s32.totalorder %s15_s18, 4  }
 0x382   :  { %14 = sbr.rel (!%p12_p4) target bundleno = 1 (0x1), region = 76 }

// kernel: upproj_forward.6
= control target key start
LH: loop header
LB: loop body
LE: loop exit
PB: predicated region body
PF: predicated region fallthrough
CT: control target
= control target key end

     0   :  { %s1907_s18 = smov 0   ;;  %s2701_s0 = inlined_call_operand.vmem [shape: bf16[2,4,438], index: 0, kind: input, shape index: {}]   ;;  %s2702_s1 = inlined_call_operand.vmem [shape: bf16[16,36], index: 1, kind: input, shape index: {}]   ;;  %s2703_s2 = inlined_call_operand.vmem [shape: bf16[2,18], index: 2, kind: input, shape index: {}]   ;;  %s2704_s3 = inlined_call_operand.vmem [shape: f32[18,2], index: 3, kind: input, shape index: {}]   ;;  %s2705_s4 = inlined_call_operand.vmem [shape: f32[1,384], index: 4, kind: input, shape index: {}]   ;;  %s2706_s5 = inlined_call_operand.vmem [shape: bf16[2,4,2,384], index: 5, kind: output, shape index: {}]  }
   0x1 LB: > { %s1765_s19 = sadd.s32 4294967295, %s1860_s18   ;;  %p1769_p0 = scmp.ge.s32.totalorder %s1860_s18, 1  ;;  %s1860_s18 = sphi %s1907_s18, %s15_s18  }
   0x2   : > { %p187_p1 = scmp.lt.s32.totalorder %s1860_s18, 3 }
   0x4   : > { %p188_p2 = pnand %p1769_p0, %p187_p1 }
   0x5   : > { %p214_p3 = scmp.lt.s32.totalorder (!%p188_p2), %s1765_s19, 1  ;;  %s1863_s24 = smov (!%p188_p2), 90  }
   0x6   : > { %191 = sbr.rel (%p188_p2) target bundleno = 993 (0x3e1), region = 40  ;;  %s1864_s25 = smov (!%p188_p2), 109  }
   0x7   : > { %s1866_s26 = smov (!%p188_p2), 108   ;;  %s1867_s27 = smov (!%p188_p2), 92  }
   0x8   : > { %s1868_s28 = smov (!%p188_p2), 91   ;;  %s1869_s29 = smov (!%p188_p2), 127  }
   0x9   : > { %s1870_s30 = smov (!%p188_p2), 126   ;;  %s1872_s6 = smov (!%p188_p2), 110  }
   0xa   : > { %s1876_s13 = smov (!%p188_p2), 19  }
   0xb   : > { %v230_v0 = vlaneseq  ;;  %v1862_v1 = vmov 1983009808   ;;  %s2756_s19 = smov (!%p214_p3, %s1765_s19), 1  ;;  %v1865_v13 = vmov 0.0   ;;  %v2711_v19 = vmov 0   ;;  %v402_v21 = vld [vmem:[%s2704_s3] sm:$0xff] }
   0xc   : > { %v228_v2 = vunpack.c.l.s4 %v1862_v1  ;;  %s1804_s20 = sshll.u32 %s2756_s19, 3  ;;  %1812 = vmatprep.subr.bf16.mxu1 %v1865_v13  ;;  %458 = vmatprep.mubr.bf16.mxu0 %v2711_v19  ;;  %vm1873_vm0 = vmmov 0   ;;  %v1874_v20 = vmov 1   ;;  %vm2707_vm1 = vcmask 736256   ;;  %s1822_s22 = smul.u32 12, %s2756_s19 }
   0xd   : > { %v1917_v3 = vshrl.u32 %v230_v0, 7  ;;  %s218_s23 = scalar_lea.vmem %s2701_s0, %s1804_s20  ;;  %1846 = vset.pattern.permute.xlu0 %v2711_v19  ;;  %1818 = vmatprep.mubr.msk.bf16.mxu1 %vm1873_vm0, %v1865_v13  ;;  %vm351_vm2 = vcmask 1041408   ;;  %vm311_vm3 = vcmask 883712   ;;  %vm2709_vm4 = vcmask 752640  }
   0xe   : > { %v229_v4 = vunpack.c.0.s8 %v228_v2  ;;  %v224_v6 = vld [vmem:[%s218_s23] sm:$0xff]  ;;  %1847 = vset.pattern.permute.xlu1 %v1874_v20  ;;  %vm299_vm5 = vcmask 891904   ;;  %vm335_vm6 = vcmask 744448   ;;  %vm361_vm7 = vcmask 1043456  }
   0xf   : > { %v226_v8 = vcombine.high %v224_v6, %v224_v6  ;;  %v242_v11 = vcombine.low %v224_v6, %v224_v6  ;;  %vm2710_vm8 = vcmask 1045504   ;;  %vm259_vm9 = vcmask 1039360  }
  0x10   : > { %v232_v5 = vsub.s32 %v229_v4, %v1917_v3  ;;  %vm2708_vm10 = vcmask 1031168   ;;  %vm286_vm11 = vcmask 900096   ;;  %vm413_vm12 = vcmask 293888  }
  0x11   : > { %vm565_vm13 = vcmask 147456   ;;  %vm599_vm14 = vcmask 1040536   ;;  %vm600_vm15 = vcmask 1041409  }
  0x12   : > { %v1924_v7 = vrot.slane %v224_v6, %v232_v5  ;;  %v1928_v9 = vrot.slane %v226_v8, %v232_v5  ;;  %v249_v12 = vrot.slane %v242_v11, %v232_v5  ;;  %610 = vst.msk [vmem:[#allocation2 + $0x4] sm:$0x1] %vm565_vm13, %v2711_v19  ;;  %566 = vst.msk [vmem:[#allocation2] sm:$0x1] %vm565_vm13, %v2711_v19 }
  0x13   : > { %627 = vst.msk [vmem:[#allocation2 + $0x8] sm:$0x1] %vm565_vm13, %v2711_v19  ;;  %637 = vst.msk [vmem:[#allocation2 + $0xc] sm:$0x1] %vm565_vm13, %v2711_v19 }
  0x14   : > { %339 = vrot.lane.b32.xlu0 %v1924_v7, %s1863_s24  ;;  %v1932_v10 = vcombine.high %v1924_v7, %v1924_v7  ;;  %343 = vrot.lane.b32.xlu1 %v1928_v9, %s1863_s24  ;;  %v250_v14 = vcombine.high %v249_v12, %v249_v12  ;;  %v264_v15 = vcombine.low %v1928_v9, %v1928_v9  ;;  %vm601_vm0 = vmor %vm600_vm15, %vm599_vm14  ;;  %vm2715_vm14 = vcmask 1045504  }
  0x15   : > { %v290_v16 = vcombine.high %v1928_v9, %v1928_v9  ;;  %v263_v17 = vcombine.low %v1924_v7, %v1924_v7  ;;  %v277_v18 = vcombine.low %v249_v12, %v249_v12  ;;  %vm2716_vm15 = vcmask 752640  }
  0x18   : > { %341 = vrot.lane.b32.xlu0 %v1932_v10, %s1863_s24  ;;  %293 = vrot.lane.b32.xlu1 %v1932_v10, %s1864_s25 }
  0x1c   : > { %295 = vrot.lane.b32.xlu0 %v1928_v9, %s1864_s25  ;;  %291 = vrot.lane.b32.xlu1 %v1924_v7, %s1864_s25 }
  0x20   : > { %307 = vrot.lane.b32.xlu0 %v1924_v7, %s1866_s26  ;;  %305 = vrot.lane.b32.xlu1 %v250_v14, %s1866_s26 }
  0x24   : > { %303 = vrot.lane.b32.xlu0 %v249_v12, %s1866_s26  ;;  %317 = vrot.lane.b32.xlu1 %v1924_v7, %s1867_s27 }
  0x28   : > { %319 = vrot.lane.b32.xlu0 %v264_v15, %s1867_s27  ;;  %345 = vrot.lane.b32.xlu1 %v290_v16, %s1863_s24 }
  0x2c   : > { %315 = vrot.lane.b32.xlu0 %v263_v17, %s1867_s27  ;;  %329 = vrot.lane.b32.xlu1 %v249_v12, %s1868_s28 }
  0x30   : > { %331 = vrot.lane.b32.xlu0 %v263_v17, %s1868_s28  ;;  %297 = vrot.lane.b32.xlu1 %v290_v16, %s1864_s25 }
  0x34   : > { %309 = vrot.lane.b32.xlu0 %v1932_v10, %s1866_s26  ;;  %327 = vrot.lane.b32.xlu1 %v277_v18, %s1868_s28 }
  0x38   : > { %253 = vrot.lane.b32.xlu0 %v250_v14, %s1869_s29  ;;  %255 = vrot.lane.b32.xlu1 %v1924_v7, %s1869_s29 }
  0x3c   : > { %321 = vrot.lane.b32.xlu0 %v1928_v9, %s1867_s27  ;;  %251 = vrot.lane.b32.xlu1 %v249_v12, %s1869_s29 }
  0x40   : > { %267 = vrot.lane.b32.xlu0 %v1924_v7, %s1870_s30  ;;  %269 = vrot.lane.b32.xlu1 %v264_v15, %s1870_s30 }
  0x44   : > { %333 = vrot.lane.b32.xlu0 %v1924_v7, %s1868_s28  ;;  %265 = vrot.lane.b32.xlu1 %v263_v17, %s1870_s30 }
  0x48   : > { %280 = vrot.lane.b32.xlu0 %v249_v12, %s1872_s6  ;;  %282 = vrot.lane.b32.xlu1 %v263_v17, %s1872_s6 }
  0x4c   : > { %257 = vrot.lane.b32.xlu0 %v1932_v10, %s1869_s29  ;;  %278 = vrot.lane.b32.xlu1 %v277_v18, %s1872_s6 }
  0x50   : > { %271 = vrot.lane.b32.xlu0 %v1928_v9, %s1870_s30  ;;  %284 = vrot.lane.b32.xlu1 %v1924_v7, %s1872_s6 }
  0x54   : > { %512 = vperm.xlu0 %1846, %v402_v21   ;;  %527 = vperm.xlu1 %1847, %v402_v21  }
  0x58   : > { %1849 = vset.pattern.permute.xlu0 %v1874_v20  ;;  %1848 = vset.pattern.permute.xlu1 %v2711_v19 }
  0x86   : > { %v340_v22 = vpop.permute.xlu0 %339  ;;  %v344_v23 = vpop.permute.xlu1 %343 }
  0x8a   : > { %v342_v24 = vpop.permute.xlu0 %341  ;;  %v294_v27 = vpop.permute.xlu1 %293 }
  0x8b   : > { %v349_v25 = vsel %vm2707_vm1, %v342_v24, %v344_v23  ;;  %v348_v26 = vsel %vm2707_vm1, %v340_v22, %v342_v24 }
  0x8c   : > { %1773 = vmatprep.subr.msk.bf16.mxu0 %vm351_vm2, %v349_v25  ;;  %v418_v28 = vsel %vm351_vm2, %v348_v26, 0 }
  0x8d   : > { %437 = vmatpush1.bf16.msra.mxu0 %v418_v28 }
  0x8e   : > { %v296_v29 = vpop.permute.xlu0 %295  ;;  %v292_v30 = vpop.permute.xlu1 %291 }
  0x8f   : > { %v301_v43 = vsel %vm299_vm5, %v294_v27, %v296_v29  ;;  %v300_v53 = vsel %vm299_vm5, %v292_v30, %v294_v27 }
  0x92   : > { %v308_v31 = vpop.permute.xlu0 %307  ;;  %v306_v32 = vpop.permute.xlu1 %305 }
  0x93   : > { %v313_v40 = vsel %vm311_vm3, %v306_v32, %v308_v31 }
  0x94   : > { %v383_v44 = vsel %vm351_vm2, %v301_v43, %v313_v40 }
  0x96   : > { %v304_v33 = vpop.permute.xlu0 %303  ;;  %v318_v34 = vpop.permute.xlu1 %317 }
  0x97   : > { %v312_v50 = vsel %vm311_vm3, %v304_v33, %v306_v32  ;;  %v1853_v33 = vld [vmem:[%s2702_s1] sm:$0xff]  }
  0x98   : > { %v380_v54 = vsel %vm351_vm2, %v300_v53, %v312_v50 }
  0x9a   : > { %v320_v35 = vpop.permute.xlu0 %319  ;;  %v346_v36 = vpop.permute.xlu1 %345 }
  0x9b   : > { %v350_v37 = vsel %vm2707_vm1, %v344_v23, %v346_v36  ;;  %v325_v41 = vsel %vm2709_vm4, %v318_v34, %v320_v35  ;;  %vm604_vm1 = vcmask 150531  }
  0x9c   : > { %v424_v39 = vsel %vm351_vm2, %v350_v37, 0  ;;  %v390_v47 = vsel %vm361_vm7, %v383_v44, %v325_v41  ;;  %v405_v41 = vld [vmem:[%s2705_s4] sm:$0x7]  ;;  %v550_v44 = vsub.s32 1, %v1917_v3 }
  0x9d   : > { %1813 = vmatpush3.bf16.msra.mxu1 %v424_v39  ;;  %v546_v39 = vsub.s32 0, %v1917_v3 }
  0x9e   : > { %v316_v38 = vpop.permute.xlu0 %315  ;;  %v330_v42 = vpop.permute.xlu1 %329  ;;  %1814 = vmatprep.subr.bf16.mxu1 %v1865_v13  ;;  %v551_v53 = vrot.slane %v405_v41, %v550_v44 }
  0x9f   : > { %v324_v51 = vsel %vm2709_vm4, %v316_v38, %v318_v34 }
  0xa0   : > { %v388_v57 = vsel %vm361_vm7, %v380_v54, %v324_v51  ;;  %v554_v51 = vsub.s32 2, %v1917_v3 }
  0xa2   : > { %v332_v45 = vpop.permute.xlu0 %331  ;;  %v298_v48 = vpop.permute.xlu1 %297 }
  0xa3   : > { %v337_v46 = vsel %vm335_vm6, %v330_v42, %v332_v45  ;;  %v302_v4 = vsel %vm299_vm5, %v296_v29, %v298_v48 }
  0xa4   : > { %v397_v49 = vsel %vm2710_vm8, %v390_v47, %v337_v46 }
  0xa5   : > { %438 = vmatprep.subr.bf16.mxu0 %v397_v49  ;;  %v547_v49 = vrot.slane %v405_v41, %v546_v39 }
  0xa6   : > { %v310_v52 = vpop.permute.xlu0 %309  ;;  %v328_v55 = vpop.permute.xlu1 %327 }
  0xa7   : > { %v336_v56 = vsel %vm335_vm6, %v328_v55, %v330_v42  ;;  %v314_v0 = vsel %vm311_vm3, %v308_v31, %v310_v52 }
  0xa8   : > { %v394_v59 = vsel %vm2710_vm8, %v388_v57, %v336_v56  ;;  %v386_v5 = vsel %vm351_vm2, %v302_v4, %v314_v0 }
  0xa9   : > { %439 = vmatpush1.bf16.msra.mxu0 %v394_v59 }
  0xaa   : > { %v254_v58 = vpop.permute.xlu0 %253  ;;  %v256_v60 = vpop.permute.xlu1 %255 }
  0xab   : > { %v261_v15 = vsel %vm259_vm9, %v254_v58, %v256_v60 }
  0xac   : > { %v357_v18 = vsel %vm351_vm2, %v1932_v10, %v261_v15 }
  0xae   : > { %v322_v61 = vpop.permute.xlu0 %321  ;;  %v252_v62 = vpop.permute.xlu1 %251 }
  0xaf   : > { %v326_v1 = vsel %vm2709_vm4, %v320_v35, %v322_v61  ;;  %v260_v22 = vsel %vm259_vm9, %v252_v62, %v254_v58  ;;  %v555_v62 = vrot.slane %v405_v41, %v554_v51 }
  0xb0   : > { %v392_v11 = vsel %vm361_vm7, %v386_v5, %v326_v1  ;;  %v354_v28 = vsel %vm351_vm2, %v1924_v7, %v260_v22 }
  0xb2   : > { %v268_v63 = vpop.permute.xlu0 %267  ;;  %v270_v2 = vpop.permute.xlu1 %269 }
  0xb3   : > { %v275_v16 = vsel %vm2708_vm10, %v268_v63, %v270_v2 }
  0xb4   : > { %v365_v24 = vsel %vm361_vm7, %v357_v18, %v275_v16 }
  0xb6   : > { %v334_v6 = vpop.permute.xlu0 %333  ;;  %v266_v12 = vpop.permute.xlu1 %265 }
  0xb7   : > { %v338_v8 = vsel %vm335_vm6, %v332_v45, %v334_v6  ;;  %v274_v25 = vsel %vm2708_vm10, %v266_v12, %v268_v63  ;;  %v1875_v45 = vmov 1966171168  }
  0xb8   : > { %v400_v14 = vsel %vm2710_vm8, %v392_v11, %v338_v8  ;;  %v363_v30 = vsel %vm361_vm7, %v354_v28, %v274_v25  ;;  %v572_v46 = vunpack.c.l.s4 %v1875_v45 }
  0xb9   : > { %1815 = vmatpush3.bf16.msra.mxu1 %v400_v14 }
  0xba   : > { %v281_v17 = vpop.permute.xlu0 %280  ;;  %1816 = vmatprep.subr.bf16.mxu1 %v1865_v13  ;;  %v283_v21 = vpop.permute.xlu1 %282  ;;  %v573_v57 = vunpack.c.0.s8 %v572_v46 }
  0xbb   : > { %v288_v23 = vsel %vm286_vm11, %v281_v17, %v283_v21 }
  0xbc   : > { %v373_v27 = vsel %vm2710_vm8, %v365_v24, %v288_v23  ;;  %v2064_v4 = vsub.s32 %v573_v57, %v1917_v3  ;;  %v403_v57 = vld [vmem:[%s2704_s3 + $0x8] sm:$0xff] }
  0xbd   : > { %440 = vmatprep.subr.bf16.mxu0 %v373_v27 }
  0xbe   : > { %v258_v26 = vpop.permute.xlu0 %257  ;;  %v279_v29 = vpop.permute.xlu1 %278 }
  0xbf   : > { %v262_v13 = vsel %vm259_vm9, %v256_v60, %v258_v26  ;;  %v287_v10 = vsel %vm286_vm11, %v279_v29, %v281_v17 }
  0xc0   : > { %v370_v32 = vsel %vm2710_vm8, %v363_v30, %v287_v10  ;;  %v360_v34 = vsel %vm351_vm2, %v1928_v9, %v262_v13 }
  0xc1   : > { %441 = vmatpush1.bf16.msra.mxu0 %v370_v32 }
  0xc2   : > { %v272_v31 = vpop.permute.xlu0 %271  ;;  %v285_v7 = vpop.permute.xlu1 %284 }
  0xc3   : > { %v276_v35 = vsel %vm2708_vm10, %v270_v2, %v272_v31  ;;  %v289_v37 = vsel %vm286_vm11, %v283_v21, %v285_v7  ;;  %vm596_vm10 = vcmask 154624  }
  0xc4   : > { %v367_v36 = vsel %vm361_vm7, %v360_v34, %v276_v35  ;;  %1774 = vmatmul.mubr.msk.bf16.vlgmr.msra.gmra.mxu0 %vm413_vm12, %v1853_v33 }
  0xc5   : > { %v376_v38 = vsel %vm2710_vm8, %v367_v36, %v289_v37  ;;  %1293 = vmatprep.mubr.bf16.mxu0 %v2711_v19  ;;  %vm607_vm8 = vcmask 434328  }
  0xc6   : > { %1817 = vmatpush3.bf16.msra.mxu1 %v376_v38 }
  0xc9   : > { %1819 = vmatmul.mubr.msk.bf16.vlgmr.msra.gmra.mxu1 %vm413_vm12, %v1853_v33  ;;  %vm602_vm12 = vcmask 1042434  }
  0xca   : > { %1334 = vmatprep.mubr.bf16.mxu1 %v2711_v19  ;;  %vm603_vm13 = vmor %vm602_vm12, %vm601_vm0  ;;  %vm2718_vm12 = vcmask 1031168  }
  0xcb   : > { %vm2070_vm4 = vmor %vm604_vm1, %vm603_vm13  ;;  %vm1024_vm1 = vcmask 1040384  }
  0xcc   : > { %vm2717_vm0 = vmmov %vm2716_vm15 }
  0xcf   : > { %v513_v9 = vpop.permute.xlu0 %512  ;;  %v528_v42 = vpop.permute.xlu1 %527 }
 0x184   : > { %v460_v40 = vpop.f32.mrf.mxu0 }
 0x185   : > { %v520_v43 = vmul.f32 %v513_v9, %v460_v40 }
 0x186   : > { %v462_v47 = vpop.f32.mrf.mxu0 }
 0x187   : > { %v521_v48 = vmul.f32 %v513_v9, %v462_v47  ;;  %v534_v50 = vadd.f32 %v528_v42, %v520_v43 }
 0x189   : > { %v503_v52 = vpop.f32.mrf.mxu1  ;;  %v535_v54 = vadd.f32 %v528_v42, %v521_v48  ;;  %v540_v55 = vmax.f32 %v534_v50, 0.0 }
 0x18a   : > { %v522_v56 = vmul.f32 %v513_v9, %v503_v52 }
 0x18b   : > { %v1820_v58 = vpop.f32.mrf.mxu1  ;;  %v541_v59 = vmax.f32 %v535_v54, 0.0  ;;  %v559_v60 = vmul.f32 %v547_v49, %v540_v55 }
 0x18c   : > { %v536_v61 = vadd.f32 %v528_v42, %v522_v56 }
 0x18d   : > { %v2061_v63 = vpop.f32.mrf.mxu1  ;;  %v560_v0 = vmul.f32 %v551_v53, %v541_v59 }
 0x18e   : > { %v542_v1 = vmax.f32 %v536_v61, 0.0 }
 0x18f   : > { %v1821_v2 = vpop.f32.mrf.mxu1  ;;  %v1776_v5 = vpack.c.bf16 %v560_v0, %v559_v60  ;;  %v404_v60 = vld [vmem:[%s2704_s3 + $0x10] sm:$0x3] }
 0x190   : > { %v561_v6 = vmul.f32 %v555_v62, %v542_v1 }
 0x191   : > { %v577_v12 = vrot.slane %v1776_v5, %v2064_v4 }
 0x192   : > { %v564_v8 = vpack.c.bf16 %v561_v6, %v561_v6 }
 0x194   : > { %v584_v11 = vrot.slane %v564_v8, %v2064_v4 }
 0x196   : > { %v611_v14 = vcombine.high %v577_v12, %v584_v11  ;;  %v585_v15 = vcombine.low %v577_v12, %v584_v11 }
 0x198   : > { %v618_v16 = vrot.slane %v611_v14, %v2064_v4  ;;  %v592_v17 = vrot.slane %v585_v15, %v2064_v4 }
 0x19a   : > { %619 = vrot.lane.b32.xlu1 %v618_v16, %s1876_s13  ;;  %593 = vrot.lane.b32.xlu0 %v592_v17, %s1876_s13  ;;  %v638_v18 = vcombine.high %v618_v16, %v618_v16  ;;  %v628_v21 = vcombine.high %v592_v17, %v592_v17 }
 0x19e   : > { %639 = vrot.lane.b32.xlu0 %v638_v18, %s1876_s13  ;;  %629 = vrot.lane.b32.xlu1 %v628_v21, %s1876_s13 }
 0x20c   : > { %v620_v3 = vpop.permute.xlu1 %619  ;;  %v594_v22 = vpop.permute.xlu0 %593 }
 0x20d   : > { %v621_v24 = vrot.slane %v620_v3, 7  ;;  %v595_v25 = vrot.slane %v594_v22, 7 }
 0x20f   : > { %v622_v26 = vsel %vm596_vm10, %v621_v24, %v620_v3  ;;  %v597_v27 = vsel %vm596_vm10, %v595_v25, %v594_v22 }
 0x210   : > { %624 = vst.msk [vmem:[#allocation2 + $0x4] sm:$0xf] %vm2070_vm4, %v622_v26  ;;  %606 = vst.msk [vmem:[#allocation2] sm:$0xf] %vm2070_vm4, %v597_v27  ;;  %v640_v28 = vpop.permute.xlu0 %639  ;;  %v630_v13 = vpop.permute.xlu1 %629 }
 0x211   : > { %625 = vst.msk [vmem:[#allocation2 + $0x7] sm:$0x1] %vm607_vm8, %v2711_v19  ;;  %608 = vst.msk [vmem:[#allocation2 + $0x3] sm:$0x1] %vm607_vm8, %v2711_v19  ;;  %v641_v29 = vrot.slane %v640_v28, 7  ;;  %v631_v10 = vrot.slane %v630_v13, 7 }
 0x213   : > { %v642_v30 = vsel %vm596_vm10, %v641_v29, %v640_v28  ;;  %v632_v31 = vsel %vm596_vm10, %v631_v10, %v630_v13  ;;  %vm1183_vm10 = vcmask 1046528  }
 0x214   : > { %644 = vst.msk [vmem:[#allocation2 + $0xc] sm:$0xf] %vm2070_vm4, %v642_v30  ;;  %634 = vst.msk [vmem:[#allocation2 + $0x8] sm:$0xf] %vm2070_vm4, %v632_v31  ;;  %vm1085_vm4 = vcmask 1042432  }
 0x215   : > { %645 = vst.msk [vmem:[#allocation2 + $0xf] sm:$0x1] %vm607_vm8, %v2711_v19  ;;  %635 = vst.msk [vmem:[#allocation2 + $0xb] sm:$0x1] %vm607_vm8, %v2711_v19  ;;  %vm1134_vm8 = vcmask 1044480  }
 0x218   : > { %v1780_v32 = vld.sshfl [vmem:[#allocation2] sm:$0x33 pattern:$0x75316420] }
 0x219   : > { %v2095_v33 = vrot.slane %v1780_v32, %v2064_v4  ;;  %v1779_v34 = vld.sshfl [vmem:[#allocation2 + $0x4] sm:$0x33 pattern:$0x75316420]  ;;  %v754_v41 = vcombine.high %v1780_v32, %v1780_v32 }
 0x21a   : > { %v725_v35 = vrot.slane %v1779_v34, %v2064_v4  ;;  %v718_v9 = vcombine.high %v1779_v34, %v1779_v34 }
 0x21b   : > { %771 = vrot.lane.b32.xlu0 %v2095_v33, %s1864_s25  ;;  %v768_v42 = vrot.slane %v754_v41, %v2064_v4  ;;  %v769_v43 = vcombine.high %v2095_v33, %v2095_v33 }
 0x21c   : > { %735 = vrot.lane.b32.xlu1 %v725_v35, %s1872_s6  ;;  %v1781_v7 = vld.sshfl [vmem:[#allocation2 + $0xc] sm:$0x33 pattern:$0x75316420]  ;;  %v732_v39 = vrot.slane %v718_v9, %v2064_v4  ;;  %v733_v40 = vcombine.high %v725_v35, %v725_v35 }
 0x21d   : > { %v798_v36 = vrot.slane %v1781_v7, %v2064_v4  ;;  %v1778_v37 = vld.sshfl [vmem:[#allocation2 + $0x8] sm:$0x33 pattern:$0x75316420]  ;;  %v791_v45 = vcombine.high %v1781_v7, %v1781_v7  ;;  %v770_v48 = vcombine.high %v768_v42, %v768_v42 }
 0x21e   : > { %v689_v38 = vrot.slane %v1778_v37, %v2064_v4  ;;  %v734_v47 = vcombine.high %v732_v39, %v732_v39  ;;  %v682_v50 = vcombine.high %v1778_v37, %v1778_v37 }
 0x21f   : > { %819 = vrot.lane.b32.xlu0 %v725_v35, %s1864_s25  ;;  %v805_v46 = vrot.slane %v791_v45, %v2064_v4  ;;  %v806_v49 = vcombine.high %v798_v36, %v798_v36 }
 0x220   : > { %918 = vrot.lane.b32.xlu1 %v725_v35, %s1868_s28  ;;  %v697_v44 = vcombine.high %v689_v38, %v689_v38  ;;  %v696_v51 = vrot.slane %v682_v50, %v2064_v4  ;;  %v1777_v50 = vld.sshfl [vmem:[#allocation2 + $0xc] sm:$0x13 pattern:$0x75316420] }
 0x221   : > { %v807_v53 = vcombine.high %v805_v46, %v805_v46 }
 0x222   : > { %v698_v52 = vcombine.high %v696_v51, %v696_v51 }
 0x223   : > { %841 = vrot.lane.b32.xlu0 %v2095_v33, %s1866_s26 }
 0x224   : > { %907 = vrot.lane.b32.xlu1 %v2095_v33, %s1868_s28 }
 0x227   : > { %896 = vrot.lane.b32.xlu0 %v725_v35, %s1867_s27 }
 0x228   : > { %808 = vrot.lane.b32.xlu1 %v798_v36, %s1869_s29 }
 0x22b   : > { %830 = vrot.lane.b32.xlu0 %v689_v38, %s1870_s30 }
 0x22c   : > { %699 = vrot.lane.b32.xlu1 %v689_v38, %s1869_s29 }
 0x22f   : > { %737 = vrot.lane.b32.xlu0 %v732_v39, %s1872_s6 }
 0x230   : > { %739 = vrot.lane.b32.xlu1 %v733_v40, %s1872_s6 }
 0x233   : > { %900 = vrot.lane.b32.xlu0 %v733_v40, %s1867_s27 }
 0x234   : > { %773 = vrot.lane.b32.xlu1 %v768_v42, %s1864_s25 }
 0x237   : > { %920 = vrot.lane.b32.xlu0 %v732_v39, %s1868_s28 }
 0x238   : > { %775 = vrot.lane.b32.xlu1 %v769_v43, %s1864_s25 }
 0x23b   : > { %911 = vrot.lane.b32.xlu0 %v769_v43, %s1868_s28 }
 0x23c   : > { %821 = vrot.lane.b32.xlu1 %v732_v39, %s1864_s25 }
 0x23f   : > { %703 = vrot.lane.b32.xlu0 %v697_v44, %s1869_s29 }
 0x240   : > { %823 = vrot.lane.b32.xlu1 %v733_v40, %s1864_s25 }
 0x243   : > { %810 = vrot.lane.b32.xlu0 %v805_v46, %s1869_s29 }
 0x244   : > { %843 = vrot.lane.b32.xlu1 %v768_v42, %s1866_s26 }
 0x247   : > { %741 = vrot.lane.b32.xlu0 %v734_v47, %s1872_s6 }
 0x248   : > { %863 = vrot.lane.b32.xlu1 %v689_v38, %s1864_s25 }
 0x24b   : > { %777 = vrot.lane.b32.xlu0 %v770_v48, %s1864_s25 }
 0x24c   : > { %874 = vrot.lane.b32.xlu1 %v798_v36, %s1864_s25 }
 0x24f   : > { %825 = vrot.lane.b32.xlu0 %v734_v47, %s1864_s25 }
 0x250   : > { %885 = vrot.lane.b32.xlu1 %v689_v38, %s1866_s26 }
 0x253   : > { %856 = vrot.lane.b32.xlu0 %v806_v49, %s1872_s6 }
 0x254   : > { %852 = vrot.lane.b32.xlu1 %v798_v36, %s1872_s6 }
 0x257   : > { %865 = vrot.lane.b32.xlu0 %v696_v51, %s1864_s25 }
 0x258   : > { %845 = vrot.lane.b32.xlu1 %v769_v43, %s1866_s26 }
 0x25b   : > { %876 = vrot.lane.b32.xlu0 %v805_v46, %s1864_s25 }
 0x25c   : > { %898 = vrot.lane.b32.xlu1 %v732_v39, %s1867_s27 }
 0x25f   : > { %887 = vrot.lane.b32.xlu0 %v696_v51, %s1866_s26 }
 0x260   : > { %922 = vrot.lane.b32.xlu1 %v733_v40, %s1868_s28 }
 0x263   : > { %847 = vrot.lane.b32.xlu0 %v770_v48, %s1866_s26 }
 0x264   : > { %909 = vrot.lane.b32.xlu1 %v768_v42, %s1868_s28 }
 0x267   : > { %913 = vrot.lane.b32.xlu0 %v770_v48, %s1868_s28 }
 0x268   : > { %701 = vrot.lane.b32.xlu1 %v696_v51, %s1869_s29 }
 0x26b   : > { %705 = vrot.lane.b32.xlu0 %v698_v52, %s1869_s29 }
 0x26c   : > { %812 = vrot.lane.b32.xlu1 %v806_v49, %s1869_s29 }
 0x26f   : > { %814 = vrot.lane.b32.xlu0 %v807_v53, %s1869_s29 }
 0x270   : > { %832 = vrot.lane.b32.xlu1 %v696_v51, %s1870_s30 }
 0x273   : > { %880 = vrot.lane.b32.xlu0 %v807_v53, %s1864_s25 }
 0x274   : > { %854 = vrot.lane.b32.xlu1 %v805_v46, %s1872_s6 }
 0x277   : > { %858 = vrot.lane.b32.xlu0 %v807_v53, %s1872_s6 }
 0x278   : > { %878 = vrot.lane.b32.xlu1 %v806_v49, %s1864_s25 }
 0x27b   : > { %869 = vrot.lane.b32.xlu0 %v698_v52, %s1864_s25 }
 0x27c   : > { %867 = vrot.lane.b32.xlu1 %v697_v44, %s1864_s25 }
 0x27f   : > { %836 = vrot.lane.b32.xlu0 %v698_v52, %s1870_s30 }
 0x280   : > { %834 = vrot.lane.b32.xlu1 %v697_v44, %s1870_s30 }
 0x283   : > { %891 = vrot.lane.b32.xlu0 %v698_v52, %s1866_s26 }
 0x284   : > { %889 = vrot.lane.b32.xlu1 %v697_v44, %s1866_s26 }
 0x287   : > { %929 = vrot.lane.b32.xlu0 %v2095_v33, %s1863_s24 }
 0x288   : > { %924 = vrot.lane.b32.xlu1 %v734_v47, %s1868_s28 }
 0x28b   : > { %933 = vrot.lane.b32.xlu0 %v769_v43, %s1863_s24 }
 0x28c   : > { %931 = vrot.lane.b32.xlu1 %v768_v42, %s1863_s24 }
 0x28d   : > { %v772_v54 = vpop.permute.xlu0 %771 }
 0x28e   : > { %v736_v55 = vpop.permute.xlu1 %735 }
 0x28f   : > { %902 = vrot.lane.b32.xlu0 %v734_v47, %s1867_s27 }
 0x290   : > { %935 = vrot.lane.b32.xlu1 %v770_v48, %s1863_s24  ;;  %s2670_s24 = scalar_lea.vmem %s2706_s5, %s1822_s22 }
 0x291   : > { %v820_v56 = vpop.permute.xlu0 %819 }
 0x292   : > { %v919_v58 = vpop.permute.xlu1 %918 }
 0x293   : > { %531 = vperm.xlu0 %1849, %v403_v57  }
 0x294   : > { %517 = vperm.xlu1 %1848, %v403_v57   ;;  %v2271_v57 = vrot.slane %v1777_v50, %v2064_v4 }
 0x295   : > { %v842_v59 = vpop.permute.xlu0 %841 }
 0x296   : > { %v2176_v61 = vpop.permute.xlu1 %907 }
 0x298   : > { %1509 = vperm.xlu1 %1848, %v404_v60  }
 0x299   : > { %v2178_v62 = vpop.permute.xlu0 %896 }
 0x29a   : > { %v2180_v0 = vpop.permute.xlu1 %808 }
 0x29c   : > { %1850 = vset.pattern.permute.xlu1 %v1874_v20 }
 0x29d   : > { %v2183_v1 = vpop.permute.xlu0 %830  ;;  %1525 = vperm.xlu1 %1850, %v404_v60  }
 0x29e   : > { %v2185_v2 = vpop.permute.xlu1 %699 }
 0x2a1   : > { %v738_v5 = vpop.permute.xlu0 %737 }
 0x2a2   : > { %v2188_v6 = vsel %vm286_vm11, %v736_v55, %v738_v5  ;;  %v740_v8 = vpop.permute.xlu1 %739 }
 0x2a3   : > { %v2191_v11 = vsel %vm286_vm11, %v738_v5, %v740_v8 }
 0x2a5   : > { %v2193_v12 = vpop.permute.xlu0 %900 }
 0x2a6   : > { %v774_v14 = vpop.permute.xlu1 %773 }
 0x2a7   : > { %v2196_v15 = vsel %vm299_vm5, %v772_v54, %v774_v14  ;;  %v658_v54 = vcombine.high %v1777_v50, %v1777_v50 }
 0x2a8   : > { %v946_v20 = vrot.slane %v2196_v15, 7 }
 0x2a9   : > { %v2199_v16 = vpop.permute.xlu0 %920 }
 0x2aa   : > { %v1045_v17 = vsel %vm1024_vm1, %v2188_v6, %v946_v20  ;;  %v2205_v18 = vsel %vm335_vm6, %v919_v58, %v2199_v16  ;;  %v776_v21 = vpop.permute.xlu1 %775 }
 0x2ab   : > { %v2208_v3 = vsel %vm299_vm5, %v774_v14, %v776_v21 }
 0x2ac   : > { %v947_v22 = vrot.slane %v2208_v3, 7 }
 0x2ad   : > { %v2211_v23 = vpop.permute.xlu0 %911 }
 0x2ae   : > { %v2215_v24 = vsel %vm1024_vm1, %v2191_v11, %v947_v22  ;;  %v822_v25 = vpop.permute.xlu1 %821  ;;  %v965_v22 = vrot.slane %v2191_v11, 5  ;;  %v2720_v11 = vrot.slane %v2208_v3, 4 }
 0x2af   : > { %v2218_v26 = vsel %vm299_vm5, %v820_v56, %v822_v25 }
 0x2b0   : > { %v949_v27 = vrot.slane %v2218_v26, 7  ;;  %v958_v28 = vrot.slane %v2218_v26, 6 }
 0x2b1   : > { %v2222_v13 = vpop.permute.xlu0 %703 }
 0x2b2   : > { %v824_v29 = vpop.permute.xlu1 %823  ;;  %v1054_v10 = vsel %vm1024_vm1, %v2196_v15, %v949_v27  ;;  %v2227_v30 = vsel %vm351_vm2, %v1045_v17, %v958_v28  ;;  %v976_v28 = vrot.slane %v2196_v15, 4 }
 0x2b3   : > { %v2252_v46 = vsel %vm299_vm5, %v822_v25, %v824_v29 }
 0x2b4   : > { %v950_v48 = vrot.slane %v2252_v46, 7 }
 0x2b5   : > { %v2229_v31 = vpop.permute.xlu0 %810 }
 0x2b6   : > { %v844_v32 = vpop.permute.xlu1 %843  ;;  %v1057_v55 = vsel %vm1024_vm1, %v2208_v3, %v950_v48 }
 0x2b7   : > { %v2232_v33 = vsel %vm311_vm3, %v842_v59, %v844_v32 }
 0x2b8   : > { %v961_v34 = vrot.slane %v2232_v33, 6 }
 0x2b9   : > { %v742_v35 = vpop.permute.xlu0 %741 }
 0x2ba   : > { %v1080_v7 = vsel %vm351_vm2, %v1054_v10, %v961_v34  ;;  %v864_v36 = vpop.permute.xlu1 %863  ;;  %v2241_v40 = vsel %vm286_vm11, %v740_v8, %v742_v35  ;;  %v2287_v8 = vrot.slane %v658_v54, %v2064_v4  ;;  %v959_v10 = vrot.slane %v2252_v46, 6 }
 0x2bb   : > { %v1021_v34 = vrot.slane %v2205_v18, 1 }
 0x2bd   : > { %v778_v37 = vpop.permute.xlu0 %777 }
 0x2be   : > { %v2237_v38 = vsel %vm299_vm5, %v776_v21, %v778_v37  ;;  %v875_v9 = vpop.permute.xlu1 %874  ;;  %v964_v21 = vrot.slane %v2188_v6, 5  ;;  %v2306_v6 = vsel %vm1024_vm1, %v2205_v18, 0  ;;  %v988_v18 = vrot.slane %v2218_v26, 3 }
 0x2bf   : > { %v948_v39 = vrot.slane %v2237_v38, 7 }
 0x2c1   : > { %v2245_v41 = vsel %vm1024_vm1, %v2241_v40, %v948_v39  ;;  %v826_v42 = vpop.permute.xlu0 %825 }
 0x2c2   : > { %v886_v43 = vpop.permute.xlu1 %885  ;;  %v2315_v48 = vsel %vm299_vm5, %v824_v29, %v826_v42  ;;  %v2331_v29 = vsel %vm351_vm2, %v2215_v24, %v959_v10  ;;  %v978_v10 = vrot.slane %v2237_v38, 4 }
 0x2c5   : > { %v2247_v44 = vpop.permute.xlu0 %856 }
 0x2c6   : > { %v2249_v45 = vpop.permute.xlu1 %852 }
 0x2c9   : > { %v2254_v47 = vpop.permute.xlu0 %865 }
 0x2ca   : > { %v2257_v49 = vpop.permute.xlu1 %845  ;;  %v2278_v59 = vsel %vm299_vm5, %v864_v36, %v2254_v47 }
 0x2cb   : > { %v2261_v51 = vsel %vm311_vm3, %v844_v32, %v2257_v49  ;;  %v973_v25 = vrot.slane %v2278_v59, 5 }
 0x2cc   : > { %v962_v52 = vrot.slane %v2261_v51, 6 }
 0x2cd   : > { %v2264_v53 = vpop.permute.xlu0 %876  ;;  %v1105_v54 = vsel %vm1085_vm4, %v1080_v7, %v973_v25 }
 0x2ce   : > { %v2268_v56 = vpop.permute.xlu1 %898  ;;  %v2274_v58 = vsel %vm351_vm2, %v1057_v55, %v962_v52  ;;  %v2282_v60 = vsel %vm299_vm5, %v875_v9, %v2264_v53  ;;  %v951_v52 = vrot.slane %v2315_v48, 7 }
 0x2cf   : > { %v985_v32 = vrot.slane %v2282_v60, 4 }
 0x2d1   : > { %v2284_v5 = vpop.permute.xlu0 %887  ;;  %v1129_v42 = vsel %vm361_vm7, %v1105_v54, %v985_v32  ;;  %v1060_v32 = vsel %vm1024_vm1, %v2237_v38, %v951_v52 }
 0x2d2   : > { %v893_v14 = vsel %vm311_vm3, %v886_v43, %v2284_v5  ;;  %v2291_v20 = vpop.permute.xlu1 %922  ;;  %v816_v43 = vsel %vm259_vm9, %v2180_v0, %v2229_v31 }
 0x2d3   : > { %1784 = vmatprep.subr.msk.bf16.mxu1 %vm1024_vm1, %v893_v14  ;;  %v997_v36 = vrot.slane %v893_v14, 3  ;;  %v943_v19 = vrot.slane %v816_v43, 7  ;;  %v952_v35 = vrot.slane %v816_v43, 6  ;;  %v966_v14 = vrot.slane %v2241_v40, 5 }
 0x2d5   : > { %v848_v37 = vpop.permute.xlu0 %847  ;;  %v1154_v25 = vsel %vm1134_vm8, %v1129_v42, %v997_v36 }
 0x2d6   : > { %v2317_v50 = vpop.permute.xlu1 %909 }
 0x2d7   : > { %v2325_v55 = vsel %vm335_vm6, %v2176_v61, %v2317_v50 }
 0x2d8   : > { %v1009_v0 = vrot.slane %v2325_v55, 2 }
 0x2d9   : > { %v2335_v7 = vpop.permute.xlu0 %913 }
 0x2da   : > { %v702_v27 = vpop.permute.xlu1 %701  ;;  %v1178_v24 = vsel %vm2715_vm14, %v1154_v25, %v1009_v0  ;;  %v994_v0 = vrot.slane %v2282_v60, 3 }
 0x2db   : > { %v707_v43 = vsel %vm259_vm9, %v2185_v2, %v702_v27  ;;  %v2348_v54 = vsel %vm259_vm9, %v702_v27, %v2222_v13  ;;  %v2353_v39 = vsel %vm1183_vm10, %v1178_v24, %v1021_v34  ;;  %v1015_v27 = vrot.slane %v2282_v60, 1 }
 0x2dc   : > { %v940_v42 = vrot.slane %v707_v43, 7  ;;  %v1036_v40 = vsel %vm1024_vm1, %v707_v43, %v943_v19  ;;  %v941_v2 = vrot.slane %v2348_v54, 7 }
 0x2dd   : > { %v706_v61 = vpop.permute.xlu0 %705 }
 0x2de   : > { %v1027_v19 = vsel %vm1024_vm1, %v2271_v57, %v940_v42  ;;  %v709_v34 = vsel %vm259_vm9, %v2222_v13, %v706_v61  ;;  %v813_v24 = vpop.permute.xlu1 %812  ;;  %v2376_v13 = vsel %vm2716_vm15, %v2178_v62, %v2268_v56  ;;  %v2381_v61 = vsel %vm2717_vm0, %v2268_v56, %v2193_v12  ;;  %vm2732_vm15 = vmmov %vm2718_vm12 }
 0x2df   : > { %v1062_v52 = vsel %vm351_vm2, %v1027_v19, %v952_v35  ;;  %v817_v25 = vsel %vm259_vm9, %v2229_v31, %v813_v24  ;;  %v942_v9 = vrot.slane %v709_v34, 7  ;;  %v1030_v35 = vsel %vm1024_vm1, %v2287_v8, %v941_v2  ;;  %vm2733_vm0 = vmmov %vm2718_vm12 }
 0x2e0   : > { %v1087_v36 = vsel %vm1085_vm4, %v1062_v52, %v964_v21  ;;  %v953_v17 = vrot.slane %v817_v25, 6  ;;  %v2388_v21 = vsel %vm311_vm3, %v2257_v49, %v848_v37  ;;  %v1226_v49 = vsel %vm1024_vm1, %v2282_v60, 0 }
 0x2e1   : > { %v815_v31 = vpop.permute.xlu0 %814  ;;  %v1111_v42 = vsel %vm361_vm7, %v1087_v36, %v976_v28  ;;  %v2719_v37 = vcombine.high %v2271_v57, %v2271_v57  ;;  %v1007_v2 = vrot.slane %v2381_v61, 2  ;;  %v944_v57 = vrot.slane %v817_v25, 7 }
 0x2e2   : > { %v1064_v19 = vsel %vm351_vm2, %v1030_v35, %v953_v17  ;;  %v818_v62 = vsel %vm259_vm9, %v813_v24, %v815_v31  ;;  %v2392_v52 = vpop.permute.xlu1 %832  ;;  %v2395_v43 = vsel %vm1134_vm8, %v1111_v42, %v988_v18  ;;  %v1006_v17 = vrot.slane %v2376_v13, 2 }
 0x2e3   : > { %v1089_v56 = vsel %vm1085_vm4, %v1064_v19, %v965_v22  ;;  %v954_v8 = vrot.slane %v818_v62, 6  ;;  %v838_v28 = vsel %vm2718_vm12, %v2183_v1, %v2392_v52  ;;  %v1033_v18 = vsel %vm1024_vm1, %v2719_v37, %v942_v9 }
 0x2e4   : > { %v955_v36 = vrot.slane %v838_v28, 6  ;;  %v1113_v22 = vsel %vm361_vm7, %v1089_v56, %v2720_v11  ;;  %v963_v24 = vrot.slane %v2388_v21, 6  ;;  %v2418_v1 = vsel %vm335_vm6, %v2317_v50, %v2211_v23 }
 0x2e5   : > { %v1066_v35 = vsel %vm351_vm2, %v1033_v18, %v954_v8  ;;  %v881_v31 = vpop.permute.xlu0 %880  ;;  %v945_v42 = vrot.slane %v818_v62, 7  ;;  %v2721_v56 = vrot.slane %v2196_v15, 5  ;;  %v2434_v25 = vsel %vm335_vm6, %v2199_v16, %v2291_v20 }
 0x2e6   : > { %v1091_v9 = vsel %vm1085_vm4, %v1066_v35, %v966_v14  ;;  %v1068_v19 = vsel %vm351_vm2, %v1036_v40, %v955_v36  ;;  %v855_v28 = vpop.permute.xlu1 %854  ;;  %v993_v14 = vrot.slane %v2388_v21, 3  ;;  %v1018_v62 = vrot.slane %v2325_v55, 1 }
 0x2e7   : > { %v1093_v37 = vsel %vm1085_vm4, %v1068_v19, %v2721_v56  ;;  %v860_v11 = vsel %vm286_vm11, %v2249_v45, %v855_v28  ;;  %v861_v50 = vsel %vm286_vm11, %v855_v28, %v2247_v44  ;;  %v1115_v8 = vsel %vm361_vm7, %v1091_v9, %v978_v10 }
 0x2e8   : > { %v970_v15 = vrot.slane %v860_v11, 5  ;;  %v1019_v18 = vrot.slane %v2418_v1, 1  ;;  %v971_v45 = vrot.slane %v861_v50, 5  ;;  %v2722_v35 = vrot.slane %v2218_v26, 4 }
 0x2e9   : > { %v859_v36 = vpop.permute.xlu0 %858  ;;  %v1084_v9 = vsel %vm351_vm2, %v1060_v32, %v963_v24  ;;  %v2723_v56 = vrot.slane %v2232_v33, 3  ;;  %v2456_v26 = vsel %vm335_vm6, %v2211_v23, %v2335_v7  ;;  %v1039_v32 = vsel %vm1024_vm1, %v2348_v54, %v944_v57 }
 0x2ea   : > { %v1117_v10 = vsel %vm361_vm7, %v1093_v37, %v2722_v35  ;;  %v1099_v16 = vsel %vm1085_vm4, %v2227_v30, %v970_v15  ;;  %v2448_v19 = vsel %vm286_vm11, %v2247_v44, %v859_v36  ;;  %v879_v28 = vpop.permute.xlu1 %878  ;;  %v1042_v24 = vsel %vm1024_vm1, %v709_v34, %v945_v42  ;;  %vm2728_vm11 = vmmov %vm2715_vm14 }
 0x2eb   : > { %v1142_v40 = vsel %vm1134_vm8, %v1117_v10, %v2723_v56  ;;  %v2463_v30 = vsel %vm299_vm5, %v2264_v53, %v879_v28  ;;  %v1000_v44 = vrot.slane %v860_v11, 2  ;;  %v1001_v37 = vrot.slane %v861_v50, 2  ;;  %vm2729_vm13 = vmmov %vm2728_vm11 }
 0x2ec   : > { %v2466_v33 = vsel %vm299_vm5, %v879_v28, %v881_v31  ;;  %1782 = vmatprep.subr.msk.bf16.mxu0 %vm1024_vm1, %v2463_v30  ;;  %v2724_v23 = vrot.slane %v2252_v46, 3  ;;  %vm1221_vm9 = vcmask 146432   ;;  %v1101_v54 = vsel %vm1085_vm4, %v2331_v29, %v971_v45  ;;  %vm2730_vm14 = vmmov %vm2728_vm11 }
 0x2ed   : > { %v2725_v34 = vrot.slane %v2278_v59, 4  ;;  %v1002_v57 = vrot.slane %v2448_v19, 2  ;;  %1274 = vmatpush1.bf16.msra.mxu0 %v1226_v49  ;;  %v870_v31 = vpop.permute.xlu0 %869  ;;  %v2726_v42 = vrot.slane %v2315_v48, 3  ;;  %v986_v50 = vrot.slane %v2463_v30, 4 }
 0x2ee   : > { %v1138_v7 = vsel %vm1134_vm8, %v1113_v22, %v2724_v23  ;;  %v995_v22 = vrot.slane %v2463_v30, 3  ;;  %v1232_v15 = vsel %vm1024_vm1, %v2466_v33, 0  ;;  %v2727_v29 = vrot.slane %v2278_v59, 2  ;;  %v868_v36 = vpop.permute.xlu1 %867 }
 0x2ef   : > { %v1123_v53 = vsel %vm361_vm7, %v1099_v16, %v2725_v34  ;;  %v1140_v11 = vsel %vm1134_vm8, %v1115_v8, %v2726_v42  ;;  %1315 = vmatpush1.bf16.msra.mxu1 %v1232_v15  ;;  %v2495_v8 = vsel %vm299_vm5, %v2254_v47, %v868_v36  ;;  %v2498_v10 = vsel %vm299_vm5, %v868_v36, %v870_v31  ;;  %vm2731_vm5 = vmmov %vm2728_vm11 }
 0x2f0   : > { %v1166_v45 = vsel %vm2728_vm11, %v1142_v40, %v2727_v29  ;;  %v987_v16 = vrot.slane %v2466_v33, 4  ;;  %v974_v40 = vrot.slane %v2495_v8, 5  ;;  %v975_v28 = vrot.slane %v2498_v10, 5  ;;  %vm2735_vm12 = vmmov %vm2731_vm5 }
 0x2f1   : > { %v1194_v49 = vsel %vm1183_vm10, %v1166_v45, %v1015_v27  ;;  %v983_v56 = vrot.slane %v2495_v8, 4  ;;  %v1013_v23 = vrot.slane %v2495_v8, 1  ;;  %v1014_v27 = vrot.slane %v2498_v10, 1  ;;  %v837_v34 = vpop.permute.xlu0 %836  ;;  %vm2736_vm11 = vmmov %vm2731_vm5 }
 0x2f2   : > { %1316 = vmatprep.subr.bf16.mxu1 %v1194_v49  ;;  %v1162_v47 = vsel %vm2729_vm13, %v1138_v7, %v1001_v37  ;;  %v1160_v31 = vsel %vm2730_vm14, %v2395_v43, %v1000_v44  ;;  %v1107_v42 = vsel %vm1085_vm4, %v2274_v58, %v974_v40  ;;  %v1109_v15 = vsel %vm1085_vm4, %v1084_v9, %v975_v28  ;;  %v835_v29 = vpop.permute.xlu1 %834 }
 0x2f3   : > { %v1164_v45 = vsel %vm2731_vm5, %v1140_v11, %v1002_v57  ;;  %v1125_v36 = vsel %vm361_vm7, %v1101_v54, %v983_v56  ;;  %v839_v49 = vsel %vm2732_vm15, %v2392_v52, %v835_v29  ;;  %v840_v35 = vsel %vm2733_vm0, %v835_v29, %v837_v34  ;;  %v2525_v54 = vld [vmem:[%s2703_s2] sm:$0x1] }
 0x2f4   : > { %v1188_v37 = vsel %vm1183_vm10, %v1162_v47, %v1013_v23  ;;  %v1191_v7 = vsel %vm1183_vm10, %v1164_v45, %v1014_v27  ;;  %v956_v43 = vrot.slane %v839_v49, 6  ;;  %v957_v44 = vrot.slane %v840_v35, 6 }
 0x2f5   : > { %1275 = vmatprep.subr.bf16.mxu0 %v1188_v37  ;;  %1317 = vmatpush1.bf16.msra.mxu1 %v1191_v7  ;;  %v2734_v58 = vrot.slane %v2278_v59, 1  ;;  %v1150_v52 = vsel %vm1134_vm8, %v1125_v36, %v995_v22  ;;  %v1004_v57 = vrot.slane %v2495_v8, 2  ;;  %v892_v11 = vpop.permute.xlu0 %891  ;;  %v1131_v35 = vsel %vm361_vm7, %v1107_v42, %v986_v50 }
 0x2f6   : > { %1788 = vmatprep.subr.msk.bf16.mxu1 %vm1024_vm1, %v2434_v25  ;;  %v1174_v59 = vsel %vm2735_vm12, %v1150_v52, %v1007_v2  ;;  %v1148_v40 = vsel %vm1134_vm8, %v1123_v53, %v994_v0  ;;  %v1070_v28 = vsel %vm351_vm2, %v1039_v32, %v956_v43  ;;  %v1072_v22 = vsel %vm351_vm2, %v1042_v24, %v957_v44  ;;  %v890_v8 = vpop.permute.xlu1 %889 }
 0x2f7   : > { %v1185_v9 = vsel %vm1183_vm10, %v1160_v31, %v2734_v58  ;;  %v1206_v56 = vsel %vm1183_vm10, %v1174_v59, %v1019_v18  ;;  %v1172_v50 = vsel %vm2736_vm11, %v1148_v40, %v1006_v17  ;;  %v2737_v61 = vrot.slane %v2208_v3, 5 }
 0x2f8   : > { %1276 = vmatpush1.bf16.msra.mxu0 %v1185_v9  ;;  %v2738_v60 = vrot.slane %v2237_v38, 5  ;;  %1785 = vmatmul.mubr.msk.bf16.vlgmr.msra.gmra.mxu1 %vm1221_vm9, %v2525_v54  ;;  %v894_v32 = vsel %vm311_vm3, %v2284_v5, %v890_v8  ;;  %v895_v18 = vsel %vm311_vm3, %v890_v8, %v892_v11  ;;  %v1203_v3 = vsel %vm1183_vm10, %v1172_v50, %v1018_v62  ;;  %vm2743_vm3 = vmmov %vm2731_vm5 }
 0x2f9   : > { %v1095_v2 = vsel %vm1085_vm4, %v1070_v28, %v2737_v61  ;;  %v998_v24 = vrot.slane %v894_v32, 3  ;;  %v999_v13 = vrot.slane %v895_v18, 3  ;;  %v1238_v17 = vsel %vm1024_vm1, %v894_v32, 0  ;;  %1397 = vmatpush1.bf16.msra.mxu1 %v2306_v6  ;;  %1786 = vmatprep.subr.msk.bf16.mxu0 %vm1024_vm1, %v895_v18  ;;  %v930_v5 = vpop.permute.xlu0 %929  ;;  %vm2744_vm13 = vmmov %vm2743_vm3 }
 0x2fa   : > { %v1097_v0 = vsel %vm1085_vm4, %v1072_v22, %v2738_v60  ;;  %v1005_v38 = vrot.slane %v2498_v10, 2  ;;  %1398 = vmatprep.subr.bf16.mxu1 %v1206_v56  ;;  %v2739_v53 = vrot.slane %v2315_v48, 4  ;;  %v2740_v27 = vrot.slane %v2252_v46, 4  ;;  %v925_v47 = vpop.permute.xlu1 %924  ;;  %vm2746_vm14 = vmmov %vm2743_vm3  ;;  %v464_v60 = vpop.f32.mrf.mxu0 }
 0x2fb   : > { %1783 = vmatmul.mubr.msk.bf16.vlgmr.msra.gmra.mxu0 %vm1221_vm9, %v2525_v54  ;;  %v1133_v6 = vsel %vm361_vm7, %v1109_v15, %v987_v16  ;;  %v1017_v55 = vrot.slane %v2466_v33, 1  ;;  %v1156_v62 = vsel %vm1134_vm8, %v1131_v35, %v998_v24  ;;  %v2741_v42 = vrot.slane %v2261_v51, 3  ;;  %vm2748_vm5 = vmmov %vm2743_vm3 }
 0x2fc   : > { %v1121_v23 = vsel %vm361_vm7, %v1097_v0, %v2739_v53  ;;  %v1119_v34 = vsel %vm361_vm7, %v1095_v2, %v2740_v27  ;;  %1356 = vmatpush1.bf16.msra.mxu0 %v1238_v17  ;;  %v2742_v45 = vmov 0   ;;  %v1011_v46 = vrot.slane %v2456_v26, 2  ;;  %v466_v0 = vpop.f32.mrf.mxu0 }
 0x2fd   : > { %v1146_v31 = vsel %vm1134_vm8, %v1121_v23, %v993_v14  ;;  %v1144_v29 = vsel %vm1134_vm8, %v1119_v34, %v2741_v42  ;;  %1416 = vmatprep.mubr.bf16.mxu1 %v2742_v45  ;;  %1375 = vmatprep.mubr.bf16.mxu0 %v2742_v45  ;;  %v1158_v36 = vsel %vm1134_vm8, %v1133_v6, %v999_v13  ;;  %v1022_v21 = vrot.slane %v2434_v25, 1  ;;  %v934_v43 = vpop.permute.xlu0 %933 }
 0x2fe   : > { %v1170_v16 = vsel %vm2743_vm3, %v1146_v31, %v1005_v38  ;;  %v1168_v15 = vsel %vm2744_vm13, %v1144_v29, %v1004_v57  ;;  %v972_v14 = vrot.slane %v2448_v19, 5  ;;  %1399 = vmatpush1.bf16.msra.mxu1 %v1203_v3  ;;  %v2745_v49 = vrot.slane %v2463_v30, 1  ;;  %v932_v19 = vpop.permute.xlu1 %931 }
 0x2ff   : > { %v1200_v51 = vsel %vm1183_vm10, %v1170_v16, %v1017_v55  ;;  %v984_v7 = vrot.slane %v2498_v10, 4  ;;  %v1182_v44 = vsel %vm2746_vm14, %v1158_v36, %v1011_v46  ;;  %v2747_v58 = vrot.slane %v2418_v1, 2 }
 0x300   : > { %v1197_v37 = vsel %vm1183_vm10, %v1168_v15, %v2745_v49  ;;  %1357 = vmatprep.subr.bf16.mxu0 %v1200_v51  ;;  %v928_v25 = vsel %vm335_vm6, %v2291_v20, %v925_v47  ;;  %v2749_v30 = vrot.slane %v2315_v48, 6  ;;  %vm2750_vm15 = vcmask 736256  }
 0x301   : > { %v1180_v9 = vsel %vm2748_vm5, %v1156_v62, %v2747_v58  ;;  %1358 = vmatpush1.bf16.msra.mxu0 %v1197_v37  ;;  %1789 = vmatmul.mubr.msk.bf16.vlgmr.msra.gmra.mxu1 %vm1221_vm9, %v2525_v54  ;;  %v937_v57 = vsel %vm2750_vm15, %v930_v5, %v932_v19  ;;  %v1023_v20 = vrot.slane %v928_v25, 1  ;;  %v1250_v11 = vsel %vm1024_vm1, %v928_v25, 0  ;;  %vm2751_vm6 = vmmov %vm2750_vm15 }
 0x302   : > { %v1215_v52 = vsel %vm1183_vm10, %v1180_v9, %v1022_v21  ;;  %v1078_v10 = vsel %vm351_vm2, %v2245_v41, %v2749_v30  ;;  %1790 = vmatprep.subr.msk.bf16.mxu0 %vm1024_vm1, %v937_v57  ;;  %1498 = vmatprep.mubr.bf16.mxu1 %v2742_v45  ;;  %v938_v35 = vsel %vm2751_vm6, %v932_v19, %v934_v43  ;;  %v903_v41 = vpop.permute.xlu0 %902  ;;  %v996_v59 = vrot.slane %v2466_v33, 3  ;;  %v936_v28 = vpop.permute.xlu1 %935 }
 0x303   : > { %v1103_v1 = vsel %vm1085_vm4, %v1078_v10, %v972_v14  ;;  %vm2752_vm2 = vcmask 752640   ;;  %vm2753_vm4 = vmmov %vm2751_vm6  ;;  %v1020_v56 = vrot.slane %v2456_v26, 1  ;;  %v1256_v50 = vsel %vm1024_vm1, %v938_v35, 0 }
 0x304   : > { %1787 = vmatmul.mubr.msk.bf16.vlgmr.msra.gmra.mxu0 %vm1221_vm9, %v2525_v54  ;;  %v1127_v48 = vsel %vm361_vm7, %v1103_v1, %v984_v7  ;;  %v906_v40 = vsel %vm2752_vm2, %v2193_v12, %v903_v41  ;;  %v939_v8 = vsel %vm2753_vm4, %v934_v43, %v936_v28  ;;  %v1218_v61 = vsel %vm1183_vm10, %v1182_v44, %v1023_v20  ;;  %vm2754_vm7 = vmmov %vm2743_vm3 }
 0x305   : > { %1438 = vmatpush1.bf16.msra.mxu0 %v1250_v11  ;;  %1457 = vmatprep.mubr.bf16.mxu0 %v2742_v45  ;;  %v1008_v22 = vrot.slane %v906_v40, 2  ;;  %v1152_v33 = vsel %vm1134_vm8, %v1127_v48, %v996_v59 }
 0x306   : > { %1439 = vmatprep.subr.bf16.mxu0 %v2353_v39  ;;  %1792 = vmatprep.subr.msk.bf16.mxu1 %vm1024_vm1, %v939_v8 }
 0x307   : > { %1479 = vmatpush1.bf16.msra.mxu1 %v1256_v50  ;;  %v1176_v12 = vsel %vm2754_vm7, %v1152_v33, %v1008_v22 }
 0x308   : > { %1480 = vmatprep.subr.bf16.mxu1 %v1218_v61  ;;  %v1209_v2 = vsel %vm1183_vm10, %v1176_v12, %v1020_v56 }
 0x309   : > { %1440 = vmatpush1.bf16.msra.mxu0 %v1209_v2 }
 0x30b   : > { %1481 = vmatpush1.bf16.msra.mxu1 %v1215_v52 }
 0x30c   : > { %1791 = vmatmul.mubr.msk.bf16.vlgmr.msra.gmra.mxu0 %vm1221_vm9, %v2525_v54 }
 0x30e   : > { %1793 = vmatmul.mubr.msk.bf16.vlgmr.msra.gmra.mxu1 %vm1221_vm9, %v2525_v54  ;;  %v532_v18 = vpop.permute.xlu0 %531 }
 0x30f   : > { %v518_v39 = vpop.permute.xlu1 %517 }
 0x310   : > { %v525_v32 = vmul.f32 %v518_v39, %v2061_v63  ;;  %v523_v24 = vmul.f32 %v518_v39, %v464_v60  ;;  %v524_v5 = vmul.f32 %v518_v39, %v466_v0 }
 0x312   : > { %v2640_v54 = vadd.f32 %v532_v18, %v525_v32  ;;  %v2643_v6 = vadd.f32 %v532_v18, %v523_v24  ;;  %v2649_v29 = vadd.f32 %v532_v18, %v524_v5 }
 0x313   : > { %v2633_v26 = vpop.permute.xlu1 %1509 }
 0x314   : > { %v1580_v58 = vrot.slane %v2643_v6, 2  ;;  %v1581_v30 = vrot.slane %v2649_v29, 2  ;;  %v1625_v59 = vrot.slane %v2649_v29, 4  ;;  %v1582_v50 = vrot.slane %v2640_v54, 2 }
 0x315   : > { %v1624_v61 = vrot.slane %v2643_v6, 4 }
 0x318   : > { %v2636_v17 = vpop.permute.xlu1 %1525 }
 0x3b8   : > { %v1336_v13 = vpop.f32.mrf.mxu1 }
 0x3b9   : > { %v1514_v3 = vmul.f32 %v2633_v26, %v1336_v13 }
 0x3ba   : > { %v1338_v23 = vpop.f32.mrf.mxu1 }
 0x3bb   : > { %v1295_v38 = vpop.f32.mrf.mxu0  ;;  %v1530_v34 = vadd.f32 %v2636_v17, %v1514_v3  ;;  %v1515_v47 = vmul.f32 %v2633_v26, %v1338_v23 }
 0x3bc   : > { %v1512_v53 = vmul.f32 %v2633_v26, %v1295_v38  ;;  %v1340_v62 = vpop.f32.mrf.mxu1 }
 0x3bd   : > { %v1297_v27 = vpop.f32.mrf.mxu0  ;;  %v1542_v31 = vadd.f32 %v1530_v34, %v2640_v54  ;;  %v1531_v51 = vadd.f32 %v2636_v17, %v1515_v47 }
 0x3be   : > { %v1513_v63 = vmul.f32 %v2633_v26, %v1297_v27  ;;  %v1528_v55 = vadd.f32 %v2636_v17, %v1512_v53  ;;  %v1341_v16 = vpop.f32.mrf.mxu1  ;;  %v1626_v53 = vrot.slane %v2640_v54, 4 }
 0x3bf   : > { %v1299_v42 = vpop.f32.mrf.mxu0  ;;  %v1545_v15 = vmax.f32 %v1542_v31, 0.0  ;;  %v1586_v20 = vadd.f32 %v1580_v58, %v1531_v51 }
 0x3c0   : > { %v1529_v45 = vadd.f32 %v2636_v17, %v1513_v63  ;;  %v1540_v46 = vadd.f32 %v1528_v55, %v2643_v6  ;;  %v1669_v55 = vrot.slane %v2649_v29, 6 }
 0x3c1   : > { %v1300_v36 = vpop.f32.mrf.mxu0  ;;  %v1418_v14 = vpop.f32.mrf.mxu1  ;;  %v1548_v7 = vpack.c.bf16 %v1545_v15, %v1545_v15  ;;  %v1589_v2 = vmax.f32 %v1586_v20, 0.0 }
 0x3c2   : > { %v1541_v21 = vadd.f32 %v1529_v45, %v2649_v29  ;;  %v1543_v49 = vmax.f32 %v1540_v46, 0.0  ;;  %v1518_v9 = vmul.f32 %v2633_v26, %v1418_v14  ;;  %v1668_v45 = vrot.slane %v2643_v6, 6 }
 0x3c3   : > { %v1420_v44 = vpop.f32.mrf.mxu1  ;;  %v1566_v48 = vrot.slane %v1548_v7, %v2064_v4 }
 0x3c4   : > { %v1544_v37 = vmax.f32 %v1541_v21, 0.0  ;;  %v1377_v43 = vpop.f32.mrf.mxu0  ;;  %v1519_v19 = vmul.f32 %v2633_v26, %v1420_v44  ;;  %v1534_v22 = vadd.f32 %v2636_v17, %v1518_v9 }
 0x3c5   : > { %v1516_v25 = vmul.f32 %v2633_v26, %v1377_v43  ;;  %v1422_v57 = vpop.f32.mrf.mxu1 }
 0x3c6   : > { %v1794_v52 = vpack.c.bf16 %v1544_v37, %v1543_v49  ;;  %v1379_v10 = vpop.f32.mrf.mxu0  ;;  %v1535_v11 = vadd.f32 %v2636_v17, %v1519_v19  ;;  %v1630_v32 = vadd.f32 %v1624_v61, %v1534_v22  ;;  %v1670_v49 = vrot.slane %v2640_v54, 6 }
 0x3c7   : > { %v1532_v1 = vadd.f32 %v2636_v17, %v1516_v25  ;;  %v1517_v35 = vmul.f32 %v2633_v26, %v1379_v10  ;;  %v1423_v28 = vpop.f32.mrf.mxu1 }
 0x3c8   : > { %v1559_v41 = vrot.slane %v1794_v52, %v2064_v4  ;;  %v1381_v40 = vpop.f32.mrf.mxu0  ;;  %v1631_v60 = vadd.f32 %v1625_v59, %v1535_v11  ;;  %v1633_v47 = vmax.f32 %v1630_v32, 0.0 }
 0x3c9   : > { %v1587_v8 = vadd.f32 %v1581_v30, %v1532_v1  ;;  %v1533_v56 = vadd.f32 %v2636_v17, %v1517_v35 }
 0x3ca   : > { %v1567_v33 = vcombine.low %v1559_v41, %v1566_v48  ;;  %v1382_v12 = vpop.f32.mrf.mxu0  ;;  %v1634_v38 = vmax.f32 %v1631_v60, 0.0 }
 0x3cb   : > { %v1590_v39 = vmax.f32 %v1587_v8, 0.0  ;;  %v1588_v0 = vadd.f32 %v1582_v50, %v1533_v56 }
 0x3cc   : > { %1795 = vst.sshfl [vmem:[%s2670_s24] sm:$0x15 pattern:$0x73625140] %v1567_v33  ;;  %v1459_v13 = vpop.f32.mrf.mxu0  ;;  %v1798_v29 = vpack.c.bf16 %v1634_v38, %v1633_v47 }
 0x3cd   : > { %v1796_v18 = vpack.c.bf16 %v1590_v39, %v1589_v2  ;;  %v1591_v24 = vmax.f32 %v1588_v0, 0.0  ;;  %v1520_v3 = vmul.f32 %v2633_v26, %v1459_v13 }
 0x3ce   : > { %v1500_v23 = vpop.f32.mrf.mxu1  ;;  %v1461_v27 = vpop.f32.mrf.mxu0 }
 0x3cf   : > { %v1594_v5 = vpack.c.bf16 %v1591_v24, %v1591_v24  ;;  %v1536_v34 = vadd.f32 %v2636_v17, %v1520_v3  ;;  %v1522_v63 = vmul.f32 %v2633_v26, %v1500_v23  ;;  %v1521_v62 = vmul.f32 %v2633_v26, %v1461_v27 }
 0x3d0   : > { %v1605_v31 = vrot.slane %v1796_v18, %v2064_v4  ;;  %v1502_v46 = vpop.f32.mrf.mxu1  ;;  %v1463_v16 = vpop.f32.mrf.mxu0 }
 0x3d1   : > { %v1612_v42 = vrot.slane %v1594_v5, %v2064_v4  ;;  %v1632_v15 = vadd.f32 %v1626_v53, %v1536_v34  ;;  %v1538_v36 = vadd.f32 %v2636_v17, %v1522_v63  ;;  %v1537_v21 = vadd.f32 %v2636_v17, %v1521_v62 }
 0x3d2   : > { %v1523_v14 = vmul.f32 %v2633_v26, %v1502_v46  ;;  %v1504_v37 = vpop.f32.mrf.mxu1  ;;  %v1464_v7 = vpop.f32.mrf.mxu0  ;;  %v1649_v26 = vrot.slane %v1798_v29, %v2064_v4 }
 0x3d3   : > { %v1613_v51 = vcombine.low %v1605_v31, %v1612_v42  ;;  %v1635_v43 = vmax.f32 %v1632_v15, 0.0  ;;  %v1675_v44 = vadd.f32 %v1669_v55, %v1538_v36  ;;  %v1674_v6 = vadd.f32 %v1668_v45, %v1537_v21 }
 0x3d4   : > { %v1539_v58 = vadd.f32 %v2636_v17, %v1523_v14  ;;  %v1505_v9 = vpop.f32.mrf.mxu1 }
 0x3d5   : > { %1805 = vst.sshfl [vmem:[%s2670_s24 + $0x3] sm:$0x15 pattern:$0x73625140] %v1613_v51  ;;  %v1638_v25 = vpack.c.bf16 %v1635_v43, %v1635_v43  ;;  %v1678_v19 = vmax.f32 %v1675_v44, 0.0  ;;  %v1677_v52 = vmax.f32 %v1674_v6, 0.0 }
 0x3d6   : > { %v1676_v30 = vadd.f32 %v1670_v49, %v1539_v58 }
 0x3d7   : > { %v1656_v10 = vrot.slane %v1638_v25, %v2064_v4  ;;  %v1800_v54 = vpack.c.bf16 %v1678_v19, %v1677_v52 }
 0x3d8   : > { %v1679_v57 = vmax.f32 %v1676_v30, 0.0 }
 0x3d9   : > { %v1657_v1 = vcombine.low %v1649_v26, %v1656_v10  ;;  %v1693_v20 = vrot.slane %v1800_v54, %v2064_v4 }
 0x3da   : > { %v1682_v11 = vpack.c.bf16 %v1679_v57, %v1679_v57 }
 0x3db   : > { %1806 = vst.sshfl [vmem:[%s2670_s24 + $0x6] sm:$0x15 pattern:$0x73625140] %v1657_v1 }
 0x3dc   : > { %v1700_v17 = vrot.slane %v1682_v11, %v2064_v4 }
 0x3de   : > { %v1701_v35 = vcombine.low %v1693_v20, %v1700_v17 }
 0x3e0   : > { %1807 = vst.sshfl [vmem:[%s2670_s24 + $0x9] sm:$0x15 pattern:$0x73625140] %v1701_v35 }
 0x3e1 PF: > { %s15_s18 = sadd.s32 1, %s1860_s18  }
 0x3e2   : > { %p12_p4 = scmp.ge.s32.totalorder %s15_s18, 4  }
 0x3e4   :  { %14 = sbr.rel (!%p12_p4) target bundleno = 1 (0x1), region = 76 }

// kernel: upproj_forward.7
= control target key start
LH: loop header
LB: loop body
LE: loop exit
PB: predicated region body
PF: predicated region fallthrough
CT: control target
= control target key end

     0   :  { %s5150_s18 = smov 0   ;;  %s8507_s0 = inlined_call_operand.vmem [shape: bf16[2,2,1254], index: 0, kind: input, shape index: {}]   ;;  %s8508_s1 = inlined_call_operand.vmem [shape: bf16[8,18], index: 1, kind: input, shape index: {}]   ;;  %s8509_s2 = inlined_call_operand.vmem [shape: bf16[1,9], index: 2, kind: input, shape index: {}]   ;;  %s8510_s3 = inlined_call_operand.vmem [shape: f32[9,2], index: 3, kind: input, shape index: {}]   ;;  %s8511_s4 = inlined_call_operand.vmem [shape: f32[1,1152], index: 4, kind: input, shape index: {}]   ;;  %s8512_s5 = inlined_call_operand.vmem [shape: f32[2,4,1,1152], index: 5, kind: output, shape index: {}]  }
   0x1 LB: > { %s4999_s19 = sadd.s32 4294967295, %s5103_s18   ;;  %p5003_p0 = scmp.ge.s32.totalorder %s5103_s18, 1  ;;  %s5103_s18 = sphi %s5150_s18, %s15_s18  }
   0x2   : > { %p186_p1 = scmp.lt.s32.totalorder %s5103_s18, 3 }
   0x4   : > { %p187_p2 = pnand %p5003_p0, %p186_p1 }
   0x6   : > { %190 = sbr.rel (%p187_p2) target bundleno = 1275 (0x4fb), region = 40 }
   0xb   : > { %p212_p3 = scmp.lt.s32.totalorder %s4999_s19, 1  ;;  %v8530_v0 = vlaneseq  ;;  %v5105_v1 = vmov 1966171168   ;;  %s5106_s24 = smov 127   ;;  %v8531_v54 = vmov 0   ;;  %vm8514_vm0 = vcmask 474112  }
   0xc   : > { %v227_v2 = vunpack.c.l.s4 %v5105_v1  ;;  %s5107_s25 = smov 126   ;;  %s5108_s26 = smov 94   ;;  %861 = vmatprep.mubr.bf16.mxu0 %v8531_v54  ;;  %902 = vmatprep.mubr.bf16.mxu1 %v8531_v54  ;;  %vm8525_vm1 = vcmask 1040384   ;;  %vm8520_vm2 = vcmask 1039360   ;;  %vm8519_vm3 = vcmask 1031168  }
   0xd   : > { %s9308_s19 = smov (!%p212_p3, %s4999_s19), 1  ;;  %v5161_v3 = vshrl.u32 %v8530_v0, 7  ;;  %s5109_s27 = smov 93   ;;  %5089 = vset.pattern.permute.xlu0 %v8531_v54  ;;  %vm8522_vm4 = vcmask 1041408   ;;  %vm8521_vm5 = vcmask 769024   ;;  %vm8516_vm6 = vcmask 1042432  }
   0xe   : > { %v228_v4 = vunpack.c.0.s8 %v227_v2  ;;  %s5064_s20 = smul.u32 10, %s9308_s19  ;;  %s5110_s28 = smov 58   ;;  %vm8524_vm7 = vcmask 760832   ;;  %vm8515_vm8 = vcmask 1043456   ;;  %vm8523_vm9 = vcmask 752640  }
   0xf   : > { %s5111_s29 = smov 92   ;;  %s5112_s30 = smov 60   ;;  %vm8518_vm10 = vcmask 1044480   ;;  %vm8513_vm11 = vcmask 490496   ;;  %vm8517_vm12 = vcmask 482304   ;;  %vm746_vm13 = vcmask 1045504  }
  0x10   : > { %v5165_v5 = vsub.s32 %v228_v4, %v5161_v3  ;;  %s5170_s23 = scalar_lea.vmem %s8507_s0, %s5064_s20  ;;  %s5113_s6 = smov 59   ;;  %vm765_vm14 = vcmask 1046528   ;;  %vm798_vm15 = vcmask 146432  }
  0x11   : > { %v221_v6 = vld [vmem:[%s5170_s23] sm:$0xff]  ;;  %v222_v38 = vld [vmem:[%s5170_s23 + $0x8] sm:$0x3]  ;;  %s5118_s15 = smov 35  }
  0x12   : > { %8675 = vst [vmem:[#allocation3_spill] sm:$0xff] %v5165_v5  ;;  %v232_v7 = vrot.slane %v221_v6, %v5165_v5  ;;  %v288_v8 = vcombine.low %v221_v6, %v221_v6  ;;  %v225_v15 = vcombine.high %v221_v6, %v221_v6  ;;  %v313_v40 = vcombine.low %v222_v38, %v222_v38 }
  0x13   : > { %v5309_v43 = vrot.slane %v222_v38, %v5165_v5 }
  0x14   : > { %v5175_v9 = vrot.slane %v232_v7, %v5165_v5  ;;  %v295_v10 = vrot.slane %v288_v8, %v5165_v5  ;;  %v366_v14 = vcombine.low %v232_v7, %v232_v7  ;;  %v5199_v19 = vrot.slane %v225_v15, %v5165_v5 }
  0x15   : > { %v240_v27 = vcombine.high %v232_v7, %v232_v7  ;;  %v5299_v41 = vrot.slane %v313_v40, %v5165_v5  ;;  %v384_v45 = vcombine.low %v5309_v43, %v5309_v43  ;;  %v5347_v52 = vrot.slane %v5309_v43, %v5165_v5 }
  0x16   : > { %344 = vrot.lane.b32.xlu1 %v5175_v9, %s5106_s24  ;;  %v5181_v11 = vrot.slane %v295_v10, %v5165_v5  ;;  %v296_v12 = vcombine.high %v295_v10, %v295_v10  ;;  %v5190_v16 = vcombine.high %v5175_v9, %v5175_v9  ;;  %v5196_v18 = vrot.slane %v366_v14, %v5165_v5 }
  0x17   : > { %v422_v20 = vcombine.low %v295_v10, %v295_v10  ;;  %v367_v22 = vcombine.low %v5199_v19, %v5199_v19  ;;  %v5223_v28 = vrot.slane %v240_v27, %v5165_v5  ;;  %v5238_v30 = vrot.slane %v5199_v19, %v5165_v5 }
  0x18   : > { %336 = vrot.lane.b32.xlu0 %v5181_v11, %s5106_s24  ;;  %v310_v13 = vrot.slane %v296_v12, %v5165_v5  ;;  %v311_v17 = vcombine.high %v5181_v11, %v5181_v11  ;;  %v5206_v21 = vcombine.high %v5196_v18, %v5196_v18  ;;  %v5267_v34 = vcombine.low %v5175_v9, %v5175_v9 }
  0x19   : > { %v429_v24 = vrot.slane %v422_v20, %v5165_v5  ;;  %v5216_v25 = vrot.slane %v367_v22, %v5165_v5  ;;  %v5231_v29 = vcombine.low %v5223_v28, %v5223_v28  ;;  %v5247_v31 = vcombine.low %v5238_v30, %v5238_v30 }
  0x1a   : > { %394 = vrot.lane.b32.xlu1 %v5175_v9, %s5107_s25  ;;  %v312_v23 = vcombine.high %v310_v13, %v310_v13  ;;  %v5259_v32 = vcombine.high %v5223_v28, %v5223_v28  ;;  %v514_v33 = vcombine.low %v310_v13, %v310_v13  ;;  %v513_v35 = vcombine.low %v5181_v11, %v5181_v11 }
  0x1b   : > { %v430_v26 = vcombine.high %v429_v24, %v429_v24  ;;  %v548_v36 = vcombine.low %v5216_v25, %v5216_v25  ;;  %v547_v37 = vcombine.low %v5196_v18, %v5196_v18  ;;  %v580_v39 = vcombine.low %v429_v24, %v429_v24 }
  0x1c   : > { %338 = vrot.lane.b32.xlu0 %v310_v13, %s5106_s24  ;;  %v5306_v42 = vrot.slane %v5299_v41, %v5165_v5  ;;  %v383_v44 = vcombine.high %v5216_v25, %v5216_v25  ;;  %v391_v46 = vrot.slane %v384_v45, %v5165_v5  ;;  %v5327_v47 = vcombine.high %v5238_v30, %v5238_v30 }
  0x1d   : > { %v431_v48 = vcombine.low %v5299_v41, %v5299_v41  ;;  %v241_v49 = vcombine.high %v5199_v19, %v5199_v19  ;;  %v5360_v55 = vcombine.low %v5347_v52, %v5347_v52  ;;  %v473_v15 = vcombine.high %v5309_v43, %v5309_v43 }
  0x1e   : > { %398 = vrot.lane.b32.xlu1 %v5190_v16, %s5107_s25  ;;  %v515_v61 = vcombine.low %v5306_v42, %v5306_v42  ;;  %v549_v4 = vcombine.low %v391_v46, %v391_v46  ;;  %v5115_v27 = vmov 1  }
  0x1f   : > { %v438_v50 = vrot.slane %v431_v48, %v5165_v5  ;;  %v5342_v51 = vrot.slane %v241_v49, %v5165_v5  ;;  %v480_v20 = vrot.slane %v473_v15, %v5165_v5  ;;  %5090 = vset.pattern.permute.xlu1 %v5115_v27 }
  0x20   : > { %340 = vrot.lane.b32.xlu0 %v311_v17, %s5106_s24 }
  0x21   : > { %v472_v53 = vcombine.low %v5342_v51, %v5342_v51  ;;  %v5375_v57 = vcombine.high %v5342_v51, %v5342_v51 }
  0x22   : > { %392 = vrot.lane.b32.xlu1 %v5196_v18, %s5107_s25 }
  0x24   : > { %396 = vrot.lane.b32.xlu0 %v5206_v21, %s5107_s25 }
  0x26   : > { %342 = vrot.lane.b32.xlu1 %v312_v23, %s5106_s24 }
  0x28   : > { %400 = vrot.lane.b32.xlu0 %v5216_v25, %s5107_s25 }
  0x2a   : > { %443 = vrot.lane.b32.xlu1 %v430_v26, %s5108_s26 }
  0x2c   : > { %441 = vrot.lane.b32.xlu0 %v5181_v11, %s5108_s26 }
  0x2e   : > { %447 = vrot.lane.b32.xlu1 %v5196_v18, %s5108_s26 }
  0x30   : > { %445 = vrot.lane.b32.xlu0 %v311_v17, %s5108_s26 }
  0x32   : > { %485 = vrot.lane.b32.xlu1 %v5231_v29, %s5109_s27 }
  0x34   : > { %439 = vrot.lane.b32.xlu0 %v429_v24, %s5108_s26 }
  0x36   : > { %489 = vrot.lane.b32.xlu1 %v5223_v28, %s5109_s27 }
  0x38   : > { %487 = vrot.lane.b32.xlu0 %v5175_v9, %s5109_s27 }
  0x3a   : > { %612 = vrot.lane.b32.xlu1 %v5175_v9, %s5110_s28 }
  0x3c   : > { %491 = vrot.lane.b32.xlu0 %v5247_v31, %s5109_s27 }
  0x3e   : > { %616 = vrot.lane.b32.xlu1 %v5190_v16, %s5110_s28 }
  0x40   : > { %614 = vrot.lane.b32.xlu0 %v5223_v28, %s5110_s28 }
  0x42   : > { %620 = vrot.lane.b32.xlu1 %v5238_v30, %s5110_s28 }
  0x44   : > { %618 = vrot.lane.b32.xlu0 %v5259_v32, %s5110_s28 }
  0x46   : > { %519 = vrot.lane.b32.xlu1 %v514_v33, %s5111_s29 }
  0x48   : > { %483 = vrot.lane.b32.xlu0 %v5267_v34, %s5109_s27 }
  0x4a   : > { %523 = vrot.lane.b32.xlu1 %v310_v13, %s5111_s29  ;;  %v321_v13 = vcombine.high %v5299_v41, %v5299_v41 }
  0x4c   : > { %521 = vrot.lane.b32.xlu0 %v5181_v11, %s5111_s29 }
  0x4e   : > { %517 = vrot.lane.b32.xlu1 %v513_v35, %s5111_s29 }
  0x50   : > { %525 = vrot.lane.b32.xlu0 %v5267_v34, %s5111_s29 }
  0x52   : > { %554 = vrot.lane.b32.xlu1 %v5196_v18, %s5112_s30 }
  0x54   : > { %552 = vrot.lane.b32.xlu0 %v5267_v34, %s5112_s30 }
  0x56   : > { %558 = vrot.lane.b32.xlu1 %v548_v36, %s5112_s30 }
  0x58   : > { %556 = vrot.lane.b32.xlu0 %v5175_v9, %s5112_s30 }
  0x5a   : > { %584 = vrot.lane.b32.xlu1 %v513_v35, %s5113_s6 }
  0x5c   : > { %550 = vrot.lane.b32.xlu0 %v547_v37, %s5112_s30 }
  0x5e   : > { %588 = vrot.lane.b32.xlu1 %v5181_v11, %s5113_s6  ;;  %v581_v11 = vcombine.low %v438_v50, %v438_v50 }
  0x60   : > { %586 = vrot.lane.b32.xlu0 %v429_v24, %s5113_s6 }
  0x62   : > { %582 = vrot.lane.b32.xlu1 %v580_v39, %s5113_s6 }
  0x64   : > { %590 = vrot.lane.b32.xlu0 %v547_v37, %s5113_s6  ;;  %v793_v37 = vld [vmem:[%s8510_s3] sm:$0xff] }
  0x66   : > { %348 = vrot.lane.b32.xlu1 %v5190_v16, %s5106_s24 }
  0x68   : > { %346 = vrot.lane.b32.xlu0 %v5223_v28, %s5106_s24 }
  0x6a   : > { %352 = vrot.lane.b32.xlu1 %v5306_v42, %s5106_s24 }
  0x6c   : > { %350 = vrot.lane.b32.xlu0 %v5259_v32, %s5106_s24 }
  0x6e   : > { %404 = vrot.lane.b32.xlu1 %v383_v44, %s5107_s25 }
  0x70   : > { %402 = vrot.lane.b32.xlu0 %v5238_v30, %s5107_s25 }
  0x72   : > { %408 = vrot.lane.b32.xlu1 %v391_v46, %s5107_s25 }
  0x74   : > { %406 = vrot.lane.b32.xlu0 %v5327_v47, %s5107_s25 }
  0x76   : > { %451 = vrot.lane.b32.xlu1 %v5206_v21, %s5108_s26 }
  0x78   : > { %449 = vrot.lane.b32.xlu0 %v5175_v9, %s5108_s26 }
  0x7a   : > { %455 = vrot.lane.b32.xlu1 %v438_v50, %s5108_s26 }
  0x7c   : > { %453 = vrot.lane.b32.xlu0 %v5190_v16, %s5108_s26 }
  0x7e   : > { %495 = vrot.lane.b32.xlu1 %v5238_v30, %s5109_s27 }
  0x80   : > { %493 = vrot.lane.b32.xlu0 %v472_v53, %s5109_s27 }
  0x82   : > { %499 = vrot.lane.b32.xlu1 %v5360_v55, %s5109_s27 }
  0x84   : > { %497 = vrot.lane.b32.xlu0 %v5342_v51, %s5109_s27 }
  0x86   : > { %624 = vrot.lane.b32.xlu1 %v5327_v47, %s5110_s28 }
  0x88   : > { %v5369_v56 = vpop.permute.xlu1 %344  ;;  %622 = vrot.lane.b32.xlu0 %v5342_v51, %s5110_s28 }
  0x8a   : > { %v5377_v58 = vpop.permute.xlu0 %336  ;;  %628 = vrot.lane.b32.xlu1 %v5347_v52, %s5110_s28 }
  0x8c   : > { %v5381_v59 = vpop.permute.xlu1 %394  ;;  %626 = vrot.lane.b32.xlu0 %v5375_v57, %s5110_s28 }
  0x8e   : > { %v5385_v60 = vpop.permute.xlu0 %338  ;;  %529 = vrot.lane.b32.xlu1 %v5175_v9, %s5111_s29 }
  0x8f   : > { %v357_v53 = vsel %vm8520_vm2, %v5377_v58, %v5385_v60 }
  0x90   : > { %v5391_v62 = vpop.permute.xlu1 %398  ;;  %527 = vrot.lane.b32.xlu0 %v5231_v29, %s5111_s29  ;;  %v645_v15 = vsel %vm8525_vm1, %v5175_v9, %v357_v53 }
  0x92   : > { %v5395_v63 = vpop.permute.xlu0 %340  ;;  %533 = vrot.lane.b32.xlu1 %v515_v61, %s5111_s29 }
  0x94   : > { %v5398_v1 = vpop.permute.xlu1 %392  ;;  %531 = vrot.lane.b32.xlu0 %v5223_v28, %s5111_s29 }
  0x95   : > { %v413_v58 = vsel %vm8519_vm3, %v5398_v1, %v5381_v59 }
  0x96   : > { %v5402_v2 = vpop.permute.xlu0 %396  ;;  %562 = vrot.lane.b32.xlu1 %v5216_v25, %s5112_s30  ;;  %v482_v25 = vcombine.low %v480_v20, %v480_v20 }
  0x98   : > { %v5406_v6 = vpop.permute.xlu1 %342  ;;  %560 = vrot.lane.b32.xlu0 %v5247_v31, %s5112_s30 }
  0x9a   : > { %v5410_v7 = vpop.permute.xlu0 %400  ;;  %566 = vrot.lane.b32.xlu1 %v549_v4, %s5112_s30  ;;  %v360_v4 = vsel %vm8520_vm2, %v5406_v6, %v5369_v56 }
  0x9b   : > { %v416_v1 = vsel %vm8519_vm3, %v5391_v62, %v5410_v7 }
  0x9c   : > { %v5413_v8 = vpop.permute.xlu1 %443  ;;  %564 = vrot.lane.b32.xlu0 %v5238_v30, %s5112_s30 }
  0x9e   : > { %v5417_v10 = vpop.permute.xlu0 %441  ;;  %594 = vrot.lane.b32.xlu1 %v5196_v18, %s5113_s6  ;;  %v335_v18 = vrot.slane %v321_v13, %v5165_v5 }
  0xa0   : > { %v5421_v12 = vpop.permute.xlu1 %447  ;;  %592 = vrot.lane.b32.xlu0 %v5267_v34, %s5113_s6  ;;  %v516_v23 = vcombine.low %v335_v18, %v335_v18 }
  0xa2   : > { %v5427_v14 = vpop.permute.xlu0 %445  ;;  %598 = vrot.lane.b32.xlu1 %v581_v11, %s5113_s6  ;;  %v358_v11 = vsel %vm8520_vm2, %v5385_v60, %v5395_v63 }
  0xa4   : > { %v5432_v17 = vpop.permute.xlu1 %485  ;;  %596 = vrot.lane.b32.xlu0 %v5175_v9, %s5113_s6  ;;  %v648_v9 = vsel %vm8525_vm1, %v5223_v28, %v358_v11 }
  0xa6   : > { %v5437_v19 = vpop.permute.xlu0 %439  ;;  %410 = vrot.lane.b32.xlu1 %v5347_v52, %s5107_s25 }
  0xa7   : > { %v460_v28 = vsel %vm8521_vm5, %v5437_v19, %v5417_v10 }
  0xa8   : > { %v5442_v21 = vpop.permute.xlu1 %489  ;;  %354 = vrot.lane.b32.xlu0 %v335_v18, %s5106_s24 }
  0xaa   : > { %v5445_v22 = vpop.permute.xlu0 %487  ;;  %630 = vrot.lane.b32.xlu1 %v480_v20, %s5110_s28  ;;  %v672_v20 = vsel %vm8522_vm4, %v645_v15, %v413_v58 }
  0xac   : > { %v613_v24 = vpop.permute.xlu1 %612  ;;  %457 = vrot.lane.b32.xlu0 %v5306_v42, %s5108_s26 }
  0xae   : > { %v5450_v26 = vpop.permute.xlu0 %491  ;;  %535 = vrot.lane.b32.xlu1 %v516_v23, %s5111_s29  ;;  %v463_v23 = vsel %vm8521_vm5, %v5427_v14, %v5421_v12 }
  0xb0   : > { %v617_v29 = vpop.permute.xlu1 %616  ;;  %501 = vrot.lane.b32.xlu0 %v482_v25, %s5109_s27 }
  0xb2   : > { %v615_v31 = vpop.permute.xlu0 %614  ;;  %600 = vrot.lane.b32.xlu1 %v515_v61, %s5113_s6  ;;  %v359_v61 = vsel %vm8520_vm2, %v5395_v63, %v5406_v6  ;;  %v414_v6 = vsel %vm8519_vm3, %v5381_v59, %v5402_v2  ;;  %v654_v63 = vsel %vm8525_vm1, %v5259_v32, %v360_v4  ;;  %v461_v59 = vsel %vm8521_vm5, %v5417_v10, %v5413_v8 }
  0xb3   : > { %v634_v33 = vsel %vm8514_vm0, %v615_v31, %v617_v29  ;;  %v633_v34 = vsel %vm8514_vm0, %v613_v24, %v615_v31  ;;  %v651_v60 = vsel %vm8525_vm1, %v5190_v16, %v359_v61  ;;  %v462_v16 = vsel %vm8521_vm5, %v5413_v8, %v5427_v14 }
  0xb4   : > { %v5457_v35 = vpop.permute.xlu1 %620  ;;  %5004 = vmatprep.subr.msk.bf16.mxu0 %vm8525_vm1, %v634_v33  ;;  %568 = vrot.lane.b32.xlu0 %v5360_v55, %s5112_s30  ;;  %v803_v36 = vsel %vm8525_vm1, %v633_v34, 0  ;;  %v415_v32 = vsel %vm8519_vm3, %v5402_v2, %v5391_v62  ;;  %v505_v24 = vsel %vm8524_vm7, %v5432_v17, %v5445_v22  ;;  %v678_v8 = vsel %vm8522_vm4, %v654_v63, %v416_v1 }
  0xb5   : > { %842 = vmatpush1.bf16.msra.mxu0 %v803_v36  ;;  %v697_v33 = vsel %vm8516_vm6, %v678_v8, %v463_v23  ;;  %v691_v34 = vsel %vm8516_vm6, %v672_v20, %v460_v28 }
  0xb6   : > { %v619_v38 = vpop.permute.xlu0 %618  ;;  %1048 = vperm.xlu1 %5090, %v793_v37  }
  0xb7   : > { %v636_v39 = vsel %vm8514_vm0, %v619_v38, %v5457_v35  ;;  %v635_v40 = vsel %vm8514_vm0, %v617_v29, %v619_v38  ;;  %v676_v29 = vsel %vm8522_vm4, %v651_v60, %v415_v32  ;;  %v506_v38 = vsel %vm8524_vm7, %v5445_v22, %v5442_v21 }
  0xb8   : > { %v520_v41 = vpop.permute.xlu1 %519  ;;  %5006 = vmatprep.subr.msk.bf16.mxu1 %vm8525_vm1, %v636_v39  ;;  %v809_v42 = vsel %vm8525_vm1, %v635_v40, 0  ;;  %1035 = vperm.xlu0 %5089, %v793_v37   ;;  %v695_v14 = vsel %vm8516_vm6, %v676_v29, %v462_v16 }
  0xb9   : > { %883 = vmatpush1.bf16.msra.mxu1 %v809_v42 }
  0xba   : > { %v484_v43 = vpop.permute.xlu0 %483  ;;  %5091 = vset.pattern.permute.xlu1 %v8531_v54 }
  0xbb   : > { %v504_v10 = vsel %vm8524_vm7, %v484_v43, %v5432_v17  ;;  %v507_v17 = vsel %vm8524_vm7, %v5442_v21, %v5450_v26 }
  0xbc   : > { %v5472_v44 = vpop.permute.xlu1 %523  ;;  %5092 = vset.pattern.permute.xlu0 %v5115_v27  ;;  %v674_v27 = vsel %vm8522_vm4, %v648_v9, %v414_v6  ;;  %v710_v43 = vsel %vm8515_vm8, %v691_v34, %v504_v10  ;;  %v716_v11 = vsel %vm8515_vm8, %v697_v33, %v507_v17 }
  0xbd   : > { %v693_v2 = vsel %vm8516_vm6, %v674_v27, %v461_v59 }
  0xbe   : > { %v5474_v45 = vpop.permute.xlu0 %521  ;;  %v712_v36 = vsel %vm8515_vm8, %v693_v2, %v505_v24 }
  0xbf   : > { %v539_v62 = vsel %vm8523_vm9, %v520_v41, %v5474_v45  ;;  %v540_v22 = vsel %vm8523_vm9, %v5474_v45, %v5472_v44 }
  0xc0   : > { %v518_v46 = vpop.permute.xlu1 %517  ;;  %v731_v39 = vsel %vm8518_vm10, %v712_v36, %v539_v62 }
  0xc1   : > { %v538_v37 = vsel %vm8523_vm9, %v518_v46, %v520_v41 }
  0xc2   : > { %v5476_v48 = vpop.permute.xlu0 %525  ;;  %v729_v21 = vsel %vm8518_vm10, %v710_v43, %v538_v37 }
  0xc3   : > { %v541_v53 = vsel %vm8523_vm9, %v5472_v44, %v5476_v48  ;;  %v714_v44 = vsel %vm8515_vm8, %v695_v14, %v506_v38 }
  0xc4   : > { %v5478_v49 = vpop.permute.xlu1 %554  ;;  %v735_v45 = vsel %vm8518_vm10, %v716_v11, %v541_v53  ;;  %v733_v9 = vsel %vm8518_vm10, %v714_v44, %v540_v22 }
  0xc6   : > { %v553_v50 = vpop.permute.xlu0 %552 }
  0xc7   : > { %v572_v19 = vsel %vm8513_vm11, %v553_v50, %v5478_v49 }
  0xc8   : > { %v5483_v55 = vpop.permute.xlu1 %558  ;;  %v750_v46 = vsel %vm746_vm13, %v731_v39, %v572_v19 }
  0xca   : > { %v557_v13 = vpop.permute.xlu0 %556 }
  0xcb   : > { %v573_v58 = vsel %vm8513_vm11, %v5478_v49, %v557_v13 }
  0xcc   : > { %v585_v18 = vpop.permute.xlu1 %584  ;;  %v752_v16 = vsel %vm746_vm13, %v733_v9, %v573_v58 }
  0xce   : > { %v551_v25 = vpop.permute.xlu0 %550 }
  0xcf   : > { %v571_v40 = vsel %vm8513_vm11, %v551_v25, %v553_v50  ;;  %v574_v50 = vsel %vm8513_vm11, %v557_v13, %v5483_v55 }
  0xd0   : > { %v589_v31 = vpop.permute.xlu1 %588  ;;  %v748_v6 = vsel %vm746_vm13, %v729_v21, %v571_v40  ;;  %v754_v13 = vsel %vm746_vm13, %v735_v45, %v574_v50 }
  0xd2   : > { %v587_v42 = vpop.permute.xlu0 %586 }
  0xd3   : > { %v604_v41 = vsel %vm8517_vm12, %v585_v18, %v587_v42  ;;  %v605_v60 = vsel %vm8517_vm12, %v587_v42, %v589_v31 }
  0xd4   : > { %v583_v61 = vpop.permute.xlu1 %582  ;;  %v770_v4 = vsel %vm765_vm14, %v750_v46, %v604_v41  ;;  %v773_v32 = vsel %vm765_vm14, %v752_v16, %v605_v60 }
  0xd5   : > { %v603_v15 = vsel %vm8517_vm12, %v583_v61, %v585_v18  ;;  %843 = vmatprep.subr.bf16.mxu0 %v770_v4  ;;  %v5584_v18 = vld [vmem:[%s8508_s1] sm:$0xf] }
  0xd6   : > { %v5574_v63 = vpop.permute.xlu0 %590  ;;  %v767_v1 = vsel %vm765_vm14, %v748_v6, %v603_v15 }
  0xd7   : > { %v606_v49 = vsel %vm8517_vm12, %v589_v31, %v5574_v63  ;;  %844 = vmatpush1.bf16.msra.mxu0 %v767_v1 }
  0xd8   : > { %v349_v20 = vpop.permute.xlu1 %348  ;;  %v776_v59 = vsel %vm765_vm14, %v754_v13, %v606_v49 }
  0xd9   : > { %884 = vmatprep.subr.bf16.mxu1 %v776_v59 }
  0xda   : > { %885 = vmatpush1.bf16.msra.mxu1 %v773_v32  ;;  %v347_v23 = vpop.permute.xlu0 %346  ;;  %5005 = vmatmul.mubr.msk.bf16.vlgmr.msra.gmra.mxu0 %vm798_vm15, %v5584_v18 }
  0xdb   : > { %943 = vmatprep.mubr.bf16.mxu0 %v8531_v54  ;;  %v361_v50 = vsel %vm8520_vm2, %v5369_v56, %v347_v23  ;;  %v362_v61 = vsel %vm8520_vm2, %v347_v23, %v349_v20 }
  0xdc   : > { %v5592_v28 = vpop.permute.xlu1 %352  ;;  %v657_v45 = vsel %vm8525_vm1, %v5238_v30, %v361_v50  ;;  %v660_v56 = vsel %vm8525_vm1, %v5342_v51, %v362_v61 }
  0xdd   : > { %5007 = vmatmul.mubr.msk.bf16.vlgmr.msra.gmra.mxu1 %vm798_vm15, %v5584_v18 }
  0xde   : > { %v351_v24 = vpop.permute.xlu0 %350  ;;  %984 = vmatprep.mubr.bf16.mxu1 %v8531_v54 }
  0xdf   : > { %v363_v11 = vsel %vm8520_vm2, %v349_v20, %v351_v24  ;;  %v364_v58 = vsel %vm8520_vm2, %v351_v24, %v5592_v28 }
  0xe0   : > { %v405_v25 = vpop.permute.xlu1 %404  ;;  %v663_v9 = vsel %vm8525_vm1, %v5327_v47, %v363_v11 }
  0xe2   : > { %v403_v27 = vpop.permute.xlu0 %402 }
  0xe3   : > { %v417_v15 = vsel %vm8519_vm3, %v5410_v7, %v403_v27  ;;  %v418_v6 = vsel %vm8519_vm3, %v403_v27, %v405_v25  ;;  %v666_v7 = vsel %vm8525_vm1, %v5375_v57, %v364_v58 }
  0xe4   : > { %v5597_v8 = vpop.permute.xlu1 %408  ;;  %v680_v51 = vsel %vm8522_vm4, %v657_v45, %v417_v15  ;;  %v682_v20 = vsel %vm8522_vm4, %v660_v56, %v418_v6 }
  0xe6   : > { %v407_v29 = vpop.permute.xlu0 %406 }
  0xe7   : > { %v419_v60 = vsel %vm8519_vm3, %v405_v25, %v407_v29  ;;  %v420_v1 = vsel %vm8519_vm3, %v407_v29, %v5597_v8 }
  0xe8   : > { %v452_v62 = vpop.permute.xlu1 %451  ;;  %v684_v47 = vsel %vm8522_vm4, %v663_v9, %v419_v60  ;;  %v686_v57 = vsel %vm8522_vm4, %v666_v7, %v420_v1  ;;  %v5116_v60 = vmov 0.0  }
  0xea   : > { %v450_v2 = vpop.permute.xlu0 %449 }
  0xeb   : > { %v464_v49 = vsel %vm8521_vm5, %v5421_v12, %v450_v2  ;;  %v465_v13 = vsel %vm8521_vm5, %v450_v2, %v452_v62 }
  0xec   : > { %v5599_v14 = vpop.permute.xlu1 %455  ;;  %v699_v24 = vsel %vm8516_vm6, %v680_v51, %v464_v49  ;;  %v701_v25 = vsel %vm8516_vm6, %v682_v20, %v465_v13 }
  0xee   : > { %v454_v10 = vpop.permute.xlu0 %453 }
  0xef   : > { %v466_v59 = vsel %vm8521_vm5, %v452_v62, %v454_v10  ;;  %v467_v16 = vsel %vm8521_vm5, %v454_v10, %v5599_v14 }
  0xf0   : > { %v496_v19 = vpop.permute.xlu1 %495  ;;  %v703_v62 = vsel %vm8516_vm6, %v684_v47, %v466_v59  ;;  %v705_v2 = vsel %vm8516_vm6, %v686_v57, %v467_v16 }
  0xf2   : > { %v494_v31 = vpop.permute.xlu0 %493 }
  0xf3   : > { %v508_v12 = vsel %vm8524_vm7, %v5450_v26, %v494_v31  ;;  %v509_v32 = vsel %vm8524_vm7, %v494_v31, %v496_v19 }
  0xf4   : > { %v5601_v33 = vpop.permute.xlu1 %499 }
  0xf6   : > { %v498_v34 = vpop.permute.xlu0 %497 }
  0xf8   : > { %v625_v36 = vpop.permute.xlu1 %624 }
  0xfa   : > { %v623_v37 = vpop.permute.xlu0 %622 }
  0xfb   : > { %v637_v38 = vsel %vm8514_vm0, %v5457_v35, %v623_v37  ;;  %v638_v17 = vsel %vm8514_vm0, %v623_v37, %v625_v36  ;;  %v720_v37 = vsel %vm8515_vm8, %v701_v25, %v509_v32 }
  0xfc   : > { %v5606_v39 = vpop.permute.xlu1 %628  ;;  %5008 = vmatprep.subr.msk.bf16.mxu0 %vm8525_vm1, %v638_v17  ;;  %v815_v40 = vsel %vm8525_vm1, %v637_v38, 0  ;;  %v510_v38 = vsel %vm8524_vm7, %v496_v19, %v498_v34 }
  0xfd   : > { %924 = vmatpush1.bf16.msra.mxu0 %v815_v40  ;;  %v722_v11 = vsel %vm8515_vm8, %v703_v62, %v510_v38 }
  0xfe   : > { %v627_v42 = vpop.permute.xlu0 %626 }
  0xff   : > { %v639_v43 = vsel %vm8514_vm0, %v625_v36, %v627_v42  ;;  %v640_v53 = vsel %vm8514_vm0, %v627_v42, %v5606_v39  ;;  %v718_v36 = vsel %vm8515_vm8, %v699_v24, %v508_v12 }
 0x100   : > { %v530_v41 = vpop.permute.xlu1 %529  ;;  %5010 = vmatprep.subr.msk.bf16.mxu1 %vm8525_vm1, %v640_v53  ;;  %v821_v35 = vsel %vm8525_vm1, %v639_v43, 0 }
 0x101   : > { %965 = vmatpush1.bf16.msra.mxu1 %v821_v35 }
 0x102   : > { %v528_v46 = vpop.permute.xlu0 %527 }
 0x103   : > { %v542_v27 = vsel %vm8523_vm9, %v5476_v48, %v528_v46  ;;  %v543_v29 = vsel %vm8523_vm9, %v528_v46, %v530_v41  ;;  %v511_v48 = vsel %vm8524_vm7, %v498_v34, %v5601_v33 }
 0x104   : > { %v5615_v22 = vpop.permute.xlu1 %533  ;;  %v737_v17 = vsel %vm8518_vm10, %v718_v36, %v542_v27  ;;  %v739_v40 = vsel %vm8518_vm10, %v720_v37, %v543_v29  ;;  %v795_v37 = vld [vmem:[%s8511_s4] sm:$0xff] }
 0x106   : > { %v532_v21 = vpop.permute.xlu0 %531 }
 0x107   : > { %v544_v42 = vsel %vm8523_vm9, %v530_v41, %v532_v21 }
 0x108   : > { %v563_v4 = vpop.permute.xlu1 %562  ;;  %v741_v58 = vsel %vm8518_vm10, %v722_v11, %v544_v42 }
 0x10a   : > { %v561_v44 = vpop.permute.xlu0 %560 }
 0x10b   : > { %v575_v10 = vsel %vm8513_vm11, %v5483_v55, %v561_v44  ;;  %v576_v26 = vsel %vm8513_vm11, %v561_v44, %v563_v4  ;;  %v545_v55 = vsel %vm8523_vm9, %v532_v21, %v5615_v22 }
 0x10c   : > { %v5640_v30 = vpop.permute.xlu1 %566  ;;  %v758_v19 = vsel %vm746_vm13, %v739_v40, %v576_v26  ;;  %v756_v46 = vsel %vm746_vm13, %v737_v17, %v575_v10  ;;  %v1081_v40 = vsub.s32 2, %v5161_v3 }
 0x10e   : > { %v565_v23 = vpop.permute.xlu0 %564 }
 0x10f   : > { %v577_v34 = vsel %vm8513_vm11, %v563_v4, %v565_v23  ;;  %v578_v50 = vsel %vm8513_vm11, %v565_v23, %v5640_v30  ;;  %vm5117_vm11 = vmmov 0  }
 0x110   : > { %v595_v31 = vpop.permute.xlu1 %594  ;;  %v760_v56 = vsel %vm746_vm13, %v741_v58, %v577_v34  ;;  %v1082_v58 = vrot.slane %v795_v37, %v1081_v40 }
 0x112   : > { %v593_v43 = vpop.permute.xlu0 %592 }
 0x113   : > { %v607_v53 = vsel %vm8517_vm12, %v5574_v63, %v593_v43  ;;  %v608_v35 = vsel %vm8517_vm12, %v593_v43, %v595_v31  ;;  %v724_v63 = vsel %vm8515_vm8, %v705_v2, %v511_v48  ;;  %v1077_v48 = vsub.s32 1, %v5161_v3 }
 0x114   : > { %v599_v61 = vpop.permute.xlu1 %598  ;;  %v782_v41 = vsel %vm765_vm14, %v758_v19, %v608_v35  ;;  %v779_v21 = vsel %vm765_vm14, %v756_v46, %v607_v53  ;;  %v743_v15 = vsel %vm8518_vm10, %v724_v63, %v545_v55  ;;  %v1085_v46 = vsub.s32 3, %v5161_v3 }
 0x115   : > { %925 = vmatprep.subr.bf16.mxu0 %v782_v41  ;;  %v762_v45 = vsel %vm746_vm13, %v743_v15, %v578_v50  ;;  %v1078_v41 = vrot.slane %v795_v37, %v1077_v48  ;;  %v1271_v48 = vld [vmem:[#allocation2 + $0xa] sm:$0x1] }
 0x116   : > { %926 = vmatpush1.bf16.msra.mxu0 %v779_v21  ;;  %v597_v6 = vpop.permute.xlu0 %596 }
 0x117   : > { %v609_v4 = vsel %vm8517_vm12, %v595_v31, %v597_v6  ;;  %v610_v44 = vsel %vm8517_vm12, %v597_v6, %v599_v61  ;;  %5056 = vmatprep.subr.bf16.mxu0 %v5116_v60  ;;  %v1073_v31 = vsub.s32 0, %v5161_v3 }
 0x118   : > { %v411_v1 = vpop.permute.xlu1 %410  ;;  %v788_v9 = vsel %vm765_vm14, %v762_v45, %v610_v44  ;;  %v785_v7 = vsel %vm765_vm14, %v760_v56, %v609_v4  ;;  %v1086_v56 = vrot.slane %v795_v37, %v1085_v46  ;;  %v1137_v46 = vld [vmem:[#allocation2] sm:$0x1] }
 0x119   : > { %5009 = vmatmul.mubr.msk.bf16.vlgmr.msra.gmra.mxu0 %vm798_vm15, %v5584_v18  ;;  %966 = vmatprep.subr.bf16.mxu1 %v788_v9  ;;  %v1074_v53 = vrot.slane %v795_v37, %v1073_v31 }
 0x11a   : > { %v355_v49 = vpop.permute.xlu0 %354  ;;  %967 = vmatpush1.bf16.msra.mxu1 %v785_v7  ;;  %5060 = vmatprep.mubr.msk.bf16.mxu0 %vm5117_vm11, %v5116_v60  ;;  %vm8676_vm11 = vcmask 490496  }
 0x11b   : > { %v365_v13 = vsel %vm8520_vm2, %v5592_v28, %v355_v49  ;;  %vm1235_vm2 = vcmask 1043459  }
 0x11c   : > { %v631_v51 = vpop.permute.xlu1 %630  ;;  %v669_v47 = vsel %vm8525_vm1, %v5347_v52, %v365_v13 }
 0x11d   : > { %v641_v20 = vsel %vm8514_vm0, %v5606_v39, %v631_v51  ;;  %5011 = vmatmul.mubr.msk.bf16.vlgmr.msra.gmra.mxu1 %vm798_vm15, %v5584_v18  ;;  %v421_v39 = vsel %vm8519_vm3, %v5597_v8, %v411_v1  ;;  %vm1134_vm0 = vcmask 278528  }
 0x11e   : > { %v827_v59 = vsel %vm8525_vm1, %v641_v20, 0  ;;  %v458_v16 = vpop.permute.xlu0 %457  ;;  %3695 = vmatprep.mubr.bf16.mxu1 %v8531_v54  ;;  %v688_v12 = vsel %vm8522_vm4, %v669_v47, %v421_v39  ;;  %vm1240_vm1 = vsmask.f32 4352 }
 0x11f   : > { %5057 = vmatpush3.bf16.msra.mxu0 %v827_v59  ;;  %v468_v57 = vsel %vm8521_vm5, %v5599_v14, %v458_v16  ;;  %vm8529_vm5 = vsmask.f32 3328 }
 0x120   : > { %v536_v28 = vpop.permute.xlu1 %535  ;;  %5058 = vmatprep.subr.bf16.mxu0 %v5116_v60  ;;  %v707_v23 = vsel %vm8516_vm6, %v688_v12, %v468_v57  ;;  %v1093_v12 = vsub.s32 5, %v5161_v3 }
 0x121   : > { %v546_v27 = vsel %vm8523_vm9, %v5615_v22, %v536_v28  ;;  %v1305_v22 = vld [vmem:[#allocation2 + $0x14] sm:$0x1]  ;;  %v1089_v28 = vsub.s32 4, %v5161_v3  ;;  %vm1237_vm9 = vmand %vm1235_vm2, %vm8529_vm5  ;;  %vm1251_vm2 = vcmask 1047559   ;;  %vm1252_vm5 = vsmask.f32 7424 }
 0x122   : > { %v502_v32 = vpop.permute.xlu0 %501 }
 0x123   : > { %v512_v24 = vsel %vm8524_vm7, %v5601_v33, %v502_v32  ;;  %vm1239_vm7 = vcmask 1044484  }
 0x124   : > { %v726_v25 = vsel %vm8515_vm8, %v707_v23, %v512_v24  ;;  %v601_v52 = vpop.permute.xlu1 %600  ;;  %vm8526_vm8 = vsmask.f32 256 }
 0x125   : > { %v745_v29 = vsel %vm8518_vm10, %v726_v25, %v546_v27  ;;  %v611_v62 = vsel %vm8517_vm12, %v599_v61, %v601_v52  ;;  %vm5725_vm6 = vmand %vm1134_vm0, %vm8526_vm8  ;;  %v1090_v27 = vrot.slane %v795_v37, %v1089_v28  ;;  %v5013_v28 = vld [vmem:[%s8511_s4 + $0x8] ss:$0 sm:$0xff]  ;;  %vm1225_vm0 = vcmask 1040664  }
 0x126   : > { %v569_v14 = vpop.permute.xlu0 %568  ;;  %vm8528_vm12 = vsmask.f32 2304 }
 0x127   : > { %v579_v8 = vsel %vm8676_vm11, %v5640_v30, %v569_v14  ;;  %v1306_v30 = vsel %vm5725_vm6, 0, %v1305_v22  ;;  %v1097_v14 = vsub.s32 6, %v5161_v3  ;;  %vm1231_vm11 = vcmask 1042434  }
 0x128   : > { %v764_v2 = vsel %vm746_vm13, %v745_v29, %v579_v8  ;;  %1307 = vst [vmem:[#allocation2 + $0x14] sm:$0x1] %v1306_v30  ;;  %v1101_v29 = vsub.s32 7, %v5161_v3  ;;  %vm8527_vm13 = vsmask.f32 1280  ;;  %vm1233_vm3 = vmand %vm1231_vm11, %vm8528_vm12  ;;  %vm1247_vm11 = vcmask 1046534  }
 0x129   : > { %v791_v10 = vsel %vm765_vm14, %v764_v2, %v611_v62  ;;  %v1098_v3 = vrot.slane %v795_v37, %v1097_v14  ;;  %vm1226_vm14 = vmand %vm1225_vm0, %vm8526_vm8  ;;  %vm1248_vm12 = vsmask.f32 6400 }
 0x12a   : > { %5059 = vmatpush3.bf16.msra.mxu0 %v791_v10  ;;  %v1094_v10 = vrot.slane %v795_v37, %v1093_v12  ;;  %v1102_v40 = vrot.slane %v795_v37, %v1101_v29  ;;  %v1354_v37 = vld [vmem:[#allocation2 + $0x1e] sm:$0x1]  ;;  %vm1241_vm8 = vmand %vm1239_vm7, %vm1240_vm1  ;;  %vm1218_vm1 = vcmask 285696  }
 0x12d   : > { %5061 = vmatmul.mubr.msk.bf16.vlgmr.msra.gmra.mxu0 %vm798_vm15, %v5584_v18 }
 0x12e   : > { %3736 = vmatprep.mubr.bf16.mxu0 %v8531_v54 }
 0x131   : > { %v5734_v18 = vpop.permute.xlu1 %1048 }
 0x133   : > { %v5731_v26 = vpop.permute.xlu0 %1035 }
 0x19a   : > { %v863_v36 = vpop.f32.mrf.mxu0 }
 0x19b   : > { %v1038_v38 = vmul.f32 %v5731_v26, %v863_v36 }
 0x19c   : > { %v865_v17 = vpop.f32.mrf.mxu0 }
 0x19d   : > { %v904_v42 = vpop.f32.mrf.mxu1  ;;  %v1039_v55 = vmul.f32 %v5731_v26, %v865_v17  ;;  %v5744_v43 = vadd.f32 %v5734_v18, %v1038_v38 }
 0x19e   : > { %v867_v35 = vpop.f32.mrf.mxu0  ;;  %v1040_v19 = vmul.f32 %v5731_v26, %v904_v42  ;;  %v1272_v42 = vsel %vm5725_vm6, 0, %v1271_v48 }
 0x19f   : > { %8679 = vst [vmem:[#allocation4_spill] sm:$0xff] %v5744_v43  ;;  %v906_v34 = vpop.f32.mrf.mxu1  ;;  %v5749_v50 = vadd.f32 %v5734_v18, %v1039_v55  ;;  %v1060_v61 = vmax.f32 %v5744_v43, 0.0  ;;  %1273 = vst [vmem:[#allocation2 + $0xa] sm:$0x1] %v1272_v42 }
 0x1a0   : > { %v868_v21 = vpop.f32.mrf.mxu0  ;;  %v1041_v11 = vmul.f32 %v5731_v26, %v906_v34  ;;  %v5754_v63 = vadd.f32 %v5734_v18, %v1040_v19 }
 0x1a1   : > { %8680 = vst [vmem:[#allocation5_spill] sm:$0xff] %v5749_v50  ;;  %v908_v15 = vpop.f32.mrf.mxu1  ;;  %v1061_v6 = vmax.f32 %v5749_v50, 0.0  ;;  %v1116_v4 = vmul.f32 %v1074_v53, %v1060_v61  ;;  %v1138_v61 = vsel %vm5725_vm6, 0, %v1137_v46  ;;  %v1355_v21 = vsel %vm5725_vm6, 0, %v1354_v37 }
 0x1a2   : > { %8681 = vst [vmem:[#allocation6_spill] sm:$0xff] %v5754_v63  ;;  %v5758_v44 = vadd.f32 %v5734_v18, %v1041_v11  ;;  %v1062_v45 = vmax.f32 %v5754_v63, 0.0  ;;  %1139 = vst [vmem:[#allocation2] sm:$0x1] %v1138_v61  ;;  %vm1227_vm6 = vcmask 1041409  }
 0x1a3   : > { %v909_v60 = vpop.f32.mrf.mxu1  ;;  %v1117_v1 = vmul.f32 %v1078_v41, %v1061_v6  ;;  %1356 = vst [vmem:[#allocation2 + $0x1e] sm:$0x1] %v1355_v21  ;;  %vm1229_vm15 = vmand %vm1227_vm6, %vm8527_vm13  ;;  %vm1243_vm6 = vcmask 1045509   ;;  %vm1244_vm13 = vsmask.f32 5376 }
 0x1a4   : > { %8682 = vst [vmem:[#allocation7_spill] sm:$0xff] %v5758_v44  ;;  %v1063_v9 = vmax.f32 %v5758_v44, 0.0  ;;  %v1118_v7 = vmul.f32 %v1082_v58, %v1062_v45  ;;  %vm1230_vm10 = vmor %vm1229_vm15, %vm1226_vm14 }
 0x1a5   : > { %v5014_v49 = vpack.c.bf16 %v1117_v1, %v1116_v4  ;;  %vm1234_vm4 = vmor %vm1233_vm3, %vm1230_vm10 }
 0x1a6   : > { %v1119_v13 = vmul.f32 %v1086_v56, %v1063_v9  ;;  %vm1238_vm0 = vmor %vm1237_vm9, %vm1234_vm4 }
 0x1a7   : > { %v1159_v20 = vrot.slane %v5014_v49, %v5165_v5  ;;  %vm1242_vm14 = vmor %vm1241_vm8, %vm1238_vm0  ;;  %vm8690_vm8 = vsmask.f32 256  ;;  %vm8694_vm0 = vsmask.f32 1280 }
 0x1a8   : > { %v5015_v51 = vpack.c.bf16 %v1119_v13, %v1118_v7  ;;  %vm1245_vm15 = vmand %vm1243_vm6, %vm1244_vm13 }
 0x1a9   : > { %vm1246_vm3 = vmor %vm1245_vm15, %vm1242_vm14  ;;  %v1255_v42 = vld [vmem:[#allocation2] sm:$0xff] }
 0x1aa   : > { %v1166_v59 = vrot.slane %v5015_v51, %v5165_v5  ;;  %vm1249_vm10 = vmand %vm1247_vm11, %vm1248_vm12  ;;  %v1378_v61 = vld [vmem:[#allocation2 + $0x1e] sm:$0xff]  ;;  %vm8691_vm12 = vcmask 1040384  }
 0x1ab   : > { %vm1250_vm4 = vmor %vm1249_vm10, %vm1246_vm3  ;;  %vm1265_vm10 = vcmask 827672  }
 0x1ac   : > { %v1308_v16 = vcombine.high %v1159_v20, %v1166_v59  ;;  %v1181_v47 = vcombine.low %v1159_v20, %v1166_v59  ;;  %vm1253_vm9 = vmand %vm1251_vm2, %vm1252_vm5  ;;  %vm1259_vm5 = vcmask 279553  }
 0x1ad   : > { %vm5815_vm7 = vmor %vm1253_vm9, %vm1250_vm4 }
 0x1ae   : > { %v1316_v9 = vrot.slane %v1308_v16, %v5165_v5  ;;  %v1189_v33 = vrot.slane %v1181_v47, %v5165_v5  ;;  %vm5840_vm13 = vmand %vm8691_vm12, %vm8690_vm8 }
 0x1af   : > { %vm1260_vm6 = vmand %vm1259_vm5, %vm8694_vm0 }
 0x1b0   : > { %vm5868_vm14 = vmor %vm1260_vm6, %vm5840_vm13 }
 0x1b1   : > { %vm8698_vm15 = vmmov %vm8691_vm12 }
 0x1b2   : > { %vm8699_vm11 = vmmov %vm8691_vm12 }
 0x1b3   : > { %vm8700_vm3 = vmmov %vm8699_vm11 }
 0x1b4   : > { %vm8701_vm2 = vmmov %vm8700_vm3 }
 0x1b5   : > { %vm8702_vm4 = vmmov %vm8690_vm8 }
 0x1b6   : > { %vm5901_vm9 = vmand %vm1265_vm10, %vm8702_vm4  ;;  %vm8753_vm10 = vcmask 1039360  }
 0x1b7   : > { %vm8738_vm12 = vmmov %vm8694_vm0  ;;  %vm8739_vm0 = vcmask 1041408  }
 0x1b8   : > { %vm6287_vm6 = vmand %vm8739_vm0, %vm8738_vm12 }
 0x1d9   : > { %v945_v57 = vpop.f32.mrf.mxu0 }
 0x1da   : > { %v1042_v39 = vmul.f32 %v5731_v26, %v945_v57 }
 0x1db   : > { %v947_v32 = vpop.f32.mrf.mxu0 }
 0x1dc   : > { %v5768_v23 = vadd.f32 %v5734_v18, %v1042_v39  ;;  %v1043_v24 = vmul.f32 %v5731_v26, %v947_v32 }
 0x1dd   : > { %v949_v25 = vpop.f32.mrf.mxu0  ;;  %v986_v52 = vpop.f32.mrf.mxu1 }
 0x1de   : > { %8683 = vst [vmem:[#allocation8_spill] sm:$0xff] %v5768_v23  ;;  %v1064_v8 = vmax.f32 %v5768_v23, 0.0  ;;  %v5775_v62 = vadd.f32 %v5734_v18, %v1043_v24  ;;  %v1044_v2 = vmul.f32 %v5731_v26, %v986_v52 }
 0x1df   : > { %v950_v22 = vpop.f32.mrf.mxu0  ;;  %v988_v30 = vpop.f32.mrf.mxu1 }
 0x1e0   : > { %8684 = vst [vmem:[#allocation9_spill] sm:$0xff] %v5775_v62  ;;  %v1065_v31 = vmax.f32 %v5775_v62, 0.0  ;;  %v5780_v36 = vadd.f32 %v5734_v18, %v1044_v2  ;;  %v1045_v38 = vmul.f32 %v5731_v26, %v988_v30  ;;  %v1120_v35 = vmul.f32 %v1090_v27, %v1064_v8 }
 0x1e1   : > { %v990_v17 = vpop.f32.mrf.mxu1 }
 0x1e2   : > { %8685 = vst [vmem:[#allocation10_spill] sm:$0xff] %v5780_v36  ;;  %v1066_v55 = vmax.f32 %v5780_v36, 0.0  ;;  %v5787_v53 = vadd.f32 %v5734_v18, %v1045_v38  ;;  %v1121_v19 = vmul.f32 %v1094_v10, %v1065_v31  ;;  %v1344_v10 = vld [vmem:[#allocation2 + $0x14] sm:$0xff]  ;;  %v1295_v38 = vld [vmem:[#allocation2 + $0xa] sm:$0xff] }
 0x1e3   : > { %v991_v34 = vpop.f32.mrf.mxu1 }
 0x1e4   : > { %8686 = vst [vmem:[#allocation11_spill] sm:$0xff] %v5787_v53  ;;  %v1067_v41 = vmax.f32 %v5787_v53, 0.0  ;;  %v1122_v11 = vmul.f32 %v1098_v3, %v1066_v55  ;;  %v5016_v15 = vpack.c.bf16 %v1121_v19, %v1120_v35 }
 0x1e6   : > { %v1123_v58 = vmul.f32 %v1102_v40, %v1067_v41  ;;  %v1173_v4 = vrot.slane %v5016_v15, %v5165_v5 }
 0x1e8   : > { %v5017_v6 = vpack.c.bf16 %v1123_v58, %v1122_v11 }
 0x1ea   : > { %v1180_v45 = vrot.slane %v5017_v6, %v5165_v5 }
 0x1ec   : > { %v1309_v56 = vcombine.high %v1173_v4, %v1180_v45  ;;  %v1182_v60 = vcombine.low %v1173_v4, %v1180_v45 }
 0x1ed   : > { %v1027_v1 = vpop.f32.mrf.mxu0 }
 0x1ee   : > { %v1046_v7 = vmul.f32 %v5731_v26, %v1027_v1  ;;  %v1323_v49 = vrot.slane %v1309_v56, %v5165_v5  ;;  %v1196_v13 = vrot.slane %v1182_v60, %v5165_v5  ;;  %v1262_v1 = vld [vmem:[#allocation2 + $0x8] sm:$0x3] }
 0x1ef   : > { %v5062_v51 = vpop.f32.mrf.mxu0 }
 0x1f0   : > { %v5802_v20 = vadd.f32 %v5734_v18, %v1046_v7  ;;  %v1324_v59 = vcombine.low %v1316_v9, %v1323_v49  ;;  %v1197_v57 = vcombine.low %v1189_v33, %v1196_v13  ;;  %v1298_v13 = vld [vmem:[#allocation2 + $0x12] sm:$0x3] }
 0x1f1   : > { %v1030_v39 = vpop.f32.mrf.mxu0 }
 0x1f2   : > { %8687 = vst [vmem:[#allocation12_spill] sm:$0xff] %v5802_v20  ;;  %1333 = vrot.lane.b32.xlu0 %v1324_v59, %s5118_s15  ;;  %v1275_v26 = vshrl.u32 %v1197_v57, 16  ;;  %v1068_v16 = vmax.f32 %v5802_v20, 0.0  ;;  %v1358_v32 = vshrl.u32 %v1324_v59, 16 }
 0x1f3   : > { %v5063_v12 = vpop.f32.mrf.mxu0 }
 0x1f4   : > { %1284 = vrot.lane.b32.xlu1 %v1275_v26, %s5118_s15  ;;  %v1124_v47 = vmul.f32 %v5013_v28, %v1068_v16  ;;  %v1347_v26 = vld [vmem:[#allocation2 + $0x1c] sm:$0x3] }
 0x1f6   : > { %1212 = vrot.lane.b32.xlu0 %v1197_v57, %s5118_s15  ;;  %v1133_v24 = vpack.c.bf16 %v1124_v47, %v1124_v47 }
 0x1f8   : > { %1367 = vrot.lane.b32.xlu1 %v1358_v32, %s5118_s15  ;;  %v1204_v18 = vrot.slane %v1133_v24, %v5165_v5 }
 0x1fa   : > { %v1211_v25 = vrot.slane %v1204_v18, %v5165_v5  ;;  %v1325_v52 = vcombine.high %v1204_v18, %v1204_v18  ;;  %v1381_v18 = vld [vmem:[#allocation2 + $0x26] sm:$0x3] }
 0x1fc   : > { %1214 = vrot.lane.b32.xlu0 %v1211_v25, %s5118_s15  ;;  %v1280_v27 = vshrl.u32 %v1211_v25, 16  ;;  %v1332_v14 = vrot.slane %v1325_v52, %v5165_v5 }
 0x1fe   : > { %1286 = vrot.lane.b32.xlu1 %v1280_v27, %s5118_s15  ;;  %v1363_v29 = vshrl.u32 %v1332_v14, 16 }
 0x200   : > { %1335 = vrot.lane.b32.xlu0 %v1332_v14, %s5118_s15 }
 0x202   : > { %1369 = vrot.lane.b32.xlu1 %v1363_v29, %s5118_s15 }
 0x264   : > { %v1334_v8 = vpop.permute.xlu0 %1333 }
 0x265   : > { %v1337_v22 = vrot.slane %v1334_v8, 7 }
 0x266   : > { %v1285_v30 = vpop.permute.xlu1 %1284 }
 0x267   : > { %v1339_v31 = vsel %vm1218_vm1, %v1337_v22, %v1334_v8  ;;  %v1288_v48 = vrot.slane %v1285_v30, 7 }
 0x268   : > { %v5822_v17 = vsel %vm5815_vm7, %v1339_v31, %v1344_v10  ;;  %v1213_v3 = vpop.permute.xlu0 %1212 }
 0x269   : > { %1346 = vst [vmem:[#allocation2 + $0x14] sm:$0xff] %v5822_v17  ;;  %v1290_v40 = vsel %vm1218_vm1, %v1288_v48, %v1285_v30  ;;  %v1216_v55 = vrot.slane %v1213_v3, 7  ;;  %v5828_v35 = vrot.slane %v5822_v17, %v5165_v5  ;;  %v1471_v52 = vcombine.high %v5822_v17, %v5822_v17 }
 0x26a   : > { %v5832_v19 = vsel %vm5815_vm7, %v1290_v40, %v1295_v38  ;;  %v1368_v46 = vpop.permute.xlu1 %1367 }
 0x26b   : > { %1297 = vst [vmem:[#allocation2 + $0xa] sm:$0xff] %v5832_v19  ;;  %v1219_v34 = vsel %vm1218_vm1, %v1216_v55, %v1213_v3  ;;  %v1371_v41 = vrot.slane %v1368_v46, 7  ;;  %v1494_v37 = vrot.slane %v5828_v35, %v5165_v5  ;;  %v1486_v25 = vcombine.high %v5828_v35, %v5828_v35 }
 0x26c   : > { %v5846_v11 = vsel %vm5815_vm7, %v1219_v34, %v1255_v42  ;;  %v5897_v8 = vrot.slane %v5832_v19, %v5165_v5 }
 0x26d   : > { %1257 = vst [vmem:[#allocation2] sm:$0xff] %v5846_v11  ;;  %v1373_v58 = vsel %vm1218_vm1, %v1371_v41, %v1368_v46  ;;  %1971 = vrot.lane.b32.xlu0 %v1494_v37, %s5109_s27  ;;  %1542 = vrot.lane.b32.xlu1 %v1494_v37, %s5106_s24  ;;  %v5855_v15 = vrot.slane %v5846_v11, %v5165_v5 }
 0x26e   : > { %v5859_v6 = vsel %vm5815_vm7, %v1373_v58, %v1378_v61  ;;  %v1215_v4 = vpop.permute.xlu0 %1214  ;;  %v1516_v29 = vcombine.high %v1494_v37, %v1494_v37  ;;  %v5911_v31 = vrot.slane %v1486_v25, %v5165_v5  ;;  %v1605_v38 = vrot.slane %v5897_v8, %v5165_v5 }
 0x26f   : > { %1380 = vst [vmem:[#allocation2 + $0x1e] sm:$0xff] %v5859_v6  ;;  %v1217_v45 = vrot.slane %v1215_v4, 7  ;;  %v5864_v56 = vrot.slane %v5855_v15, %v5165_v5  ;;  %v1404_v17 = vrot.slane %v5859_v6, %v5165_v5  ;;  %v1708_v34 = vcombine.high %v5855_v15, %v5855_v15 }
 0x270   : > { %v1287_v9 = vpop.permute.xlu1 %1286  ;;  %vm8734_vm7 = vcmask 752640  }
 0x271   : > { %8695 = vst [vmem:[#allocation13_spill] sm:$0xff] %v5864_v56  ;;  %v1221_v7 = vsel %vm8698_vm15, %v1216_v55, %v1217_v45  ;;  %v1289_v49 = vrot.slane %v1287_v9, 7  ;;  %1913 = vrot.lane.b32.xlu0 %v5864_v56, %s5111_s29  ;;  %1764 = vrot.lane.b32.xlu1 %v5864_v56, %s5109_s27  ;;  %v5932_v46 = vrot.slane %v1404_v17, %v5165_v5  ;;  %vm8747_vm15 = vcmask 769024  }
 0x272   : > { %v1222_v33 = vsel %vm1218_vm1, %v1221_v7, %v1215_v4  ;;  %v1336_v51 = vpop.permute.xlu0 %1335  ;;  %v5945_v58 = vrot.slane %v1708_v34, %v5165_v5  ;;  %v5949_v15 = vcombine.high %v5864_v56, %v5864_v56  ;;  %v1693_v4 = vcombine.high %v5846_v11, %v5846_v11  ;;  %vm8755_vm4 = vmmov %vm8747_vm15 }
 0x273   : > { %v1263_v59 = vsel %vm5868_vm14, %v1222_v33, %v1262_v1  ;;  %v1291_v57 = vsel %vm8699_vm11, %v1288_v48, %v1289_v49  ;;  %v1338_v28 = vrot.slane %v1336_v51, 7  ;;  %v5916_v48 = vrot.slane %v1471_v52, %v5165_v5  ;;  %vm8748_vm11 = vmmov %vm8734_vm7 }
 0x274   : > { %1264 = vst [vmem:[#allocation2 + $0x8] sm:$0x3] %v1263_v59  ;;  %v1292_v39 = vsel %vm1218_vm1, %v1291_v57, %v1287_v9  ;;  %v1370_v16 = vpop.permute.xlu1 %1369  ;;  %8705 = vst [vmem:[#allocation14_spill] sm:$0xff] %v5945_v58  ;;  %v5958_v45 = vrot.slane %v1693_v4, %v5165_v5  ;;  %v5988_v11 = vcombine.high %v1605_v38, %v1605_v38 }
 0x275   : > { %v1299_v12 = vsel %vm5868_vm14, %v1292_v39, %v1298_v13  ;;  %v1340_v47 = vsel %vm8700_vm3, %v1337_v22, %v1338_v28  ;;  %v1372_v32 = vrot.slane %v1370_v16, 7  ;;  %2029 = vrot.lane.b32.xlu0 %v1494_v37, %s5111_s29  ;;  %1884 = vrot.lane.b32.xlu1 %v1494_v37, %s5107_s25  ;;  %v5929_v35 = vrot.slane %v5916_v48, %v5165_v5 }
 0x276   : > { %1300 = vst [vmem:[#allocation2 + $0x12] sm:$0x3] %v1299_v12  ;;  %v1341_v24 = vsel %vm1218_vm1, %v1340_v47, %v1336_v51  ;;  %8706 = vst [vmem:[#allocation15_spill] sm:$0xff] %v5949_v15  ;;  %v5964_v60 = vrot.slane %v5958_v45, %v5165_v5  ;;  %v1582_v1 = vcombine.high %v5832_v19, %v5832_v19 }
 0x277   : > { %v1348_v27 = vsel %vm5868_vm14, %v1341_v24, %v1347_v26  ;;  %v1374_v14 = vsel %vm8701_vm2, %v1371_v41, %v1372_v32  ;;  %v5998_v9 = vcombine.high %v5932_v46, %v5932_v46  ;;  %v1597_v49 = vcombine.high %v5897_v8, %v5897_v8 }
 0x278   : > { %1349 = vst [vmem:[#allocation2 + $0x1c] sm:$0x3] %v1348_v27  ;;  %v1375_v2 = vsel %vm1218_vm1, %v1374_v14, %v1370_v16  ;;  %8707 = vst [vmem:[#allocation16_spill] sm:$0xff] %v5964_v60  ;;  %v6001_v7 = vrot.slane %v1582_v1, %v5165_v5  ;;  %v6025_v13 = vcombine.high %v5945_v58, %v5945_v58  ;;  %vm8733_vm1 = vcmask 760832  }
 0x279   : > { %v1382_v22 = vsel %vm5868_vm14, %v1375_v2, %v1381_v18  ;;  %1546 = vrot.lane.b32.xlu0 %v1516_v29, %s5106_s24  ;;  %2087 = vrot.lane.b32.xlu1 %v5864_v56, %s5113_s6  ;;  %8708 = vst [vmem:[#allocation17_spill] sm:$0xff] %v5998_v9  ;;  %v6017_v33 = vrot.slane %v1597_v49, %v5165_v5  ;;  %vm8736_vm5 = vmmov %vm8733_vm1 }
 0x27a   : > { %1383 = vst [vmem:[#allocation2 + $0x26] sm:$0x3] %v1382_v22  ;;  %v6008_v19 = vrot.slane %v6001_v7, %v5165_v5  ;;  %8710 = vst [vmem:[#allocation19_spill] sm:$0xff] %v6025_v13  ;;  %v1412_v51 = vcombine.high %v1404_v17, %v1404_v17  ;;  %v1518_v57 = vcombine.high %v5911_v31, %v5911_v31 }
 0x27b   : > { %v1267_v30 = vld [vmem:[#allocation2 + $0x9] sm:$0x1]  ;;  %v1487_v28 = vcombine.high %v5916_v48, %v5916_v48  ;;  %v1397_v39 = vcombine.high %v5859_v6, %v5859_v6  ;;  %v6069_v12 = vcombine.high %v5964_v60, %v5964_v60  ;;  %v1517_v47 = vcombine.high %v5929_v35, %v5929_v35  ;;  %vm8737_vm8 = vmmov %vm8733_vm1 }
 0x27c   : > { %v1268_v3 = vsel %vm5901_vm9, 0, %v1267_v30  ;;  %8709 = vst [vmem:[#allocation18_spill] sm:$0xff] %v6008_v19  ;;  %v6032_v59 = vrot.slane %v1412_v51, %v5165_v5  ;;  %v1709_v32 = vcombine.high %v5958_v45, %v5958_v45  ;;  %v1598_v34 = vcombine.high %v6001_v7, %v6001_v7  ;;  %vm8743_vm14 = vmmov %vm8701_vm2 }
 0x27d   : > { %1269 = vst [vmem:[#allocation2 + $0x9] sm:$0x1] %v1268_v3  ;;  %v1301_v40 = vld [vmem:[#allocation2 + $0x13] sm:$0x1]  ;;  %1544 = vrot.lane.b32.xlu1 %v5911_v31, %s5106_s24  ;;  %1653 = vrot.lane.b32.xlu0 %v1605_v38, %s5108_s26  ;;  %v6051_v26 = vrot.slane %v1487_v28, %v5165_v5  ;;  %v6054_v16 = vrot.slane %v1397_v39, %v5165_v5  ;;  %8712 = vst [vmem:[#allocation21_spill] sm:$0xff] %v6069_v12 }
 0x27e   : > { %v1302_v42 = vsel %vm5901_vm9, 0, %v1301_v40  ;;  %v6097_v25 = vrot.slane %v1709_v32, %v5165_v5  ;;  %v6147_v17 = vcombine.high %v6032_v59, %v6032_v59  ;;  %v6201_v49 = vcombine.high %v6008_v19, %v6008_v19  ;;  %vm8750_vm3 = vmmov %vm8733_vm1 }
 0x27f   : > { %1303 = vst [vmem:[#allocation2 + $0x13] sm:$0x1] %v1302_v42  ;;  %v1350_v55 = vld [vmem:[#allocation2 + $0x1d] sm:$0x1]  ;;  %v6062_v6 = vrot.slane %v6054_v16, %v5165_v5  ;;  %v6157_v42 = vcombine.high %v6017_v33, %v6017_v33  ;;  %vm8754_vm2 = vmmov %vm8733_vm1 }
 0x280   : > { %v1351_v61 = vsel %vm5901_vm9, 0, %v1350_v55  ;;  %8713 = vst [vmem:[#allocation22_spill] sm:$0xff] %v6097_v25  ;;  %8716 = vst [vmem:[#allocation25_spill] sm:$0xff] %v6147_v17  ;;  %v6243_v54 = vcombine.high %v6097_v25, %v6097_v25 }
 0x281   : > { %1352 = vst [vmem:[#allocation2 + $0x1d] sm:$0x1] %v1351_v61  ;;  %v1384_v41 = vld [vmem:[#allocation2 + $0x27] sm:$0x1]  ;;  %1550 = vrot.lane.b32.xlu0 %v5929_v35, %s5106_s24  ;;  %1826 = vrot.lane.b32.xlu1 %v5932_v46, %s5106_s24  ;;  %8711 = vst [vmem:[#allocation20_spill] sm:$0xff] %v6062_v6 }
 0x282   : > { %v1385_v37 = vsel %vm5901_vm9, 0, %v1384_v41  ;;  %8717 = vst [vmem:[#allocation26_spill] sm:$0xff] %v6157_v42  ;;  %8722 = vst [vmem:[#allocation31_spill] sm:$0xff] %v6201_v49 }
 0x283   : > { %1386 = vst [vmem:[#allocation2 + $0x27] sm:$0x1] %v1385_v37  ;;  %v6177_v37 = vrot.slane %v1598_v34, %v5165_v5  ;;  %v1519_v34 = vcombine.high %v6051_v26, %v6051_v26  ;;  %8730 = vst [vmem:[#allocation39_spill] sm:$0xff] %v6243_v54 }
 0x284   : > { %v5025_v63 = vld.sshfl [vmem:[#allocation2 + $0x8] sm:$0x11 pattern:$0x75316420]  ;;  %vm8756_vm9 = vmmov %vm8733_vm1 }
 0x285   : > { %1766 = vrot.lane.b32.xlu0 %v5945_v58, %s5109_s27  ;;  %1768 = vrot.lane.b32.xlu1 %v5949_v15, %s5109_s27  ;;  %8718 = vst [vmem:[#allocation27_spill] sm:$0xff] %v6177_v37 }
 0x289   : > { %1855 = vrot.lane.b32.xlu0 %v1605_v38, %s5109_s27  ;;  %1975 = vrot.lane.b32.xlu1 %v1516_v29, %s5109_s27 }
 0x28d   : > { %1973 = vrot.lane.b32.xlu0 %v5911_v31, %s5109_s27  ;;  %1772 = vrot.lane.b32.xlu1 %v5964_v60, %s5109_s27 }
 0x291   : > { %2000 = vrot.lane.b32.xlu0 %v5932_v46, %s5109_s27  ;;  %1942 = vrot.lane.b32.xlu1 %v5932_v46, %s5108_s26 }
 0x295   : > { %1886 = vrot.lane.b32.xlu0 %v5911_v31, %s5107_s25  ;;  %1979 = vrot.lane.b32.xlu1 %v5929_v35, %s5109_s27 }
 0x299   : > { %1917 = vrot.lane.b32.xlu0 %v5949_v15, %s5111_s29  ;;  %1915 = vrot.lane.b32.xlu1 %v5945_v58, %s5111_s29 }
 0x29d   : > { %2091 = vrot.lane.b32.xlu0 %v5949_v15, %s5113_s6  ;;  %1888 = vrot.lane.b32.xlu1 %v1516_v29, %s5107_s25 }
 0x2a1   : > { %2058 = vrot.lane.b32.xlu0 %v1605_v38, %s5112_s30  ;;  %2031 = vrot.lane.b32.xlu1 %v5911_v31, %s5111_s29 }
 0x2a5   : > { %1657 = vrot.lane.b32.xlu0 %v5988_v11, %s5108_s26  ;;  %1892 = vrot.lane.b32.xlu1 %v5929_v35, %s5107_s25 }
 0x2a9   : > { %2033 = vrot.lane.b32.xlu1 %v1516_v29, %s5111_s29  ;;  %1830 = vrot.lane.b32.xlu0 %v5998_v9, %s5106_s24 }
 0x2ad   : > { %1921 = vrot.lane.b32.xlu1 %v5964_v60, %s5111_s29  ;;  %1661 = vrot.lane.b32.xlu0 %v6008_v19, %s5108_s26 }
 0x2b1   : > { %2037 = vrot.lane.b32.xlu1 %v5929_v35, %s5111_s29  ;;  %1857 = vrot.lane.b32.xlu0 %v6017_v33, %s5109_s27 }
 0x2b5   : > { %2089 = vrot.lane.b32.xlu1 %v5945_v58, %s5113_s6  ;;  %1770 = vrot.lane.b32.xlu0 %v6025_v13, %s5109_s27  ;;  %v6306_v58 = vld.sshfl [vmem:[#allocation2 + $0x1c] sm:$0x11 pattern:$0x75316420] }
 0x2b9   : > { %2116 = vrot.lane.b32.xlu1 %v1605_v38, %s5113_s6  ;;  %1944 = vrot.lane.b32.xlu0 %v6032_v59, %s5108_s26 }
 0x2bd   : > { %2095 = vrot.lane.b32.xlu1 %v5964_v60, %s5113_s6  ;;  %1977 = vrot.lane.b32.xlu0 %v1518_v57, %s5109_s27 }
 0x2c1   : > { %1655 = vrot.lane.b32.xlu1 %v6017_v33, %s5108_s26  ;;  %2002 = vrot.lane.b32.xlu0 %v6032_v59, %s5109_s27 }
 0x2c5   : > { %1552 = vrot.lane.b32.xlu0 %v6051_v26, %s5106_s24  ;;  %1828 = vrot.lane.b32.xlu1 %v6032_v59, %s5106_s24 }
 0x2c9   : > { %1548 = vrot.lane.b32.xlu1 %v1518_v57, %s5106_s24  ;;  %2008 = vrot.lane.b32.xlu0 %v6062_v6, %s5109_s27 }
 0x2cd   : > { %1859 = vrot.lane.b32.xlu1 %v5988_v11, %s5109_s27  ;;  %1776 = vrot.lane.b32.xlu0 %v6069_v12, %s5109_s27 }
 0x2d1   : > { %1983 = vrot.lane.b32.xlu0 %v1517_v47, %s5109_s27  ;;  %1834 = vrot.lane.b32.xlu1 %v6062_v6, %s5106_s24 }
 0x2d5   : > { %1890 = vrot.lane.b32.xlu0 %v1518_v57, %s5107_s25  ;;  %1863 = vrot.lane.b32.xlu1 %v6008_v19, %s5109_s27 }
 0x2d9   : > { %1894 = vrot.lane.b32.xlu0 %v6051_v26, %s5107_s25  ;;  %1946 = vrot.lane.b32.xlu1 %v5998_v9, %s5108_s26 }
 0x2dd   : > { %2035 = vrot.lane.b32.xlu0 %v1518_v57, %s5111_s29  ;;  %1950 = vrot.lane.b32.xlu1 %v6062_v6, %s5108_s26  ;;  %v1413_v57 = vcombine.high %v6054_v16, %v6054_v16 }
 0x2df   : > { %v6092_v24 = vpop.permute.xlu0 %1971  ;;  %v6094_v18 = vpop.permute.xlu1 %1542 }
 0x2e1   : > { %1923 = vrot.lane.b32.xlu0 %v6097_v25, %s5111_s29  ;;  %2004 = vrot.lane.b32.xlu1 %v5998_v9, %s5109_s27 }
 0x2e3   : > { %v6103_v52 = vpop.permute.xlu0 %1913  ;;  %v6105_v27 = vpop.permute.xlu1 %1764 }
 0x2e5   : > { %2039 = vrot.lane.b32.xlu0 %v6051_v26, %s5111_s29  ;;  %1554 = vrot.lane.b32.xlu1 %v1517_v47, %s5106_s24 }
 0x2e7   : > { %v6110_v14 = vpop.permute.xlu0 %2029  ;;  %v6112_v29 = vpop.permute.xlu1 %1884 }
 0x2e9   : > { %2062 = vrot.lane.b32.xlu0 %v5988_v11, %s5112_s30  ;;  %1774 = vrot.lane.b32.xlu1 %v6097_v25, %s5109_s27 }
 0x2eb   : > { %v6118_v8 = vpop.permute.xlu0 %1546  ;;  %v6120_v2 = vpop.permute.xlu1 %2087 }
 0x2ec   : > { %8714 = vst [vmem:[#allocation23_spill] sm:$0xff] %v6118_v8 }
 0x2ed   : > { %2120 = vrot.lane.b32.xlu0 %v5988_v11, %s5113_s6  ;;  %1981 = vrot.lane.b32.xlu1 %v6051_v26, %s5109_s27  ;;  %v6189_v11 = vcombine.high %v6062_v6, %v6062_v6 }
 0x2ef   : > { %v6126_v10 = vpop.permute.xlu0 %1653  ;;  %v6128_v22 = vpop.permute.xlu1 %1544  ;;  %8720 = vst [vmem:[#allocation29_spill] sm:$0xff] %v6189_v11 }
 0x2f1   : > { %2093 = vrot.lane.b32.xlu0 %v6025_v13, %s5113_s6  ;;  %1919 = vrot.lane.b32.xlu1 %v6025_v13, %s5111_s29 }
 0x2f3   : > { %v6134_v30 = vpop.permute.xlu0 %1550  ;;  %v6136_v31 = vpop.permute.xlu1 %1826 }
 0x2f4   : > { %8715 = vst [vmem:[#allocation24_spill] sm:$0xff] %v6134_v30 }
 0x2f5   : > { %2097 = vrot.lane.b32.xlu0 %v6097_v25, %s5113_s6  ;;  %1896 = vrot.lane.b32.xlu1 %v1517_v47, %s5107_s25 }
 0x2f7   : > { %v6141_v38 = vpop.permute.xlu0 %1766  ;;  %v6143_v48 = vpop.permute.xlu1 %1768 }
 0x2f9   : > { %1832 = vrot.lane.b32.xlu0 %v6147_v17, %s5106_s24  ;;  %1925 = vrot.lane.b32.xlu1 %v6069_v12, %s5111_s29 }
 0x2fb   : > { %v1856_v3 = vpop.permute.xlu0 %1855  ;;  %v6153_v40 = vpop.permute.xlu1 %1975 }
 0x2fd   : > { %1861 = vrot.lane.b32.xlu0 %v6157_v42, %s5109_s27  ;;  %2041 = vrot.lane.b32.xlu1 %v1517_v47, %s5111_s29  ;;  %v6222_v47 = vrot.slane %v1413_v57, %v5165_v5 }
 0x2ff   : > { %v6162_v55 = vpop.permute.xlu0 %1973  ;;  %v6164_v35 = vpop.permute.xlu1 %1772  ;;  %8726 = vst [vmem:[#allocation35_spill] sm:$0xff] %v6222_v47 }
 0x300   : > { %v6255_v53 = vsel %vm8733_vm1, %v6092_v24, %v6162_v55  ;;  %vm8757_vm1 = vcmask 1031168  }
 0x301   : > { %1948 = vrot.lane.b32.xlu0 %v6147_v17, %s5108_s26  ;;  %2060 = vrot.lane.b32.xlu1 %v6017_v33, %s5112_s30  ;;  %v8742_v25 = vshll.u32 %v6255_v53, 16 }
 0x303   : > { %v6172_v61 = vpop.permute.xlu0 %2000  ;;  %v6174_v41 = vpop.permute.xlu1 %1942  ;;  %v2438_v15 = vrot.slane %v8742_v25, 7  ;;  %v6320_v25 = vrot.slane %v6306_v58, %v5165_v5 }
 0x305   : > { %1663 = vrot.lane.b32.xlu0 %v6177_v37, %s5108_s26  ;;  %2118 = vrot.lane.b32.xlu1 %v6017_v33, %s5113_s6 }
 0x307   : > { %v6183_v4 = vpop.permute.xlu0 %1886  ;;  %v6185_v45 = vpop.permute.xlu1 %1979 }
 0x308   : > { %8719 = vst [vmem:[#allocation28_spill] sm:$0xff] %v6185_v45  ;;  %v1904_v6 = vsel %vm8757_vm1, %v6112_v29, %v6183_v4  ;;  %v2525_v29 = vrot.slane %v6255_v53, 6 }
 0x309   : > { %2066 = vrot.lane.b32.xlu1 %v6008_v19, %s5112_s30  ;;  %1838 = vrot.lane.b32.xlu0 %v6189_v11, %s5106_s24 }
 0x30b   : > { %v6195_v1 = vpop.permute.xlu0 %1917  ;;  %v6197_v7 = vpop.permute.xlu1 %1915 }
 0x30c   : > { %8721 = vst [vmem:[#allocation30_spill] sm:$0xff] %v6195_v1  ;;  %v6263_v36 = vsel %vm8734_vm7, %v6103_v52, %v6197_v7  ;;  %v6282_v52 = vsel %vm8737_vm8, %v6105_v27, %v6141_v38  ;;  %v6301_v27 = vrot.slane %v5025_v63, %v5165_v5  ;;  %vm8760_vm7 = vmmov %vm8739_vm0  ;;  %vm8764_vm8 = vcmask 1042432  }
 0x30d   : > { %1659 = vrot.lane.b32.xlu1 %v6157_v42, %s5108_s26  ;;  %1867 = vrot.lane.b32.xlu0 %v6201_v49, %s5109_s27  ;;  %v2345_v44 = vrot.slane %v6263_v36, 7  ;;  %vm8767_vm0 = vmmov %vm8743_vm14 }
 0x30f   : > { %v6207_v33 = vpop.permute.xlu0 %2091  ;;  %v6209_v51 = vpop.permute.xlu1 %1888 }
 0x310   : > { %8723 = vst [vmem:[#allocation32_spill] sm:$0xff] %v6207_v33  ;;  %8724 = vst [vmem:[#allocation33_spill] sm:$0xff] %v6209_v51 }
 0x311   : > { %1665 = vrot.lane.b32.xlu1 %v6201_v49, %s5108_s26  ;;  %1954 = vrot.lane.b32.xlu0 %v6189_v11, %s5108_s26 }
 0x313   : > { %v6217_v28 = vpop.permute.xlu0 %2058  ;;  %v6219_v39 = vpop.permute.xlu1 %2031 }
 0x314   : > { %8725 = vst [vmem:[#allocation34_spill] sm:$0xff] %v6217_v28 }
 0x315   : > { %2012 = vrot.lane.b32.xlu0 %v6189_v11, %s5109_s27  ;;  %1836 = vrot.lane.b32.xlu1 %v6222_v47, %s5106_s24 }
 0x317   : > { %v6228_v16 = vpop.permute.xlu0 %1657  ;;  %v6230_v32 = vpop.permute.xlu1 %1892 }
 0x318   : > { %8727 = vst [vmem:[#allocation36_spill] sm:$0xff] %v6228_v16  ;;  %8728 = vst [vmem:[#allocation37_spill] sm:$0xff] %v6230_v32 }
 0x319   : > { %1898 = vrot.lane.b32.xlu0 %v1519_v34, %s5107_s25  ;;  %2006 = vrot.lane.b32.xlu1 %v6147_v17, %s5109_s27  ;;  %v6366_v17 = vcombine.high %v6222_v47, %v6222_v47 }
 0x31b   : > { %v6237_v57 = vpop.permute.xlu0 %1830  ;;  %v6239_v0 = vpop.permute.xlu1 %2033  ;;  %8752 = vst [vmem:[#allocation48_spill] sm:$0xff] %v6366_v17 }
 0x31c   : > { %8729 = vst [vmem:[#allocation38_spill] sm:$0xff] %v6237_v57 }
 0x31d   : > { %1927 = vrot.lane.b32.xlu0 %v6243_v54, %s5111_s29  ;;  %1556 = vrot.lane.b32.xlu1 %v1519_v34, %s5106_s24 }
 0x31f   : > { %v6248_v20 = vpop.permute.xlu0 %1661  ;;  %v6250_v26 = vpop.permute.xlu1 %1921 }
 0x320   : > { %8731 = vst [vmem:[#allocation40_spill] sm:$0xff] %v6248_v20  ;;  %8732 = vst [vmem:[#allocation41_spill] sm:$0xff] %v6250_v26  ;;  %v6362_v26 = vcombine.high %v6177_v37, %v6177_v37 }
 0x321   : > { %2043 = vrot.lane.b32.xlu0 %v1519_v34, %s5111_s29  ;;  %1865 = vrot.lane.b32.xlu1 %v6177_v37, %s5109_s27 }
 0x322   : > { %8751 = vst [vmem:[#allocation47_spill] sm:$0xff] %v6362_v26 }
 0x323   : > { %v6265_v62 = vpop.permute.xlu0 %1857  ;;  %v6267_v23 = vpop.permute.xlu1 %2037 }
 0x324   : > { %8735 = vst [vmem:[#allocation42_spill] sm:$0xff] %v6267_v23  ;;  %v6272_v24 = vsel %vm8736_vm5, %v1856_v3, %v6265_v62  ;;  %vm8763_vm5 = vsmask.f32 2304 }
 0x325   : > { %v8557_v50 = vshll.u32 %v6272_v24, 16  ;;  %2064 = vrot.lane.b32.xlu0 %v6157_v42, %s5112_s30  ;;  %1778 = vrot.lane.b32.xlu1 %v6243_v54, %s5109_s27  ;;  %v6353_v54 = vsel %vm8750_vm3, %v6141_v38, %v6143_v48  ;;  %v2336_v42 = vrot.slane %v6272_v24, 7  ;;  %vm6417_vm12 = vmand %vm8764_vm8, %vm8763_vm5  ;;  %vm8783_vm8 = vsmask.f32 3328 }
 0x326   : > { %vm8771_vm3 = vmmov %vm8760_vm7 }
 0x327   : > { %v2921_v43 = vsel %vm5840_vm13, %v6282_v52, %v8557_v50  ;;  %v6296_v11 = vpop.permute.xlu0 %1770  ;;  %v6298_v60 = vpop.permute.xlu1 %2089  ;;  %vm8782_vm5 = vmmov %vm8771_vm3 }
 0x328   : > { %v3040_v13 = vsel %vm8743_vm14, %v2921_v43, %v2345_v44  ;;  %v6322_v43 = vld.sshfl [vmem:[#allocation2 + $0x12] sm:$0x11 pattern:$0x75316420]  ;;  %vm8768_vm14 = vmmov %vm8753_vm10 }
 0x329   : > { %1780 = vrot.lane.b32.xlu0 %v6301_v27, %s5109_s27  ;;  %1952 = vrot.lane.b32.xlu1 %v6222_v47, %s5108_s26  ;;  %v3103_v50 = vsel %vm6287_vm6, %v3040_v13, %v2438_v15  ;;  %v6333_v15 = vrot.slane %v6322_v43, %v5165_v5 }
 0x32b   : > { %v6314_v56 = vpop.permute.xlu0 %1944  ;;  %v6316_v20 = vpop.permute.xlu1 %2116  ;;  %8746 = vst [vmem:[#allocation45_spill] sm:$0xff] %v6333_v15 }
 0x32c   : > { %8744 = vst [vmem:[#allocation43_spill] sm:$0xff] %v6316_v20  ;;  %v6338_v13 = vsel %vm8747_vm15, %v6174_v41, %v6314_v56  ;;  %v1749_v20 = vcombine.high %v5025_v63, %v5025_v63  ;;  %vm8770_vm15 = vmmov %vm8753_vm10 }
 0x32d   : > { %1558 = vrot.lane.b32.xlu0 %v6320_v25, %s5106_s24  ;;  %1985 = vrot.lane.b32.xlu1 %v1519_v34, %s5109_s27  ;;  %v2229_v34 = vshll.u32 %v6282_v52, 16  ;;  %v2400_v63 = vshll.u32 %v6338_v13, 16 }
 0x32e   : > { %v6384_v49 = vrot.slane %v1749_v20, %v5165_v5  ;;  %v2232_v20 = vshll.u32 %v6353_v54, 16 }
 0x32f   : > { %v6327_v44 = vpop.permute.xlu0 %1977  ;;  %v6329_v28 = vpop.permute.xlu1 %2095 }
 0x330   : > { %8745 = vst [vmem:[#allocation44_spill] sm:$0xff] %v6329_v28  ;;  %v6348_v28 = vsel %vm8748_vm11, %v6110_v14, %v6219_v39  ;;  %v6371_v14 = vsel %vm8753_vm10, %v6094_v18, %v6128_v22  ;;  %vm8773_vm10 = vmmov %vm8757_vm1 }
 0x331   : > { %1669 = vrot.lane.b32.xlu0 %v6333_v15, %s5108_s26  ;;  %2010 = vrot.lane.b32.xlu1 %v6222_v47, %s5109_s27  ;;  %8749 = vst [vmem:[#allocation46_spill] sm:$0xff] %v6348_v28  ;;  %v6389_v47 = vsel %vm8756_vm9, %v6162_v55, %v6153_v40  ;;  %v2625_v18 = vshll.u32 %v6348_v28, 16  ;;  %vm8778_vm9 = vcmask 769024   ;;  %vm8780_vm1 = vmmov %vm8767_vm0 }
 0x333   : > { %v6356_v41 = vpop.permute.xlu0 %2002  ;;  %v6358_v19 = vpop.permute.xlu1 %1655 }
 0x334   : > { %v6376_v38 = vsel %vm8754_vm2, %v6172_v61, %v6356_v41  ;;  %v6381_v9 = vsel %vm8755_vm4, %v6126_v10, %v6358_v19  ;;  %v2390_v10 = vrot.slane %v2229_v34, 7  ;;  %v2402_v61 = vrot.slane %v2400_v63, 7  ;;  %vm8775_vm2 = vmmov %vm8768_vm14 }
 0x335   : > { %v2534_v32 = vrot.slane %v6376_v38, 6  ;;  %1871 = vrot.lane.b32.xlu0 %v6333_v15, %s5109_s27  ;;  %1667 = vrot.lane.b32.xlu1 %v6362_v26, %s5108_s26  ;;  %v2912_v55 = vsel %vm5840_vm13, %v6381_v9, %v2229_v34  ;;  %v8758_v23 = vshll.u32 %v6376_v38, 16  ;;  %vm8776_vm4 = vmmov %vm8767_vm0 }
 0x336   : > { %v3004_v63 = vsel %vm8767_vm0, %v2912_v55, %v2336_v42  ;;  %v2327_v42 = vrot.slane %v1904_v6, 7  ;;  %v1905_v55 = vsel %vm8773_vm10, %v6183_v4, %v6209_v51  ;;  %v6471_v4 = vsel %vm8775_vm2, %v6128_v22, %v6118_v8  ;;  %vm8792_vm2 = vmmov %vm8780_vm1 }
 0x337   : > { %v6408_v15 = vrot.slane %v8758_v23, 6  ;;  %v6411_v12 = vsel %vm8760_vm7, %v3103_v50, %v2534_v32  ;;  %v6413_v37 = vpop.permute.xlu0 %1552  ;;  %v1829_v30 = vpop.permute.xlu1 %1828  ;;  %v6428_v50 = vrot.slane %v2625_v18, 6  ;;  %v3094_v32 = vsel %vm6287_vm6, %v3004_v63, %v2402_v61  ;;  %v6445_v61 = vld.sshfl [vmem:[#allocation2 + $0x26] sm:$0x11 pattern:$0x75316420] }
 0x338   : > { %8761 = vst [vmem:[#allocation50_spill] sm:$0xff] %v6411_v12  ;;  %8762 = vst [vmem:[#allocation51_spill] sm:$0xff] %v6413_v37  ;;  %v6426_v23 = vsel %vm8768_vm14, %v6136_v31, %v1829_v30  ;;  %v6434_v37 = vsel %vm8770_vm15, %v1829_v30, %v6237_v57  ;;  %v1934_v31 = vsel %vm8748_vm11, %v6197_v7, %v6195_v1  ;;  %vm8781_vm7 = vcmask 760832  }
 0x339   : > { %8759 = vst [vmem:[#allocation49_spill] sm:$0xff] %v6408_v15  ;;  %8769 = vst [vmem:[#allocation52_spill] sm:$0xff] %v6428_v50  ;;  %v2202_v28 = vshll.u32 %v6426_v23, 16  ;;  %1987 = vrot.lane.b32.xlu0 %v6320_v25, %s5109_s27  ;;  %1840 = vrot.lane.b32.xlu1 %v6366_v17, %s5106_s24  ;;  %v2205_v18 = vshll.u32 %v6434_v37, 16  ;;  %v6448_v30 = vsel %vm8771_vm3, %v3094_v32, %v2525_v29  ;;  %v2557_v57 = vshll.u32 %v1934_v31, 16 }
 0x33a   : > { %8772 = vst [vmem:[#allocation53_spill] sm:$0xff] %v6448_v30  ;;  %v6486_v22 = vrot.slane %v6445_v61, %v5165_v5  ;;  %v1674_v30 = vsel %vm8778_vm9, %v6358_v19, %v6228_v16  ;;  %vm8784_vm0 = vcmask 1043456   ;;  %vm8789_vm15 = vmmov %vm8780_vm1  ;;  %v2706_v16 = vrot.slane %v6389_v47, 5 }
 0x33b   : > { %v2903_v63 = vsel %vm5840_vm13, %v6371_v14, %v2202_v28  ;;  %v6456_v6 = vpop.permute.xlu0 %2008  ;;  %v6458_v34 = vpop.permute.xlu1 %1548  ;;  %v2553_v28 = vshll.u32 %v6263_v36, 16  ;;  %v2904_v7 = vsel %vm5840_vm13, %v6471_v4, %v2205_v18  ;;  %v2175_v36 = vshll.u32 %v6371_v14, 16  ;;  %vm6514_vm14 = vmand %vm8784_vm0, %vm8783_vm8 }
 0x33c   : > { %8774 = vst [vmem:[#allocation54_spill] sm:$0xff] %v6456_v6  ;;  %v2968_v32 = vsel %vm8776_vm4, %v2903_v63, %v2327_v42  ;;  %v1638_v6 = vcombine.high %v6322_v43, %v6322_v43  ;;  %v2391_v42 = vrot.slane %v2232_v20, 7  ;;  %v2328_v63 = vrot.slane %v1905_v55, 7  ;;  %vm8790_vm11 = vmmov %vm8780_vm1 }
 0x33d   : > { %v3085_v29 = vsel %vm6287_vm6, %v2968_v32, %v2390_v10  ;;  %1931 = vrot.lane.b32.xlu0 %v6384_v49, %s5111_s29  ;;  %v2516_v43 = vrot.slane %v6272_v24, 6  ;;  %1869 = vrot.lane.b32.xlu1 %v6362_v26, %s5109_s27  ;;  %v8777_v18 = vshll.u32 %v6389_v47, 16  ;;  %v2705_v10 = vrot.slane %v6255_v53, 5  ;;  %vm8797_vm9 = vmmov %vm8780_vm1 }
 0x33e   : > { %v2346_v32 = vrot.slane %v1934_v31, 7  ;;  %v2555_v55 = vrot.slane %v2553_v28, 6  ;;  %v2972_v50 = vsel %vm8780_vm1, %v2904_v7, %v2328_v63  ;;  %v2559_v12 = vrot.slane %v2557_v57, 6  ;;  %vm8798_vm1 = vmmov %vm8771_vm3 }
 0x33f   : > { %v6494_v15 = vrot.slane %v8777_v18, 7  ;;  %v6500_v1 = vpop.permute.xlu0 %1776  ;;  %v6502_v14 = vpop.permute.xlu1 %1859  ;;  %v3150_v18 = vsel %vm8782_vm5, %v3085_v29, %v2516_v43  ;;  %v2355_v31 = vshll.u32 %v6381_v9, 16  ;;  %v2913_v7 = vsel %vm5840_vm13, %v1674_v30, %v2232_v20  ;;  %vm8802_vm5 = vmmov %vm8798_vm1 }
 0x340   : > { %8779 = vst [vmem:[#allocation55_spill] sm:$0xff] %v6500_v1  ;;  %v1876_v26 = vsel %vm8781_vm7, %v6265_v62, %v6502_v14  ;;  %v2318_v62 = vrot.slane %v6426_v23, 7  ;;  %v3267_v9 = vsel %vm6417_vm12, %v3150_v18, %v2555_v55  ;;  %v8787_v57 = vshll.u32 %v6376_v38, 16  ;;  %vm8803_vm8 = vmmov %vm8798_vm1 }
 0x341   : > { %v2259_v51 = vshll.u32 %v1876_v26, 16  ;;  %v2337_v8 = vrot.slane %v1876_v26, 7  ;;  %1842 = vrot.lane.b32.xlu0 %v6486_v22, %s5106_s24  ;;  %v2517_v29 = vrot.slane %v1876_v26, 6  ;;  %1956 = vrot.lane.b32.xlu1 %v6366_v17, %s5108_s26  ;;  %v3086_v63 = vsel %vm6287_vm6, %v2972_v50, %v2391_v42 }
 0x342   : > { %v6527_v28 = vrot.slane %v8787_v57, 5  ;;  %vm8791_vm10 = vcmask 1042432   ;;  %v2894_v50 = vsel %vm5840_vm13, %v5932_v46, %v2175_v36  ;;  %v2357_v36 = vrot.slane %v2355_v31, 7 }
 0x343   : > { %v2922_v20 = vsel %vm5840_vm13, %v6353_v54, %v2259_v51  ;;  %v6534_v43 = vpop.permute.xlu0 %1983  ;;  %v6536_v26 = vpop.permute.xlu1 %1834  ;;  %v3008_v23 = vsel %vm8789_vm15, %v2913_v7, %v2337_v8  ;;  %v3154_v18 = vsel %vm8771_vm3, %v3086_v63, %v2517_v29  ;;  %v6545_v57 = vsel %vm8791_vm10, %v3267_v9, %v2705_v10  ;;  %vm8793_vm4 = vmmov %vm8791_vm10 }
 0x344   : > { %8788 = vst [vmem:[#allocation56_spill] sm:$0xff] %v6534_v43  ;;  %v6541_v55 = vsel %vm8790_vm11, %v2922_v20, %v2346_v32  ;;  %v3268_v42 = vsel %vm6417_vm12, %v3154_v18, %v2559_v12  ;;  %v2932_v32 = vsel %vm8792_vm2, %v2894_v50, %v2318_v62  ;;  %v2178_v12 = vshll.u32 %v6471_v4, 16  ;;  %vm8804_vm0 = vmmov %vm8793_vm4 }
 0x345   : > { %1958 = vrot.lane.b32.xlu0 %v6486_v22, %s5108_s26  ;;  %v3104_v8 = vsel %vm6287_vm6, %v6541_v55, %v6494_v15  ;;  %2014 = vrot.lane.b32.xlu1 %v6366_v17, %s5109_s27  ;;  %v6566_v46 = vsel %vm8793_vm4, %v3268_v42, %v2706_v16  ;;  %v6574_v9 = vrot.slane %v1638_v6, %v5165_v5  ;;  %v2319_v63 = vrot.slane %v6434_v37, 7  ;;  %vm8808_vm11 = vmmov %vm8804_vm0  ;;  %v8832_v55 = vld [vmem:[#allocation51_spill] sm:$0xff] }
 0x346   : > { %8794 = vst [vmem:[#allocation57_spill] sm:$0xff] %v6566_v46  ;;  %v2359_v20 = vshll.u32 %v1674_v30, 16  ;;  %v3076_v62 = vsel %vm6287_vm6, %v2932_v32, %v2357_v36  ;;  %v2507_v16 = vrot.slane %v6282_v52, 6  ;;  %v2895_v4 = vsel %vm5840_vm13, %v6032_v59, %v2178_v12  ;;  %vm8812_vm10 = vmmov %vm8798_vm1 }
 0x347   : > { %v6569_v7 = vpop.permute.xlu0 %1890  ;;  %v6571_v29 = vpop.permute.xlu1 %1863  ;;  %8796 = vst [vmem:[#allocation59_spill] sm:$0xff] %v6574_v9  ;;  %v2936_v37 = vsel %vm8797_vm9, %v2895_v4, %v2319_v63  ;;  %vm8799_vm7 = vcmask 769024   ;;  %v8800_v52 = vshll.u32 %v6272_v24, 16  ;;  %v1527_v59 = vcombine.high %v6306_v58, %v6306_v58 }
 0x348   : > { %8795 = vst [vmem:[#allocation58_spill] sm:$0xff] %v6571_v29  ;;  %v3114_v30 = vsel %vm8798_vm1, %v3076_v62, %v2507_v16  ;;  %v2361_v42 = vrot.slane %v2359_v20, 7  ;;  %v2544_v36 = vrot.slane %v2259_v51, 6  ;;  %v2526_v62 = vrot.slane %v6389_v47, 6 }
 0x349   : > { %1671 = vrot.lane.b32.xlu0 %v6574_v9, %s5108_s26  ;;  %1929 = vrot.lane.b32.xlu1 %v6301_v27, %s5111_s29  ;;  %v2543_v50 = vrot.slane %v8800_v52, 6  ;;  %v2696_v16 = vrot.slane %v6338_v13, 5  ;;  %vm8807_vm15 = vcmask 1043456   ;;  %vm8809_vm3 = vcmask 760832  }
 0x34a   : > { %v3077_v12 = vsel %vm6287_vm6, %v2936_v37, %v2361_v42  ;;  %v5119_v42 = vmov 65535   ;;  %vm8814_vm2 = vcmask 1044480   ;;  %vm8816_vm4 = vmmov %vm8807_vm15  ;;  %v1811_v15 = vcombine.high %v6445_v61, %v6445_v61 }
 0x34b   : > { %v6587_v6 = vpop.permute.xlu0 %1894  ;;  %v6589_v31 = vpop.permute.xlu1 %1946  ;;  %v3258_v20 = vsel %vm6417_vm12, %v3114_v30, %v2543_v50  ;;  %v8805_v30 = vshll.u32 %v6255_v53, 16  ;;  %v1541_v50 = vrot.slane %v1527_v59, %v5165_v5  ;;  %v8810_v53 = vshll.u32 %v6389_v47, 16  ;;  %vm8817_vm9 = vmmov %vm8816_vm4 }
 0x34c   : > { %v1963_v18 = vsel %vm8799_vm7, %v6314_v56, %v6589_v31  ;;  %v2858_v59 = vrot.slane %v6376_v38, 4  ;;  %vm8818_vm1 = vcmask 752640   ;;  %vm8821_vm7 = vmmov %vm8809_vm3 }
 0x34d   : > { %v2404_v32 = vshll.u32 %v1963_v18, 16  ;;  %2016 = vrot.lane.b32.xlu0 %v6486_v22, %s5109_s27  ;;  %1782 = vrot.lane.b32.xlu1 %v6384_v49, %s5109_s27  ;;  %v2508_v22 = vrot.slane %v6353_v54, 6  ;;  %v2697_v4 = vrot.slane %v1963_v18, 5  ;;  %v3296_v54 = vsel %vm8804_vm0, %v3258_v20, %v2696_v16 }
 0x34e   : > { %v2732_v13 = vrot.slane %v8805_v30, 5  ;;  %v2733_v20 = vrot.slane %v8810_v53, 5  ;;  %v6687_v61 = vsel %vm8818_vm1, %v6219_v39, %v6239_v0  ;;  %v1825_v39 = vrot.slane %v1811_v15, %v5165_v5  ;;  %v6709_v53 = vld [vmem:[%s8509_s2] sm:$0x1] }
 0x34f   : > { %v2406_v63 = vrot.slane %v2404_v32, 7  ;;  %v6606_v56 = vpop.permute.xlu0 %2035  ;;  %v6608_v24 = vpop.permute.xlu1 %1950  ;;  %v3118_v51 = vsel %vm8802_vm5, %v3077_v12, %v2508_v22  ;;  %v3589_v32 = vsel %vm8807_vm15, 4294967295, %v5119_v42  ;;  %8819 = vst [vmem:[#allocation65_spill] sm:$0xff] %v6687_v61  ;;  %vm8822_vm5 = vmmov %vm8809_vm3  ;;  %vm8824_vm0 = vcmask 482304  }
 0x350   : > { %8801 = vst [vmem:[#allocation60_spill] sm:$0xff] %v6608_v24  ;;  %v3259_v18 = vsel %vm6417_vm12, %v3118_v51, %v2544_v36  ;;  %8823 = vst [vmem:[#allocation67_spill] sm:$0xff] %v6709_v53 }
 0x351   : > { %v3095_v58 = vsel %vm6287_vm6, %v3008_v23, %v2406_v63  ;;  %1873 = vrot.lane.b32.xlu0 %v6574_v9, %s5109_s27  ;;  %1900 = vrot.lane.b32.xlu1 %v6320_v25, %s5107_s25  ;;  %v3300_v12 = vsel %vm8808_vm11, %v3259_v18, %v2697_v4  ;;  %vm8825_vm15 = vmmov %vm8824_vm0  ;;  %v8863_v9 = vld [vmem:[#allocation52_spill] sm:$0xff] }
 0x352   : > { %v6621_v37 = vsel %vm8803_vm8, %v3095_v58, %v2526_v62  ;;  %v3440_v62 = vsel %vm6514_vm14, %v3296_v54, %v2732_v13  ;;  %v3441_v38 = vsel %vm6514_vm14, %v3300_v12, %v2733_v20  ;;  %v6697_v12 = vsel %vm8821_vm7, %v6143_v48, %v6296_v11  ;;  %vm8826_vm11 = vmmov %vm8809_vm3 }
 0x353   : > { %v6630_v23 = vpop.permute.xlu0 %1923  ;;  %v6632_v52 = vpop.permute.xlu1 %2004  ;;  %v3478_v30 = vsel %vm8817_vm9, %v3440_v62, %v2858_v59  ;;  %vm3585_vm8 = vcmask 72704   ;;  %v2629_v48 = vshll.u32 %v6687_v61, 16  ;;  %v2107_v20 = vsel %vm8824_vm0, %v6120_v2, %v6298_v60  ;;  %v8829_v2 = vld [vmem:[#allocation46_spill] sm:$0xff]  ;;  %vm8844_vm9 = vmmov %vm8818_vm1 }
 0x354   : > { %8806 = vst [vmem:[#allocation61_spill] sm:$0xff] %v6632_v52  ;;  %v2021_v63 = vsel %vm8809_vm3, %v6356_v41, %v6632_v52  ;;  %vm8851_vm7 = vcmask 1031168   ;;  %vm8856_vm0 = vcmask 1043456  }
 0x355   : > { %v2535_v22 = vrot.slane %v2021_v63, 6  ;;  %v2593_v36 = vshll.u32 %v2021_v63, 16  ;;  %1989 = vrot.lane.b32.xlu0 %v1541_v50, %s5109_s27  ;;  %v2859_v16 = vrot.slane %v2021_v63, 4  ;;  %2045 = vrot.lane.b32.xlu1 %v6320_v25, %s5111_s29  ;;  %v6667_v25 = vsel %vm8814_vm2, %v3589_v32, 0 }
 0x356   : > { %8815 = vst [vmem:[#allocation64_spill] sm:$0xff] %v6667_v25  ;;  %v3591_v42 = vand.u32 %v6667_v25, %v3478_v30  ;;  %v6702_v63 = vsel %vm8822_vm5, %v6296_v11, %v6164_v35  ;;  %v6718_v11 = vsel %vm8825_vm15, %v6298_v60, %v6207_v33  ;;  %v8830_v30 = vld [vmem:[#allocation28_spill] sm:$0xff]  ;;  %vm8853_vm5 = vmmov %vm8851_vm7  ;;  %vm8865_vm15 = vcmask 1042432  }
 0x357   : > { %v6648_v4 = vrot.slane %v2593_v36, 6  ;;  %v6650_v58 = vrot.slane %v2593_v36, 5  ;;  %v6658_v47 = vsel %vm8812_vm10, %v3104_v8, %v2535_v22  ;;  %v6660_v41 = vpop.permute.xlu0 %2039  ;;  %v6662_v51 = vpop.permute.xlu1 %1554  ;;  %v3481_v54 = vsel %vm8816_vm4, %v3441_v38, %v2859_v16  ;;  %v8833_v60 = vld [vmem:[#allocation24_spill] sm:$0xff] }
 0x358   : > { %8813 = vst [vmem:[#allocation63_spill] sm:$0xff] %v6662_v51  ;;  %v3593_v8 = vand.u32 %v6667_v25, %v3481_v54  ;;  %v8602_v22 = vshll.u32 %v6702_v63, 16  ;;  %v6726_v36 = vsel %vm8826_vm11, %v6153_v40, %v6327_v44  ;;  %v2867_v16 = vrot.slane %v8829_v2, 4  ;;  %vm8868_vm11 = vmmov %vm8853_vm5 }
 0x359   : > { %8811 = vst [vmem:[#allocation62_spill] sm:$0xff] %v6650_v58  ;;  %1902 = vrot.lane.b32.xlu0 %v1541_v50, %s5107_s25  ;;  %1560 = vrot.lane.b32.xlu1 %v1541_v50, %s5106_s24  ;;  %8827 = vst [vmem:[#allocation68_spill] sm:$0xff] %v6726_v36  ;;  %v2751_v38 = vshll.u32 %v2107_v20, 16  ;;  %v2755_v54 = vshll.u32 %v6718_v11, 16  ;;  %v6740_v15 = vsel %vm8809_vm3, %v6327_v44, %v8830_v30  ;;  %v8831_v40 = vmov 0   ;;  %v8842_v58 = vld [vmem:[#allocation27_spill] sm:$0xff] }
 0x35a   : > { %3677 = vmatprep.subr.bf16.mxu1 %v3593_v8  ;;  %v6744_v8 = vrot.slane %v2629_v48, 6  ;;  %v2444_v2 = vshll.u32 %v6726_v36, 16  ;;  %vm8834_vm10 = vcmask 1039360   ;;  %v6760_v10 = vrot.slane %v8602_v22, 7  ;;  %v8859_v36 = vld [vmem:[#allocation20_spill] sm:$0xff]  ;;  %vm8869_vm3 = vmmov %vm8853_vm5 }
 0x35b   : > { %v6689_v18 = vpop.permute.xlu0 %2062  ;;  %v6692_v32 = vpop.permute.xlu1 %1774  ;;  %3678 = vmatpush1.bf16.msra.mxu1 %v3591_v42  ;;  %v6751_v13 = vsel %vm8834_vm10, %v8833_v60, %v8832_v55  ;;  %v2723_v42 = vrot.slane %v2107_v20, 5  ;;  %v2448_v46 = vshll.u32 %v6740_v15, 16  ;;  %vm8839_vm2 = vmmov %vm8834_vm10  ;;  %v6777_v48 = vrot.slane %v2755_v54, 5  ;;  %v8846_v20 = vld [vmem:[#allocation42_spill] sm:$0xff] }
 0x35c   : > { %8820 = vst [vmem:[#allocation66_spill] sm:$0xff] %v6689_v18  ;;  %8835 = vst [vmem:[#allocation46_spill] sm:$0xff] %v6751_v13  ;;  %v6794_v54 = vsel %vm8844_vm9, %v6239_v0, %v6606_v56  ;;  %v6825_v33 = vrot.slane %v2444_v2, 5 }
 0x35d   : > { %2047 = vrot.lane.b32.xlu0 %v1541_v50, %s5111_s29  ;;  %1844 = vrot.lane.b32.xlu1 %v1825_v39, %s5106_s24  ;;  %v8603_v50 = vshll.u32 %v6697_v12, 16  ;;  %vm8841_vm4 = vmmov %vm8839_vm2  ;;  %v6805_v52 = vrot.slane %v2448_v46, 7  ;;  %s5065_s24 = smul.u32 36, %s9308_s19 }
 0x35e   : > { %5027 = vmatmul.mubr.msk.bf16.vlgmr.msra.gmra.mxu1 %vm3585_vm8, %v6709_v53  ;;  %v1565_v22 = vsel %vm8841_vm4, %v6458_v34, %v8833_v60  ;;  %v6783_v53 = vrot.slane %v2444_v2, 7  ;;  %8858 = vst [vmem:[#allocation73_spill] sm:$0xff] %v6825_v33  ;;  %vm8875_vm10 = vmmov %vm8818_vm1 }
 0x35f   : > { %v6728_v62 = vpop.permute.xlu0 %2120  ;;  %v6730_v59 = vpop.permute.xlu1 %1981  ;;  %3777 = vmatprep.mubr.bf16.mxu1 %v8831_v40  ;;  %v6756_v44 = vrot.slane %v8603_v50, 7  ;;  %v6775_v50 = vrot.slane %v2751_v38, 5  ;;  %v2187_v40 = vshll.u32 %v6751_v13, 16  ;;  %v2184_v38 = vshll.u32 %v1565_v22, 16  ;;  %vm8878_vm9 = vmmov %vm8818_vm1 }
 0x360   : > { %8828 = vst [vmem:[#allocation69_spill] sm:$0xff] %v6728_v62  ;;  %v6799_v13 = vsel %vm8818_vm1, %v6606_v56, %v8846_v20  ;;  %v8855_v56 = vsel %vm6514_vm14, %v6545_v57, %v6527_v28 }
 0x361   : > { %2018 = vrot.lane.b32.xlu0 %v1825_v39, %s5109_s27  ;;  %1960 = vrot.lane.b32.xlu1 %v1825_v39, %s5108_s26  ;;  %8836 = vst [vmem:[#allocation28_spill] sm:$0xff] %v6756_v44  ;;  %v8838_v39 = vld [vmem:[#allocation23_spill] sm:$0xff]  ;;  %8847 = vst [vmem:[#allocation27_spill] sm:$0xff] %v6799_v13  ;;  %v2637_v2 = vshll.u32 %v6799_v13, 16  ;;  %v8874_v13 = vld [vmem:[#allocation41_spill] sm:$0xff]  ;;  %s8366_s27 = scalar_lea.vmem %s8512_s5, %s5065_s24 }
 0x362   : > { %v6770_v61 = vsel %vm8839_vm2, %v8838_v39, %v6458_v34  ;;  %v8843_v34 = vld [vmem:[#allocation21_spill] sm:$0xff]  ;;  %8845 = vst [vmem:[#allocation23_spill] sm:$0xff] %v6794_v54  ;;  %vm8877_vm2 = vmmov %vm8818_vm1 }
 0x363   : > { %v6763_v5 = vpop.permute.xlu0 %2093  ;;  %v1920_v17 = vpop.permute.xlu1 %1919  ;;  %8840 = vst [vmem:[#allocation24_spill] sm:$0xff] %v6770_v61  ;;  %v2181_v60 = vshll.u32 %v6770_v61, 16  ;;  %v6894_v25 = vrot.slane %v2637_v2, 6 }
 0x364   : > { %8837 = vst [vmem:[#allocation51_spill] sm:$0xff] %v6763_v5  ;;  %v6827_v5 = vrot.slane %v2448_v46, 5 }
 0x365   : > { %2068 = vrot.lane.b32.xlu0 %v8842_v58, %s5112_s30  ;;  %2099 = vrot.lane.b32.xlu1 %v8843_v34, %s5113_s6  ;;  %v8850_v34 = vld [vmem:[#allocation33_spill] sm:$0xff] }
 0x366   : > { %v6810_v61 = vsel %vm8851_vm7, %v8850_v34, %v6569_v7  ;;  %v6832_v34 = vsel %vm5840_vm13, %v8859_v36, %v2187_v40  ;;  %v2633_v40 = vshll.u32 %v6794_v54, 16  ;;  %vm8881_vm7 = vmmov %vm8841_vm4 }
 0x367   : > { %v6801_v39 = vpop.permute.xlu0 %2097  ;;  %v6803_v44 = vpop.permute.xlu1 %1896  ;;  %8852 = vst [vmem:[#allocation33_spill] sm:$0xff] %v6810_v61  ;;  %8860 = vst [vmem:[#allocation20_spill] sm:$0xff] %v6832_v34  ;;  %v6874_v34 = vsel %vm8875_vm10, %v8874_v13, %v6630_v23  ;;  %v6899_v61 = vsel %vm8818_vm1, %v8846_v20, %v6660_v41 }
 0x368   : > { %8848 = vst [vmem:[#allocation42_spill] sm:$0xff] %v6801_v39  ;;  %8849 = vst [vmem:[#allocation70_spill] sm:$0xff] %v6803_v44  ;;  %v6815_v0 = vsel %vm8853_vm5, %v6587_v6, %v6803_v44  ;;  %v6823_v39 = vsel %vm8856_vm0, %v8855_v56, %v2867_v16  ;;  %v8861_v44 = vld [vmem:[#allocation26_spill] sm:$0xff]  ;;  %v8867_v16 = vld [vmem:[#allocation37_spill] sm:$0xff]  ;;  %vm8886_vm0 = vcmask 1040384  }
 0x369   : > { %8854 = vst [vmem:[#allocation71_spill] sm:$0xff] %v6815_v0  ;;  %8857 = vst [vmem:[#allocation72_spill] sm:$0xff] %v6823_v39  ;;  %2122 = vrot.lane.b32.xlu0 %v8861_v44, %s5113_s6  ;;  %v8862_v0 = vld [vmem:[#allocation50_spill] sm:$0xff]  ;;  %v1907_v46 = vsel %vm8868_vm11, %v6569_v7, %v8867_v16  ;;  %v6850_v36 = vsel %vm8869_vm3, %v8867_v16, %v6587_v6  ;;  %v8870_v44 = vld [vmem:[#allocation31_spill] sm:$0xff] }
 0x36a   : > { %v8864_v28 = vsel %vm6417_vm12, %v8862_v0, %v8863_v9  ;;  %2070 = vrot.lane.b32.xlu1 %v8870_v44, %s5112_s30  ;;  %v8871_v9 = vld [vmem:[#allocation17_spill] sm:$0xff]  ;;  %8876 = vst [vmem:[#allocation52_spill] sm:$0xff] %v6874_v34  ;;  %8880 = vst [vmem:[#allocation31_spill] sm:$0xff] %v6899_v61 }
 0x36b   : > { %v6842_v57 = vsel %vm8865_vm15, %v8864_v28, %v2723_v42  ;;  %v6859_v42 = vsel %vm5840_vm13, %v8871_v9, %v2181_v60  ;;  %v8872_v0 = vld [vmem:[#allocation25_spill] sm:$0xff]  ;;  %v1833_v56 = vpop.permute.xlu0 %1832  ;;  %v6867_v28 = vpop.permute.xlu1 %1925  ;;  %v1936_v60 = vsel %vm8877_vm2, %v1920_v17, %v8874_v13  ;;  %v6892_v13 = vrot.slane %v2633_v40, 6  ;;  %vm8884_vm5 = vmmov %vm8818_vm1 }
 0x36c   : > { %8866 = vst [vmem:[#allocation26_spill] sm:$0xff] %v6842_v57  ;;  %v6864_v7 = vsel %vm5840_vm13, %v8872_v0, %v2184_v38  ;;  %8873 = vst [vmem:[#allocation50_spill] sm:$0xff] %v6867_v28  ;;  %v6880_v38 = vsel %vm8841_vm4, %v1833_v56, %v6536_v26  ;;  %v6885_v9 = vsel %vm8878_vm9, %v6630_v23, %v6867_v28  ;;  %v2330_v0 = vrot.slane %v1907_v46, 7  ;;  %v8882_v46 = vld [vmem:[#allocation18_spill] sm:$0xff] }
 0x36d   : > { %v2211_v39 = vshll.u32 %v6880_v38, 16  ;;  %2126 = vrot.lane.b32.xlu0 %v8842_v58, %s5113_s6  ;;  %8879 = vst [vmem:[#allocation37_spill] sm:$0xff] %v6892_v13  ;;  %v6904_v23 = vsel %vm8881_vm7, %v8832_v55, %v6662_v51  ;;  %v8883_v58 = vld [vmem:[#allocation30_spill] sm:$0xff]  ;;  %v2565_v2 = vshll.u32 %v1936_v60, 16  ;;  %v2569_v28 = vshll.u32 %v6874_v34, 16  ;;  %v8889_v51 = vld [vmem:[#allocation39_spill] sm:$0xff]  ;;  %vm8893_vm2 = vmmov %vm8886_vm0 }
 0x36e   : > { %2124 = vrot.lane.b32.xlu1 %v8882_v46, %s5113_s6  ;;  %v6911_v40 = vsel %vm8884_vm5, %v8883_v58, %v1920_v17  ;;  %v3286_v55 = vsel %vm6417_vm12, %v6658_v47, %v6744_v8  ;;  %vm8887_vm15 = vcmask 760832   ;;  %v2641_v58 = vshll.u32 %v6899_v61, 16  ;;  %vm8895_vm9 = vmmov %vm8886_vm0 }
 0x36f   : > { %v2906_v16 = vsel %vm5840_vm13, %v1565_v22, %v2211_v39  ;;  %v1862_v20 = vpop.permute.xlu0 %1861  ;;  %v6915_v54 = vpop.permute.xlu1 %2041  ;;  %v2190_v22 = vshll.u32 %v6904_v23, 16  ;;  %vm8888_vm11 = vmmov %vm8887_vm15  ;;  %vm8894_vm4 = vcmask 1041408   ;;  %v6968_v33 = vrot.slane %v2569_v28, 6 }
 0x370   : > { %8885 = vst [vmem:[#allocation17_spill] sm:$0xff] %v6915_v54  ;;  %v2980_v46 = vsel %vm8886_vm0, %v2906_v16, %v2330_v0  ;;  %v6925_v17 = vsel %vm8887_vm15, %v6502_v14, %v1862_v20  ;;  %v6931_v39 = vsel %vm8888_vm11, %v1862_v20, %v6571_v29  ;;  %vm8890_vm3 = vmmov %vm8888_vm11  ;;  %v2347_v14 = vrot.slane %v6911_v40, 7 }
 0x371   : > { %v8630_v6 = vshll.u32 %v6925_v17, 16  ;;  %2101 = vrot.lane.b32.xlu0 %v8889_v51, %s5113_s6  ;;  %v6939_v47 = vsel %vm8890_vm3, %v6164_v35, %v6692_v32  ;;  %v2519_v16 = vrot.slane %v6931_v39, 6  ;;  %v2348_v0 = vrot.slane %v1936_v60, 7  ;;  %vm8891_vm10 = vmmov %vm8890_vm3 }
 0x372   : > { %2128 = vrot.lane.b32.xlu1 %v8870_v44, %s5113_s6  ;;  %v2567_v20 = vrot.slane %v2565_v2, 6  ;;  %v3088_v35 = vsel %vm6287_vm6, %v2980_v46, %v6760_v10  ;;  %v6957_v8 = vsel %vm8891_vm10, %v6692_v32, %v6500_v1  ;;  %v8892_v44 = vshll.u32 %v6931_v39, 16  ;;  %vm8905_vm15 = vmmov %vm8890_vm3 }
 0x373   : > { %v2923_v61 = vsel %vm5840_vm13, %v6697_v12, %v8630_v6  ;;  %v1949_v34 = vpop.permute.xlu0 %1948  ;;  %v2061_v29 = vpop.permute.xlu1 %2060  ;;  %v3162_v6 = vsel %vm8894_vm4, %v3088_v35, %v2519_v16  ;;  %v6978_v46 = vsel %vm8818_vm1, %v6660_v41, %v6915_v54  ;;  %v8900_v16 = vld [vmem:[#allocation38_spill] sm:$0xff]  ;;  %v8901_v41 = vrot.slane %v6718_v11, 5  ;;  %vm8906_vm11 = vmmov %vm8890_vm3  ;;  %v8914_v54 = vld [vmem:[#allocation45_spill] sm:$0xff] }
 0x374   : > { %v2924_v60 = vsel %vm5840_vm13, %v6702_v63, %v8892_v44  ;;  %v6965_v2 = vsel %vm8893_vm2, %v2923_v61, %v2347_v14  ;;  %v3270_v32 = vsel %vm6417_vm12, %v3162_v6, %v2567_v20  ;;  %8896 = vst [vmem:[#allocation25_spill] sm:$0xff] %v6978_v46  ;;  %v8897_v44 = vld [vmem:[#allocation47_spill] sm:$0xff]  ;;  %v6982_v61 = vrot.slane %v2641_v58, 6 }
 0x375   : > { %v6971_v10 = vsel %vm8895_vm9, %v2924_v60, %v2348_v0  ;;  %2072 = vrot.lane.b32.xlu0 %v8897_v44, %s5112_s30  ;;  %v8899_v14 = vld [vmem:[#allocation35_spill] sm:$0xff]  ;;  %v6991_v0 = vsel %vm8881_vm7, %v8900_v16, %v1833_v56  ;;  %vm8902_vm5 = vcmask 1042432   ;;  %vm8904_vm0 = vcmask 769024  }
 0x376   : > { %8898 = vst [vmem:[#allocation41_spill] sm:$0xff] %v6982_v61  ;;  %v6987_v28 = vsel %vm5840_vm13, %v8899_v14, %v2190_v22  ;;  %2103 = vrot.lane.b32.xlu1 %v6301_v27, %s5113_s6  ;;  %v6998_v6 = vsel %vm8902_vm5, %v3286_v55, %v8901_v41  ;;  %v7005_v22 = vsel %vm8904_vm0, %v6589_v31, %v1949_v34  ;;  %v8907_v14 = vld [vmem:[#allocation34_spill] sm:$0xff]  ;;  %vm8908_vm3 = vcmask 490496   ;;  %vm8910_vm2 = vmmov %vm8904_vm0 }
 0x377   : > { %8903 = vst [vmem:[#allocation18_spill] sm:$0xff] %v6998_v6  ;;  %v7007_v56 = vpop.permute.xlu0 %1663  ;;  %v2119_v60 = vpop.permute.xlu1 %2118  ;;  %v7012_v11 = vsel %vm8905_vm15, %v8830_v30, %v6730_v59  ;;  %v7017_v55 = vsel %vm8906_vm11, %v6730_v59, %v6534_v43  ;;  %v2078_v16 = vsel %vm8908_vm3, %v8907_v14, %v2061_v29  ;;  %vm8909_vm10 = vmmov %vm8908_vm3  ;;  %v2320_v41 = vrot.slane %v6991_v0, 7  ;;  %v8911_v43 = vld [vmem:[#allocation43_spill] sm:$0xff] }
 0x378   : > { %v2079_v31 = vsel %vm8909_vm10, %v2061_v29, %v6689_v18  ;;  %v7026_v35 = vsel %vm8910_vm2, %v1949_v34, %v6608_v24  ;;  %v2714_v20 = vrot.slane %v2078_v16, 5  ;;  %v2321_v59 = vrot.slane %v6880_v38, 7  ;;  %v8915_v34 = vld [vmem:[#allocation53_spill] sm:$0xff]  ;;  %vm8918_vm1 = vmmov %vm8902_vm5 }
 0x379   : > { %v2715_v30 = vrot.slane %v2079_v31, 5  ;;  %2105 = vrot.lane.b32.xlu0 %v6384_v49, %s5113_s6  ;;  %v2408_v58 = vshll.u32 %v7005_v22, 16  ;;  %vm8912_vm4 = vcmask 482304   ;;  %v8916_v16 = vld [vmem:[#allocation49_spill] sm:$0xff]  ;;  %v8919_v38 = vsel %vm6417_vm12, %v6621_v37, %v6648_v4  ;;  %vm8920_vm7 = vmmov %vm8918_vm1 }
 0x37a   : > { %v2136_v14 = vsel %vm8912_vm4, %v8911_v43, %v2119_v60  ;;  %vm8913_vm9 = vmmov %vm8912_vm4  ;;  %2074 = vrot.lane.b32.xlu1 %v8914_v54, %s5112_s30  ;;  %v8917_v31 = vsel %vm6417_vm12, %v8915_v34, %v8916_v16  ;;  %v2412_v24 = vshll.u32 %v7026_v35, 16  ;;  %vm8925_vm5 = vcmask 1043456  }
 0x37b   : > { %v2137_v29 = vsel %vm8913_vm9, %v2119_v60, %v6728_v62  ;;  %v3368_v46 = vsel %vm8918_vm1, %v8917_v31, %v2714_v20  ;;  %v3372_v43 = vsel %vm8920_vm7, %v8919_v38, %v2715_v30  ;;  %v2787_v61 = vshll.u32 %v2136_v14, 16  ;;  %v7050_v60 = vpop.permute.xlu0 %1838  ;;  %v7052_v62 = vpop.permute.xlu1 %2066  ;;  %vm8928_vm0 = vmmov %vm8918_vm1 }
 0x37c   : > { %v2791_v1 = vshll.u32 %v2137_v29, 16  ;;  %8921 = vst [vmem:[#allocation30_spill] sm:$0xff] %v7050_v60  ;;  %8922 = vst [vmem:[#allocation39_spill] sm:$0xff] %v7052_v62  ;;  %v3458_v34 = vsel %vm6514_vm14, %v3368_v46, %v6775_v50  ;;  %v2876_v20 = vrot.slane %v2136_v14, 4  ;;  %v2877_v16 = vrot.slane %v2137_v29, 4 }
 0x37d   : > { %v7058_v31 = vrot.slane %v2787_v61, 5  ;;  %2132 = vrot.lane.b32.xlu0 %v8914_v54, %s5113_s6  ;;  %v2338_v50 = vrot.slane %v6925_v17, 7  ;;  %v3459_v61 = vsel %vm6514_vm14, %v3372_v43, %v6777_v48  ;;  %v2339_v30 = vrot.slane %v6931_v39, 7  ;;  %vm8930_vm15 = vmmov %vm8925_vm5  ;;  %v8932_v43 = vld [vmem:[#allocation36_spill] sm:$0xff] }
 0x37e   : > { %v7060_v18 = vrot.slane %v2791_v1, 5  ;;  %v7074_v46 = vsel %vm8925_vm5, %v3458_v34, %v2876_v20  ;;  %2130 = vrot.lane.b32.xlu1 %v8897_v44, %s5113_s6  ;;  %v8927_v1 = vrot.slane %v6740_v15, 5  ;;  %v7094_v44 = vsel %vm8930_vm15, %v3459_v61, %v2877_v16  ;;  %vm8933_vm11 = vmmov %vm8910_vm2 }
 0x37f   : > { %8923 = vst [vmem:[#allocation47_spill] sm:$0xff] %v7058_v31  ;;  %8926 = vst [vmem:[#allocation38_spill] sm:$0xff] %v7074_v46  ;;  %v7091_v29 = vpop.permute.xlu0 %1867  ;;  %v1660_v38 = vpop.permute.xlu1 %1659  ;;  %v2410_v34 = vrot.slane %v2408_v58, 7  ;;  %v2414_v48 = vrot.slane %v2412_v24, 7  ;;  %v8937_v61 = vshll.u32 %v6702_v63, 16  ;;  %v8938_v24 = vld [vmem:[#allocation13_spill] sm:$0xff] }
 0x380   : > { %8924 = vst [vmem:[#allocation35_spill] sm:$0xff] %v7060_v18  ;;  %v7081_v54 = vsel %vm8928_vm0, %v3270_v32, %v8927_v1  ;;  %8931 = vst [vmem:[#allocation43_spill] sm:$0xff] %v7094_v44  ;;  %v1675_v20 = vsel %vm8933_vm11, %v8932_v43, %v1660_v38  ;;  %v8934_v1 = vld [vmem:[#allocation40_spill] sm:$0xff]  ;;  %v8936_v18 = vshll.u32 %v6697_v12, 16  ;;  %v8644_v58 = vshll.u32 %v7012_v11, 16  ;;  %v8941_v31 = vld [vmem:[#allocation59_spill] sm:$0xff] }
 0x381   : > { %8929 = vst [vmem:[#allocation34_spill] sm:$0xff] %v7081_v54  ;;  %vm8935_vm3 = vmmov %vm8910_vm2  ;;  %v2363_v14 = vshll.u32 %v1675_v20, 16  ;;  %2145 = vrot.lane.b32.xlu0 %v8938_v24, %s5110_s28  ;;  %v8643_v43 = vshll.u32 %v7017_v55, 16  ;;  %vm8939_vm10 = vcmask 1040384   ;;  %vm8946_vm1 = vcmask 1041408  }
 0x382   : > { %v1676_v4 = vsel %vm8935_vm3, %v1660_v38, %v8934_v1  ;;  %v2914_v16 = vsel %vm5840_vm13, %v1675_v20, %v8936_v18  ;;  %vm8940_vm2 = vmmov %vm8939_vm10  ;;  %2076 = vrot.lane.b32.xlu1 %v8941_v31, %s5112_s30  ;;  %vm8953_vm5 = vcmask 482304   ;;  %vm8961_vm11 = vcmask 1039360  }
 0x383   : > { %v2367_v37 = vshll.u32 %v1676_v4, 16  ;;  %v2915_v32 = vsel %vm5840_vm13, %v1676_v4, %v8937_v61  ;;  %v3012_v38 = vsel %vm8939_vm10, %v2914_v16, %v2338_v50  ;;  %v2365_v18 = vrot.slane %v2363_v14, 7  ;;  %v7124_v61 = vpop.permute.xlu0 %1954  ;;  %v7126_v24 = vpop.permute.xlu1 %1665  ;;  %vm8942_vm4 = vmmov %vm8940_vm2 }
 0x384   : > { %v3016_v6 = vsel %vm8940_vm2, %v2915_v32, %v2339_v30  ;;  %v3096_v57 = vsel %vm6287_vm6, %v3012_v38, %v2410_v34  ;;  %v2940_v50 = vsel %vm8942_vm4, %v6859_v42, %v2320_v41  ;;  %vm8943_vm9 = vmmov %vm8940_vm2  ;;  %v8944_v32 = vld [vmem:[#allocation68_spill] sm:$0xff]  ;;  %v8947_v14 = vrot.slane %v6740_v15, 6 }
 0x385   : > { %v2369_v20 = vrot.slane %v2367_v37, 7  ;;  %v3097_v4 = vsel %vm6287_vm6, %v3016_v6, %v2414_v48  ;;  %v2944_v30 = vsel %vm8943_vm9, %v6864_v7, %v2321_v59  ;;  %v8945_v16 = vrot.slane %v8944_v32, 6  ;;  %vm8948_vm7 = vmmov %vm8946_vm1  ;;  %2134 = vrot.lane.b32.xlu0 %v8941_v31, %s5113_s6 }
 0x386   : > { %v7140_v34 = vsel %vm8948_vm7, %v3097_v4, %v8947_v14  ;;  %v8949_v6 = vshll.u32 %v6939_v47, 16  ;;  %v3078_v42 = vsel %vm6287_vm6, %v2940_v50, %v2365_v18  ;;  %v8950_v15 = vshll.u32 %v6957_v8, 16  ;;  %v8951_v4 = vld [vmem:[#allocation51_spill] sm:$0xff]  ;;  %v8955_v18 = vld [vmem:[#allocation14_spill] sm:$0xff]  ;;  %vm8957_vm0 = vmmov %vm8946_vm1 }
 0x387   : > { %v7135_v37 = vsel %vm8946_vm1, %v3096_v57, %v8945_v16  ;;  %v3079_v7 = vsel %vm6287_vm6, %v2944_v30, %v2369_v20  ;;  %v8952_v16 = vld [vmem:[#allocation32_spill] sm:$0xff]  ;;  %2147 = vrot.lane.b32.xlu1 %v8955_v18, %s5110_s28  ;;  %v7168_v20 = vrot.slane %v8644_v58, 7  ;;  %v7172_v31 = vrot.slane %v8643_v43, 7  ;;  %vm8960_vm15 = vmmov %vm8957_vm0 }
 0x388   : > { %v7144_v48 = vrot.slane %v8949_v6, 7  ;;  %v7155_v57 = vrot.slane %v8950_v15, 7  ;;  %v7162_v14 = vsel %vm8953_vm5, %v8952_v16, %v8951_v4  ;;  %v8956_v30 = vrot.slane %v6702_v63, 6  ;;  %v7178_v15 = vpop.permute.xlu0 %2012  ;;  %v1837_v16 = vpop.permute.xlu1 %1836  ;;  %vm8962_vm3 = vmmov %vm8961_vm11 }
 0x389   : > { %8954 = vst [vmem:[#allocation45_spill] sm:$0xff] %v7162_v14  ;;  %v8958_v59 = vshll.u32 %v6931_v39, 16  ;;  %v8959_v41 = vrot.slane %v6697_v12, 6  ;;  %v7187_v43 = vsel %vm8961_vm11, %v6536_v26, %v1837_v16  ;;  %v7191_v50 = vsel %vm8962_vm3, %v1837_v16, %v7050_v60  ;;  %v8964_v12 = vld [vmem:[#allocation19_spill] sm:$0xff]  ;;  %vm8970_vm10 = vmmov %vm8940_vm2 }
 0x38a   : > { %v3126_v6 = vsel %vm8957_vm0, %v3079_v7, %v8956_v30  ;;  %v2759_v63 = vshll.u32 %v7162_v14, 16  ;;  %v8963_v7 = vshll.u32 %v6925_v17, 16  ;;  %v2214_v39 = vshll.u32 %v7187_v43, 16  ;;  %2151 = vrot.lane.b32.xlu0 %v8964_v12, %s5110_s28  ;;  %v8965_v26 = vld [vmem:[#allocation71_spill] sm:$0xff]  ;;  %v8967_v14 = vld [vmem:[#allocation46_spill] sm:$0xff] }
 0x38b   : > { %v2546_v18 = vrot.slane %v8958_v59, 6  ;;  %v3122_v38 = vsel %vm8960_vm15, %v3078_v42, %v8959_v41  ;;  %v2217_v59 = vshll.u32 %v7191_v50, 16  ;;  %v2332_v41 = vrot.slane %v8965_v26, 7  ;;  %v8966_v16 = vld [vmem:[#allocation15_spill] sm:$0xff]  ;;  %vm8984_vm15 = vmmov %vm8957_vm0 }
 0x38c   : > { %v2545_v30 = vrot.slane %v8963_v7, 6  ;;  %v2208_v58 = vshll.u32 %v6991_v0, 16  ;;  %2149 = vrot.lane.b32.xlu1 %v8966_v16, %s5110_s28  ;;  %v2699_v7 = vrot.slane %v7026_v35, 5  ;;  %v2907_v12 = vsel %vm5840_vm13, %v8967_v14, %v2214_v39  ;;  %v7216_v0 = vpop.permute.xlu0 %1898  ;;  %v2007_v42 = vpop.permute.xlu1 %2006  ;;  %v8971_v14 = vld [vmem:[#allocation61_spill] sm:$0xff] }
 0x38d   : > { %v3261_v44 = vsel %vm6417_vm12, %v3126_v6, %v2546_v18  ;;  %v2908_v26 = vsel %vm5840_vm13, %v6904_v23, %v2217_v59  ;;  %8968 = vst [vmem:[#allocation53_spill] sm:$0xff] %v7216_v0  ;;  %v2573_v16 = vshll.u32 %v6885_v9, 16  ;;  %v2698_v6 = vrot.slane %v7005_v22, 5  ;;  %v8973_v23 = vld [vmem:[#allocation54_spill] sm:$0xff] }
 0x38e   : > { %v3260_v46 = vsel %vm6417_vm12, %v3122_v38, %v2545_v30  ;;  %v8969_v35 = vrot.slane %v6850_v36, 7  ;;  %v7226_v38 = vsel %vm8940_vm2, %v2908_v26, %v2332_v41  ;;  %vm8972_vm4 = vcmask 760832   ;;  %v8975_v59 = vld [vmem:[#allocation22_spill] sm:$0xff] }
 0x38f   : > { %v7230_v30 = vsel %vm8972_vm4, %v8971_v14, %v2007_v42  ;;  %vm8974_vm9 = vmmov %vm8972_vm4  ;;  %2155 = vrot.lane.b32.xlu0 %v8975_v59, %s5110_s28  ;;  %vm8976_vm1 = vcmask 1042432   ;;  %v8978_v14 = vld [vmem:[#allocation16_spill] sm:$0xff]  ;;  %vm8980_vm5 = vcmask 769024   ;;  %vm8989_vm11 = vcmask 1043456  }
 0x390   : > { %v7223_v18 = vsel %vm8970_vm10, %v2907_v12, %v8969_v35  ;;  %v2023_v39 = vsel %vm8974_vm9, %v2007_v42, %v8973_v23  ;;  %v3308_v22 = vsel %vm8976_vm1, %v3261_v44, %v2699_v7  ;;  %v8977_v12 = vld [vmem:[#allocation24_spill] sm:$0xff]  ;;  %v2536_v26 = vrot.slane %v7230_v30, 6  ;;  %2153 = vrot.lane.b32.xlu1 %v8978_v14, %s5110_s28  ;;  %vm8979_vm7 = vmmov %vm8976_vm1  ;;  %v7249_v60 = vpop.permute.xlu0 %1927  ;;  %v7251_v0 = vpop.permute.xlu1 %1556  ;;  %v8991_v14 = vld [vmem:[#allocation33_spill] sm:$0xff] }
 0x391   : > { %v3089_v36 = vsel %vm6287_vm6, %v7223_v18, %v7144_v48  ;;  %v2905_v41 = vsel %vm5840_vm13, %v8977_v12, %v2208_v58  ;;  %v2537_v35 = vrot.slane %v2023_v39, 6  ;;  %v3304_v42 = vsel %vm8979_vm7, %v3260_v46, %v2698_v6  ;;  %v8988_v12 = vld [vmem:[#allocation21_spill] sm:$0xff]  ;;  %vm8990_vm3 = vmmov %vm8989_vm11 }
 0x392   : > { %v2601_v59 = vshll.u32 %v2023_v39, 16  ;;  %v2860_v44 = vrot.slane %v7230_v30, 4  ;;  %v2861_v7 = vrot.slane %v2023_v39, 4  ;;  %v3090_v58 = vsel %vm6287_vm6, %v7226_v38, %v7155_v57  ;;  %vm8993_vm10 = vmmov %vm8940_vm2 }
 0x393   : > { %v7260_v48 = vsel %vm8980_vm5, %v7007_v56, %v7126_v24  ;;  %v8981_v46 = vsel %vm6287_vm6, %v6965_v2, %v6783_v53  ;;  %v8983_v18 = vsel %vm6287_vm6, %v6971_v10, %v6805_v52  ;;  %v3443_v38 = vsel %vm6514_vm14, %v3308_v22, %v6827_v5  ;;  %2159 = vrot.lane.b32.xlu0 %v8889_v51, %s5110_s28  ;;  %v8986_v52 = vld [vmem:[#allocation73_spill] sm:$0xff]  ;;  %vm8994_vm2 = vmmov %vm8980_vm5  ;;  %v8997_v53 = vld [vmem:[#allocation28_spill] sm:$0xff] }
 0x394   : > { %v7268_v6 = vsel %vm8957_vm0, %v8981_v46, %v2536_v26  ;;  %v7276_v57 = vsel %vm8984_vm15, %v8983_v18, %v2537_v35  ;;  %v7281_v39 = vrot.slane %v2601_v59, 5  ;;  %v3442_v10 = vsel %vm6514_vm14, %v3304_v42, %v8986_v52  ;;  %2157 = vrot.lane.b32.xlu1 %v8988_v12, %s5110_s28  ;;  %v7316_v42 = vpop.permute.xlu0 %2043  ;;  %vm8998_vm9 = vmmov %vm8972_vm4 }
 0x395   : > { %8982 = vst [vmem:[#allocation49_spill] sm:$0xff] %v7268_v6  ;;  %v7296_v5 = vrot.slane %v2759_v63, 5  ;;  %v2350_v22 = vrot.slane %v6885_v9, 7  ;;  %v3487_v26 = vsel %vm8989_vm11, %v3443_v38, %v2861_v7  ;;  %v3484_v35 = vsel %vm8990_vm3, %v3442_v10, %v2860_v44  ;;  %v1866_v7 = vpop.permute.xlu1 %1865  ;;  %v8995_v38 = vld [vmem:[#allocation64_spill] sm:$0xff]  ;;  %v8996_v10 = vld [vmem:[#allocation58_spill] sm:$0xff]  ;;  %vm8999_vm1 = vmmov %vm8957_vm0 }
 0x396   : > { %8985 = vst [vmem:[#allocation36_spill] sm:$0xff] %v7281_v39  ;;  %v8992_v46 = vrot.slane %v8991_v14, 7  ;;  %v7309_v51 = vsel %vm8994_vm2, %v8934_v1, %v7007_v56  ;;  %v2375_v63 = vshll.u32 %v7260_v48, 16  ;;  %v8651_v44 = vshll.u32 %v7230_v30, 16  ;;  %vm9001_vm7 = vmmov %vm8993_vm10 }
 0x397   : > { %8987 = vst [vmem:[#allocation40_spill] sm:$0xff] %v7296_v5  ;;  %v3597_v52 = vand.u32 %v8995_v38, %v3487_v26  ;;  %v7323_v56 = vsel %vm8972_vm4, %v8996_v10, %v1866_v7  ;;  %v7325_v1 = vrot.slane %v2573_v16, 6  ;;  %v2518_v12 = vrot.slane %v6925_v17, 6  ;;  %2163 = vrot.lane.b32.xlu0 %v6384_v49, %s5110_s28  ;;  %vm9002_vm5 = vmmov %vm9001_vm7 }
 0x398   : > { %v2976_v18 = vsel %vm8993_vm10, %v2905_v41, %v8992_v46  ;;  %v3595_v41 = vand.u32 %v8995_v38, %v3484_v35  ;;  %v2322_v14 = vrot.slane %v7187_v43, 7  ;;  %v2323_v46 = vrot.slane %v7191_v50, 7  ;;  %2161 = vrot.lane.b32.xlu1 %v6301_v27, %s5110_s28  ;;  %vm9005_vm0 = vmmov %vm9002_vm5 }
 0x399   : > { %v3087_v26 = vsel %vm6287_vm6, %v2976_v18, %v8997_v53  ;;  %3718 = vmatprep.subr.bf16.mxu0 %v3597_v52  ;;  %v7337_v35 = vsel %vm8998_vm9, %v1866_v7, %v7091_v29  ;;  %v2268_v16 = vshll.u32 %v7323_v56, 16  ;;  %v2520_v17 = vrot.slane %v7323_v56, 6  ;;  %v2065_v18 = vpop.permute.xlu0 %2064  ;;  %v7346_v52 = vpop.permute.xlu1 %1778  ;;  %vm9006_vm15 = vmmov %vm9005_vm0 }
 0x39a   : > { %v2371_v43 = vshll.u32 %v7309_v51, 16  ;;  %v2377_v50 = vrot.slane %v2375_v63, 7  ;;  %3719 = vmatpush1.bf16.msra.mxu0 %v3595_v41  ;;  %v2271_v49 = vshll.u32 %v7337_v35, 16  ;;  %v2521_v53 = vrot.slane %v7337_v35, 6  ;;  %v794_v63 = vld [vmem:[%s8510_s3 + $0x8] sm:$0x1]  ;;  %vm9007_vm11 = vmmov %vm8999_vm1 }
 0x39b   : > { %v2599_v7 = vrot.slane %v8651_v44, 6  ;;  %v2603_v10 = vrot.slane %v2601_v59, 6  ;;  %v2925_v9 = vsel %vm5840_vm13, %v6939_v47, %v2268_v16  ;;  %v7354_v27 = vsel %vm8999_vm1, %v3089_v36, %v2520_v17  ;;  %v9000_v41 = vld [vmem:[#allocation20_spill] sm:$0xff]  ;;  %4443 = vperm.xlu0 %5092, %v794_v63   ;;  %vm9017_vm4 = vmmov %vm8999_vm1 }
 0x39c   : > { %v2948_v2 = vsel %vm9001_vm7, %v9000_v41, %v2322_v14  ;;  %v2952_v13 = vsel %vm9002_vm5, %v6987_v28, %v2323_v46  ;;  %v2926_v59 = vsel %vm5840_vm13, %v6957_v8, %v2271_v49  ;;  %v9003_v44 = vld [vmem:[#allocation52_spill] sm:$0xff]  ;;  %v3170_v17 = vsel %vm9007_vm11, %v3090_v58, %v2521_v53  ;;  %v9008_v14 = vld [vmem:[#allocation67_spill] sm:$0xff]  ;;  %v9009_v46 = vld [vmem:[#allocation66_spill] sm:$0xff]  ;;  %4403 = vperm.xlu1 %5091, %v794_v63  }
 0x39d   : > { %v9004_v6 = vrot.slane %v9003_v44, 7  ;;  %v7372_v36 = vsel %vm9006_vm15, %v2926_v59, %v2350_v22  ;;  %5028 = vmatmul.mubr.msk.bf16.vlgmr.msra.gmra.mxu0 %vm3585_vm8, %v9008_v14  ;;  %vm9010_vm3 = vcmask 490496   ;;  %v2373_v41 = vrot.slane %v2371_v43, 7  ;;  %v1953_v53 = vpop.permute.xlu1 %1952  ;;  %vm9023_vm7 = vmmov %vm8999_vm1 }
 0x39e   : > { %v2080_v44 = vsel %vm9010_vm3, %v9009_v46, %v2065_v18  ;;  %vm9011_vm10 = vmmov %vm9010_vm3  ;;  %v9012_v59 = vmov 0   ;;  %v3081_v28 = vsel %vm6287_vm6, %v2952_v13, %v2377_v50  ;;  %v3278_v43 = vsel %vm6417_vm12, %v7135_v37, %v2599_v7 }
 0x39f   : > { %v7369_v39 = vsel %vm9005_vm0, %v2925_v9, %v9004_v6  ;;  %v3272_v6 = vsel %vm6417_vm12, %v3170_v17, %v7325_v1  ;;  %v2081_v22 = vsel %vm9011_vm10, %v2065_v18, %v7052_v62  ;;  %v2716_v58 = vrot.slane %v2080_v44, 5  ;;  %v7388_v9 = vpop.permute.xlu0 %1780  ;;  %3818 = vmatprep.mubr.bf16.mxu0 %v9012_v59 }
 0x3a0   : > { %v2717_v54 = vrot.slane %v2081_v22, 5  ;;  %v3279_v1 = vsel %vm6417_vm12, %v7140_v34, %v2603_v10  ;;  %v9013_v18 = vshll.u32 %v7012_v11, 16  ;;  %v9014_v63 = vshll.u32 %v6911_v40, 16 }
 0x3a1   : > { %v3080_v44 = vsel %vm6287_vm6, %v2948_v2, %v2373_v41  ;;  %vm9015_vm2 = vcmask 1042432   ;;  %v3158_v50 = vsel %vm9017_vm4, %v3087_v26, %v2518_v12  ;;  %v2547_v37 = vrot.slane %v2268_v16, 6  ;;  %v7429_v16 = vpop.permute.xlu1 %1985 }
 0x3a2   : > { %v7401_v17 = vrot.slane %v9013_v18, 5  ;;  %v2563_v46 = vrot.slane %v9014_v63, 6  ;;  %v7408_v13 = vsel %vm9015_vm2, %v3278_v43, %v2716_v58  ;;  %vm9018_vm9 = vmmov %vm9015_vm2  ;;  %v9020_v40 = vshll.u32 %v6939_v47, 16 }
 0x3a3   : > { %9016 = vst [vmem:[#allocation13_spill] sm:$0xff] %v7408_v13  ;;  %v7412_v7 = vsel %vm9018_vm9, %v3279_v1, %v2717_v54  ;;  %v2340_v10 = vrot.slane %v7323_v56, 7  ;;  %v2548_v41 = vrot.slane %v2271_v49, 6  ;;  %v9021_v12 = vrot.slane %v6957_v8, 6  ;;  %v7427_v54 = vpop.permute.xlu0 %1558  ;;  %v9024_v1 = vld [vmem:[#allocation60_spill] sm:$0xff]  ;;  %vm9028_vm15 = vmmov %vm9015_vm2 }
 0x3a4   : > { %9019 = vst [vmem:[#allocation59_spill] sm:$0xff] %v7412_v7  ;;  %v2916_v2 = vsel %vm5840_vm13, %v7309_v51, %v9020_v40  ;;  %v2341_v22 = vrot.slane %v7337_v35, 7  ;;  %v9022_v58 = vrot.slane %v6939_v47, 6  ;;  %vm9025_vm5 = vcmask 769024   ;;  %vm9031_vm10 = vmmov %vm9015_vm2 }
 0x3a5   : > { %v3134_v26 = vsel %vm8999_vm1, %v3081_v28, %v9021_v12  ;;  %v1966_v51 = vsel %vm9025_vm5, %v9024_v1, %v1953_v53  ;;  %vm9026_vm0 = vmmov %vm9025_vm5  ;;  %v9027_v40 = vshll.u32 %v6957_v8, 16  ;;  %vm9029_vm11 = vcmask 1040384  }
 0x3a6   : > { %v3130_v43 = vsel %vm9023_vm7, %v3080_v44, %v9022_v58  ;;  %v1967_v56 = vsel %vm9026_vm0, %v1953_v53, %v7124_v61  ;;  %v2416_v49 = vshll.u32 %v1966_v51, 16  ;;  %v2700_v63 = vrot.slane %v1966_v51, 5  ;;  %vm9030_vm3 = vmmov %vm9029_vm11 }
 0x3a7   : > { %v2420_v18 = vshll.u32 %v1967_v56, 16  ;;  %v2701_v28 = vrot.slane %v1967_v56, 5  ;;  %v2917_v35 = vsel %vm5840_vm13, %v7260_v48, %v9027_v40  ;;  %v3262_v47 = vsel %vm6417_vm12, %v3130_v43, %v2547_v37  ;;  %v7457_v1 = vpop.permute.xlu0 %1669  ;;  %v2011_v37 = vpop.permute.xlu1 %2010  ;;  %vm9037_vm9 = vmmov %vm8999_vm1 }
 0x3a8   : > { %v3107_v44 = vsel %vm6287_vm6, %v7369_v39, %v7168_v20  ;;  %v3108_v53 = vsel %vm6287_vm6, %v7372_v36, %v7172_v31  ;;  %v3263_v8 = vsel %vm6417_vm12, %v3134_v26, %v2548_v41  ;;  %v2418_v12 = vrot.slane %v2416_v49, 7 }
 0x3a9   : > { %v2422_v58 = vrot.slane %v2420_v18, 7  ;;  %v3312_v48 = vsel %vm9028_vm15, %v3262_v47, %v2700_v63  ;;  %v3020_v43 = vsel %vm9029_vm11, %v2916_v2, %v2340_v10  ;;  %v3024_v51 = vsel %vm9030_vm3, %v2917_v35, %v2341_v22  ;;  %v9034_v22 = vld [vmem:[#allocation50_spill] sm:$0xff]  ;;  %vm9054_vm3 = vmmov %vm9015_vm2 }
 0x3aa   : > { %v3316_v20 = vsel %vm9031_vm10, %v3263_v8, %v2701_v28  ;;  %v3444_v31 = vsel %vm6514_vm14, %v3312_v48, %v7401_v17  ;;  %v9032_v39 = vshll.u32 %v7017_v55, 16  ;;  %v3098_v41 = vsel %vm6287_vm6, %v3020_v43, %v2418_v12  ;;  %v9048_v43 = vld [vmem:[#allocation44_spill] sm:$0xff] }
 0x3ab   : > { %v3099_v26 = vsel %vm6287_vm6, %v3024_v51, %v2422_v58  ;;  %v9033_v56 = vrot.slane %v7017_v55, 5  ;;  %v3269_v10 = vsel %vm6417_vm12, %v3158_v50, %v2563_v46  ;;  %vm9035_vm4 = vcmask 752640   ;;  %v7502_v35 = vpop.permute.xlu0 %1871  ;;  %v1668_v47 = vpop.permute.xlu1 %1667  ;;  %v9050_v51 = vld [vmem:[#allocation55_spill] sm:$0xff] }
 0x3ac   : > { %v2737_v36 = vrot.slane %v9032_v39, 5  ;;  %v7479_v17 = vsel %vm9035_vm4, %v9034_v22, %v7249_v60  ;;  %v9036_v49 = vrot.slane %v7012_v11, 6  ;;  %v9039_v63 = vrot.slane %v7017_v55, 6  ;;  %vm9060_vm4 = vmmov %vm8999_vm1 }
 0x3ad   : > { %v3352_v2 = vsel %vm9015_vm2, %v3272_v6, %v9033_v56  ;;  %v9041_v6 = vld [vmem:[#allocation63_spill] sm:$0xff]  ;;  %vm9042_vm7 = vcmask 1039360   ;;  %vm9043_vm5 = vcmask 760832   ;;  %v9047_v8 = vshll.u32 %v7230_v30, 16  ;;  %vm9058_vm2 = vmmov %vm8999_vm1 }
 0x3ae   : > { %v7484_v18 = vsel %vm9037_vm9, %v3098_v41, %v9036_v49  ;;  %v7489_v28 = vsel %vm8999_vm1, %v3099_v26, %v9039_v63  ;;  %v1568_v40 = vsel %vm9042_vm7, %v9041_v6, %v7251_v0  ;;  %v7496_v46 = vsel %vm9043_vm5, %v8973_v23, %v2011_v37  ;;  %vm9045_vm0 = vmmov %vm9043_vm5  ;;  %v9055_v41 = vld [vmem:[#allocation53_spill] sm:$0xff]  ;;  %v9056_v26 = vld [vmem:[#allocation70_spill] sm:$0xff] }
 0x3af   : > { %9038 = vst [vmem:[#allocation68_spill] sm:$0xff] %v7484_v18  ;;  %9040 = vst [vmem:[#allocation51_spill] sm:$0xff] %v7489_v28  ;;  %v7500_v50 = vsel %vm9045_vm0, %v2011_v37, %v7178_v15  ;;  %v3445_v55 = vsel %vm6514_vm14, %v3316_v20, %v2737_v36  ;;  %v2743_v12 = vrot.slane %v9047_v8, 5  ;;  %v2538_v58 = vrot.slane %v7496_v46, 6 }
 0x3b0   : > { %9044 = vst [vmem:[#allocation32_spill] sm:$0xff] %v7496_v46  ;;  %9046 = vst [vmem:[#allocation14_spill] sm:$0xff] %v7500_v50  ;;  %v2539_v48 = vrot.slane %v7500_v50, 6  ;;  %v8655_v23 = vshll.u32 %v7500_v50, 16  ;;  %vm9049_vm15 = vcmask 482304   ;;  %v2863_v20 = vrot.slane %v7500_v50, 4 }
 0x3b1   : > { %v7514_v37 = vsel %vm9049_vm15, %v8951_v4, %v9048_v43  ;;  %vm9051_vm11 = vmmov %vm9045_vm0  ;;  %v9053_v30 = vrot.slane %v8944_v32, 5  ;;  %vm9057_vm10 = vcmask 1031168   ;;  %v2577_v22 = vshll.u32 %v7479_v17, 16 }
 0x3b2   : > { %v7519_v39 = vsel %vm9051_vm11, %v9050_v51, %v7346_v52  ;;  %v1910_v56 = vsel %vm9057_vm10, %v9056_v26, %v9055_v41  ;;  %v2193_v49 = vshll.u32 %v1568_v40, 16  ;;  %v2746_v4 = vrot.slane %v8655_v23, 5  ;;  %v1841_v51 = vpop.permute.xlu1 %1840 }
 0x3b3   : > { %9052 = vst [vmem:[#allocation19_spill] sm:$0xff] %v7519_v39  ;;  %v3340_v36 = vsel %vm9054_vm3, %v3269_v10, %v9053_v30  ;;  %v2862_v63 = vrot.slane %v7496_v46, 4  ;;  %v7533_v6 = vsel %vm9058_vm2, %v3107_v44, %v2538_v58  ;;  %v7536_v8 = vsel %vm9060_vm4, %v3108_v53, %v2539_v48  ;;  %v7542_v10 = vpop.permute.xlu0 %1987  ;;  %v9064_v58 = vld [vmem:[#allocation25_spill] sm:$0xff] }
 0x3b4   : > { %9059 = vst [vmem:[#allocation71_spill] sm:$0xff] %v7533_v6  ;;  %vm9061_vm9 = vcmask 769024   ;;  %v3454_v44 = vsel %vm6514_vm14, %v3352_v2, %v2746_v4  ;;  %v3451_v53 = vsel %vm6514_vm14, %v3340_v36, %v2743_v12  ;;  %v2872_v48 = vrot.slane %v9064_v58, 4  ;;  %v9066_v30 = vld [vmem:[#allocation29_spill] sm:$0xff]  ;;  %v9068_v12 = vld [vmem:[#allocation30_spill] sm:$0xff] }
 0x3b5   : > { %v7540_v32 = vsel %vm9061_vm9, %v7126_v24, %v1668_v47  ;;  %v2333_v24 = vrot.slane %v1910_v56, 7  ;;  %v2351_v23 = vrot.slane %v7479_v17, 7  ;;  %vm9065_vm1 = vcmask 1043456   ;;  %v9070_v17 = vld [vmem:[#allocation23_spill] sm:$0xff]  ;;  %vm9077_vm3 = vmmov %vm9061_vm9 }
 0x3b6   : > { %9062 = vst [vmem:[#allocation15_spill] sm:$0xff] %v7540_v32  ;;  %v3493_v5 = vsel %vm9065_vm1, %v3445_v55, %v2863_v20  ;;  %v7556_v13 = vrot.slane %v2577_v22, 6  ;;  %v2900_v28 = vsel %vm5840_vm13, %v9066_v30, %v2193_v49  ;;  %v2379_v34 = vshll.u32 %v7540_v32, 16  ;;  %vm9067_vm7 = vmmov %vm9065_vm1  ;;  %v1870_v30 = vpop.permute.xlu1 %1869 }
 0x3b7   : > { %v3601_v2 = vand.u32 %v8995_v38, %v3493_v5  ;;  %v3490_v4 = vsel %vm9067_vm7, %v3444_v31, %v2862_v63  ;;  %vm9069_vm5 = vcmask 1039360   ;;  %v7566_v56 = vpop.permute.xlu0 %1931  ;;  %v9071_v26 = vrot.slane %v9070_v17, 4  ;;  %vm9072_vm0 = vmmov %vm9065_vm1  ;;  %v9087_v17 = vld [vmem:[#allocation72_spill] sm:$0xff] }
 0x3b8   : > { %v1852_v36 = vsel %vm9069_vm5, %v9068_v12, %v1841_v51  ;;  %vm9073_vm15 = vmmov %vm9072_vm0  ;;  %v9075_v22 = vshll.u32 %v7519_v39, 16  ;;  %v3599_v31 = vand.u32 %v8995_v38, %v3490_v4  ;;  %vm9079_vm10 = vcmask 760832  }
 0x3b9   : > { %v7571_v55 = vsel %vm9072_vm0, %v3451_v53, %v9071_v26  ;;  %v7574_v20 = vsel %vm9073_vm15, %v3454_v44, %v2872_v48  ;;  %vm9076_vm11 = vmmov %vm9069_vm5  ;;  %3759 = vmatprep.subr.bf16.mxu1 %v3601_v2  ;;  %v2220_v63 = vshll.u32 %v1852_v36, 16  ;;  %v7586_v26 = vsel %vm9077_vm3, %v1668_v47, %v7457_v1 }
 0x3ba   : > { %9074 = vst [vmem:[#allocation46_spill] sm:$0xff] %v7574_v20  ;;  %v2396_v49 = vrot.slane %v9075_v22, 7  ;;  %v7581_v5 = vsel %vm9076_vm11, %v7251_v0, %v7427_v54  ;;  %9078 = vst [vmem:[#allocation61_spill] sm:$0xff] %v7586_v26  ;;  %v2324_v53 = vrot.slane %v1852_v36, 7  ;;  %v7590_v44 = vsel %vm9079_vm10, %v7091_v29, %v1870_v30  ;;  %3760 = vmatpush1.bf16.msra.mxu1 %v3599_v31 }
 0x3bb   : > { %9080 = vst [vmem:[#allocation54_spill] sm:$0xff] %v7590_v44  ;;  %vm9081_vm2 = vmmov %vm9079_vm10  ;;  %v2381_v0 = vrot.slane %v2379_v34, 7  ;;  %v2909_v2 = vsel %vm5840_vm13, %v1568_v40, %v2220_v63  ;;  %v2274_v4 = vshll.u32 %v7590_v44, 16  ;;  %vm9085_vm9 = vcmask 1040384   ;;  %v7611_v40 = vpop.permute.xlu0 %1842 }
 0x3bc   : > { %v7594_v48 = vsel %vm9081_vm2, %v1870_v30, %v7502_v35  ;;  %vm9083_vm4 = vmmov %vm9081_vm2  ;;  %v2956_v29 = vsel %vm9085_vm9, %v2900_v28, %v2324_v53  ;;  %v9088_v34 = vand.u32 %v8995_v38, %v9087_v17  ;;  %v2522_v22 = vrot.slane %v7590_v44, 6  ;;  %v1957_v28 = vpop.permute.xlu1 %1956  ;;  %v9106_v44 = vld [vmem:[#allocation27_spill] sm:$0xff] }
 0x3bd   : > { %9082 = vst [vmem:[#allocation22_spill] sm:$0xff] %v7594_v48  ;;  %v2277_v12 = vshll.u32 %v7594_v48, 16  ;;  %v7603_v47 = vsel %vm9083_vm4, %v7346_v52, %v7388_v9  ;;  %vm9086_vm1 = vmmov %vm9085_vm9  ;;  %v2196_v31 = vshll.u32 %v7581_v5, 16  ;;  %v3082_v63 = vsel %vm6287_vm6, %v2956_v29, %v2381_v0  ;;  %5029 = vmatmul.mubr.msk.bf16.vlgmr.msra.gmra.mxu1 %vm3585_vm8, %v9008_v14 }
 0x3be   : > { %9084 = vst [vmem:[#allocation24_spill] sm:$0xff] %v7603_v47  ;;  %v2992_v36 = vsel %vm9086_vm1, %v2909_v2, %v2333_v24  ;;  %3841 = vmatprep.subr.bf16.mxu1 %v9088_v34  ;;  %v7618_v30 = vrot.slane %v2274_v4, 6  ;;  %v2513_v24 = vrot.slane %v7519_v39, 6  ;;  %v2383_v53 = vshll.u32 %v7586_v26, 16  ;;  %vm9092_vm5 = vmmov %vm9086_vm1  ;;  %3859 = vmatprep.mubr.bf16.mxu1 %v9012_v59 }
 0x3bf   : > { %v3091_v52 = vsel %vm6287_vm6, %v2992_v36, %v2396_v49  ;;  %v2927_v2 = vsel %vm5840_vm13, %v7519_v39, %v2274_v4  ;;  %v2928_v0 = vsel %vm5840_vm13, %v7603_v47, %v2277_v12  ;;  %v7630_v29 = vld.sshfl [vmem:[#allocation2 + $0x26] sm:$0x1 pattern:$0x75316420]  ;;  %vm9090_vm7 = vcmask 482304   ;;  %vm9095_vm15 = vmmov %vm9076_vm11 }
 0x3c0   : > { %v9089_v49 = vld [vmem:[#allocation42_spill] sm:$0xff]  ;;  %v7638_v17 = vsel %vm9092_vm5, %v2927_v2, %v2351_v23  ;;  %vm9094_vm0 = vcmask 1041408   ;;  %v7645_v4 = vsel %vm9095_vm15, %v1841_v51, %v7611_v40  ;;  %v7654_v23 = vpop.permute.xlu0 %1958  ;;  %v9098_v2 = vld [vmem:[#allocation65_spill] sm:$0xff]  ;;  %vm9103_vm3 = vcmask 1043456   ;;  %vm9107_vm10 = vmmov %vm9086_vm1 }
 0x3c1   : > { %v7635_v36 = vsel %vm9090_vm7, %v9048_v43, %v9089_v49  ;;  %9093 = vst [vmem:[#allocation73_spill] sm:$0xff] %v7638_v17  ;;  %v7641_v14 = vsel %vm9094_vm0, %v3091_v52, %v2522_v22  ;;  %v2325_v43 = vrot.slane %v7645_v4, 7  ;;  %vm9096_vm11 = vmmov %vm9094_vm0  ;;  %v9099_v22 = vrot.slane %v9098_v2, 4  ;;  %v9100_v52 = vld [vmem:[#allocation57_spill] sm:$0xff]  ;;  %v9101_v51 = vld [vmem:[#allocation62_spill] sm:$0xff] }
 0x3c2   : > { %9091 = vst [vmem:[#allocation16_spill] sm:$0xff] %v7635_v36  ;;  %v3138_v6 = vsel %vm9096_vm11, %v3082_v63, %v2513_v24  ;;  %9097 = vst [vmem:[#allocation21_spill] sm:$0xff] %v7654_v23  ;;  %v9102_v18 = vsel %vm6514_vm14, %v9100_v52, %v9101_v51  ;;  %v2763_v7 = vshll.u32 %v7514_v37, 16  ;;  %v9104_v49 = vld [vmem:[#allocation48_spill] sm:$0xff]  ;;  %v2015_v24 = vpop.permute.xlu1 %2014  ;;  %v9105_v2 = vld [vmem:[#allocation3_spill] sm:$0xff]  ;;  %v2767_v52 = vshll.u32 %v7635_v36, 16 }
 0x3c3   : > { %v7664_v26 = vsel %vm9103_vm3, %v9102_v18, %v9099_v22  ;;  %v2901_v34 = vsel %vm5840_vm13, %v9104_v49, %v2196_v31  ;;  %v3264_v63 = vsel %vm6417_vm12, %v3138_v6, %v7618_v30  ;;  %v2385_v18 = vrot.slane %v2383_v53, 7  ;;  %vm9118_vm1 = vmmov %vm9081_vm2 }
 0x3c4   : > { %v2960_v22 = vsel %vm9107_vm10, %v2901_v34, %v2325_v43  ;;  %v2645_v50 = vshll.u32 %v9064_v58, 16  ;;  %v7683_v31 = vsel %vm9081_vm2, %v7429_v16, %v7542_v10  ;;  %v1672_v43 = vpop.permute.xlu0 %1671  ;;  %v7692_v39 = vrot.slane %v2763_v7, 5  ;;  %v9112_v58 = vld [vmem:[#allocation17_spill] sm:$0xff]  ;;  %vm9122_vm5 = vmmov %vm9094_vm0 }
 0x3c5   : > { %9109 = vst [vmem:[#allocation33_spill] sm:$0xff] %v7683_v31  ;;  %v3083_v34 = vsel %vm6287_vm6, %v2960_v22, %v2385_v18  ;;  %vm9113_vm4 = vcmask 752640   ;;  %v2514_v36 = vrot.slane %v7603_v47, 6  ;;  %vm9114_vm9 = vcmask 769024   ;;  %v9117_v18 = vld [vmem:[#allocation56_spill] sm:$0xff]  ;;  %vm9126_vm15 = vmmov %vm9118_vm1 }
 0x3c6   : > { %9111 = vst [vmem:[#allocation64_spill] sm:$0xff] %v7692_v39  ;;  %v7697_v62 = vsel %vm9113_vm4, %v9112_v58, %v7316_v42  ;;  %v7702_v30 = vsel %vm9114_vm9, %v7124_v61, %v1957_v28  ;;  %v7704_v32 = vpop.permute.xlu1 %1929  ;;  %v7706_v53 = vrot.slane %v2767_v52, 5  ;;  %v7711_v7 = vsel %vm9118_vm1, %v9117_v18, %v7429_v16  ;;  %vm9120_vm7 = vmmov %vm9114_vm9 }
 0x3c7   : > { %9115 = vst [vmem:[#allocation58_spill] sm:$0xff] %v7702_v30  ;;  %9119 = vst [vmem:[#allocation20_spill] sm:$0xff] %v7711_v7  ;;  %v2464_v22 = vshll.u32 %v7683_v31, 16  ;;  %v7716_v58 = vsel %vm9120_vm7, %v1957_v28, %v7654_v23  ;;  %v7718_v6 = vrot.slane %v2645_v50, 6  ;;  %v3142_v49 = vsel %vm9122_vm5, %v3083_v34, %v2514_v36 }
 0x3c8   : > { %9116 = vst [vmem:[#allocation28_spill] sm:$0xff] %v7706_v53  ;;  %9121 = vst [vmem:[#allocation52_spill] sm:$0xff] %v7716_v58  ;;  %v2550_v51 = vrot.slane %v2277_v12, 6  ;;  %v2702_v16 = vrot.slane %v7702_v30, 5  ;;  %v7729_v28 = vpop.permute.xlu0 %2016  ;;  %v2460_v61 = vshll.u32 %v7711_v7, 16  ;;  %v2703_v36 = vrot.slane %v7716_v58, 5 }
 0x3c9   : > { %vm9124_vm0 = vmmov %vm9113_vm4  ;;  %9125 = vst [vmem:[#allocation67_spill] sm:$0xff] %v7729_v28  ;;  %v2466_v52 = vrot.slane %v2464_v22, 7  ;;  %v7740_v53 = vsel %vm9126_vm15, %v7178_v15, %v2015_v24  ;;  %v9128_v50 = vshll.u32 %v7603_v47, 16  ;;  %v2711_v20 = vrot.slane %v7711_v7, 5 }
 0x3ca   : > { %v1940_v18 = vsel %vm9124_vm0, %v7249_v60, %v7704_v32  ;;  %v7734_v17 = vpop.permute.xlu1 %1782  ;;  %v3265_v12 = vsel %vm6417_vm12, %v3142_v49, %v2550_v51  ;;  %vm9127_vm11 = vmmov %vm9118_vm1  ;;  %v2223_v51 = vshll.u32 %v7645_v4, 16  ;;  %v7764_v7 = vrot.slane %v2460_v61, 7 }
 0x3cb   : > { %v2352_v34 = vrot.slane %v1940_v18, 7  ;;  %v7744_v60 = vsel %vm9127_vm11, %v2015_v24, %v7729_v28  ;;  %v2397_v39 = vrot.slane %v9128_v50, 7  ;;  %vm9129_vm3 = vmmov %vm9107_vm10  ;;  %vm9130_vm10 = vcmask 1042432  }
 0x3cc   : > { %v2541_v23 = vrot.slane %v7744_v60, 6  ;;  %v3320_v15 = vsel %vm9130_vm10, %v3264_v63, %v2702_v16  ;;  %v1874_v24 = vpop.permute.xlu0 %1873  ;;  %vm9131_vm2 = vmmov %vm9130_vm10  ;;  %v2864_v50 = vrot.slane %v7740_v53, 4  ;;  %v2865_v58 = vrot.slane %v7744_v60, 4 }
 0x3cd   : > { %v3068_v30 = vsel %vm9129_vm3, %v2928_v0, %v2352_v34  ;;  %v3324_v28 = vsel %vm9131_vm2, %v3265_v12, %v2703_v36  ;;  %vm9132_vm4 = vmmov %vm9122_vm5  ;;  %v2738_v4 = vrot.slane %v2460_v61, 5  ;;  %v2739_v47 = vrot.slane %v2464_v22, 5 }
 0x3ce   : > { %v3110_v49 = vsel %vm6287_vm6, %v3068_v30, %v2466_v52  ;;  %v7762_v34 = vpop.permute.xlu1 %1900  ;;  %v9133_v30 = vshll.u32 %v7496_v46, 16  ;;  %v2712_v16 = vrot.slane %v7683_v31, 5  ;;  %v2581_v36 = vshll.u32 %v1940_v18, 16  ;;  %vm9139_vm0 = vmmov %vm9129_vm3 }
 0x3cf   : > { %v7760_v0 = vsel %vm9132_vm4, %v3110_v49, %v2541_v23  ;;  %vm9134_vm9 = vcmask 1031168   ;;  %v2523_v12 = vrot.slane %v7594_v48, 6  ;;  %v3446_v49 = vsel %vm6514_vm14, %v3320_v15, %v2738_v4  ;;  %vm9141_vm11 = vmmov %vm9132_vm4 }
 0x3d0   : > { %v7769_v52 = vrot.slane %v9133_v30, 5  ;;  %v1911_v23 = vsel %vm9134_vm9, %v9055_v41, %v7762_v34  ;;  %v3447_v22 = vsel %vm6514_vm14, %v3324_v28, %v2739_v47  ;;  %v1990_v63 = vpop.permute.xlu0 %1989  ;;  %v2910_v30 = vsel %vm5840_vm13, %v7581_v5, %v2223_v51  ;;  %vm9143_vm10 = vmmov %vm9131_vm2 }
 0x3d1   : > { %v2334_v61 = vrot.slane %v1911_v23, 7  ;;  %v2617_v18 = vshll.u32 %v7744_v60, 16  ;;  %vm9135_vm1 = vcmask 1043456   ;;  %v9137_v48 = vshll.u32 %v7740_v53, 16 }
 0x3d2   : > { %v3499_v31 = vsel %vm9135_vm1, %v3447_v22, %v2865_v58  ;;  %vm9136_vm7 = vmmov %vm9135_vm1  ;;  %v7786_v46 = vpop.permute.xlu1 %2045  ;;  %vm9138_vm5 = vcmask 769024   ;;  %v2583_v5 = vrot.slane %v2581_v36, 6  ;;  %vm9140_vm15 = vcmask 752640  }
 0x3d3   : > { %v3496_v41 = vsel %vm9136_vm7, %v3446_v49, %v2864_v50  ;;  %v2747_v15 = vrot.slane %v9137_v48, 5  ;;  %v7792_v4 = vsel %vm9138_vm5, %v7457_v1, %v1672_v43  ;;  %v2996_v47 = vsel %vm9139_vm0, %v2910_v30, %v2334_v61  ;;  %vm9148_vm7 = vmmov %vm9135_vm1 }
 0x3d4   : > { %v3605_v28 = vand.u32 %v8995_v38, %v3499_v31  ;;  %v3092_v51 = vsel %vm6287_vm6, %v2996_v47, %v2397_v39  ;;  %v3603_v58 = vand.u32 %v8995_v38, %v3496_v41  ;;  %v2056_v50 = vsel %vm9140_vm15, %v7316_v42, %v7786_v46  ;;  %v1903_v31 = vpop.permute.xlu0 %1902  ;;  %vm9149_vm5 = vmmov %vm9140_vm15 }
 0x3d5   : > { %v2540_v48 = vrot.slane %v7740_v53, 6  ;;  %v3178_v23 = vsel %vm9141_vm11, %v3092_v51, %v2523_v12  ;;  %v2653_v1 = vshll.u32 %v2056_v50, 16  ;;  %v3613_v43 = vand.u32 %v8995_v38, %v7571_v55 }
 0x3d6   : > { %3800 = vmatprep.subr.bf16.mxu0 %v3605_v28  ;;  %v2387_v36 = vshll.u32 %v7792_v4, 16  ;;  %v2748_v39 = vrot.slane %v2617_v18, 5  ;;  %vm9142_vm3 = vcmask 760832   ;;  %v3274_v42 = vsel %vm6417_vm12, %v3178_v23, %v2583_v5  ;;  %v1561_v12 = vpop.permute.xlu1 %1560 }
 0x3d7   : > { %v7811_v49 = vsel %vm9142_vm3, %v7502_v35, %v1874_v24  ;;  %3801 = vmatpush1.bf16.msra.mxu0 %v3603_v58  ;;  %v3360_v61 = vsel %vm9143_vm10, %v3274_v42, %v2712_v16  ;;  %v7816_v22 = vrot.slane %v2653_v1, 6  ;;  %v2874_v55 = vrot.slane %v2056_v50, 4  ;;  %vm9145_vm4 = vmmov %vm9142_vm3 }
 0x3d8   : > { %3882 = vmatprep.subr.bf16.mxu0 %v3613_v43  ;;  %v9144_v30 = vsel %vm6417_vm12, %v7641_v14, %v7556_v13  ;;  %v7827_v35 = vsel %vm9145_vm4, %v7388_v9, %v7734_v17  ;;  %v3456_v24 = vsel %vm6514_vm14, %v3360_v61, %v2748_v39  ;;  %vm9146_vm9 = vcmask 1039360   ;;  %v7845_v9 = vld [vmem:[%s8509_s2] sm:$0x1]  ;;  %vm9153_vm11 = vmmov %vm9142_vm3 }
 0x3d9   : > { %v3356_v41 = vsel %vm9131_vm2, %v9144_v30, %v2711_v20  ;;  %v1570_v16 = vsel %vm9146_vm9, %v7427_v54, %v1561_v12  ;;  %v7840_v20 = vsel %vm9135_vm1, %v3456_v24, %v2874_v55  ;;  %v9147_v17 = vrot.slane %v7697_v62, 4  ;;  %vm9152_vm15 = vmmov %vm9146_vm9 }
 0x3da   : > { %v3455_v47 = vsel %vm6514_vm14, %v3356_v41, %v2747_v15  ;;  %5030 = vmatmul.mubr.msk.bf16.vlgmr.msra.gmra.mxu0 %vm3585_vm8, %v7845_v9  ;;  %v2199_v54 = vshll.u32 %v1570_v16, 16  ;;  %v7852_v15 = vpop.permute.xlu0 %2047  ;;  %v2389_v28 = vrot.slane %v2387_v36, 7  ;;  %v7857_v5 = vsel %vm9149_vm5, %v7704_v32, %v7566_v56  ;;  %v1845_v23 = vpop.permute.xlu1 %1844  ;;  %vm9157_vm3 = vmmov %vm9131_vm2  ;;  %v9163_v41 = vld [vmem:[#allocation36_spill] sm:$0xff] }
 0x3db   : > { %v3523_v14 = vsel %vm9148_vm7, %v3455_v47, %v9147_v17  ;;  %v2280_v51 = vshll.u32 %v7811_v49, 16  ;;  %v9150_v58 = vand.u32 %v8995_v38, %v7664_v26  ;;  %3900 = vmatprep.mubr.bf16.mxu0 %v9012_v59  ;;  %v2253_v1 = vshll.u32 %v7827_v35, 16  ;;  %vm9160_vm10 = vmmov %vm9131_vm2  ;;  %v9167_v17 = vld [vmem:[#allocation46_spill] sm:$0xff] }
 0x3dc   : > { %v3621_v50 = vand.u32 %v8995_v38, %v3523_v14  ;;  %v2515_v43 = vrot.slane %v7827_v35, 6  ;;  %vm9151_vm0 = vcmask 1031168   ;;  %v1854_v32 = vsel %vm9152_vm15, %v7611_v40, %v1845_v23  ;;  %vm9165_vm2 = vmmov %vm9135_vm1  ;;  %v9169_v23 = vld [vmem:[#allocation67_spill] sm:$0xff] }
 0x3dd   : > { %3883 = vmatpush1.bf16.msra.mxu0 %v9150_v58  ;;  %v1912_v36 = vsel %vm9151_vm0, %v7762_v34, %v1903_v31  ;;  %v7873_v56 = vsel %vm9153_vm11, %v7542_v10, %v1990_v63  ;;  %v2226_v26 = vshll.u32 %v1854_v32, 16  ;;  %v2326_v39 = vrot.slane %v1854_v32, 7  ;;  %vm9170_vm1 = vmmov %vm9153_vm11  ;;  %v9172_v32 = vld [vmem:[#allocation21_spill] sm:$0xff] }
 0x3de   : > { %3964 = vmatprep.subr.bf16.mxu0 %v3621_v50  ;;  %v9154_v12 = vrot.slane %v7630_v29, %v9105_v2  ;;  %v2019_v31 = vpop.permute.xlu0 %2018  ;;  %v9155_v40 = vrot.slane %v7012_v11, 5  ;;  %v9156_v10 = vsel %vm6417_vm12, %v7354_v27, %v6968_v33  ;;  %v9158_v61 = vrot.slane %v7514_v37, 5  ;;  %v9162_v11 = vld [vmem:[#allocation34_spill] sm:$0xff]  ;;  %v1961_v47 = vpop.permute.xlu1 %1960  ;;  %vm9179_vm15 = vmmov %vm9165_vm2 }
 0x3df   : > { %v9159_v29 = vsel %vm6417_vm12, %v7276_v57, %v6894_v25  ;;  %v9161_v30 = vrot.slane %v9106_v44, 4  ;;  %v9164_v24 = vsel %vm6514_vm14, %v9162_v11, %v9163_v41  ;;  %v2551_v27 = vrot.slane %v2280_v51, 6  ;;  %vm9185_vm11 = vmmov %vm9157_vm3 }
 0x3e0   : > { %v2902_v34 = vsel %vm5840_vm13, %v9154_v12, %v2199_v54  ;;  %v3348_v63 = vsel %vm9157_vm3, %v9156_v10, %v9155_v40  ;;  %v7900_v55 = vsel %vm9160_vm10, %v9159_v29, %v9158_v61  ;;  %v2335_v37 = vrot.slane %v1912_v36, 7  ;;  %v9175_v12 = vld [vmem:[#allocation43_spill] sm:$0xff] }
 0x3e1   : > { %v7910_v33 = vsel %vm9165_vm2, %v9164_v24, %v9161_v30  ;;  %v2911_v25 = vsel %vm5840_vm13, %v1570_v16, %v2226_v26  ;;  %vm9166_vm4 = vcmask 1040384   ;;  %v2468_v44 = vshll.u32 %v7873_v56, 16  ;;  %v9177_v61 = vld [vmem:[#allocation31_spill] sm:$0xff] }
 0x3e2   : > { %v2964_v57 = vsel %vm9166_vm4, %v2902_v34, %v2326_v39  ;;  %v3619_v14 = vand.u32 %v8995_v38, %v9167_v17  ;;  %v3453_v58 = vsel %vm6514_vm14, %v3348_v63, %v7769_v52  ;;  %vm9168_vm9 = vmmov %vm9166_vm4  ;;  %v7928_v16 = vsel %vm9170_vm1, %v9169_v23, %v2019_v31  ;;  %5032 = vmatmul.mubr.msk.bf16.vlgmr.msra.gmra.mxu0 %vm3585_vm8, %v7845_v9  ;;  %v2069_v31 = vpop.permute.xlu0 %2068  ;;  %v7954_v63 = vpop.permute.xlu1 %2099 }
 0x3e3   : > { %v3084_v54 = vsel %vm6287_vm6, %v2964_v57, %v2389_v28  ;;  %v3000_v50 = vsel %vm9168_vm9, %v2911_v25, %v2335_v37  ;;  %vm9171_vm7 = vcmask 1041408   ;;  %vm9173_vm5 = vcmask 769024   ;;  %v9174_v28 = vld [vmem:[#allocation73_spill] sm:$0xff]  ;;  %3982 = vmatprep.mubr.bf16.mxu0 %v9012_v59  ;;  %v9181_v37 = vld [vmem:[#allocation32_spill] sm:$0xff]  ;;  %vm9195_vm4 = vmmov %vm9179_vm15 }
 0x3e4   : > { %v3146_v36 = vsel %vm9171_vm7, %v3084_v54, %v2515_v43  ;;  %v7933_v26 = vsel %vm9173_vm5, %v9172_v32, %v1961_v47  ;;  %v3109_v39 = vsel %vm6287_vm6, %v9174_v28, %v7764_v7  ;;  %v2398_v52 = vrot.slane %v2253_v1, 7  ;;  %vm9176_vm0 = vmmov %vm9171_vm7  ;;  %3965 = vmatpush1.bf16.msra.mxu0 %v3619_v14  ;;  %v9183_v47 = vld [vmem:[#allocation14_spill] sm:$0xff] }
 0x3e5   : > { %v3629_v34 = vand.u32 %v8995_v38, %v9175_v12  ;;  %v3266_v43 = vsel %vm6417_vm12, %v3146_v36, %v2551_v27  ;;  %v7950_v40 = vsel %vm9176_vm0, %v3109_v39, %v2540_v48  ;;  %v2585_v7 = vshll.u32 %v7857_v5, 16  ;;  %v9188_v36 = vld [vmem:[#allocation15_spill] sm:$0xff]  ;;  %v9189_v12 = vld [vmem:[#allocation54_spill] sm:$0xff]  ;;  %vm9191_vm3 = vmmov %vm9176_vm0 }
 0x3e6   : > { %v2704_v10 = vrot.slane %v7933_v26, 5  ;;  %v9178_v29 = vrot.slane %v9177_v61, 4  ;;  %v9180_v11 = vshll.u32 %v7697_v62, 16  ;;  %v2740_v48 = vrot.slane %v2468_v44, 5  ;;  %v7983_v39 = vpop.permute.xlu0 %2122  ;;  %vm9205_vm7 = vmmov %vm9185_vm11 }
 0x3e7   : > { %v3093_v24 = vsel %vm6287_vm6, %v3000_v50, %v2398_v52  ;;  %v2621_v27 = vshll.u32 %v7928_v16, 16  ;;  %4046 = vmatprep.subr.bf16.mxu0 %v3629_v34  ;;  %v9182_v25 = vshll.u32 %v9181_v37, 16  ;;  %v9184_v54 = vshll.u32 %v9183_v47, 16 }
 0x3e8   : > { %v3517_v30 = vsel %vm9179_vm15, %v3453_v58, %v9178_v29  ;;  %v7962_v41 = vrot.slane %v9180_v11, 6  ;;  %v2524_v14 = vrot.slane %v7811_v49, 6  ;;  %v3328_v62 = vsel %vm9185_vm11, %v3266_v43, %v2704_v10  ;;  %v9186_v58 = vld [vmem:[#allocation19_spill] sm:$0xff]  ;;  %v9190_v43 = vld [vmem:[#allocation58_spill] sm:$0xff]  ;;  %v7991_v29 = vpop.permute.xlu1 %2070  ;;  %vm9213_vm15 = vmmov %vm9195_vm4 }
 0x3e9   : > { %v2607_v57 = vrot.slane %v9182_v25, 6  ;;  %v2611_v17 = vrot.slane %v9184_v54, 6  ;;  %v9187_v23 = vshll.u32 %v9186_v58, 16  ;;  %v2866_v50 = vrot.slane %v7928_v16, 4  ;;  %v9193_v25 = vld [vmem:[#allocation39_spill] sm:$0xff]  ;;  %vm9214_vm11 = vmmov %vm9205_vm7 }
 0x3ea   : > { %v3448_v28 = vsel %vm6514_vm14, %v3328_v62, %v2740_v48  ;;  %v2342_v34 = vrot.slane %v9189_v12, 7  ;;  %v2424_v10 = vshll.u32 %v9190_v43, 16  ;;  %v2587_v61 = vrot.slane %v2585_v7, 6  ;;  %v9196_v62 = vld [vmem:[#allocation52_spill] sm:$0xff]  ;;  %5034 = vmatmul.mubr.msk.bf16.vlgmr.msra.gmra.mxu0 %vm3585_vm8, %v7845_v9  ;;  %v9201_v12 = vld [vmem:[#allocation59_spill] sm:$0xff]  ;;  %v9202_v43 = vld [vmem:[#allocation22_spill] sm:$0xff] }
 0x3eb   : > { %v2918_v32 = vsel %vm5840_vm13, %v9188_v36, %v9187_v23  ;;  %v3182_v11 = vsel %vm9191_vm3, %v3093_v24, %v2524_v14  ;;  %vm9192_vm10 = vcmask 752640   ;;  %v2749_v37 = vrot.slane %v2621_v27, 5  ;;  %v2127_v36 = vpop.permute.xlu0 %2126  ;;  %4064 = vmatprep.mubr.bf16.mxu0 %v9012_v59 }
 0x3ec   : > { %v7997_v48 = vsel %vm9192_vm10, %v7786_v46, %v7852_v15  ;;  %vm9194_vm2 = vcmask 490496   ;;  %v3502_v54 = vsel %vm9195_vm4, %v3448_v28, %v2866_v50  ;;  %v2428_v58 = vshll.u32 %v9196_v62, 16  ;;  %v9198_v46 = vld [vmem:[#allocation42_spill] sm:$0xff]  ;;  %v9200_v28 = vld [vmem:[#allocation64_spill] sm:$0xff] }
 0x3ed   : > { %v2082_v47 = vsel %vm9194_vm2, %v9193_v25, %v2069_v31  ;;  %v2713_v7 = vrot.slane %v7873_v56, 5  ;;  %vm9197_vm9 = vmmov %vm9194_vm2  ;;  %v3607_v14 = vand.u32 %v8995_v38, %v3502_v54  ;;  %vm9199_vm1 = vcmask 482304  }
 0x3ee   : > { %v2083_v24 = vsel %vm9197_vm9, %v2069_v31, %v7991_v29  ;;  %v8012_v15 = vsel %vm9199_vm1, %v9198_v46, %v7954_v63  ;;  %v3617_v23 = vand.u32 %v8995_v38, %v3517_v30  ;;  %v3275_v50 = vsel %vm6417_vm12, %v3182_v11, %v2587_v61  ;;  %v9203_v46 = vld [vmem:[#allocation38_spill] sm:$0xff]  ;;  %v2125_v30 = vpop.permute.xlu1 %2124  ;;  %vm9206_vm5 = vmmov %vm9199_vm1 }
 0x3ef   : > { %v3461_v31 = vsel %vm6514_vm14, %v9201_v12, %v9200_v28  ;;  %v2343_v25 = vrot.slane %v9202_v43, 7  ;;  %v2875_v54 = vrot.slane %v7997_v48, 4  ;;  %v2718_v62 = vrot.slane %v2082_v47, 5  ;;  %3842 = vmatpush1.bf16.msra.mxu1 %v3607_v14  ;;  %vm9207_vm0 = vmmov %vm9199_vm1  ;;  %v9211_v43 = vld [vmem:[#allocation68_spill] sm:$0xff] }
 0x3f0   : > { %v9204_v13 = vand.u32 %v8995_v38, %v9203_v46  ;;  %v3364_v52 = vsel %vm9205_vm7, %v3275_v50, %v2713_v7  ;;  %v2719_v42 = vrot.slane %v2083_v24, 5  ;;  %3923 = vmatprep.subr.bf16.mxu1 %v3617_v23  ;;  %v8031_v61 = vsel %vm9206_vm5, %v7983_v39, %v2125_v30  ;;  %v9208_v24 = vld [vmem:[#allocation24_spill] sm:$0xff]  ;;  %v9210_v50 = vld [vmem:[#allocation61_spill] sm:$0xff]  ;;  %vm9217_vm2 = vmmov %vm9205_vm7 }
 0x3f1   : > { %v8034_v11 = vsel %vm9207_vm0, %v2125_v30, %v2127_v36  ;;  %v3457_v47 = vsel %vm6514_vm14, %v3364_v52, %v2749_v37  ;;  %v2426_v28 = vrot.slane %v2424_v10, 7  ;;  %v2771_v14 = vshll.u32 %v8012_v15, 16  ;;  %v9212_v37 = vld [vmem:[#allocation51_spill] sm:$0xff]  ;;  %vm9218_vm4 = vmmov %vm9207_vm0 }
 0x3f2   : > { %4047 = vmatpush1.bf16.msra.mxu0 %v9204_v13  ;;  %v8039_v13 = vrot.slane %v2428_v58, 7  ;;  %v3615_v7 = vand.u32 %v8995_v38, %v7910_v33  ;;  %v9209_v23 = vshll.u32 %v9208_v24, 16  ;;  %v3280_v52 = vsel %vm6417_vm12, %v9211_v43, %v2607_v57  ;;  %5031 = vmatmul.mubr.msk.bf16.vlgmr.msra.gmra.mxu1 %vm3585_vm8, %v7845_v9  ;;  %v2102_v33 = vpop.permute.xlu0 %2101  ;;  %v8062_v57 = vpop.permute.xlu1 %2128  ;;  %vm9223_vm9 = vmmov %vm9207_vm0 }
 0x3f3   : > { %v3281_v10 = vsel %vm6417_vm12, %v9212_v37, %v2611_v17  ;;  %v3529_v58 = vsel %vm9213_vm15, %v3457_v47, %v2875_v54  ;;  %v3384_v46 = vsel %vm9214_vm11, %v3280_v52, %v2718_v62  ;;  %v2879_v30 = vrot.slane %v8031_v61, 4  ;;  %3941 = vmatprep.mubr.bf16.mxu1 %v9012_v59  ;;  %v9219_v47 = vld [vmem:[#allocation20_spill] sm:$0xff]  ;;  %vm9224_vm1 = vmmov %vm9213_vm15 }
 0x3f4   : > { %v2919_v12 = vsel %vm5840_vm13, %v9210_v50, %v9209_v23  ;;  %v2880_v24 = vrot.slane %v8034_v11, 4  ;;  %3924 = vmatpush1.bf16.msra.mxu1 %v3615_v7  ;;  %v3625_v23 = vand.u32 %v8995_v38, %v3529_v58  ;;  %vm9215_vm3 = vcmask 1040384   ;;  %vm9225_vm7 = vmmov %vm9224_vm1 }
 0x3f5   : > { %v3028_v17 = vsel %vm9215_vm3, %v2918_v32, %v2342_v34  ;;  %vm9216_vm10 = vmmov %vm9215_vm3  ;;  %v3388_v54 = vsel %vm9217_vm2, %v3281_v10, %v2719_v42  ;;  %v8070_v62 = vsel %vm9218_vm4, %v2127_v36, %v8062_v57  ;;  %v2531_v43 = vrot.slane %v9219_v47, 6  ;;  %5036 = vmatmul.mubr.msk.bf16.vlgmr.msra.gmra.mxu0 %vm3585_vm8, %v7845_v9  ;;  %v9222_v10 = vld [vmem:[#allocation69_spill] sm:$0xff] }
 0x3f6   : > { %v3032_v50 = vsel %vm9216_vm10, %v2919_v12, %v2343_v25  ;;  %v3100_v7 = vsel %vm6287_vm6, %v3028_v17, %v2426_v28  ;;  %v2773_v37 = vrot.slane %v2771_v14, 5  ;;  %4005 = vmatprep.subr.bf16.mxu1 %v3625_v23  ;;  %v9220_v32 = vshll.u32 %v7740_v53, 16  ;;  %v9221_v25 = vld [vmem:[#allocation28_spill] sm:$0xff]  ;;  %v2073_v12 = vpop.permute.xlu0 %2072  ;;  %v2104_v14 = vpop.permute.xlu1 %2103  ;;  %4146 = vmatprep.mubr.bf16.mxu0 %v9012_v59  ;;  %vm9227_vm0 = vmmov %vm9224_vm1  ;;  %v9231_v47 = vld [vmem:[#allocation37_spill] sm:$0xff] }
 0x3f7   : > { %v3101_v52 = vsel %vm6287_vm6, %v3032_v50, %v8039_v13  ;;  %v2432_v42 = vshll.u32 %v7933_v26, 16  ;;  %v3462_v36 = vsel %vm6514_vm14, %v3384_v46, %v9221_v25  ;;  %v2881_v28 = vrot.slane %v8070_v62, 4  ;;  %vm9233_vm15 = vmmov %vm9217_vm2 }
 0x3f8   : > { %v2615_v34 = vrot.slane %v9220_v32, 6  ;;  %v8090_v13 = vsel %vm9223_vm9, %v9222_v10, %v7983_v39  ;;  %v3544_v53 = vsel %vm9224_vm1, %v3462_v36, %v2880_v24  ;;  %v3541_v26 = vsel %vm9225_vm7, %v3461_v31, %v2879_v30  ;;  %v9228_v39 = vld [vmem:[#allocation45_spill] sm:$0xff]  ;;  %vm9234_vm11 = vmmov %vm9218_vm4 }
 0x3f9   : > { %v3463_v58 = vsel %vm6514_vm14, %v3388_v54, %v2773_v37  ;;  %v2619_v46 = vrot.slane %v2617_v18, 6  ;;  %vm9226_vm5 = vcmask 490496   ;;  %v9229_v50 = vrot.slane %v9228_v39, 5  ;;  %v9230_v24 = vld [vmem:[#allocation49_spill] sm:$0xff]  ;;  %vm9235_vm3 = vmmov %vm9218_vm4 }
 0x3fa   : > { %v2084_v23 = vsel %vm9226_vm5, %v7991_v29, %v2073_v12  ;;  %v3547_v17 = vsel %vm9227_vm0, %v3463_v58, %v2881_v28  ;;  %v9232_v31 = vsel %vm6417_vm12, %v9230_v24, %v9231_v47  ;;  %v2344_v54 = vrot.slane %v7811_v49, 7  ;;  %5033 = vmatmul.mubr.msk.bf16.vlgmr.msra.gmra.mxu1 %vm3585_vm8, %v7845_v9  ;;  %v2106_v36 = vpop.permute.xlu0 %2105  ;;  %vm9238_vm2 = vmmov %vm9226_vm5  ;;  %v9242_v24 = vld [vmem:[#allocation40_spill] sm:$0xff] }
 0x3fb   : > { %v8110_v30 = vsel %vm9233_vm15, %v9232_v31, %v9229_v50  ;;  %v3623_v60 = vand.u32 %v8995_v38, %v7840_v20  ;;  %v8116_v18 = vsel %vm9234_vm11, %v2102_v33, %v2104_v14  ;;  %v3637_v29 = vand.u32 %v8995_v38, %v3547_v17  ;;  %v9236_v20 = vld [vmem:[#allocation33_spill] sm:$0xff]  ;;  %v2075_v17 = vpop.permute.xlu1 %2074  ;;  %4023 = vmatprep.mubr.bf16.mxu1 %v9012_v59  ;;  %vm9244_vm1 = vmmov %vm9227_vm0 }
 0x3fc   : > { %v2878_v37 = vrot.slane %v8090_v13, 4  ;;  %v8122_v32 = vsel %vm9235_vm3, %v7954_v63, %v2102_v33  ;;  %v3633_v25 = vand.u32 %v8995_v38, %v3541_v26  ;;  %v3635_v28 = vand.u32 %v8995_v38, %v3544_v53  ;;  %vm9245_vm7 = vmmov %vm9233_vm15 }
 0x3fd   : > { %v2532_v10 = vrot.slane %v9236_v20, 6  ;;  %v2434_v58 = vrot.slane %v2432_v42, 7  ;;  %v2720_v39 = vrot.slane %v2084_v23, 5  ;;  %4006 = vmatpush1.bf16.msra.mxu1 %v3623_v60  ;;  %4128 = vmatprep.subr.bf16.mxu0 %v3637_v29  ;;  %vm9237_vm10 = vcmask 1041408   ;;  %vm9246_vm5 = vmmov %vm9245_vm7 }
 0x3fe   : > { %v3210_v50 = vsel %vm9237_vm10, %v3100_v7, %v2531_v43  ;;  %v2779_v63 = vshll.u32 %v8116_v18, 16  ;;  %4087 = vmatprep.subr.bf16.mxu1 %v3633_v25  ;;  %4129 = vmatpush1.bf16.msra.mxu0 %v3635_v28  ;;  %v2085_v33 = vsel %vm9238_vm2, %v2073_v12, %v2075_v17  ;;  %vm9239_vm4 = vmmov %vm9237_vm10  ;;  %v2920_v42 = vsel %vm5840_vm13, %v7792_v4, %v2253_v1  ;;  %v9241_v7 = vld [vmem:[#allocation13_spill] sm:$0xff]  ;;  %v2133_v1 = vpop.permute.xlu0 %2132 }
 0x3ff   : > { %v3214_v26 = vsel %vm9239_vm4, %v3101_v52, %v2532_v10  ;;  %v2775_v53 = vshll.u32 %v8122_v32, 16  ;;  %v2721_v23 = vrot.slane %v2085_v33, 5  ;;  %vm9240_vm9 = vcmask 1040384   ;;  %vm9247_vm0 = vmmov %vm9235_vm3 }
 0x400   : > { %v3036_v43 = vsel %vm9240_vm9, %v2920_v42, %v2344_v54  ;;  %v9243_v12 = vsel %vm6514_vm14, %v9241_v7, %v9242_v24  ;;  %v3282_v47 = vsel %vm6417_vm12, %v3210_v50, %v2615_v34  ;;  %v3283_v4 = vsel %vm6417_vm12, %v3214_v26, %v2619_v46  ;;  %vm9248_vm15 = vmmov %vm9247_vm0 }
 0x401   : > { %v3538_v52 = vsel %vm9244_vm1, %v9243_v12, %v2878_v37  ;;  %v2533_v31 = vrot.slane %v7873_v56, 6  ;;  %v3102_v60 = vsel %vm6287_vm6, %v3036_v43, %v2434_v58  ;;  %v3392_v54 = vsel %vm9245_vm7, %v3282_v47, %v2720_v39  ;;  %5038 = vmatmul.mubr.msk.bf16.vlgmr.msra.gmra.mxu0 %vm3585_vm8, %v7845_v9  ;;  %v2131_v37 = vpop.permute.xlu1 %2130  ;;  %vm9249_vm11 = vmmov %vm9247_vm0 }
 0x402   : > { %v3396_v29 = vsel %vm9246_vm5, %v3283_v4, %v2721_v23  ;;  %v2781_v25 = vrot.slane %v2779_v63, 5  ;;  %v8159_v34 = vsel %vm9247_vm0, %v2104_v14, %v2106_v36  ;;  %v8163_v46 = vsel %vm9248_vm15, %v8062_v57, %v2131_v37  ;;  %4228 = vmatprep.mubr.bf16.mxu0 %v9012_v59  ;;  %5035 = vmatmul.mubr.msk.bf16.vlgmr.msra.gmra.mxu1 %vm3585_vm8, %v7845_v9  ;;  %v2146_v14 = vpop.permute.xlu0 %2145  ;;  %vm9250_vm3 = vmmov %vm9239_vm4 }
 0x403   : > { %v8166_v28 = vsel %vm9249_vm11, %v2131_v37, %v2133_v1  ;;  %v2777_v20 = vrot.slane %v2775_v53, 5  ;;  %v3631_v10 = vand.u32 %v8995_v38, %v3538_v52  ;;  %v2882_v58 = vrot.slane %v8163_v46, 4  ;;  %4105 = vmatprep.mubr.bf16.mxu1 %v9012_v59  ;;  %vm9251_vm10 = vmmov %vm9244_vm1 }
 0x404   : > { %v2883_v39 = vrot.slane %v8166_v28, 4  ;;  %v3465_v57 = vsel %vm6514_vm14, %v3396_v29, %v2781_v25  ;;  %v3218_v36 = vsel %vm9250_vm3, %v3102_v60, %v2533_v31  ;;  %v2783_v63 = vshll.u32 %v8159_v34, 16  ;;  %vm9252_vm2 = vmmov %vm9244_vm1 }
 0x405   : > { %v3464_v50 = vsel %vm6514_vm14, %v3392_v54, %v2777_v20  ;;  %4088 = vmatpush1.bf16.msra.mxu1 %v3631_v10  ;;  %v2077_v33 = vpop.permute.xlu1 %2076  ;;  %v2623_v42 = vrot.slane %v2621_v27, 6  ;;  %vm9253_vm4 = vcmask 490496   ;;  %v2353_v7 = vrot.slane %v7857_v5, 7  ;;  %vm9254_vm9 = vmmov %vm9246_vm5 }
 0x406   : > { %v3553_v26 = vsel %vm9251_vm10, %v3465_v57, %v2883_v39  ;;  %v3550_v53 = vsel %vm9252_vm2, %v3464_v50, %v2882_v58  ;;  %v2086_v23 = vsel %vm9253_vm4, %v2075_v17, %v2077_v33  ;;  %v2929_v24 = vsel %vm5840_vm13, %v7827_v35, %v2280_v51  ;;  %v2135_v4 = vpop.permute.xlu0 %2134  ;;  %vm9255_vm1 = vmmov %vm9247_vm0  ;;  %v9256_v51 = vld [vmem:[#allocation16_spill] sm:$0xff] }
 0x407   : > { %v3641_v43 = vand.u32 %v8995_v38, %v3553_v26  ;;  %v2722_v12 = vrot.slane %v2086_v23, 5  ;;  %v2470_v52 = vrot.slane %v2468_v44, 7  ;;  %v2795_v27 = vshll.u32 %v8090_v13, 16  ;;  %vm9259_vm5 = vmmov %vm9252_vm2 }
 0x408   : > { %v2799_v47 = vshll.u32 %v8031_v61, 16  ;;  %v3284_v17 = vsel %vm6417_vm12, %v3218_v36, %v2623_v42  ;;  %v2785_v5 = vrot.slane %v2783_v63, 5  ;;  %v8201_v31 = vsel %vm9255_vm1, %v2133_v1, %v2135_v4  ;;  %vm9263_vm0 = vmmov %vm9252_vm2 }
 0x409   : > { %4169 = vmatprep.subr.bf16.mxu1 %v3641_v43  ;;  %v3400_v49 = vsel %vm9254_vm9, %v3284_v17, %v2722_v12  ;;  %v3639_v21 = vand.u32 %v8995_v38, %v3550_v53  ;;  %v2148_v35 = vpop.permute.xlu1 %2147  ;;  %v2727_v56 = vrot.slane %v9256_v51, 5  ;;  %v2884_v44 = vrot.slane %v8201_v31, 4  ;;  %vm9272_vm10 = vmmov %vm9263_vm0  ;;  %v9276_v51 = vld [vmem:[#allocation71_spill] sm:$0xff] }
 0x40a   : > { %vm9257_vm13 = vcmask 474112   ;;  %vm9258_vm7 = vcmask 1040384   ;;  %v2542_v60 = vrot.slane %v7928_v16, 6  ;;  %v3466_v54 = vsel %vm6514_vm14, %v3400_v49, %v2785_v5  ;;  %5037 = vmatmul.mubr.msk.bf16.vlgmr.msra.gmra.mxu1 %vm3585_vm8, %v7845_v9  ;;  %v2152_v10 = vpop.permute.xlu0 %2151  ;;  %vm9273_vm2 = vmmov %vm9263_vm0 }
 0x40b   : > { %v2165_v61 = vsel %vm9257_vm13, %v2146_v14, %v2148_v35  ;;  %v3072_v13 = vsel %vm9258_vm7, %v2929_v24, %v2353_v7  ;;  %v2728_v1 = vrot.slane %v8012_v15, 5  ;;  %v2797_v37 = vrot.slane %v2795_v27, 5  ;;  %4170 = vmatpush1.bf16.msra.mxu1 %v3639_v21  ;;  %4187 = vmatprep.mubr.bf16.mxu1 %v9012_v59  ;;  %v9260_v15 = vld [vmem:[#allocation26_spill] sm:$0xff]  ;;  %v9261_v14 = vld [vmem:[#allocation47_spill] sm:$0xff]  ;;  %vm9264_vm15 = vmmov %vm9257_vm13 }
 0x40c   : > { %v2885_v29 = vrot.slane %v2165_v61, 4  ;;  %v2803_v25 = vshll.u32 %v8034_v11, 16  ;;  %v3556_v20 = vsel %vm9259_vm5, %v3466_v54, %v2884_v44  ;;  %v3111_v58 = vsel %vm6287_vm6, %v3072_v13, %v2470_v52  ;;  %vm9265_vm11 = vmmov %vm9257_vm13  ;;  %v9277_v44 = vld [vmem:[#allocation41_spill] sm:$0xff] }
 0x40d   : > { %v2801_v39 = vrot.slane %v2799_v47, 5  ;;  %v2150_v16 = vpop.permute.xlu1 %2149  ;;  %v9262_v57 = vsel %vm6514_vm14, %v9260_v15, %v9261_v14  ;;  %v3643_v36 = vand.u32 %v8995_v38, %v3556_v20  ;;  %v2657_v50 = vshll.u32 %v7997_v48, 16  ;;  %vm9266_vm6 = vmmov %vm9250_vm3 }
 0x40e   : > { %v3559_v11 = vsel %vm9263_vm0, %v9262_v57, %v2885_v29  ;;  %v2166_v63 = vsel %vm9264_vm15, %v2148_v35, %v2150_v16  ;;  %v2167_v3 = vsel %vm9265_vm11, %v2150_v16, %v2152_v10  ;;  %v8231_v26 = vsel %vm9266_vm6, %v3111_v58, %v2542_v60  ;;  %vm9268_vm3 = vmmov %vm9254_vm9  ;;  %v2156_v12 = vpop.permute.xlu0 %2155 }
 0x40f   : > { %v3645_v33 = vand.u32 %v8995_v38, %v3559_v11  ;;  %v2807_v42 = vshll.u32 %v8070_v62, 16  ;;  %v2886_v53 = vrot.slane %v2166_v63, 4  ;;  %v2887_v23 = vrot.slane %v2167_v3, 4  ;;  %vm9274_vm4 = vmmov %vm9265_vm11 }
 0x410   : > { %v9267_v43 = vsel %vm6417_vm12, %v7536_v8, %v7718_v6  ;;  %v2805_v7 = vrot.slane %v2803_v25, 5  ;;  %v2811_v24 = vshll.u32 %v8163_v46, 16  ;;  %v3469_v52 = vsel %vm6514_vm14, %v8110_v30, %v2797_v37  ;;  %v9269_v8 = vld [vmem:[#allocation18_spill] sm:$0xff]  ;;  %v9270_v6 = vld [vmem:[#allocation35_spill] sm:$0xff]  ;;  %vm9275_vm9 = vmmov %vm9274_vm4 }
 0x411   : > { %v3424_v48 = vsel %vm9268_vm3, %v9267_v43, %v2728_v1  ;;  %4210 = vmatprep.subr.bf16.mxu0 %v3645_v33  ;;  %v3470_v62 = vsel %vm6514_vm14, %v7900_v55, %v2801_v39  ;;  %v2729_v27 = vrot.slane %v8122_v32, 5  ;;  %v9271_v47 = vsel %vm6514_vm14, %v9269_v8, %v9270_v6  ;;  %v2154_v46 = vpop.permute.xlu1 %2153  ;;  %vm9279_vm1 = vmmov %vm9268_vm3 }
 0x412   : > { %v3562_v17 = vsel %vm9272_vm10, %v9271_v47, %v2886_v53  ;;  %4211 = vmatpush1.bf16.msra.mxu0 %v3643_v36  ;;  %v3565_v4 = vsel %vm9273_vm2, %v3469_v52, %v2887_v23  ;;  %v2168_v5 = vsel %vm9274_vm4, %v2152_v10, %v2154_v46  ;;  %v2169_v30 = vsel %vm9275_vm9, %v2154_v46, %v2156_v12  ;;  %v2160_v1 = vpop.permute.xlu0 %2159  ;;  %vm9281_vm13 = vmmov %vm9279_vm1 }
 0x413   : > { %v3649_v49 = vand.u32 %v8995_v38, %v3565_v4  ;;  %v3647_v55 = vand.u32 %v8995_v38, %v3562_v17  ;;  %v2809_v32 = vrot.slane %v2807_v42, 5  ;;  %v2888_v21 = vrot.slane %v2168_v5, 4  ;;  %5039 = vmatmul.mubr.msk.bf16.vlgmr.msra.gmra.mxu1 %vm3585_vm8, %v7845_v9  ;;  %vm9282_vm7 = vmmov %vm9263_vm0  ;;  %v9295_v4 = vld [vmem:[#allocation4_spill] sm:$0xff] }
 0x414   : > { %v2889_v35 = vrot.slane %v2169_v30, 4  ;;  %v9278_v61 = vsel %vm6417_vm12, %v9276_v51, %v9277_v44  ;;  %v2813_v60 = vrot.slane %v2811_v24, 5  ;;  %v2815_v54 = vshll.u32 %v8166_v28, 16  ;;  %4269 = vmatprep.mubr.bf16.mxu1 %v9012_v59  ;;  %vm9283_vm5 = vmmov %vm9263_vm0 }
 0x415   : > { %v3420_v13 = vsel %vm9279_vm1, %v9278_v61, %v2727_v56  ;;  %v2819_v29 = vshll.u32 %v8201_v31, 16  ;;  %5040 = vmatmul.mubr.msk.bf16.vlgmr.msra.gmra.mxu0 %vm3585_vm8, %v7845_v9  ;;  %v2659_v25 = vrot.slane %v2657_v50, 6  ;;  %v9280_v56 = vsel %vm6417_vm12, %v7950_v40, %v7962_v41  ;;  %4251 = vmatprep.subr.bf16.mxu1 %v3649_v49  ;;  %v2158_v20 = vpop.permute.xlu1 %2157  ;;  %vm9284_vm0 = vmmov %vm9274_vm4 }
 0x416   : > { %v3471_v37 = vsel %vm6514_vm14, %v3420_v13, %v2805_v7  ;;  %v3428_v28 = vsel %vm9281_vm13, %v9280_v56, %v2729_v27  ;;  %v3568_v31 = vsel %vm9282_vm7, %v3470_v62, %v2888_v21  ;;  %4252 = vmatpush1.bf16.msra.mxu1 %v3647_v55  ;;  %v2170_v58 = vsel %vm9284_vm0, %v2156_v12, %v2158_v20  ;;  %vm9285_vm15 = vmmov %vm9284_vm0  ;;  %v2164_v63 = vpop.permute.xlu0 %2163  ;;  %v9296_v55 = vld [vmem:[#allocation5_spill] sm:$0xff] }
 0x417   : > { %v3571_v10 = vsel %vm9283_vm5, %v3471_v37, %v2889_v35  ;;  %v2171_v39 = vsel %vm9285_vm15, %v2158_v20, %v2160_v1  ;;  %v3651_v15 = vand.u32 %v8995_v38, %v3568_v31  ;;  %v2730_v40 = vrot.slane %v8116_v18, 5  ;;  %4310 = vmatprep.mubr.bf16.mxu0 %v9012_v59  ;;  %vm9286_vm11 = vmmov %vm9273_vm2  ;;  %v9298_v20 = vld [vmem:[#allocation7_spill] sm:$0xff] }
 0x418   : > { %v3653_v16 = vand.u32 %v8995_v38, %v3571_v10  ;;  %v2731_v41 = vrot.slane %v8159_v34, 5  ;;  %v2890_v14 = vrot.slane %v2170_v58, 4  ;;  %v2891_v57 = vrot.slane %v2171_v39, 4  ;;  %vm9287_vm6 = vmmov %vm9273_vm2 }
 0x419   : > { %v3472_v11 = vsel %vm6514_vm14, %v3424_v48, %v2809_v32  ;;  %v2817_v36 = vrot.slane %v2815_v54, 5  ;;  %v2821_v50 = vrot.slane %v2819_v29, 5  ;;  %v3473_v3 = vsel %vm6514_vm14, %v3428_v28, %v2813_v60  ;;  %v2162_v33 = vpop.permute.xlu1 %2161  ;;  %vm9288_vm3 = vmmov %vm9284_vm0 }
 0x41a   : > { %4292 = vmatprep.subr.bf16.mxu0 %v3653_v16  ;;  %v3293_v18 = vsel %vm6417_vm12, %v8231_v26, %v2659_v25  ;;  %v3574_v34 = vsel %vm9286_vm11, %v3472_v11, %v2890_v14  ;;  %v3577_v42 = vsel %vm9287_vm6, %v3473_v3, %v2891_v57  ;;  %v2172_v53 = vsel %vm9288_vm3, %v2160_v1, %v2162_v33  ;;  %vm9289_vm10 = vmmov %vm9284_vm0  ;;  %v8329_v47 = vpop.permute.xlu0 %4443  ;;  %v9297_v1 = vld [vmem:[#allocation6_spill] sm:$0xff]  ;;  %v9299_v3 = vld [vmem:[#allocation8_spill] sm:$0xff] }
 0x41b   : > { %4293 = vmatpush1.bf16.msra.mxu0 %v3651_v15  ;;  %v2173_v23 = vsel %vm9289_vm10, %v2162_v33, %v2164_v63  ;;  %v3657_v43 = vand.u32 %v8995_v38, %v3577_v42  ;;  %v3655_v48 = vand.u32 %v8995_v38, %v3574_v34  ;;  %v9290_v7 = vsel %vm6417_vm12, %v7760_v0, %v7816_v22  ;;  %vm9291_vm2 = vmmov %vm9279_vm1 }
 0x41c   : > { %v3432_v26 = vsel %vm9291_vm2, %v9290_v7, %v2730_v40  ;;  %vm9292_vm4 = vmmov %vm9279_vm1  ;;  %v2892_v12 = vrot.slane %v2172_v53, 4  ;;  %v2893_v52 = vrot.slane %v2173_v23, 4  ;;  %5041 = vmatmul.mubr.msk.bf16.vlgmr.msra.gmra.mxu1 %vm3585_vm8, %v7845_v9  ;;  %v4491_v5 = vrot.slane %v9295_v4, 4  ;;  %v9300_v23 = vld [vmem:[#allocation9_spill] sm:$0xff] }
 0x41d   : > { %v3436_v24 = vsel %vm9292_vm4, %v3293_v18, %v2731_v41  ;;  %v3474_v62 = vsel %vm6514_vm14, %v3432_v26, %v2817_v36  ;;  %vm9293_vm9 = vmmov %vm9283_vm5  ;;  %4333 = vmatprep.subr.bf16.mxu1 %v3657_v43  ;;  %4351 = vmatprep.mubr.bf16.mxu1 %v9012_v59  ;;  %v8327_v19 = vpop.permute.xlu1 %4403  ;;  %v4492_v32 = vrot.slane %v9296_v55, 4  ;;  %v4493_v37 = vrot.slane %v9297_v1, 4 }
 0x41e   : > { %5042 = vmatmul.mubr.msk.bf16.vlgmr.msra.gmra.mxu0 %vm3585_vm8, %v7845_v9  ;;  %v3475_v45 = vsel %vm6514_vm14, %v3436_v24, %v2821_v50  ;;  %v3580_v0 = vsel %vm9293_vm9, %v3474_v62, %v2892_v12  ;;  %vm9294_vm12 = vmmov %vm9283_vm5  ;;  %4334 = vmatpush1.bf16.msra.mxu1 %v3655_v48  ;;  %v3697_v6 = vpop.f32.mrf.mxu1  ;;  %v4494_v10 = vrot.slane %v9298_v20, 4  ;;  %v4495_v18 = vrot.slane %v9299_v3, 4 }
 0x41f   : > { %v3583_v22 = vsel %vm9294_vm12, %v3475_v45, %v2893_v52  ;;  %v3659_v8 = vand.u32 %v8995_v38, %v3580_v0  ;;  %4392 = vmatprep.mubr.bf16.mxu0 %v9012_v59  ;;  %v4406_v17 = vmul.f32 %v8327_v19, %v3697_v6  ;;  %v4496_v43 = vrot.slane %v9300_v23, 4 }
 0x420   : > { %v3661_v27 = vand.u32 %v8995_v38, %v3583_v22  ;;  %v3699_v46 = vpop.f32.mrf.mxu1  ;;  %v9301_v22 = vld [vmem:[#allocation10_spill] sm:$0xff] }
 0x421   : > { %v4407_v38 = vmul.f32 %v8327_v19, %v3699_v46  ;;  %v4446_v59 = vadd.f32 %v8329_v47, %v4406_v17 }
 0x422   : > { %4374 = vmatprep.subr.bf16.mxu0 %v3661_v27  ;;  %v3701_v30 = vpop.f32.mrf.mxu1  ;;  %v4497_v27 = vrot.slane %v9301_v22, 4 }
 0x423   : > { %4375 = vmatpush1.bf16.msra.mxu0 %v3659_v8  ;;  %v4447_v49 = vadd.f32 %v8329_v47, %v4407_v38  ;;  %v9302_v38 = vld [vmem:[#allocation11_spill] sm:$0xff] }
 0x424   : > { %5043 = vmatmul.mubr.msk.bf16.vlgmr.msra.gmra.mxu1 %vm3585_vm8, %v7845_v9  ;;  %v3702_v21 = vpop.f32.mrf.mxu1 }
 0x425   : > { %v4510_v35 = vadd.f32 %v4492_v32, %v4447_v49 }
 0x426   : > { %5044 = vmatmul.mubr.msk.bf16.vlgmr.msra.gmra.mxu0 %vm3585_vm8, %v7845_v9  ;;  %v4509_v9 = vadd.f32 %v4491_v5, %v4446_v59  ;;  %v4498_v59 = vrot.slane %v9302_v38, 4 }
 0x427   : > { %v4519_v44 = vmax.f32 %v4510_v35, 0.0 }
 0x428   : > { %v4518_v51 = vmax.f32 %v4509_v9, 0.0 }
 0x42a   : > { %v4536_v61 = vcombine.low %v4518_v51, %v4519_v44 }
 0x42c   : > { %v4546_v41 = vrot.slane %v4536_v61, %v9105_v2 }
 0x45d   : > { %v3738_v13 = vpop.f32.mrf.mxu0 }
 0x45e   : > { %v4408_v60 = vmul.f32 %v8327_v19, %v3738_v13 }
 0x45f   : > { %v3740_v54 = vpop.f32.mrf.mxu0 }
 0x460   : > { %v4448_v29 = vadd.f32 %v8329_v47, %v4408_v60  ;;  %v4409_v25 = vmul.f32 %v8327_v19, %v3740_v54 }
 0x461   : > { %v3742_v56 = vpop.f32.mrf.mxu0 }
 0x462   : > { %v4511_v28 = vadd.f32 %v4493_v37, %v4448_v29  ;;  %v4449_v31 = vadd.f32 %v8329_v47, %v4409_v25 }
 0x463   : > { %v3743_v58 = vpop.f32.mrf.mxu0 }
 0x464   : > { %v4512_v39 = vadd.f32 %v4494_v10, %v4449_v31  ;;  %v4520_v16 = vmax.f32 %v4511_v28, 0.0 }
 0x466   : > { %v4521_v15 = vmax.f32 %v4512_v39, 0.0 }
 0x468   : > { %v4537_v40 = vcombine.low %v4520_v16, %v4521_v15  ;;  %v4608_v16 = vrot.slane %v9296_v55, 5 }
 0x46a   : > { %v4553_v14 = vrot.slane %v4537_v40, %v9105_v2 }
 0x46c   : > { %v4568_v57 = vcombine.low %v4546_v41, %v4553_v14 }
 0x46e   : > { %v4576_v37 = vrot.slane %v4568_v57, %v9105_v2  ;;  %v9303_v57 = vld [vmem:[#allocation12_spill] sm:$0xff] }
 0x47d   : > { %v3779_v11 = vpop.f32.mrf.mxu1 }
 0x47e   : > { %v4410_v36 = vmul.f32 %v8327_v19, %v3779_v11  ;;  %v4499_v11 = vrot.slane %v9303_v57, 4 }
 0x47f   : > { %v3781_v50 = vpop.f32.mrf.mxu1 }
 0x480   : > { %v4450_v63 = vadd.f32 %v8329_v47, %v4410_v36  ;;  %v4411_v34 = vmul.f32 %v8327_v19, %v3781_v50 }
 0x481   : > { %v3783_v33 = vpop.f32.mrf.mxu1 }
 0x482   : > { %v4513_v42 = vadd.f32 %v4495_v18, %v4450_v63  ;;  %v4451_v53 = vadd.f32 %v8329_v47, %v4411_v34 }
 0x483   : > { %v3784_v48 = vpop.f32.mrf.mxu1 }
 0x484   : > { %v4514_v7 = vadd.f32 %v4496_v43, %v4451_v53  ;;  %v4522_v26 = vmax.f32 %v4513_v42, 0.0  ;;  %v4607_v53 = vrot.slane %v9295_v4, 5 }
 0x486   : > { %v4523_v24 = vmax.f32 %v4514_v7, 0.0  ;;  %v4720_v7 = vrot.slane %v9295_v4, 6 }
 0x488   : > { %v4538_v12 = vcombine.low %v4522_v26, %v4523_v24 }
 0x48a   : > { %v4560_v44 = vrot.slane %v4538_v12, %v9105_v2 }
 0x49a   : > { %v3820_v52 = vpop.f32.mrf.mxu0 }
 0x49b   : > { %v4412_v62 = vmul.f32 %v8327_v19, %v3820_v52 }
 0x49c   : > { %v3822_v45 = vpop.f32.mrf.mxu0 }
 0x49d   : > { %v4452_v0 = vadd.f32 %v8329_v47, %v4412_v62  ;;  %v4413_v8 = vmul.f32 %v8327_v19, %v3822_v45 }
 0x49e   : > { %v3824_v6 = vpop.f32.mrf.mxu0 }
 0x49f   : > { %v4515_v17 = vadd.f32 %v4497_v27, %v4452_v0  ;;  %v4453_v46 = vadd.f32 %v8329_v47, %v4413_v8  ;;  %v4609_v27 = vrot.slane %v9297_v1, 5  ;;  %v4721_v6 = vrot.slane %v9296_v55, 6 }
 0x4a0   : > { %v3825_v5 = vpop.f32.mrf.mxu0 }
 0x4a1   : > { %v4516_v30 = vadd.f32 %v4498_v59, %v4453_v46  ;;  %v4524_v32 = vmax.f32 %v4515_v17, 0.0 }
 0x4a2   : > { %v3902_v49 = vpop.f32.mrf.mxu0 }
 0x4a3   : > { %v4525_v9 = vmax.f32 %v4516_v30, 0.0  ;;  %v4416_v54 = vmul.f32 %v8327_v19, %v3902_v49 }
 0x4a4   : > { %v3904_v21 = vpop.f32.mrf.mxu0 }
 0x4a5   : > { %v4539_v35 = vcombine.low %v4524_v32, %v4525_v9  ;;  %v4456_v31 = vadd.f32 %v8329_v47, %v4416_v54  ;;  %v4417_v15 = vmul.f32 %v8327_v19, %v3904_v21  ;;  %v4612_v9 = vrot.slane %v9300_v23, 5 }
 0x4a6   : > { %v3906_v51 = vpop.f32.mrf.mxu0  ;;  %v9304_v21 = vlaneseq }
 0x4a7   : > { %v4567_v61 = vrot.slane %v4539_v35, %v9105_v2  ;;  %v4626_v50 = vadd.f32 %v4608_v16, %v4456_v31  ;;  %v4457_v48 = vadd.f32 %v8329_v47, %v4417_v15 }
 0x4a8   : > { %v3907_v13 = vpop.f32.mrf.mxu0  ;;  %vm8391_vm14 = vcmp.lt.s32.totalorder %v9304_v21, 128 }
 0x4a9   : > { %v4569_v60 = vcombine.low %v4560_v44, %v4567_v61  ;;  %v4635_v0 = vmax.f32 %v4626_v50, 0.0  ;;  %v4627_v32 = vadd.f32 %v4609_v27, %v4457_v48 }
 0x4aa   : > { %v3984_v29 = vpop.f32.mrf.mxu0 }
 0x4ab   : > { %v4583_v25 = vrot.slane %v4569_v60, %v9105_v2  ;;  %v4420_v63 = vmul.f32 %v8327_v19, %v3984_v29 }
 0x4ac   : > { %v3986_v56 = vpop.f32.mrf.mxu0 }
 0x4ad   : > { %v4584_v28 = vcombine.low %v4576_v37, %v4583_v25  ;;  %v4460_v8 = vadd.f32 %v8329_v47, %v4420_v63  ;;  %v4421_v13 = vmul.f32 %v8327_v19, %v3986_v56  ;;  %v4610_v25 = vrot.slane %v9298_v20, 5 }
 0x4ae   : > { %v3988_v10 = vpop.f32.mrf.mxu0  ;;  %v4724_v63 = vrot.slane %v9299_v3, 6 }
 0x4af   : > { %4601 = vst [vmem:[%s8366_s27] sm:$0xff] %v4584_v28  ;;  %v4630_v10 = vadd.f32 %v4612_v9, %v4460_v8 }
 0x4b0   : > { %v3989_v40 = vpop.f32.mrf.mxu0 }
 0x4b1   : > { %v4611_v40 = vrot.slane %v9299_v3, 5  ;;  %v4639_v48 = vmax.f32 %v4630_v10, 0.0 }
 0x4b2   : > { %v3861_v58 = vpop.f32.mrf.mxu1 }
 0x4b3   : > { %v4414_v39 = vmul.f32 %v8327_v19, %v3861_v58 }
 0x4b4   : > { %v3863_v41 = vpop.f32.mrf.mxu1 }
 0x4b5   : > { %v4454_v14 = vadd.f32 %v8329_v47, %v4414_v39  ;;  %v4415_v36 = vmul.f32 %v8327_v19, %v3863_v41  ;;  %v4066_v18 = vpop.f32.mrf.mxu0 }
 0x4b6   : > { %v3865_v34 = vpop.f32.mrf.mxu1  ;;  %v4424_v43 = vmul.f32 %v8327_v19, %v4066_v18 }
 0x4b7   : > { %v4517_v33 = vadd.f32 %v4499_v11, %v4454_v14  ;;  %v4455_v42 = vadd.f32 %v8329_v47, %v4415_v36  ;;  %v4068_v26 = vpop.f32.mrf.mxu0  ;;  %v4636_v11 = vmax.f32 %v4627_v32, 0.0  ;;  %v4461_v36 = vadd.f32 %v8329_v47, %v4421_v13 }
 0x4b8   : > { %v3866_v24 = vpop.f32.mrf.mxu1  ;;  %v4464_v62 = vadd.f32 %v8329_v47, %v4424_v43  ;;  %v4425_v45 = vmul.f32 %v8327_v19, %v4068_v26 }
 0x4b9   : > { %v4526_v12 = vmax.f32 %v4517_v33, 0.0  ;;  %v4625_v52 = vadd.f32 %v4607_v53, %v4455_v42  ;;  %v4070_v46 = vpop.f32.mrf.mxu0  ;;  %v4725_v24 = vrot.slane %v9300_v23, 6 }
 0x4ba   : > { %v3943_v17 = vpop.f32.mrf.mxu1  ;;  %v4738_v30 = vadd.f32 %v4720_v7, %v4464_v62  ;;  %v4465_v49 = vadd.f32 %v8329_v47, %v4425_v45  ;;  %v4613_v7 = vrot.slane %v9301_v22, 5 }
 0x4bb   : > { %v4591_v59 = vrot.slane %v4526_v12, %v9105_v2  ;;  %v4634_v5 = vmax.f32 %v4625_v52, 0.0  ;;  %v4418_v51 = vmul.f32 %v8327_v19, %v3943_v17  ;;  %v4071_v61 = vpop.f32.mrf.mxu0  ;;  %v4614_v17 = vrot.slane %v9302_v38, 5 }
 0x4bc   : > { %v3945_v44 = vpop.f32.mrf.mxu1  ;;  %v4739_v29 = vadd.f32 %v4721_v6, %v4465_v49  ;;  %v4747_v58 = vmax.f32 %v4738_v30, 0.0  ;;  %v4631_v8 = vadd.f32 %v4613_v7, %v4461_v36  ;;  %v4723_v36 = vrot.slane %v9298_v20, 6 }
 0x4bd   : > { %v4598_v60 = vrot.slane %v4591_v59, %v9105_v2  ;;  %v4652_v54 = vcombine.low %v4634_v5, %v4635_v0  ;;  %v4458_v37 = vadd.f32 %v8329_v47, %v4418_v51  ;;  %v4419_v28 = vmul.f32 %v8327_v19, %v3945_v44 }
 0x4be   : > { %v3947_v31 = vpop.f32.mrf.mxu1  ;;  %v4748_v39 = vmax.f32 %v4739_v29, 0.0  ;;  %v4615_v44 = vrot.slane %v9303_v57, 5 }
 0x4bf   : > { %4606 = vst.msk [vmem:[%s8366_s27 + $0x8] sm:$0x1] %vm8391_vm14, %v4598_v60  ;;  %v4628_v15 = vadd.f32 %v4610_v25, %v4458_v37  ;;  %v4459_v56 = vadd.f32 %v8329_v47, %v4419_v28  ;;  %v4662_v5 = vrot.slane %v4652_v54, %v9105_v2  ;;  %v4640_v37 = vmax.f32 %v4631_v8, 0.0 }
 0x4c0   : > { %v3948_v41 = vpop.f32.mrf.mxu1  ;;  %v8408_v50 = vcombine.low %v4747_v58, %v4748_v39 }
 0x4c1   : > { %v4148_v16 = vpop.f32.mrf.mxu0  ;;  %v4637_v34 = vmax.f32 %v4628_v15, 0.0  ;;  %v4629_v33 = vadd.f32 %v4611_v40, %v4459_v56  ;;  %v4722_v15 = vrot.slane %v9297_v1, 6 }
 0x4c2   : > { %v4428_v14 = vmul.f32 %v8327_v19, %v4148_v16  ;;  %v4025_v53 = vpop.f32.mrf.mxu1 }
 0x4c3   : > { %v4150_v18 = vpop.f32.mrf.mxu0  ;;  %v4422_v26 = vmul.f32 %v8327_v19, %v4025_v53  ;;  %v4653_v52 = vcombine.low %v4636_v11, %v4637_v34  ;;  %v4638_v62 = vmax.f32 %v4629_v33, 0.0 }
 0x4c4   : > { %v4468_v42 = vadd.f32 %v8329_v47, %v4428_v14  ;;  %v4429_v43 = vmul.f32 %v8327_v19, %v4150_v18  ;;  %v4027_v27 = vpop.f32.mrf.mxu1 }
 0x4c5   : > { %v4152_v12 = vpop.f32.mrf.mxu0  ;;  %v4462_v6 = vadd.f32 %v8329_v47, %v4422_v26  ;;  %v4423_v46 = vmul.f32 %v8327_v19, %v4027_v27  ;;  %v4669_v30 = vrot.slane %v4653_v52, %v9105_v2  ;;  %v4654_v49 = vcombine.low %v4638_v62, %v4639_v48 }
 0x4c6   : > { %v4742_v45 = vadd.f32 %v4724_v63, %v4468_v42  ;;  %v4469_v0 = vadd.f32 %v8329_v47, %v4429_v43  ;;  %v4029_v9 = vpop.f32.mrf.mxu1  ;;  %v4726_v27 = vrot.slane %v9301_v22, 6 }
 0x4c7   : > { %v4153_v59 = vpop.f32.mrf.mxu0  ;;  %v4632_v21 = vadd.f32 %v4614_v17, %v4462_v6  ;;  %v4463_v51 = vadd.f32 %v8329_v47, %v4423_v46  ;;  %v4684_v61 = vcombine.low %v4662_v5, %v4669_v30  ;;  %v4676_v16 = vrot.slane %v4654_v49, %v9105_v2 }
 0x4c8   : > { %v4743_v32 = vadd.f32 %v4725_v24, %v4469_v0  ;;  %v4751_v13 = vmax.f32 %v4742_v45, 0.0  ;;  %v4030_v29 = vpop.f32.mrf.mxu1  ;;  %v4728_v6 = vrot.slane %v9303_v57, 6  ;;  %v4775_v49 = vrot.slane %v8408_v50, %v9105_v2 }
 0x4c9   : > { %v4641_v25 = vmax.f32 %v4632_v21, 0.0  ;;  %v4633_v28 = vadd.f32 %v4615_v44, %v4463_v51  ;;  %v4692_v43 = vrot.slane %v4684_v61, %v9105_v2  ;;  %v4833_v50 = vrot.slane %v9295_v4, 7 }
 0x4ca   : > { %v4752_v60 = vmax.f32 %v4743_v32, 0.0  ;;  %v4107_v54 = vpop.f32.mrf.mxu1  ;;  %v4727_v32 = vrot.slane %v9302_v38, 6 }
 0x4cb   : > { %v4655_v10 = vcombine.low %v4640_v37, %v4641_v25  ;;  %v4642_v58 = vmax.f32 %v4633_v28, 0.0  ;;  %v4426_v39 = vmul.f32 %v8327_v19, %v4107_v54 }
 0x4cc   : > { %v8424_v31 = vcombine.low %v4751_v13, %v4752_v60  ;;  %v4109_v56 = vpop.f32.mrf.mxu1 }
 0x4cd   : > { %v4683_v40 = vrot.slane %v4655_v10, %v9105_v2  ;;  %v4707_v41 = vrot.slane %v4642_v58, %v9105_v2  ;;  %v4466_v14 = vadd.f32 %v8329_v47, %v4426_v39  ;;  %v4427_v11 = vmul.f32 %v8327_v19, %v4109_v56 }
 0x4ce   : > { %v4111_v63 = vpop.f32.mrf.mxu1 }
 0x4cf   : > { %v4685_v18 = vcombine.low %v4676_v16, %v4683_v40  ;;  %v4714_v34 = vrot.slane %v4707_v41, %v9105_v2  ;;  %v4740_v33 = vadd.f32 %v4722_v15, %v4466_v14  ;;  %v4467_v42 = vadd.f32 %v8329_v47, %v4427_v11 }
 0x4d0   : > { %v4112_v53 = vpop.f32.mrf.mxu1  ;;  %v4834_v14 = vrot.slane %v9296_v55, 7 }
 0x4d1   : > { %v4699_v48 = vrot.slane %v4685_v18, %v9105_v2  ;;  %5046 = vst.msk [vmem:[%s8366_s27 + $0x11] sm:$0x1] %vm8391_vm14, %v4714_v34  ;;  %v4741_v7 = vadd.f32 %v4723_v36, %v4467_v42  ;;  %v4749_v26 = vmax.f32 %v4740_v33, 0.0  ;;  %v4835_v42 = vrot.slane %v9297_v1, 7 }
 0x4d3   : > { %v4189_v24 = vpop.f32.mrf.mxu1  ;;  %v4700_v52 = vcombine.low %v4692_v43, %v4699_v48  ;;  %v4750_v62 = vmax.f32 %v4741_v7, 0.0  ;;  %v4836_v43 = vrot.slane %v9298_v20, 7 }
 0x4d4   : > { %v4430_v45 = vmul.f32 %v8327_v19, %v4189_v24 }
 0x4d5   : > { %v4230_v12 = vpop.f32.mrf.mxu0  ;;  %v4191_v8 = vpop.f32.mrf.mxu1  ;;  %5045 = vst [vmem:[%s8366_s27 + $0x9] sm:$0xff] %v4700_v52  ;;  %v4766_v46 = vcombine.low %v4749_v26, %v4750_v62  ;;  %v4789_v26 = vrot.slane %v8424_v31, %v9105_v2 }
 0x4d6   : > { %v4432_v0 = vmul.f32 %v8327_v19, %v4230_v12  ;;  %v4470_v59 = vadd.f32 %v8329_v47, %v4430_v45  ;;  %v4431_v5 = vmul.f32 %v8327_v19, %v4191_v8 }
 0x4d7   : > { %v4232_v17 = vpop.f32.mrf.mxu0  ;;  %v4193_v9 = vpop.f32.mrf.mxu1  ;;  %v4782_v44 = vrot.slane %v4766_v46, %v9105_v2  ;;  %v4837_v46 = vrot.slane %v9299_v3, 7 }
 0x4d8   : > { %v4472_v30 = vadd.f32 %v8329_v47, %v4432_v0  ;;  %v4433_v21 = vmul.f32 %v8327_v19, %v4232_v17  ;;  %v4744_v61 = vadd.f32 %v4726_v27, %v4470_v59  ;;  %v4471_v13 = vadd.f32 %v8329_v47, %v4431_v5 }
 0x4d9   : > { %v4234_v51 = vpop.f32.mrf.mxu0  ;;  %v4194_v37 = vpop.f32.mrf.mxu1  ;;  %v4797_v28 = vcombine.low %v4775_v49, %v4782_v44 }
 0x4da   : > { %v4746_v60 = vadd.f32 %v4728_v6, %v4472_v30  ;;  %v4473_v29 = vadd.f32 %v8329_v47, %v4433_v21  ;;  %v4745_v54 = vadd.f32 %v4727_v32, %v4471_v13  ;;  %v4753_v16 = vmax.f32 %v4744_v61, 0.0 }
 0x4db   : > { %v4235_v25 = vpop.f32.mrf.mxu0  ;;  %v4805_v17 = vrot.slane %v4797_v28, %v9105_v2  ;;  %v4838_v21 = vrot.slane %v9300_v23, 7  ;;  %v4840_v28 = vrot.slane %v9302_v38, 7 }
 0x4dc   : > { %v4755_v10 = vmax.f32 %v4746_v60, 0.0  ;;  %v4271_v58 = vpop.f32.mrf.mxu1  ;;  %v4754_v15 = vmax.f32 %v4745_v54, 0.0  ;;  %v4851_v41 = vadd.f32 %v4833_v50, %v4473_v29 }
 0x4dd   : > { %v4434_v40 = vmul.f32 %v8327_v19, %v4271_v58 }
 0x4de   : > { %v4312_v39 = vpop.f32.mrf.mxu0  ;;  %v4820_v56 = vrot.slane %v4755_v10, %v9105_v2  ;;  %v4273_v11 = vpop.f32.mrf.mxu1  ;;  %v4768_v18 = vcombine.low %v4753_v16, %v4754_v15  ;;  %v4860_v1 = vmax.f32 %v4851_v41, 0.0  ;;  %v4839_v16 = vrot.slane %v9301_v22, 7 }
 0x4df   : > { %v4436_v36 = vmul.f32 %v8327_v19, %v4312_v39  ;;  %v4474_v4 = vadd.f32 %v8329_v47, %v4434_v40  ;;  %v4435_v33 = vmul.f32 %v8327_v19, %v4273_v11  ;;  %v4841_v41 = vrot.slane %v9303_v57, 7 }
 0x4e0   : > { %v4314_v63 = vpop.f32.mrf.mxu0  ;;  %v4827_v34 = vrot.slane %v4820_v56, %v9105_v2  ;;  %v4275_v48 = vpop.f32.mrf.mxu1  ;;  %v4796_v24 = vrot.slane %v4768_v18, %v9105_v2 }
 0x4e1   : > { %v4476_v53 = vadd.f32 %v8329_v47, %v4436_v36  ;;  %v4437_v55 = vmul.f32 %v8327_v19, %v4314_v63  ;;  %v4852_v12 = vadd.f32 %v4834_v14, %v4474_v4  ;;  %v4475_v52 = vadd.f32 %v8329_v47, %v4435_v33 }
 0x4e2   : > { %v4316_v7 = vpop.f32.mrf.mxu0  ;;  %5048 = vst.msk [vmem:[%s8366_s27 + $0x1a] sm:$0x1] %vm8391_vm14, %v4827_v34  ;;  %v4276_v45 = vpop.f32.mrf.mxu1  ;;  %v4798_v20 = vcombine.low %v4789_v26, %v4796_v24 }
 0x4e3   : > { %v4854_v62 = vadd.f32 %v4836_v43, %v4476_v53  ;;  %v4861_v27 = vmax.f32 %v4852_v12, 0.0  ;;  %v4853_v8 = vadd.f32 %v4835_v42, %v4475_v52  ;;  %v4477_v6 = vadd.f32 %v8329_v47, %v4437_v55 }
 0x4e4   : > { %v4317_v0 = vpop.f32.mrf.mxu0  ;;  %v4353_v59 = vpop.f32.mrf.mxu1  ;;  %v4812_v30 = vrot.slane %v4798_v20, %v9105_v2 }
 0x4e5   : > { %v4863_v31 = vmax.f32 %v4854_v62, 0.0  ;;  %v4878_v49 = vcombine.low %v4860_v1, %v4861_v27  ;;  %v4862_v32 = vmax.f32 %v4853_v8, 0.0  ;;  %v4438_v9 = vmul.f32 %v8327_v19, %v4353_v59 }
 0x4e6   : > { %v4394_v5 = vpop.f32.mrf.mxu0  ;;  %v4355_v51 = vpop.f32.mrf.mxu1  ;;  %v4813_v13 = vcombine.low %v4805_v17, %v4812_v30  ;;  %v4855_v29 = vadd.f32 %v4837_v46, %v4477_v6 }
 0x4e7   : > { %v4440_v44 = vmul.f32 %v8327_v19, %v4394_v5  ;;  %v4879_v60 = vcombine.low %v4862_v32, %v4863_v31  ;;  %v4478_v3 = vadd.f32 %v8329_v47, %v4438_v9  ;;  %v4439_v37 = vmul.f32 %v8327_v19, %v4355_v51 }
 0x4e8   : > { %v4396_v61 = vpop.f32.mrf.mxu0  ;;  %v4357_v54 = vpop.f32.mrf.mxu1  ;;  %5047 = vst [vmem:[%s8366_s27 + $0x12] sm:$0xff] %v4813_v13  ;;  %v4888_v23 = vrot.slane %v4878_v49, %v9105_v2  ;;  %v4864_v11 = vmax.f32 %v4855_v29, 0.0 }
 0x4e9   : > { %v4480_v25 = vadd.f32 %v8329_v47, %v4440_v44  ;;  %v4441_v10 = vmul.f32 %v8327_v19, %v4396_v61  ;;  %v4895_v58 = vrot.slane %v4879_v60, %v9105_v2  ;;  %v4856_v39 = vadd.f32 %v4838_v21, %v4478_v3 }
 0x4ea   : > { %v4398_v50 = vpop.f32.mrf.mxu0  ;;  %v4479_v15 = vadd.f32 %v8329_v47, %v4439_v37  ;;  %v4358_v38 = vpop.f32.mrf.mxu1 }
 0x4eb   : > { %v4858_v56 = vadd.f32 %v4840_v28, %v4480_v25  ;;  %v4481_v40 = vadd.f32 %v8329_v47, %v4441_v10  ;;  %v4910_v19 = vcombine.low %v4888_v23, %v4895_v58  ;;  %v4865_v36 = vmax.f32 %v4856_v39, 0.0 }
 0x4ec   : > { %v4399_v14 = vpop.f32.mrf.mxu0  ;;  %v4857_v63 = vadd.f32 %v4839_v16, %v4479_v15 }
 0x4ed   : > { %v4867_v18 = vmax.f32 %v4858_v56, 0.0  ;;  %v4859_v34 = vadd.f32 %v4841_v41, %v4481_v40  ;;  %v4880_v4 = vcombine.low %v4864_v11, %v4865_v36  ;;  %v4918_v55 = vrot.slane %v4910_v19, %v9105_v2 }
 0x4ee   : > { %v4866_v33 = vmax.f32 %v4857_v63, 0.0 }
 0x4ef   : > { %v4868_v22 = vmax.f32 %v4859_v34, 0.0  ;;  %v4902_v47 = vrot.slane %v4880_v4, %v9105_v2 }
 0x4f0   : > { %v4881_v42 = vcombine.low %v4866_v33, %v4867_v18 }
 0x4f1   : > { %v4933_v53 = vrot.slane %v4868_v22, %v9105_v2 }
 0x4f2   : > { %v4909_v57 = vrot.slane %v4881_v42, %v9105_v2 }
 0x4f3   : > { %v4940_v43 = vrot.slane %v4933_v53, %v9105_v2 }
 0x4f4   : > { %v4911_v48 = vcombine.low %v4902_v47, %v4909_v57 }
 0x4f5   : > { %5050 = vst.msk [vmem:[%s8366_s27 + $0x23] sm:$0x1] %vm8391_vm14, %v4940_v43 }
 0x4f6   : > { %v4925_v7 = vrot.slane %v4911_v48, %v9105_v2 }
 0x4f8   : > { %v4926_v26 = vcombine.low %v4918_v55, %v4925_v7 }
 0x4fa   : > { %5049 = vst [vmem:[%s8366_s27 + $0x1b] sm:$0xff] %v4926_v26 }
 0x4fb PF: > { %s15_s18 = sadd.s32 1, %s5103_s18  }
 0x4fc   : > { %p12_p4 = scmp.ge.s32.totalorder %s15_s18, 4  }
 0x4fe   :  { %14 = sbr.rel (!%p12_p4) target bundleno = 1 (0x1), region = 76 }

</bundles_post_ra>
